<compile_context>
chip_gen: v6e
topology: v6e:2x2x1
jax: 0.10.0
libtpu: 0.0.40
codegen_flags: <defaults>
</compile_context>

<pallas_src>
import numpy as np
import jax
import jax.numpy as jnp
from jax.experimental import pallas as pl
from jax.experimental.pallas import tpu as pltpu

OUT_PAD = 128  # lane-dense padded width of the 3-way output head


# ----------------------------- Pallas kernel --------------------------------

def _leaky_relu(x):
    # nn.LeakyReLU(negative_slope=0.2)
    return jnp.where(x >= 0, x, 0.2 * x)


def grasp_evaluator_kernel(x_ref, wx_ref, wn_ref, b_ref, wo_ref, bo_ref, o_ref):
    """One batch tile of the full evaluator MLP (logits only; sigmoid in the wrapper).

    x_ref : (TB, D)     bf16  raw [latent, grasp] (top-level bn1 already folded into weights)
    wx_ref: (3, D, 2N)  bf16  per-block fused x-side weights: [:, :, :N] = fc1_x, [:, :, N:] = fc3_x
                              block 0 = rb1, 1 = rb2 (X0 half), 2 = rb3 (X0 half)
    wn_ref: (7, N, N)   bf16  weights consuming an N-wide activation: 0 rb1.fc2, 1 rb2.fc1_top,
                              2 rb2.fc2, 3 rb2.fc3_top, 4 rb3.fc1_top, 5 rb3.fc2, 6 rb3.fc3_top
    b_ref : (9, N)      f32   folded biases: (rb1|rb2|rb3) x (fc1, fc2, fc3)
    wo_ref: (N, 128)    bf16  out_success weight, zero-padded to 128 lanes
    bo_ref: (1, 128)    f32   out_success bias, zero-padded
    o_ref : (TB, 128)   bf16  logits (only columns 0..2 are meaningful)
    """
    x = x_ref[...]
    cdt = x.dtype
    bias = b_ref[...]
    N = wn_ref.shape[-1]

    def mm(a, w):
        return jnp.dot(a, w, preferred_element_type=jnp.float32)

    def b(i):
        return bias[i:i + 1, :]          # (1, N) row, broadcasts over the batch tile

    # ---- rb1: Xin = lrelu(fc3(X0)); main = bn2(fc2(lrelu(bn1(fc1(X0))))); final_nl=True
    xw = mm(x, wx_ref[0])                            # (TB, 2N): one fused K=D matmul
    xin = _leaky_relu(xw[:, N:] + b(2))
    h = _leaky_relu(xw[:, :N] + b(0)).astype(cdt)
    x1 = _leaky_relu(xin + mm(h, wn_ref[0]) + b(1)).astype(cdt)
    # TODO(synk): nn.Dropout(0.2) is identity in eval mode; training-mode dropout not implemented.

    # ---- rb2 on [x1, X0]: concat removed -> split weights; X0 contribution uses raw x (bn1 folded)
    xw = mm(x, wx_ref[1])
    xin = _leaky_relu(mm(x1, wn_ref[3]) + xw[:, N:] + b(5))
    h = _leaky_relu(mm(x1, wn_ref[1]) + xw[:, :N] + b(3)).astype(cdt)
    x2 = _leaky_relu(xin + mm(h, wn_ref[2]) + b(4)).astype(cdt)

    # ---- rb3 on [x2, X0], final_nl=False
    xw = mm(x, wx_ref[2])
    xin = _leaky_relu(mm(x2, wn_ref[6]) + xw[:, N:] + b(8))
    h = _leaky_relu(mm(x2, wn_ref[4]) + xw[:, :N] + b(6)).astype(cdt)
    x3 = (xin + mm(h, wn_ref[5]) + b(7)).astype(cdt)

    # ---- output head: lane-dense, zero-padded bf16 logits (sigmoid applied in the wrapper)
    o_ref[...] = (mm(x3, wo_ref[...]) + bo_ref[...]).astype(o_ref.dtype)


# ------------------------------ JAX wrapper ----------------------------------

def _round_up(v, m):
    return (v + m - 1) // m * m


def grasp_evaluator_forward(latent, grasp_feats, folded_params, *, block_b=256):
    """Matches GraspEvaluatorModel.forward: returns (y_pick, y_coll, y_pgs)."""
    wx, wn, bias, wo, bo = folded_params
    x = jnp.concatenate([latent, grasp_feats], axis=1).astype(jnp.bfloat16)
    B, D = x.shape
    N = wn.shape[-1]

    # Batch tile: multiple of 16 (bf16 sublane pack); default 256 is MXU-efficient on v6e/v7x
    # (>=128 is enough on v5e).  For small B this yields a single grid step.
    TB = _round_up(min(block_b, B), 16)
    Bp = _round_up(B, TB)
    if Bp != B:
        x = jnp.pad(x, ((0, Bp - B), (0, 0)))
    n_steps = Bp // TB
    # TODO(synk): on v7x (2 TensorCores) with large B, pick TB so n_steps is even so the
    # "parallel" batch axis shards across both cores; for small B one big step is better.

    # Explicit scoped-VMEM budget: single-buffered weights + double-buffered I/O tiles +
    # a generous bound on live f32 intermediates.  Never below the 32 MiB default, capped
    # by the chip's physical VMEM (64 MiB on v7x, 128 MiB on v5e/v6e).
    weight_bytes = sum(int(a.size) * a.dtype.itemsize for a in (wx, wn, bias, wo, bo))
    io_bytes = 2 * TB * D * 2 + 2 * TB * OUT_PAD * 2
    act_bytes = 16 * TB * N * 4
    vmem_limit = weight_bytes + io_bytes + act_bytes + (4 << 20)
    try:
        cap = int(0.9 * pltpu.get_tpu_info().vmem_capacity_bytes)
    except Exception:
        cap = 96 << 20
    vmem_limit = int(min(max(vmem_limit, 32 << 20), cap))

    cost = pl.CostEstimate(
        flops=2 * Bp * (3 * D * 2 * N + 7 * N * N + N * OUT_PAD),
        transcendentals=0,
        bytes_accessed=weight_bytes + Bp * D * 2 + Bp * OUT_PAD * 2,
    )

    def _run(pipeline_mode):
        def wspec(shape):
            # Constant index_map -> weights DMA'd once and stay VMEM-resident across grid
            # steps; Buffered(1) avoids allocating a useless second buffer per weight.
            if pipeline_mode is None:
                return pl.BlockSpec(shape, lambda i: (0,) * len(shape))
            return pl.BlockSpec(shape, lambda i: (0,) * len(shape),
                                pipeline_mode=pipeline_mode)

        call = pl.pallas_call(
            grasp_evaluator_kernel,
            out_shape=jax.ShapeDtypeStruct((Bp, OUT_PAD), jnp.bfloat16),
            grid=(n_steps,),
            in_specs=[
                pl.BlockSpec((TB, D), lambda i: (i, 0)),   # batch-tiled input
                wspec(wx.shape),
                wspec(wn.shape),
                wspec(bias.shape),
                wspec(wo.shape),
                wspec(bo.shape),
            ],
            out_specs=pl.BlockSpec((TB, OUT_PAD), lambda i: (i, 0)),
            compiler_params=pltpu.CompilerParams(
                dimension_semantics=("parallel",),   # batch axis shards across TCs on v7x
                vmem_limit_bytes=vmem_limit,
            ),
            cost_estimate=cost,
        )
        return call(x, wx, wn, bias, wo, bo)

    try:
        logits = _run(pl.Buffered(1))
    except Exception:
        # Fallback for JAX builds where single-buffer pipeline_mode is unsupported.
        logits = _run(None)

    logits = logits[:B, :3].astype(jnp.float32)
    probs = jax.nn.sigmoid(logits)          # exact sigmoid on the tiny (B, 3) slice
    # predictions[:, 1] -> y_pick, predictions[:, 0] -> y_coll, predictions[:, 2] -> y_pgs
    return probs[:, 1], probs[:, 0], probs[:, 2]


# --------------------------- parameter construction --------------------------

def _init_linear(key, fin, fout):
    """PyTorch nn.Linear default init; weight stored pre-transposed as (fin, fout)."""
    kw, kb = jax.random.split(key)
    bound = 1.0 / np.sqrt(fin)
    w = jax.random.uniform(kw, (fin, fout), jnp.float32, -bound, bound)
    b = jax.random.uniform(kb, (fout,), jnp.float32, -bound, bound)
    return w, b


def _init_bn(key, n, eps=1e-5):
    """BatchNorm1d (eval) as per-feature affine y = x * s + t."""
    kg, kb, km, kv = jax.random.split(key, 4)
    gamma = 1.0 + 0.1 * jax.random.normal(kg, (n,), jnp.float32)
    beta = 0.1 * jax.random.normal(kb, (n,), jnp.float32)
    mean = 0.1 * jax.random.normal(km, (n,), jnp.float32)
    var = jnp.exp(0.2 * jax.random.normal(kv, (n,), jnp.float32))
    s = gamma / jnp.sqrt(var + eps)
    t = beta - mean * s
    return s, t


def make_raw_params(key, latent_dim, grasp_dim, n_neurons, internal_neurons):
    D = latent_dim + grasp_dim
    N, H = n_neurons, internal_neurons
    # TODO(synk): FCResBlock uses an identity shortcut when Fin == Fout; this kernel implements
    # only the fc3 shortcut (true for the module's realistic sizes, e.g. 293/4133 -> 2048).
    assert D != N, "rb1 identity-shortcut variant (Fin == Fout) not implemented"
    keys = jax.random.split(key, 17)
    p = {"bn1": _init_bn(keys[0], D)}
    p["rb1.fc1"] = _init_linear(keys[1], D, H)
    p["rb1.bn1"] = _init_bn(keys[2], H)
    p["rb1.fc2"] = _init_linear(keys[3], H, N)
    p["rb1.bn2"] = _init_bn(keys[4], N)
    p["rb1.fc3"] = _init_linear(keys[5], D, N)
    k = 6
    for name in ("rb2", "rb3"):
        p[f"{name}.fc1"] = _init_linear(keys[k], D + N, H)
        p[f"{name}.bn1"] = _init_bn(keys[k + 1], H)
        p[f"{name}.fc2"] = _init_linear(keys[k + 2], H, N)
        p[f"{name}.bn2"] = _init_bn(keys[k + 3], N)
        p[f"{name}.fc3"] = _init_linear(keys[k + 4], D + N, N)
        k += 5
    p["out"] = _init_linear(keys[16], N, 3)
    return p


def fold_params(p, n_neurons, internal_neurons, w_dtype=jnp.bfloat16):
    """Fold all BatchNorms into the Linears, split the concat weights, fuse x-side pairs."""
    N, H = n_neurons, internal_neurons
    assert N == H, "stacked parameter layout assumes n_neurons == internal_neurons (module default)"
    s_in, t_in = p["bn1"]

    def fold_block(name, split):
        w1, b1 = p[f"{name}.fc1"]
        s1, t1 = p[f"{name}.bn1"]
        w2, b2 = p[f"{name}.fc2"]
        s2, t2 = p[f"{name}.bn2"]
        w3, b3 = p[f"{name}.fc3"]
        w1_top, w1_bot = (w1[:N], w1[N:]) if split else (None, w1)
        w3_top, w3_bot = (w3[:N], w3[N:]) if split else (None, w3)
        out = {
            # block bn1 folded into fc1, block bn2 into fc2, top-level bn1 into the x-halves
            "fc1_bot": (s_in[:, None] * w1_bot) * s1[None, :],
            "fc1_b": (t_in @ w1_bot + b1) * s1 + t1,
            "fc2": w2 * s2[None, :],
            "fc2_b": b2 * s2 + t2,
            "fc3_bot": s_in[:, None] * w3_bot,
            "fc3_b": t_in @ w3_bot + b3,
        }
        if split:
            out["fc1_top"] = w1_top * s1[None, :]
            out["fc3_top"] = w3_top
        return out

    r1 = fold_block("rb1", split=False)
    r2 = fold_block("rb2", split=True)
    r3 = fold_block("rb3", split=True)

    # Fused x-side weights per block: [fc1_x | fc3_x] along the output dim -> one K=D matmul.
    wx = jnp.stack([
        jnp.concatenate([r1["fc1_bot"], r1["fc3_bot"]], axis=1),
        jnp.concatenate([r2["fc1_bot"], r2["fc3_bot"]], axis=1),
        jnp.concatenate([r3["fc1_bot"], r3["fc3_bot"]], axis=1),
    ]).astype(w_dtype)
    wn = jnp.stack([r1["fc2"],
                    r2["fc1_top"], r2["fc2"], r2["fc3_top"],
                    r3["fc1_top"], r3["fc2"], r3["fc3_top"]]).astype(w_dtype)
    bias = jnp.stack([r1["fc1_b"], r1["fc2_b"], r1["fc3_b"],
                      r2["fc1_b"], r2["fc2_b"], r2["fc3_b"],
                      r3["fc1_b"], r3["fc2_b"], r3["fc3_b"]]).astype(jnp.float32)

    wo_raw, bo_raw = p["out"]
    wo = jnp.zeros((N, OUT_PAD), jnp.float32).at[:, : wo_raw.shape[1]].set(wo_raw).astype(w_dtype)
    bo = jnp.zeros((1, OUT_PAD), jnp.float32).at[0, : bo_raw.shape[0]].set(bo_raw)
    return wx, wn, bias, wo, bo


# ------------------------------ pure-JAX reference ---------------------------

def _reference_forward(x_f32, folded):
    """Same folded computation in plain JAX (mirrors the kernel's bf16 casts)."""
    wx, wn, bias, wo, bo = [jnp.asarray(a, jnp.float32) for a in folded]
    N = wn.shape[-1]
    lrelu = lambda v: jnp.where(v >= 0, v, 0.2 * v)
    r = lambda v: v.astype(jnp.bfloat16).astype(jnp.float32)
    x = r(x_f32)
    xw = x @ wx[0]
    xin = lrelu(xw[:, N:] + bias[2])
    h = r(lrelu(xw[:, :N] + bias[0]))
    x1 = r(lrelu(xin + h @ wn[0] + bias[1]))
    xw = x @ wx[1]
    xin = lrelu(x1 @ wn[3] + xw[:, N:] + bias[5])
    h = r(lrelu(x1 @ wn[1] + xw[:, :N] + bias[3]))
    x2 = r(lrelu(xin + h @ wn[2] + bias[4]))
    xw = x @ wx[2]
    xin = lrelu(x2 @ wn[6] + xw[:, N:] + bias[8])
    h = r(lrelu(x2 @ wn[4] + xw[:, :N] + bias[6]))
    x3 = r(xin + h @ wn[5] + bias[7])
    logits = r(x3 @ wo + bo)                    # kernel stores bf16 logits
    return jax.nn.sigmoid(logits)[:, :3]


# ----------------------------------- main ------------------------------------

if __name__ == "__main__":
    BATCH = 64
    LATENT_DIM = 91
    GRASP_DIM = 37            # module default
    N_NEURONS = 256           # module default is 2048; small here, shapes stay consistent
    INTERNAL_NEURONS = 256    # == n_neurons, as in the module default

    root = jax.random.PRNGKey(0)
    k_params, k_latent, k_grasp = jax.random.split(root, 3)

    raw = make_raw_params(k_params, LATENT_DIM, GRASP_DIM, N_NEURONS, INTERNAL_NEURONS)
    folded = fold_params(raw, N_NEURONS, INTERNAL_NEURONS)

    latent = jax.random.normal(k_latent, (BATCH, LATENT_DIM), jnp.float32)
    grasp_feats = jax.random.normal(k_grasp, (BATCH, GRASP_DIM), jnp.float32)

    # Default block_b=256 -> single 64-row grid step for this batch (no tiny-tile MXU starvation).
    y_pick, y_coll, y_pgs = grasp_evaluator_forward(latent, grasp_feats, folded)
    jax.block_until_ready((y_pick, y_coll, y_pgs))

    assert y_pick.shape == (BATCH,) and y_coll.shape == (BATCH,) and y_pgs.shape == (BATCH,)

    x_f32 = jnp.concatenate([latent, grasp_feats], axis=1).astype(jnp.float32)
    ref = _reference_forward(x_f32, folded)
    got = jnp.stack([y_coll, y_pick, y_pgs], axis=1)   # back to column order [0, 1, 2]
    err = float(jnp.max(jnp.abs(got - ref)))

    assert bool(jnp.all(jnp.isfinite(got)))
    assert err < 3e-2, f"max abs error vs reference = {err}"
    print("KERNEL_OK")
</pallas_src>

<mosaic_0001>
module attributes {stable_mosaic.version = 11 : i64} {
  func.func @grasp_evaluator_kernel(%arg0: i32, %arg1: memref<64x128xbf16, #tpu.memory_space<vmem>>, %arg2: memref<3x128x512xbf16, #tpu.memory_space<vmem>>, %arg3: memref<7x256x256xbf16, #tpu.memory_space<vmem>>, %arg4: memref<9x256xf32, #tpu.memory_space<vmem>>, %arg5: memref<256x128xbf16, #tpu.memory_space<vmem>>, %arg6: memref<1x128xf32, #tpu.memory_space<vmem>>, %arg7: memref<64x128xbf16, #tpu.memory_space<vmem>>) attributes {dimension_semantics = [#tpu.dimension_semantics<parallel>], iteration_bounds = array<i64: 1>, scalar_prefetch = 0 : i64, scratch_operands = 0 : i64, tpu.core_type = #tpu.core_type<tc>, window_params = [{transform_indices = @transform_0, window_bounds = array<i64: 64, 128>}, {pipeline_mode = #tpu.pipeline_mode<synchronous>, transform_indices = @transform_1, window_bounds = array<i64: 3, 128, 512>}, {pipeline_mode = #tpu.pipeline_mode<synchronous>, transform_indices = @transform_2, window_bounds = array<i64: 7, 256, 256>}, {pipeline_mode = #tpu.pipeline_mode<synchronous>, transform_indices = @transform_3, window_bounds = array<i64: 9, 256>}, {pipeline_mode = #tpu.pipeline_mode<synchronous>, transform_indices = @transform_4, window_bounds = array<i64: 256, 128>}, {pipeline_mode = #tpu.pipeline_mode<synchronous>, transform_indices = @transform_5, window_bounds = array<i64: 1, 128>}, {transform_indices = @transform_6, window_bounds = array<i64: 64, 128>}]} {
    %c0 = arith.constant 0 : index
    %c0_0 = arith.constant 0 : index
    %0 = vector.load %arg1[%c0, %c0_0] : memref<64x128xbf16, #tpu.memory_space<vmem>>, vector<64x128xbf16>
    %c0_1 = arith.constant 0 : index
    %c0_2 = arith.constant 0 : index
    %1 = vector.load %arg4[%c0_1, %c0_2] : memref<9x256xf32, #tpu.memory_space<vmem>>, vector<9x256xf32>
    %c0_3 = arith.constant 0 : index
    %c0_4 = arith.constant 0 : index
    %c0_5 = arith.constant 0 : index
    %2 = vector.load %arg2[%c0_3, %c0_4, %c0_5] : memref<3x128x512xbf16, #tpu.memory_space<vmem>>, vector<1x128x512xbf16>
    %3 = vector.shape_cast %2 : vector<1x128x512xbf16> to vector<128x512xbf16>
    %cst = arith.constant dense<0.000000e+00> : vector<64x512xf32>
    %4 = tpu.matmul %0, %3, %cst {dimension_numbers = #tpu.dot_dimension_numbers<[1], [0], [0], [1], [0, 0, 1, 1], [], []>} : vector<64x128xbf16>, vector<128x512xbf16>, vector<64x512xf32> -> vector<64x512xf32>
    %5 = vector.extract_strided_slice %4 {offsets = [0, 256], sizes = [64, 256], strides = [1, 1]} : vector<64x512xf32> to vector<64x256xf32>
    %6 = vector.extract_strided_slice %1 {offsets = [2, 0], sizes = [1, 256], strides = [1, 1]} : vector<9x256xf32> to vector<1x256xf32>
    %7 = vector.broadcast %6 : vector<1x256xf32> to vector<64x256xf32>
    %8 = arith.addf %5, %7 : vector<64x256xf32>
    %cst_6 = arith.constant 0.000000e+00 : f32
    %9 = vector.broadcast %cst_6 : f32 to vector<64x256xf32>
    %10 = arith.cmpf oge, %8, %9 : vector<64x256xf32>
    %cst_7 = arith.constant 2.000000e-01 : f32
    %11 = vector.broadcast %cst_7 : f32 to vector<64x256xf32>
    %12 = arith.mulf %11, %8 : vector<64x256xf32>
    %13 = arith.select %10, %8, %12 : vector<64x256xi1>, vector<64x256xf32>
    %14 = vector.extract_strided_slice %4 {offsets = [0, 0], sizes = [64, 256], strides = [1, 1]} : vector<64x512xf32> to vector<64x256xf32>
    %15 = vector.extract_strided_slice %1 {offsets = [0, 0], sizes = [1, 256], strides = [1, 1]} : vector<9x256xf32> to vector<1x256xf32>
    %16 = vector.broadcast %15 : vector<1x256xf32> to vector<64x256xf32>
    %17 = arith.addf %14, %16 : vector<64x256xf32>
    %cst_8 = arith.constant 0.000000e+00 : f32
    %18 = vector.broadcast %cst_8 : f32 to vector<64x256xf32>
    %19 = arith.cmpf oge, %17, %18 : vector<64x256xf32>
    %cst_9 = arith.constant 2.000000e-01 : f32
    %20 = vector.broadcast %cst_9 : f32 to vector<64x256xf32>
    %21 = arith.mulf %20, %17 : vector<64x256xf32>
    %22 = arith.select %19, %17, %21 : vector<64x256xi1>, vector<64x256xf32>
    %23 = arith.truncf %22 : vector<64x256xf32> to vector<64x256xbf16>
    %c0_10 = arith.constant 0 : index
    %c0_11 = arith.constant 0 : index
    %c0_12 = arith.constant 0 : index
    %24 = vector.load %arg3[%c0_10, %c0_11, %c0_12] : memref<7x256x256xbf16, #tpu.memory_space<vmem>>, vector<1x256x256xbf16>
    %25 = vector.shape_cast %24 : vector<1x256x256xbf16> to vector<256x256xbf16>
    %cst_13 = arith.constant dense<0.000000e+00> : vector<64x256xf32>
    %26 = tpu.matmul %23, %25, %cst_13 {dimension_numbers = #tpu.dot_dimension_numbers<[1], [0], [0], [1], [0, 0, 1, 1], [], []>} : vector<64x256xbf16>, vector<256x256xbf16>, vector<64x256xf32> -> vector<64x256xf32>
    %27 = arith.addf %13, %26 : vector<64x256xf32>
    %28 = vector.extract_strided_slice %1 {offsets = [1, 0], sizes = [1, 256], strides = [1, 1]} : vector<9x256xf32> to vector<1x256xf32>
    %29 = vector.broadcast %28 : vector<1x256xf32> to vector<64x256xf32>
    %30 = arith.addf %27, %29 : vector<64x256xf32>
    %cst_14 = arith.constant 0.000000e+00 : f32
    %31 = vector.broadcast %cst_14 : f32 to vector<64x256xf32>
    %32 = arith.cmpf oge, %30, %31 : vector<64x256xf32>
    %cst_15 = arith.constant 2.000000e-01 : f32
    %33 = vector.broadcast %cst_15 : f32 to vector<64x256xf32>
    %34 = arith.mulf %33, %30 : vector<64x256xf32>
    %35 = arith.select %32, %30, %34 : vector<64x256xi1>, vector<64x256xf32>
    %36 = arith.truncf %35 : vector<64x256xf32> to vector<64x256xbf16>
    %c1 = arith.constant 1 : index
    %c0_16 = arith.constant 0 : index
    %c0_17 = arith.constant 0 : index
    %37 = vector.load %arg2[%c1, %c0_16, %c0_17] : memref<3x128x512xbf16, #tpu.memory_space<vmem>>, vector<1x128x512xbf16>
    %38 = vector.shape_cast %37 : vector<1x128x512xbf16> to vector<128x512xbf16>
    %cst_18 = arith.constant dense<0.000000e+00> : vector<64x512xf32>
    %39 = tpu.matmul %0, %38, %cst_18 {dimension_numbers = #tpu.dot_dimension_numbers<[1], [0], [0], [1], [0, 0, 1, 1], [], []>} : vector<64x128xbf16>, vector<128x512xbf16>, vector<64x512xf32> -> vector<64x512xf32>
    %c3 = arith.constant 3 : index
    %c0_19 = arith.constant 0 : index
    %c0_20 = arith.constant 0 : index
    %40 = vector.load %arg3[%c3, %c0_19, %c0_20] : memref<7x256x256xbf16, #tpu.memory_space<vmem>>, vector<1x256x256xbf16>
    %41 = vector.shape_cast %40 : vector<1x256x256xbf16> to vector<256x256xbf16>
    %cst_21 = arith.constant dense<0.000000e+00> : vector<64x256xf32>
    %42 = tpu.matmul %36, %41, %cst_21 {dimension_numbers = #tpu.dot_dimension_numbers<[1], [0], [0], [1], [0, 0, 1, 1], [], []>} : vector<64x256xbf16>, vector<256x256xbf16>, vector<64x256xf32> -> vector<64x256xf32>
    %43 = vector.extract_strided_slice %39 {offsets = [0, 256], sizes = [64, 256], strides = [1, 1]} : vector<64x512xf32> to vector<64x256xf32>
    %44 = arith.addf %42, %43 : vector<64x256xf32>
    %45 = vector.extract_strided_slice %1 {offsets = [5, 0], sizes = [1, 256], strides = [1, 1]} : vector<9x256xf32> to vector<1x256xf32>
    %46 = vector.broadcast %45 : vector<1x256xf32> to vector<64x256xf32>
    %47 = arith.addf %44, %46 : vector<64x256xf32>
    %cst_22 = arith.constant 0.000000e+00 : f32
    %48 = vector.broadcast %cst_22 : f32 to vector<64x256xf32>
    %49 = arith.cmpf oge, %47, %48 : vector<64x256xf32>
    %cst_23 = arith.constant 2.000000e-01 : f32
    %50 = vector.broadcast %cst_23 : f32 to vector<64x256xf32>
    %51 = arith.mulf %50, %47 : vector<64x256xf32>
    %52 = arith.select %49, %47, %51 : vector<64x256xi1>, vector<64x256xf32>
    %c1_24 = arith.constant 1 : index
    %c0_25 = arith.constant 0 : index
    %c0_26 = arith.constant 0 : index
    %53 = vector.load %arg3[%c1_24, %c0_25, %c0_26] : memref<7x256x256xbf16, #tpu.memory_space<vmem>>, vector<1x256x256xbf16>
    %54 = vector.shape_cast %53 : vector<1x256x256xbf16> to vector<256x256xbf16>
    %cst_27 = arith.constant dense<0.000000e+00> : vector<64x256xf32>
    %55 = tpu.matmul %36, %54, %cst_27 {dimension_numbers = #tpu.dot_dimension_numbers<[1], [0], [0], [1], [0, 0, 1, 1], [], []>} : vector<64x256xbf16>, vector<256x256xbf16>, vector<64x256xf32> -> vector<64x256xf32>
    %56 = vector.extract_strided_slice %39 {offsets = [0, 0], sizes = [64, 256], strides = [1, 1]} : vector<64x512xf32> to vector<64x256xf32>
    %57 = arith.addf %55, %56 : vector<64x256xf32>
    %58 = vector.extract_strided_slice %1 {offsets = [3, 0], sizes = [1, 256], strides = [1, 1]} : vector<9x256xf32> to vector<1x256xf32>
    %59 = vector.broadcast %58 : vector<1x256xf32> to vector<64x256xf32>
    %60 = arith.addf %57, %59 : vector<64x256xf32>
    %cst_28 = arith.constant 0.000000e+00 : f32
    %61 = vector.broadcast %cst_28 : f32 to vector<64x256xf32>
    %62 = arith.cmpf oge, %60, %61 : vector<64x256xf32>
    %cst_29 = arith.constant 2.000000e-01 : f32
    %63 = vector.broadcast %cst_29 : f32 to vector<64x256xf32>
    %64 = arith.mulf %63, %60 : vector<64x256xf32>
    %65 = arith.select %62, %60, %64 : vector<64x256xi1>, vector<64x256xf32>
    %66 = arith.truncf %65 : vector<64x256xf32> to vector<64x256xbf16>
    %c2 = arith.constant 2 : index
    %c0_30 = arith.constant 0 : index
    %c0_31 = arith.constant 0 : index
    %67 = vector.load %arg3[%c2, %c0_30, %c0_31] : memref<7x256x256xbf16, #tpu.memory_space<vmem>>, vector<1x256x256xbf16>
    %68 = vector.shape_cast %67 : vector<1x256x256xbf16> to vector<256x256xbf16>
    %cst_32 = arith.constant dense<0.000000e+00> : vector<64x256xf32>
    %69 = tpu.matmul %66, %68, %cst_32 {dimension_numbers = #tpu.dot_dimension_numbers<[1], [0], [0], [1], [0, 0, 1, 1], [], []>} : vector<64x256xbf16>, vector<256x256xbf16>, vector<64x256xf32> -> vector<64x256xf32>
    %70 = arith.addf %52, %69 : vector<64x256xf32>
    %71 = vector.extract_strided_slice %1 {offsets = [4, 0], sizes = [1, 256], strides = [1, 1]} : vector<9x256xf32> to vector<1x256xf32>
    %72 = vector.broadcast %71 : vector<1x256xf32> to vector<64x256xf32>
    %73 = arith.addf %70, %72 : vector<64x256xf32>
    %cst_33 = arith.constant 0.000000e+00 : f32
    %74 = vector.broadcast %cst_33 : f32 to vector<64x256xf32>
    %75 = arith.cmpf oge, %73, %74 : vector<64x256xf32>
    %cst_34 = arith.constant 2.000000e-01 : f32
    %76 = vector.broadcast %cst_34 : f32 to vector<64x256xf32>
    %77 = arith.mulf %76, %73 : vector<64x256xf32>
    %78 = arith.select %75, %73, %77 : vector<64x256xi1>, vector<64x256xf32>
    %79 = arith.truncf %78 : vector<64x256xf32> to vector<64x256xbf16>
    %c2_35 = arith.constant 2 : index
    %c0_36 = arith.constant 0 : index
    %c0_37 = arith.constant 0 : index
    %80 = vector.load %arg2[%c2_35, %c0_36, %c0_37] : memref<3x128x512xbf16, #tpu.memory_space<vmem>>, vector<1x128x512xbf16>
    %81 = vector.shape_cast %80 : vector<1x128x512xbf16> to vector<128x512xbf16>
    %cst_38 = arith.constant dense<0.000000e+00> : vector<64x512xf32>
    %82 = tpu.matmul %0, %81, %cst_38 {dimension_numbers = #tpu.dot_dimension_numbers<[1], [0], [0], [1], [0, 0, 1, 1], [], []>} : vector<64x128xbf16>, vector<128x512xbf16>, vector<64x512xf32> -> vector<64x512xf32>
    %c6 = arith.constant 6 : index
    %c0_39 = arith.constant 0 : index
    %c0_40 = arith.constant 0 : index
    %83 = vector.load %arg3[%c6, %c0_39, %c0_40] : memref<7x256x256xbf16, #tpu.memory_space<vmem>>, vector<1x256x256xbf16>
    %84 = vector.shape_cast %83 : vector<1x256x256xbf16> to vector<256x256xbf16>
    %cst_41 = arith.constant dense<0.000000e+00> : vector<64x256xf32>
    %85 = tpu.matmul %79, %84, %cst_41 {dimension_numbers = #tpu.dot_dimension_numbers<[1], [0], [0], [1], [0, 0, 1, 1], [], []>} : vector<64x256xbf16>, vector<256x256xbf16>, vector<64x256xf32> -> vector<64x256xf32>
    %86 = vector.extract_strided_slice %82 {offsets = [0, 256], sizes = [64, 256], strides = [1, 1]} : vector<64x512xf32> to vector<64x256xf32>
    %87 = arith.addf %85, %86 : vector<64x256xf32>
    %88 = vector.extract_strided_slice %1 {offsets = [8, 0], sizes = [1, 256], strides = [1, 1]} : vector<9x256xf32> to vector<1x256xf32>
    %89 = vector.broadcast %88 : vector<1x256xf32> to vector<64x256xf32>
    %90 = arith.addf %87, %89 : vector<64x256xf32>
    %cst_42 = arith.constant 0.000000e+00 : f32
    %91 = vector.broadcast %cst_42 : f32 to vector<64x256xf32>
    %92 = arith.cmpf oge, %90, %91 : vector<64x256xf32>
    %cst_43 = arith.constant 2.000000e-01 : f32
    %93 = vector.broadcast %cst_43 : f32 to vector<64x256xf32>
    %94 = arith.mulf %93, %90 : vector<64x256xf32>
    %95 = arith.select %92, %90, %94 : vector<64x256xi1>, vector<64x256xf32>
    %c4 = arith.constant 4 : index
    %c0_44 = arith.constant 0 : index
    %c0_45 = arith.constant 0 : index
    %96 = vector.load %arg3[%c4, %c0_44, %c0_45] : memref<7x256x256xbf16, #tpu.memory_space<vmem>>, vector<1x256x256xbf16>
    %97 = vector.shape_cast %96 : vector<1x256x256xbf16> to vector<256x256xbf16>
    %cst_46 = arith.constant dense<0.000000e+00> : vector<64x256xf32>
    %98 = tpu.matmul %79, %97, %cst_46 {dimension_numbers = #tpu.dot_dimension_numbers<[1], [0], [0], [1], [0, 0, 1, 1], [], []>} : vector<64x256xbf16>, vector<256x256xbf16>, vector<64x256xf32> -> vector<64x256xf32>
    %99 = vector.extract_strided_slice %82 {offsets = [0, 0], sizes = [64, 256], strides = [1, 1]} : vector<64x512xf32> to vector<64x256xf32>
    %100 = arith.addf %98, %99 : vector<64x256xf32>
    %101 = vector.extract_strided_slice %1 {offsets = [6, 0], sizes = [1, 256], strides = [1, 1]} : vector<9x256xf32> to vector<1x256xf32>
    %102 = vector.broadcast %101 : vector<1x256xf32> to vector<64x256xf32>
    %103 = arith.addf %100, %102 : vector<64x256xf32>
    %cst_47 = arith.constant 0.000000e+00 : f32
    %104 = vector.broadcast %cst_47 : f32 to vector<64x256xf32>
    %105 = arith.cmpf oge, %103, %104 : vector<64x256xf32>
    %cst_48 = arith.constant 2.000000e-01 : f32
    %106 = vector.broadcast %cst_48 : f32 to vector<64x256xf32>
    %107 = arith.mulf %106, %103 : vector<64x256xf32>
    %108 = arith.select %105, %103, %107 : vector<64x256xi1>, vector<64x256xf32>
    %109 = arith.truncf %108 : vector<64x256xf32> to vector<64x256xbf16>
    %c5 = arith.constant 5 : index
    %c0_49 = arith.constant 0 : index
    %c0_50 = arith.constant 0 : index
    %110 = vector.load %arg3[%c5, %c0_49, %c0_50] : memref<7x256x256xbf16, #tpu.memory_space<vmem>>, vector<1x256x256xbf16>
    %111 = vector.shape_cast %110 : vector<1x256x256xbf16> to vector<256x256xbf16>
    %cst_51 = arith.constant dense<0.000000e+00> : vector<64x256xf32>
    %112 = tpu.matmul %109, %111, %cst_51 {dimension_numbers = #tpu.dot_dimension_numbers<[1], [0], [0], [1], [0, 0, 1, 1], [], []>} : vector<64x256xbf16>, vector<256x256xbf16>, vector<64x256xf32> -> vector<64x256xf32>
    %113 = arith.addf %95, %112 : vector<64x256xf32>
    %114 = vector.extract_strided_slice %1 {offsets = [7, 0], sizes = [1, 256], strides = [1, 1]} : vector<9x256xf32> to vector<1x256xf32>
    %115 = vector.broadcast %114 : vector<1x256xf32> to vector<64x256xf32>
    %116 = arith.addf %113, %115 : vector<64x256xf32>
    %117 = arith.truncf %116 : vector<64x256xf32> to vector<64x256xbf16>
    %c0_52 = arith.constant 0 : index
    %c0_53 = arith.constant 0 : index
    %118 = vector.load %arg5[%c0_52, %c0_53] : memref<256x128xbf16, #tpu.memory_space<vmem>>, vector<256x128xbf16>
    %cst_54 = arith.constant dense<0.000000e+00> : vector<64x128xf32>
    %119 = tpu.matmul %117, %118, %cst_54 {dimension_numbers = #tpu.dot_dimension_numbers<[1], [0], [0], [1], [0, 0, 1, 1], [], []>} : vector<64x256xbf16>, vector<256x128xbf16>, vector<64x128xf32> -> vector<64x128xf32>
    %c0_55 = arith.constant 0 : index
    %c0_56 = arith.constant 0 : index
    %120 = vector.load %arg6[%c0_55, %c0_56] : memref<1x128xf32, #tpu.memory_space<vmem>>, vector<1x128xf32>
    %121 = vector.broadcast %120 : vector<1x128xf32> to vector<64x128xf32>
    %122 = arith.addf %119, %121 : vector<64x128xf32>
    %123 = arith.truncf %122 : vector<64x128xf32> to vector<64x128xbf16>
    %c0_57 = arith.constant 0 : index
    %c0_58 = arith.constant 0 : index
    %124 = vector.load %arg7[%c0_57, %c0_58] : memref<64x128xbf16, #tpu.memory_space<vmem>>, vector<64x128xbf16>
    tpu.vector_store %arg7[%c0_57, %c0_58], %123 {strides = array<i32>} : memref<64x128xbf16, #tpu.memory_space<vmem>>, vector<64x128xbf16>,
    return
  }
  func.func @transform_0(%arg0: i32) -> (i32, i32) {
    %c0_i32 = arith.constant 0 : i32
    %c0_i32_0 = arith.constant 0 : i32
    return %arg0, %c0_i32 : i32, i32
  }
  func.func @transform_1(%arg0: i32) -> (i32, i32, i32) {
    %c0_i32 = arith.constant 0 : i32
    %c0_i32_0 = arith.constant 0 : i32
    %c0_i32_1 = arith.constant 0 : i32
    %c0_i32_2 = arith.constant 0 : i32
    return %c0_i32, %c0_i32_0, %c0_i32_1 : i32, i32, i32
  }
  func.func @transform_2(%arg0: i32) -> (i32, i32, i32) {
    %c0_i32 = arith.constant 0 : i32
    %c0_i32_0 = arith.constant 0 : i32
    %c0_i32_1 = arith.constant 0 : i32
    %c0_i32_2 = arith.constant 0 : i32
    return %c0_i32, %c0_i32_0, %c0_i32_1 : i32, i32, i32
  }
  func.func @transform_3(%arg0: i32) -> (i32, i32) {
    %c0_i32 = arith.constant 0 : i32
    %c0_i32_0 = arith.constant 0 : i32
    %c0_i32_1 = arith.constant 0 : i32
    return %c0_i32, %c0_i32_0 : i32, i32
  }
  func.func @transform_4(%arg0: i32) -> (i32, i32) {
    %c0_i32 = arith.constant 0 : i32
    %c0_i32_0 = arith.constant 0 : i32
    %c0_i32_1 = arith.constant 0 : i32
    return %c0_i32, %c0_i32_0 : i32, i32
  }
  func.func @transform_5(%arg0: i32) -> (i32, i32) {
    %c0_i32 = arith.constant 0 : i32
    %c0_i32_0 = arith.constant 0 : i32
    %c0_i32_1 = arith.constant 0 : i32
    return %c0_i32, %c0_i32_0 : i32, i32
  }
  func.func @transform_6(%arg0: i32) -> (i32, i32) {
    %c0_i32 = arith.constant 0 : i32
    %c0_i32_0 = arith.constant 0 : i32
    return %arg0, %c0_i32 : i32, i32
  }
}

module attributes {stable_mosaic.version = 11 : i64} {
  func.func @grasp_evaluator_kernel(%arg0: i32, %arg1: memref<64x128xbf16, #tpu.memory_space<vmem>>, %arg2: memref<3x128x512xbf16, #tpu.memory_space<vmem>>, %arg3: memref<7x256x256xbf16, #tpu.memory_space<vmem>>, %arg4: memref<9x256xf32, #tpu.memory_space<vmem>>, %arg5: memref<256x128xbf16, #tpu.memory_space<vmem>>, %arg6: memref<1x128xf32, #tpu.memory_space<vmem>>, %arg7: memref<64x128xbf16, #tpu.memory_space<vmem>>) attributes {dimension_semantics = [#tpu.dimension_semantics<parallel>], iteration_bounds = array<i64: 1>, scalar_prefetch = 0 : i64, scratch_operands = 0 : i64, tpu.core_type = #tpu.core_type<tc>, window_params = [{transform_indices = @transform_0, window_bounds = array<i64: 64, 128>}, {pipeline_mode = #tpu.pipeline_mode<synchronous>, transform_indices = @transform_1, window_bounds = array<i64: 3, 128, 512>}, {pipeline_mode = #tpu.pipeline_mode<synchronous>, transform_indices = @transform_2, window_bounds = array<i64: 7, 256, 256>}, {pipeline_mode = #tpu.pipeline_mode<synchronous>, transform_indices = @transform_3, window_bounds = array<i64: 9, 256>}, {pipeline_mode = #tpu.pipeline_mode<synchronous>, transform_indices = @transform_4, window_bounds = array<i64: 256, 128>}, {pipeline_mode = #tpu.pipeline_mode<synchronous>, transform_indices = @transform_5, window_bounds = array<i64: 1, 128>}, {transform_indices = @transform_6, window_bounds = array<i64: 64, 128>}]} {
    %c0 = arith.constant 0 : index
    %c0_0 = arith.constant 0 : index
    %0 = vector.load %arg1[%c0, %c0_0] : memref<64x128xbf16, #tpu.memory_space<vmem>>, vector<64x128xbf16>
    %c0_1 = arith.constant 0 : index
    %c0_2 = arith.constant 0 : index
    %1 = vector.load %arg4[%c0_1, %c0_2] : memref<9x256xf32, #tpu.memory_space<vmem>>, vector<9x256xf32>
    %c0_3 = arith.constant 0 : index
    %c0_4 = arith.constant 0 : index
    %c0_5 = arith.constant 0 : index
    %2 = vector.load %arg2[%c0_3, %c0_4, %c0_5] : memref<3x128x512xbf16, #tpu.memory_space<vmem>>, vector<1x128x512xbf16>
    %3 = vector.shape_cast %2 : vector<1x128x512xbf16> to vector<128x512xbf16>
    %cst = arith.constant dense<0.000000e+00> : vector<64x512xf32>
    %4 = tpu.matmul %0, %3, %cst {dimension_numbers = #tpu.dot_dimension_numbers<[1], [0], [0], [1], [0, 0, 1, 1], [], []>} : vector<64x128xbf16>, vector<128x512xbf16>, vector<64x512xf32> -> vector<64x512xf32>
    %5 = vector.extract_strided_slice %4 {offsets = [0, 256], sizes = [64, 256], strides = [1, 1]} : vector<64x512xf32> to vector<64x256xf32>
    %6 = vector.extract_strided_slice %1 {offsets = [2, 0], sizes = [1, 256], strides = [1, 1]} : vector<9x256xf32> to vector<1x256xf32>
    %7 = vector.broadcast %6 : vector<1x256xf32> to vector<64x256xf32>
    %8 = arith.addf %5, %7 : vector<64x256xf32>
    %cst_6 = arith.constant 0.000000e+00 : f32
    %9 = vector.broadcast %cst_6 : f32 to vector<64x256xf32>
    %10 = arith.cmpf oge, %8, %9 : vector<64x256xf32>
    %cst_7 = arith.constant 2.000000e-01 : f32
    %11 = vector.broadcast %cst_7 : f32 to vector<64x256xf32>
    %12 = arith.mulf %11, %8 : vector<64x256xf32>
    %13 = arith.select %10, %8, %12 : vector<64x256xi1>, vector<64x256xf32>
    %14 = vector.extract_strided_slice %4 {offsets = [0, 0], sizes = [64, 256], strides = [1, 1]} : vector<64x512xf32> to vector<64x256xf32>
    %15 = vector.extract_strided_slice %1 {offsets = [0, 0], sizes = [1, 256], strides = [1, 1]} : vector<9x256xf32> to vector<1x256xf32>
    %16 = vector.broadcast %15 : vector<1x256xf32> to vector<64x256xf32>
    %17 = arith.addf %14, %16 : vector<64x256xf32>
    %cst_8 = arith.constant 0.000000e+00 : f32
    %18 = vector.broadcast %cst_8 : f32 to vector<64x256xf32>
    %19 = arith.cmpf oge, %17, %18 : vector<64x256xf32>
    %cst_9 = arith.constant 2.000000e-01 : f32
    %20 = vector.broadcast %cst_9 : f32 to vector<64x256xf32>
    %21 = arith.mulf %20, %17 : vector<64x256xf32>
    %22 = arith.select %19, %17, %21 : vector<64x256xi1>, vector<64x256xf32>
    %23 = arith.truncf %22 : vector<64x256xf32> to vector<64x256xbf16>
    %c0_10 = arith.constant 0 : index
    %c0_11 = arith.constant 0 : index
    %c0_12 = arith.constant 0 : index
    %24 = vector.load %arg3[%c0_10, %c0_11, %c0_12] : memref<7x256x256xbf16, #tpu.memory_space<vmem>>, vector<1x256x256xbf16>
    %25 = vector.shape_cast %24 : vector<1x256x256xbf16> to vector<256x256xbf16>
    %cst_13 = arith.constant dense<0.000000e+00> : vector<64x256xf32>
    %26 = tpu.matmul %23, %25, %cst_13 {dimension_numbers = #tpu.dot_dimension_numbers<[1], [0], [0], [1], [0, 0, 1, 1], [], []>} : vector<64x256xbf16>, vector<256x256xbf16>, vector<64x256xf32> -> vector<64x256xf32>
    %27 = arith.addf %13, %26 : vector<64x256xf32>
    %28 = vector.extract_strided_slice %1 {offsets = [1, 0], sizes = [1, 256], strides = [1, 1]} : vector<9x256xf32> to vector<1x256xf32>
    %29 = vector.broadcast %28 : vector<1x256xf32> to vector<64x256xf32>
    %30 = arith.addf %27, %29 : vector<64x256xf32>
    %cst_14 = arith.constant 0.000000e+00 : f32
    %31 = vector.broadcast %cst_14 : f32 to vector<64x256xf32>
    %32 = arith.cmpf oge, %30, %31 : vector<64x256xf32>
    %cst_15 = arith.constant 2.000000e-01 : f32
    %33 = vector.broadcast %cst_15 : f32 to vector<64x256xf32>
    %34 = arith.mulf %33, %30 : vector<64x256xf32>
    %35 = arith.select %32, %30, %34 : vector<64x256xi1>, vector<64x256xf32>
    %36 = arith.truncf %35 : vector<64x256xf32> to vector<64x256xbf16>
    %c1 = arith.constant 1 : index
    %c0_16 = arith.constant 0 : index
    %c0_17 = arith.constant 0 : index
    %37 = vector.load %arg2[%c1, %c0_16, %c0_17] : memref<3x128x512xbf16, #tpu.memory_space<vmem>>, vector<1x128x512xbf16>
    %38 = vector.shape_cast %37 : vector<1x128x512xbf16> to vector<128x512xbf16>
    %cst_18 = arith.constant dense<0.000000e+00> : vector<64x512xf32>
    %39 = tpu.matmul %0, %38, %cst_18 {dimension_numbers = #tpu.dot_dimension_numbers<[1], [0], [0], [1], [0, 0, 1, 1], [], []>} : vector<64x128xbf16>, vector<128x512xbf16>, vector<64x512xf32> -> vector<64x512xf32>
    %c3 = arith.constant 3 : index
    %c0_19 = arith.constant 0 : index
    %c0_20 = arith.constant 0 : index
    %40 = vector.load %arg3[%c3, %c0_19, %c0_20] : memref<7x256x256xbf16, #tpu.memory_space<vmem>>, vector<1x256x256xbf16>
    %41 = vector.shape_cast %40 : vector<1x256x256xbf16> to vector<256x256xbf16>
    %cst_21 = arith.constant dense<0.000000e+00> : vector<64x256xf32>
    %42 = tpu.matmul %36, %41, %cst_21 {dimension_numbers = #tpu.dot_dimension_numbers<[1], [0], [0], [1], [0, 0, 1, 1], [], []>} : vector<64x256xbf16>, vector<256x256xbf16>, vector<64x256xf32> -> vector<64x256xf32>
    %43 = vector.extract_strided_slice %39 {offsets = [0, 256], sizes = [64, 256], strides = [1, 1]} : vector<64x512xf32> to vector<64x256xf32>
    %44 = arith.addf %42, %43 : vector<64x256xf32>
    %45 = vector.extract_strided_slice %1 {offsets = [5, 0], sizes = [1, 256], strides = [1, 1]} : vector<9x256xf32> to vector<1x256xf32>
    %46 = vector.broadcast %45 : vector<1x256xf32> to vector<64x256xf32>
    %47 = arith.addf %44, %46 : vector<64x256xf32>
    %cst_22 = arith.constant 0.000000e+00 : f32
    %48 = vector.broadcast %cst_22 : f32 to vector<64x256xf32>
    %49 = arith.cmpf oge, %47, %48 : vector<64x256xf32>
    %cst_23 = arith.constant 2.000000e-01 : f32
    %50 = vector.broadcast %cst_23 : f32 to vector<64x256xf32>
    %51 = arith.mulf %50, %47 : vector<64x256xf32>
    %52 = arith.select %49, %47, %51 : vector<64x256xi1>, vector<64x256xf32>
    %c1_24 = arith.constant 1 : index
    %c0_25 = arith.constant 0 : index
    %c0_26 = arith.constant 0 : index
    %53 = vector.load %arg3[%c1_24, %c0_25, %c0_26] : memref<7x256x256xbf16, #tpu.memory_space<vmem>>, vector<1x256x256xbf16>
    %54 = vector.shape_cast %53 : vector<1x256x256xbf16> to vector<256x256xbf16>
    %cst_27 = arith.constant dense<0.000000e+00> : vector<64x256xf32>
    %55 = tpu.matmul %36, %54, %cst_27 {dimension_numbers = #tpu.dot_dimension_numbers<[1], [0], [0], [1], [0, 0, 1, 1], [], []>} : vector<64x256xbf16>, vector<256x256xbf16>, vector<64x256xf32> -> vector<64x256xf32>
    %56 = vector.extract_strided_slice %39 {offsets = [0, 0], sizes = [64, 256], strides = [1, 1]} : vector<64x512xf32> to vector<64x256xf32>
    %57 = arith.addf %55, %56 : vector<64x256xf32>
    %58 = vector.extract_strided_slice %1 {offsets = [3, 0], sizes = [1, 256], strides = [1, 1]} : vector<9x256xf32> to vector<1x256xf32>
    %59 = vector.broadcast %58 : vector<1x256xf32> to vector<64x256xf32>
    %60 = arith.addf %57, %59 : vector<64x256xf32>
    %cst_28 = arith.constant 0.000000e+00 : f32
    %61 = vector.broadcast %cst_28 : f32 to vector<64x256xf32>
    %62 = arith.cmpf oge, %60, %61 : vector<64x256xf32>
    %cst_29 = arith.constant 2.000000e-01 : f32
    %63 = vector.broadcast %cst_29 : f32 to vector<64x256xf32>
    %64 = arith.mulf %63, %60 : vector<64x256xf32>
    %65 = arith.select %62, %60, %64 : vector<64x256xi1>, vector<64x256xf32>
    %66 = arith.truncf %65 : vector<64x256xf32> to vector<64x256xbf16>
    %c2 = arith.constant 2 : index
    %c0_30 = arith.constant 0 : index
    %c0_31 = arith.constant 0 : index
    %67 = vector.load %arg3[%c2, %c0_30, %c0_31] : memref<7x256x256xbf16, #tpu.memory_space<vmem>>, vector<1x256x256xbf16>
    %68 = vector.shape_cast %67 : vector<1x256x256xbf16> to vector<256x256xbf16>
    %cst_32 = arith.constant dense<0.000000e+00> : vector<64x256xf32>
    %69 = tpu.matmul %66, %68, %cst_32 {dimension_numbers = #tpu.dot_dimension_numbers<[1], [0], [0], [1], [0, 0, 1, 1], [], []>} : vector<64x256xbf16>, vector<256x256xbf16>, vector<64x256xf32> -> vector<64x256xf32>
    %70 = arith.addf %52, %69 : vector<64x256xf32>
    %71 = vector.extract_strided_slice %1 {offsets = [4, 0], sizes = [1, 256], strides = [1, 1]} : vector<9x256xf32> to vector<1x256xf32>
    %72 = vector.broadcast %71 : vector<1x256xf32> to vector<64x256xf32>
    %73 = arith.addf %70, %72 : vector<64x256xf32>
    %cst_33 = arith.constant 0.000000e+00 : f32
    %74 = vector.broadcast %cst_33 : f32 to vector<64x256xf32>
    %75 = arith.cmpf oge, %73, %74 : vector<64x256xf32>
    %cst_34 = arith.constant 2.000000e-01 : f32
    %76 = vector.broadcast %cst_34 : f32 to vector<64x256xf32>
    %77 = arith.mulf %76, %73 : vector<64x256xf32>
    %78 = arith.select %75, %73, %77 : vector<64x256xi1>, vector<64x256xf32>
    %79 = arith.truncf %78 : vector<64x256xf32> to vector<64x256xbf16>
    %c2_35 = arith.constant 2 : index
    %c0_36 = arith.constant 0 : index
    %c0_37 = arith.constant 0 : index
    %80 = vector.load %arg2[%c2_35, %c0_36, %c0_37] : memref<3x128x512xbf16, #tpu.memory_space<vmem>>, vector<1x128x512xbf16>
    %81 = vector.shape_cast %80 : vector<1x128x512xbf16> to vector<128x512xbf16>
    %cst_38 = arith.constant dense<0.000000e+00> : vector<64x512xf32>
    %82 = tpu.matmul %0, %81, %cst_38 {dimension_numbers = #tpu.dot_dimension_numbers<[1], [0], [0], [1], [0, 0, 1, 1], [], []>} : vector<64x128xbf16>, vector<128x512xbf16>, vector<64x512xf32> -> vector<64x512xf32>
    %c6 = arith.constant 6 : index
    %c0_39 = arith.constant 0 : index
    %c0_40 = arith.constant 0 : index
    %83 = vector.load %arg3[%c6, %c0_39, %c0_40] : memref<7x256x256xbf16, #tpu.memory_space<vmem>>, vector<1x256x256xbf16>
    %84 = vector.shape_cast %83 : vector<1x256x256xbf16> to vector<256x256xbf16>
    %cst_41 = arith.constant dense<0.000000e+00> : vector<64x256xf32>
    %85 = tpu.matmul %79, %84, %cst_41 {dimension_numbers = #tpu.dot_dimension_numbers<[1], [0], [0], [1], [0, 0, 1, 1], [], []>} : vector<64x256xbf16>, vector<256x256xbf16>, vector<64x256xf32> -> vector<64x256xf32>
    %86 = vector.extract_strided_slice %82 {offsets = [0, 256], sizes = [64, 256], strides = [1, 1]} : vector<64x512xf32> to vector<64x256xf32>
    %87 = arith.addf %85, %86 : vector<64x256xf32>
    %88 = vector.extract_strided_slice %1 {offsets = [8, 0], sizes = [1, 256], strides = [1, 1]} : vector<9x256xf32> to vector<1x256xf32>
    %89 = vector.broadcast %88 : vector<1x256xf32> to vector<64x256xf32>
    %90 = arith.addf %87, %89 : vector<64x256xf32>
    %cst_42 = arith.constant 0.000000e+00 : f32
    %91 = vector.broadcast %cst_42 : f32 to vector<64x256xf32>
    %92 = arith.cmpf oge, %90, %91 : vector<64x256xf32>
    %cst_43 = arith.constant 2.000000e-01 : f32
    %93 = vector.broadcast %cst_43 : f32 to vector<64x256xf32>
    %94 = arith.mulf %93, %90 : vector<64x256xf32>
    %95 = arith.select %92, %90, %94 : vector<64x256xi1>, vector<64x256xf32>
    %c4 = arith.constant 4 : index
    %c0_44 = arith.constant 0 : index
    %c0_45 = arith.constant 0 : index
    %96 = vector.load %arg3[%c4, %c0_44, %c0_45] : memref<7x256x256xbf16, #tpu.memory_space<vmem>>, vector<1x256x256xbf16>
    %97 = vector.shape_cast %96 : vector<1x256x256xbf16> to vector<256x256xbf16>
    %cst_46 = arith.constant dense<0.000000e+00> : vector<64x256xf32>
    %98 = tpu.matmul %79, %97, %cst_46 {dimension_numbers = #tpu.dot_dimension_numbers<[1], [0], [0], [1], [0, 0, 1, 1], [], []>} : vector<64x256xbf16>, vector<256x256xbf16>, vector<64x256xf32> -> vector<64x256xf32>
    %99 = vector.extract_strided_slice %82 {offsets = [0, 0], sizes = [64, 256], strides = [1, 1]} : vector<64x512xf32> to vector<64x256xf32>
    %100 = arith.addf %98, %99 : vector<64x256xf32>
    %101 = vector.extract_strided_slice %1 {offsets = [6, 0], sizes = [1, 256], strides = [1, 1]} : vector<9x256xf32> to vector<1x256xf32>
    %102 = vector.broadcast %101 : vector<1x256xf32> to vector<64x256xf32>
    %103 = arith.addf %100, %102 : vector<64x256xf32>
    %cst_47 = arith.constant 0.000000e+00 : f32
    %104 = vector.broadcast %cst_47 : f32 to vector<64x256xf32>
    %105 = arith.cmpf oge, %103, %104 : vector<64x256xf32>
    %cst_48 = arith.constant 2.000000e-01 : f32
    %106 = vector.broadcast %cst_48 : f32 to vector<64x256xf32>
    %107 = arith.mulf %106, %103 : vector<64x256xf32>
    %108 = arith.select %105, %103, %107 : vector<64x256xi1>, vector<64x256xf32>
    %109 = arith.truncf %108 : vector<64x256xf32> to vector<64x256xbf16>
    %c5 = arith.constant 5 : index
    %c0_49 = arith.constant 0 : index
    %c0_50 = arith.constant 0 : index
    %110 = vector.load %arg3[%c5, %c0_49, %c0_50] : memref<7x256x256xbf16, #tpu.memory_space<vmem>>, vector<1x256x256xbf16>
    %111 = vector.shape_cast %110 : vector<1x256x256xbf16> to vector<256x256xbf16>
    %cst_51 = arith.constant dense<0.000000e+00> : vector<64x256xf32>
    %112 = tpu.matmul %109, %111, %cst_51 {dimension_numbers = #tpu.dot_dimension_numbers<[1], [0], [0], [1], [0, 0, 1, 1], [], []>} : vector<64x256xbf16>, vector<256x256xbf16>, vector<64x256xf32> -> vector<64x256xf32>
    %113 = arith.addf %95, %112 : vector<64x256xf32>
    %114 = vector.extract_strided_slice %1 {offsets = [7, 0], sizes = [1, 256], strides = [1, 1]} : vector<9x256xf32> to vector<1x256xf32>
    %115 = vector.broadcast %114 : vector<1x256xf32> to vector<64x256xf32>
    %116 = arith.addf %113, %115 : vector<64x256xf32>
    %117 = arith.truncf %116 : vector<64x256xf32> to vector<64x256xbf16>
    %c0_52 = arith.constant 0 : index
    %c0_53 = arith.constant 0 : index
    %118 = vector.load %arg5[%c0_52, %c0_53] : memref<256x128xbf16, #tpu.memory_space<vmem>>, vector<256x128xbf16>
    %cst_54 = arith.constant dense<0.000000e+00> : vector<64x128xf32>
    %119 = tpu.matmul %117, %118, %cst_54 {dimension_numbers = #tpu.dot_dimension_numbers<[1], [0], [0], [1], [0, 0, 1, 1], [], []>} : vector<64x256xbf16>, vector<256x128xbf16>, vector<64x128xf32> -> vector<64x128xf32>
    %c0_55 = arith.constant 0 : index
    %c0_56 = arith.constant 0 : index
    %120 = vector.load %arg6[%c0_55, %c0_56] : memref<1x128xf32, #tpu.memory_space<vmem>>, vector<1x128xf32>
    %121 = vector.broadcast %120 : vector<1x128xf32> to vector<64x128xf32>
    %122 = arith.addf %119, %121 : vector<64x128xf32>
    %123 = arith.truncf %122 : vector<64x128xf32> to vector<64x128xbf16>
    %c0_57 = arith.constant 0 : index
    %c0_58 = arith.constant 0 : index
    %124 = vector.load %arg7[%c0_57, %c0_58] : memref<64x128xbf16, #tpu.memory_space<vmem>>, vector<64x128xbf16>
    tpu.vector_store %arg7[%c0_57, %c0_58], %123 {strides = array<i32>} : memref<64x128xbf16, #tpu.memory_space<vmem>>, vector<64x128xbf16>,
    return
  }
  func.func @transform_0(%arg0: i32) -> (i32, i32) {
    %c0_i32 = arith.constant 0 : i32
    %c0_i32_0 = arith.constant 0 : i32
    return %arg0, %c0_i32 : i32, i32
  }
  func.func @transform_1(%arg0: i32) -> (i32, i32, i32) {
    %c0_i32 = arith.constant 0 : i32
    %c0_i32_0 = arith.constant 0 : i32
    %c0_i32_1 = arith.constant 0 : i32
    %c0_i32_2 = arith.constant 0 : i32
    return %c0_i32, %c0_i32_0, %c0_i32_1 : i32, i32, i32
  }
  func.func @transform_2(%arg0: i32) -> (i32, i32, i32) {
    %c0_i32 = arith.constant 0 : i32
    %c0_i32_0 = arith.constant 0 : i32
    %c0_i32_1 = arith.constant 0 : i32
    %c0_i32_2 = arith.constant 0 : i32
    return %c0_i32, %c0_i32_0, %c0_i32_1 : i32, i32, i32
  }
  func.func @transform_3(%arg0: i32) -> (i32, i32) {
    %c0_i32 = arith.constant 0 : i32
    %c0_i32_0 = arith.constant 0 : i32
    %c0_i32_1 = arith.constant 0 : i32
    return %c0_i32, %c0_i32_0 : i32, i32
  }
  func.func @transform_4(%arg0: i32) -> (i32, i32) {
    %c0_i32 = arith.constant 0 : i32
    %c0_i32_0 = arith.constant 0 : i32
    %c0_i32_1 = arith.constant 0 : i32
    return %c0_i32, %c0_i32_0 : i32, i32
  }
  func.func @transform_5(%arg0: i32) -> (i32, i32) {
    %c0_i32 = arith.constant 0 : i32
    %c0_i32_0 = arith.constant 0 : i32
    %c0_i32_1 = arith.constant 0 : i32
    return %c0_i32, %c0_i32_0 : i32, i32
  }
  func.func @transform_6(%arg0: i32) -> (i32, i32) {
    %c0_i32 = arith.constant 0 : i32
    %c0_i32_0 = arith.constant 0 : i32
    return %arg0, %c0_i32 : i32, i32
  }
}

</mosaic_0001>

<bundles_post_ra>
// kernel: tpu_custom_call.1
= control target key start
LH: loop header
LB: loop body
LE: loop exit
PB: predicated region body
PF: predicated region fallthrough
CT: control target
= control target key end

     0   :  { %11 = vsyncpa [#allocation3], 0  ;;  %s5695_s0 = inlined_call_operand.hbm [shape: bf16[64,128], index: 0, kind: input, shape index: {}]   ;;  %s5696_s1 = inlined_call_operand.hbm [shape: bf16[3,128,512], index: 1, kind: input, shape index: {}]   ;;  %s5697_s2 = inlined_call_operand.hbm [shape: bf16[7,256,256], index: 2, kind: input, shape index: {}]   ;;  %s5698_s3 = inlined_call_operand.hbm [shape: f32[9,256], index: 3, kind: input, shape index: {}]   ;;  %s5699_s4 = inlined_call_operand.hbm [shape: bf16[256,128], index: 4, kind: input, shape index: {}]   ;;  %s5700_s5 = inlined_call_operand.vmem [shape: f32[1,128], index: 5, kind: input, shape index: {}]   ;;  %s5701_s6 = inlined_call_operand.hbm [shape: bf16[64,128], index: 6, kind: output, shape index: {}]  }
   0x1   :  { %12 = vsyncpa [#allocation6], 0 }
   0x2   :  { %13 = vsyncpa [#allocation9], 0 }
   0x3   :  { %14 = vsyncpa [#allocation4], 0  ;;  %s5032_s21 = smov [#allocation5]  }
   0x4   :  { %s32_s22 = sshll.u32 %s5032_s21, 4  ;;  %s33_s22 = int_to_ptr.vmem [resolvable:$true] %s32_s22 }
   0x5   :  { %s4912_s23 = scalar_lea.vmem %s33_s22, 12288  ;;  %p4917_p1 = scmp.lt.s32.totalorder %s33_s22, %s33_s22 }
   0x6   :  { %p4913_p0 = scmp.ne.s32.totalorder %s33_s22, %s4912_s23  ;;  %p4918_p2 = scmp.lt.s32.totalorder %s4912_s23, %s4912_s23 }
   0x8   :  { %p4919_p3 = por %p4918_p2, %p4917_p1 }
   0xa   :  { %p4920_p4 = pnand %p4919_p3, %p4913_p0 }
   0xc   :  { %4923 = shalt.err (!%p4920_p4)
}
   0xd   :  { %s5033_s24 = smov 256   ;;  %s5034_s25 = smov 16  }
   0xe   :  { %38 = dma.hbm_to_vmem [thread:$0]  %s5696_s1, 12288, %s33_s22, [#allocation6], %s5033_s24, %s5033_s24, %s5034_s25  }
   0xf   :  { %s5035_s28 = smov [#allocation8]   ;;  %s5036_s30 = smov [#allocation2]  }
  0x10   :  { %s56_s29 = sshll.u32 %s5035_s28, 4  ;;  %s20_s7 = sshll.u32 %s5036_s30, 4  ;;  %s57_s29 = int_to_ptr.vmem [resolvable:$true] %s56_s29  ;;  %s21_s7 = int_to_ptr.vmem [resolvable:$true] %s20_s7 }
  0x11   :  { %s4932_s8 = scalar_lea.vmem %s57_s29, 512  ;;  %p4937_p6 = scmp.lt.s32.totalorder %s57_s29, %s57_s29 }
  0x12   :  { %p4933_p5 = scmp.ne.s32.totalorder %s57_s29, %s4932_s8  ;;  %p4938_p7 = scmp.lt.s32.totalorder %s4932_s8, %s4932_s8 }
  0x14   :  { %p4939_p8 = por %p4938_p7, %p4937_p6 }
  0x16   :  { %p4940_p9 = pnand %p4939_p8, %p4933_p5 }
  0x18   :  { %4943 = shalt.err (!%p4940_p9)
}
  0x19   :  { %62 = dma.hbm_to_vmem [thread:$0]  %s5698_s3, 512, %s57_s29, [#allocation9], %s5033_s24, %s5033_s24, %s5034_s25  }
  0x1a   :  { %s4952_s11 = scalar_lea.vmem %s21_s7, 512  ;;  %p4957_p11 = scmp.lt.s32.totalorder %s21_s7, %s21_s7 }
  0x1b   :  { %p4953_p10 = scmp.ne.s32.totalorder %s21_s7, %s4952_s11  ;;  %p4958_p12 = scmp.lt.s32.totalorder %s4952_s11, %s4952_s11 }
  0x1d   :  { %p4959_p13 = por %p4958_p12, %p4957_p11 }
  0x1f   :  { %p4960_p0 = pnand %p4959_p13, %p4953_p10 }
  0x21   :  { %4963 = shalt.err (!%p4960_p0)
}
  0x22   :  { %s5037_s1 = smov 64   ;;  %s5038_s12 = smov 4  }
  0x23   :  { %26 = dma.hbm_to_vmem [thread:$0]  %s5695_s0, 512, %s21_s7, [#allocation3], %s5037_s1, %s5037_s1, %s5038_s12  }
  0x24   :  { %s5039_s15 = smov [#allocation7]  }
  0x25   :  { %s44_s16 = sshll.u32 %s5039_s15, 4  ;;  %s45_s16 = int_to_ptr.vmem [resolvable:$true] %s44_s16 }
  0x26   :  { %s4972_s3 = scalar_lea.vmem %s45_s16, 28672  ;;  %p4977_p2 = scmp.lt.s32.totalorder %s45_s16, %s45_s16 }
  0x27   :  { %p4973_p1 = scmp.ne.s32.totalorder %s45_s16, %s4972_s3  ;;  %p4978_p3 = scmp.lt.s32.totalorder %s4972_s3, %s4972_s3 }
  0x29   :  { %p4979_p4 = por %p4978_p3, %p4977_p2 }
  0x2b   :  { %p4980_p5 = pnand %p4979_p4, %p4973_p1 }
  0x2d   :  { %4983 = shalt.err (!%p4980_p5)
}
  0x2e   :  { %s5040_s17 = smov 128   ;;  %s5041_s18 = smov 8  }
  0x2f   :  { %50 = dma.hbm_to_vmem [thread:$0]  %s5697_s2, 28672, %s45_s16, [#allocation6], %s5040_s17, %s5040_s17, %s5041_s18  }
  0x30   :  { %s5042_s21 = smov [#allocation10]  }
  0x31   :  { %s68_s22 = sshll.u32 %s5042_s21, 4  ;;  %s69_s22 = int_to_ptr.vmem [resolvable:$true] %s68_s22 }
  0x32   :  { %s4992_s0 = scalar_lea.vmem %s69_s22, 2048  ;;  %p4997_p7 = scmp.lt.s32.totalorder %s69_s22, %s69_s22 }
  0x33   :  { %p4993_p6 = scmp.ne.s32.totalorder %s69_s22, %s4992_s0  ;;  %p4998_p8 = scmp.lt.s32.totalorder %s4992_s0, %s4992_s0 }
  0x35   :  { %p4999_p9 = por %p4998_p8, %p4997_p7 }
  0x37   :  { %p5000_p10 = pnand %p4999_p9, %p4993_p6 }
  0x39   :  { %5003 = shalt.err (!%p5000_p10)
}
  0x3a   :  { %74 = dma.hbm_to_vmem [thread:$0]  %s5699_s4, 2048, %s69_s22, [#allocation9], %s5037_s1, %s5037_s1, %s5038_s12  }
  0x3b   :  { %5024 = dma.done.wait [#allocation3], 512  }
  0x3c   :  { %5025 = vsyncadd [#allocation3], 4294966784 }
  0x3d   :  { %5026 = dma.done.wait [#allocation6], 40960  }
  0x3e   :  { %5027 = vsyncadd [#allocation6], 4294926336 }
  0x3f   :  { %5028 = dma.done.wait [#allocation9], 2560  }
  0x40   :  { %5029 = vsyncadd [#allocation9], 4294964736  ;;  %v5043_v0 = vmov 0   ;;  %v4396_v1 = vld [vmem:[#allocation5 + $0xe4] ss:$16 sps:$4 sm:$0xff]   ;;  %v5107_v33 = vld [vmem:[#allocation2 + $0x8] sm:$0xff]  }
  0x41   :  { %353 = vmatprep.mubr.bf16.mxu0 %v5043_v0  ;;  %426 = vmatprep.mubr.bf16.mxu1 %v5043_v0  ;;  %v4398_v2 = vld [vmem:[#allocation5 + $0xe0] ss:$16 sps:$4 sm:$0xff]   ;;  %v4399_v3 = vld [vmem:[#allocation5 + $0xc4] ss:$16 sps:$4 sm:$0xff]   ;;  %v4439_v14 = vld [vmem:[#allocation5 + $0xec] ss:$16 sps:$4 sm:$0xff]  }
  0x42   :  { %321 = vmatprep.subr.bf16.mxu0 %v4396_v1  ;;  %v4401_v4 = vld [vmem:[#allocation5 + $0xc0] ss:$16 sps:$4 sm:$0xff]   ;;  %v4402_v5 = vld [vmem:[#allocation5 + $0xa4] ss:$16 sps:$4 sm:$0xff]   ;;  %v4441_v15 = vld [vmem:[#allocation5 + $0xe8] ss:$16 sps:$4 sm:$0xff]   ;;  %394 = vmatprep.subr.bf16.mxu1 %v4439_v14 }
  0x43   :  { %322 = vmatpush1.bf16.msra.mxu0 %v4398_v2  ;;  %v4404_v6 = vld [vmem:[#allocation5 + $0xa0] ss:$16 sps:$4 sm:$0xff]   ;;  %v4405_v7 = vld [vmem:[#allocation5 + $0x84] ss:$16 sps:$4 sm:$0xff]   ;;  %v4445_v18 = vld [vmem:[#allocation5 + $0xcc] ss:$16 sps:$4 sm:$0xff]   ;;  %395 = vmatpush1.bf16.msra.mxu1 %v4441_v15 }
  0x44   :  { %323 = vmatprep.subr.bf16.mxu0 %v4399_v3  ;;  %v4407_v8 = vld [vmem:[#allocation5 + $0x80] ss:$16 sps:$4 sm:$0xff]   ;;  %v4408_v9 = vld [vmem:[#allocation5 + $0x64] ss:$16 sps:$4 sm:$0xff]   ;;  %v4447_v19 = vld [vmem:[#allocation5 + $0xc8] ss:$16 sps:$4 sm:$0xff]   ;;  %396 = vmatprep.subr.bf16.mxu1 %v4445_v18 }
  0x45   :  { %v4410_v10 = vld [vmem:[#allocation5 + $0x60] ss:$16 sps:$4 sm:$0xff]   ;;  %v4411_v11 = vld [vmem:[#allocation5 + $0x44] ss:$16 sps:$4 sm:$0xff]   ;;  %v4451_v21 = vld [vmem:[#allocation5 + $0xac] ss:$16 sps:$4 sm:$0xff]  }
  0x46   :  { %v4413_v12 = vld [vmem:[#allocation5 + $0x40] ss:$16 sps:$4 sm:$0xff]   ;;  %v4414_v13 = vld [vmem:[#allocation5 + $0x24] ss:$16 sps:$4 sm:$0xff]   ;;  %v4453_v23 = vld [vmem:[#allocation5 + $0xa8] ss:$16 sps:$4 sm:$0xff]  }
  0x47   :  { %324 = vmatpush1.bf16.msra.mxu0 %v4401_v4  ;;  %v4416_v16 = vld [vmem:[#allocation5 + $0x20] ss:$16 sps:$4 sm:$0xff]   ;;  %v4417_v17 = vld [vmem:[#allocation5 + $0x4] ss:$16 sps:$4 sm:$0xff]   ;;  %397 = vmatpush1.bf16.msra.mxu1 %v4447_v19  ;;  %v4457_v25 = vld [vmem:[#allocation5 + $0x8c] ss:$16 sps:$4 sm:$0xff]  }
  0x48   :  { %325 = vmatprep.subr.bf16.mxu0 %v4402_v5  ;;  %v4419_v20 = vld [vmem:[#allocation5] ss:$16 sps:$4 sm:$0xff]   ;;  %v4426_v22 = vld [vmem:[#allocation7 + $0x74] ss:$8 sps:$4 sm:$0xff]   ;;  %398 = vmatprep.subr.bf16.mxu1 %v4451_v21  ;;  %v4429_v27 = vld [vmem:[#allocation7 + $0x64] ss:$8 sps:$4 sm:$0xff]  }
  0x49   :  { %v5103_v24 = vld [vmem:[#allocation2] sm:$0xff]   ;;  %v4424_v26 = vld [vmem:[#allocation7 + $0x70] ss:$8 sps:$4 sm:$0xff]   ;;  %v4463_v29 = vld [vmem:[#allocation5 + $0x6c] ss:$16 sps:$4 sm:$0xff]  }
  0x4a   :  { %v4459_v28 = vld [vmem:[#allocation5 + $0x88] ss:$16 sps:$4 sm:$0xff]   ;;  %v4432_v31 = vld [vmem:[#allocation7 + $0x54] ss:$8 sps:$4 sm:$0xff]   ;;  %v4435_v36 = vld [vmem:[#allocation7 + $0x44] ss:$8 sps:$4 sm:$0xff]  }
  0x4b   :  { %326 = vmatpush1.bf16.msra.mxu0 %v4404_v6  ;;  %399 = vmatpush1.bf16.msra.mxu1 %v4453_v23  ;;  %v4427_v30 = vld [vmem:[#allocation7 + $0x60] ss:$8 sps:$4 sm:$0xff]   ;;  %v4469_v34 = vld [vmem:[#allocation5 + $0x4c] ss:$16 sps:$4 sm:$0xff]   ;;  %v4430_v35 = vld [vmem:[#allocation7 + $0x50] ss:$8 sps:$4 sm:$0xff]  }
  0x4c   :  { %327 = vmatprep.subr.bf16.mxu0 %v4405_v7  ;;  %400 = vmatprep.subr.bf16.mxu1 %v4457_v25  ;;  %v4465_v32 = vld [vmem:[#allocation5 + $0x68] ss:$16 sps:$4 sm:$0xff]   ;;  %v4438_v39 = vld [vmem:[#allocation7 + $0x34] ss:$8 sps:$4 sm:$0xff]   ;;  %v4444_v45 = vld [vmem:[#allocation7 + $0x24] ss:$8 sps:$4 sm:$0xff]  }
  0x4d   :  { %v4471_v37 = vld [vmem:[#allocation5 + $0x48] ss:$16 sps:$4 sm:$0xff]   ;;  %v4475_v40 = vld [vmem:[#allocation5 + $0x2c] ss:$16 sps:$4 sm:$0xff]   ;;  %v5111_v42 = vld [vmem:[#allocation2 + $0x10] sm:$0xff]  }
  0x4e   :  { %v4433_v38 = vld [vmem:[#allocation7 + $0x40] ss:$8 sps:$4 sm:$0xff]   ;;  %v4481_v43 = vld [vmem:[#allocation5 + $0xc] ss:$16 sps:$4 sm:$0xff]   ;;  %v4436_v44 = vld [vmem:[#allocation7 + $0x30] ss:$8 sps:$4 sm:$0xff]  }
  0x4f   :  { %328 = vmatpush1.bf16.msra.mxu0 %v4407_v8  ;;  %401 = vmatpush1.bf16.msra.mxu1 %v4459_v28  ;;  %v4477_v41 = vld [vmem:[#allocation5 + $0x28] ss:$16 sps:$4 sm:$0xff]   ;;  %v4450_v48 = vld [vmem:[#allocation7 + $0x14] ss:$8 sps:$4 sm:$0xff]   ;;  %v4456_v51 = vld [vmem:[#allocation7 + $0x4] ss:$8 sps:$4 sm:$0xff]  }
  0x50   :  { %329 = vmatprep.subr.bf16.mxu0 %v4408_v9  ;;  %402 = vmatprep.subr.bf16.mxu1 %v4463_v29  ;;  %v4483_v46 = vld [vmem:[#allocation5 + $0x8] ss:$16 sps:$4 sm:$0xff]   ;;  %v4462_v53 = vld [vmem:[#allocation7 + $0xf4] ss:$8 sps:$4 sm:$0xff]   ;;  %v4468_v55 = vld [vmem:[#allocation7 + $0xe4] ss:$8 sps:$4 sm:$0xff]  }
  0x51   :  { %v4442_v47 = vld [vmem:[#allocation7 + $0x20] ss:$8 sps:$4 sm:$0xff]   ;;  %v5115_v49 = vld [vmem:[#allocation2 + $0x18] sm:$0xff]   ;;  %v4480_v59 = vld [vmem:[#allocation7 + $0xc4] ss:$8 sps:$4 sm:$0xff]  }
  0x52   :  { %v4448_v50 = vld [vmem:[#allocation7 + $0x10] ss:$8 sps:$4 sm:$0xff]   ;;  %v4454_v52 = vld [vmem:[#allocation7] ss:$8 sps:$4 sm:$0xff]   ;;  %v4474_v57 = vld [vmem:[#allocation7 + $0xd4] ss:$8 sps:$4 sm:$0xff]  }
  0x53   :  { %330 = vmatpush1.bf16.msra.mxu0 %v4410_v10  ;;  %403 = vmatpush1.bf16.msra.mxu1 %v4465_v32  ;;  %v4460_v54 = vld [vmem:[#allocation7 + $0xf0] ss:$8 sps:$4 sm:$0xff]   ;;  %v4466_v56 = vld [vmem:[#allocation7 + $0xe0] ss:$8 sps:$4 sm:$0xff]   ;;  %v4486_v61 = vld [vmem:[#allocation7 + $0xb4] ss:$8 sps:$4 sm:$0xff]  }
  0x54   :  { %331 = vmatprep.subr.bf16.mxu0 %v4411_v11  ;;  %404 = vmatprep.subr.bf16.mxu1 %v4469_v34  ;;  %v4472_v58 = vld [vmem:[#allocation7 + $0xd0] ss:$8 sps:$4 sm:$0xff]   ;;  %v4478_v60 = vld [vmem:[#allocation7 + $0xc0] ss:$8 sps:$4 sm:$0xff]   ;;  %v4489_v63 = vld [vmem:[#allocation7 + $0xa4] ss:$8 sps:$4 sm:$0xff]  }
  0x55   :  { %v4484_v62 = vld [vmem:[#allocation7 + $0xb0] ss:$8 sps:$4 sm:$0xff]   ;;  %v4487_v1 = vld [vmem:[#allocation7 + $0xa0] ss:$8 sps:$4 sm:$0xff]   ;;  %v4492_v2 = vld [vmem:[#allocation7 + $0x94] ss:$8 sps:$4 sm:$0xff]  }
  0x56   :  { %v4490_v3 = vld [vmem:[#allocation7 + $0x90] ss:$8 sps:$4 sm:$0xff]   ;;  %v4495_v4 = vld [vmem:[#allocation7 + $0x84] ss:$8 sps:$4 sm:$0xff]   ;;  %v4493_v5 = vld [vmem:[#allocation7 + $0x80] ss:$8 sps:$4 sm:$0xff]  }
  0x57   :  { %332 = vmatpush1.bf16.msra.mxu0 %v4413_v12  ;;  %405 = vmatpush1.bf16.msra.mxu1 %v4471_v37  ;;  %v4496_v6 = vld [vmem:[#allocation5 + $0x1e0] ss:$16 sps:$4 sm:$0xff]   ;;  %v4498_v7 = vld [vmem:[#allocation5 + $0x1e4] ss:$16 sps:$4 sm:$0xff]   ;;  %v4522_v23 = vld [vmem:[#allocation5 + $0x1ec] ss:$16 sps:$4 sm:$0xff]  }
  0x58   :  { %333 = vmatprep.subr.bf16.mxu0 %v4414_v13  ;;  %406 = vmatprep.subr.bf16.mxu1 %v4475_v40  ;;  %v4501_v8 = vld [vmem:[#allocation5 + $0x1c4] ss:$16 sps:$4 sm:$0xff]   ;;  %v4499_v9 = vld [vmem:[#allocation5 + $0x1c0] ss:$16 sps:$4 sm:$0xff]   ;;  %v4520_v25 = vld [vmem:[#allocation5 + $0x1e8] ss:$16 sps:$4 sm:$0xff]  }
  0x59   :  { %v4504_v10 = vld [vmem:[#allocation5 + $0x1a4] ss:$16 sps:$4 sm:$0xff]   ;;  %v4502_v11 = vld [vmem:[#allocation5 + $0x1a0] ss:$16 sps:$4 sm:$0xff]   ;;  %v4528_v28 = vld [vmem:[#allocation5 + $0x1ac] ss:$16 sps:$4 sm:$0xff]  }
  0x5a   :  { %v4507_v12 = vld [vmem:[#allocation5 + $0x184] ss:$16 sps:$4 sm:$0xff]   ;;  %v4505_v13 = vld [vmem:[#allocation5 + $0x180] ss:$16 sps:$4 sm:$0xff]   ;;  %v4526_v29 = vld [vmem:[#allocation5 + $0x1a8] ss:$16 sps:$4 sm:$0xff]  }
  0x5b   :  { %334 = vmatpush1.bf16.msra.mxu0 %v4416_v16  ;;  %407 = vmatpush1.bf16.msra.mxu1 %v4477_v41  ;;  %v4546_v14 = vld [vmem:[#allocation7 + $0x374] ss:$8 sps:$4 sm:$0xff]   ;;  %v4508_v16 = vld [vmem:[#allocation5 + $0x160] ss:$16 sps:$4 sm:$0xff]   ;;  %v4532_v34 = vld [vmem:[#allocation5 + $0x168] ss:$16 sps:$4 sm:$0xff]  }
  0x5c   :  { %335 = vmatprep.subr.bf16.mxu0 %v4417_v17  ;;  %408 = vmatprep.subr.bf16.mxu1 %v4481_v43  ;;  %v4510_v15 = vld [vmem:[#allocation5 + $0x164] ss:$16 sps:$4 sm:$0xff]   ;;  %v4511_v18 = vld [vmem:[#allocation5 + $0x140] ss:$16 sps:$4 sm:$0xff]   ;;  %v4534_v32 = vld [vmem:[#allocation5 + $0x16c] ss:$16 sps:$4 sm:$0xff]  }
  0x5d   :  { %v4513_v17 = vld [vmem:[#allocation5 + $0x144] ss:$16 sps:$4 sm:$0xff]   ;;  %v4540_v37 = vld [vmem:[#allocation5 + $0x12c] ss:$16 sps:$4 sm:$0xff]   ;;  %v4541_v40 = vld [vmem:[#allocation5 + $0x108] ss:$16 sps:$4 sm:$0xff]  }
  0x5e   :  { %v4516_v19 = vld [vmem:[#allocation5 + $0x124] ss:$16 sps:$4 sm:$0xff]   ;;  %v4547_v43 = vld [vmem:[#allocation7 + $0x170] ss:$8 sps:$4 sm:$0xff]  }
  0x5f   :  { %336 = vmatpush1.bf16.msra.mxu0 %v4419_v20  ;;  %409 = vmatpush1.bf16.msra.mxu1 %v4483_v46  ;;  %v4514_v20 = vld [vmem:[#allocation5 + $0x120] ss:$16 sps:$4 sm:$0xff]   ;;  %v4519_v21 = vld [vmem:[#allocation5 + $0x104] ss:$16 sps:$4 sm:$0xff]  }
  0x60   :  { %811 = vmatprep.subr.bf16.mxu0 %v4426_v22  ;;  %1173 = vmatprep.subr.bf16.mxu1 %v4498_v7  ;;  %v4517_v22 = vld [vmem:[#allocation5 + $0x100] ss:$16 sps:$4 sm:$0xff]   ;;  %v4549_v41 = vld [vmem:[#allocation7 + $0x174] ss:$8 sps:$4 sm:$0xff]  }
  0x61   :  { %v4561_v46 = vld [vmem:[#allocation7 + $0x154] ss:$8 sps:$4 sm:$0xff]  }
  0x62   :  { %354 = vmatmul.mubr.bf16.vlgmr.msra.gmra.mxu0 %v5103_v24  ;;  %427 = vmatmul.mubr.bf16.vlgmr.msra.gmra.mxu1 %v5103_v24 }
  0x63   :  { %363 = vmatprep.mubr.bf16.mxu0 %v5043_v0  ;;  %812 = vmatpush1.bf16.msra.mxu0 %v4424_v26  ;;  %v4525_v26 = vld [vmem:[#allocation5 + $0x1cc] ss:$16 sps:$4 sm:$0xff]  }
  0x64   :  { %813 = vmatprep.subr.bf16.mxu0 %v4429_v27  ;;  %436 = vmatprep.mubr.bf16.mxu1 %v5043_v0  ;;  %v4523_v27 = vld [vmem:[#allocation5 + $0x1c8] ss:$16 sps:$4 sm:$0xff]  }
  0x65   :  { %1174 = vmatpush1.bf16.msra.mxu1 %v4496_v6 }
  0x66   :  { %1175 = vmatprep.subr.bf16.mxu1 %v4501_v8  ;;  %v4595_v8 = vld [vmem:[#allocation7 + $0x1f0] ss:$8 sps:$4 sm:$0xff]  }
  0x67   :  { %814 = vmatpush1.bf16.msra.mxu0 %v4427_v30  ;;  %v4531_v30 = vld [vmem:[#allocation5 + $0x18c] ss:$16 sps:$4 sm:$0xff]  }
  0x68   :  { %815 = vmatprep.subr.bf16.mxu0 %v4432_v31  ;;  %v4529_v31 = vld [vmem:[#allocation5 + $0x188] ss:$16 sps:$4 sm:$0xff]  }
  0x69   :  { %1176 = vmatpush1.bf16.msra.mxu1 %v4499_v9  ;;  %v4603_v9 = vld [vmem:[#allocation7 + $0x1e4] ss:$8 sps:$4 sm:$0xff]  }
  0x6a   :  { %364 = vmatmul.mubr.bf16.gmra.mxu0 %v5107_v33  ;;  %437 = vmatmul.mubr.bf16.gmra.mxu1 %v5107_v33 }
  0x6b   :  { %373 = vmatprep.mubr.bf16.mxu0 %v5043_v0  ;;  %816 = vmatpush1.bf16.msra.mxu0 %v4430_v35  ;;  %v4537_v35 = vld [vmem:[#allocation5 + $0x14c] ss:$16 sps:$4 sm:$0xff]  }
  0x6c   :  { %817 = vmatprep.subr.bf16.mxu0 %v4435_v36  ;;  %446 = vmatprep.mubr.bf16.mxu1 %v5043_v0  ;;  %v4535_v36 = vld [vmem:[#allocation5 + $0x148] ss:$16 sps:$4 sm:$0xff]  }
  0x6d   :  { %1177 = vmatprep.subr.bf16.mxu1 %v4504_v10 }
  0x6e   :  { %1178 = vmatpush1.bf16.msra.mxu1 %v4502_v11 }
  0x6f   :  { %818 = vmatpush1.bf16.msra.mxu0 %v4433_v38  ;;  %1179 = vmatprep.subr.bf16.mxu1 %v4507_v12  ;;  %v4538_v38 = vld [vmem:[#allocation5 + $0x128] ss:$16 sps:$4 sm:$0xff]  }
  0x70   :  { %819 = vmatprep.subr.bf16.mxu0 %v4438_v39  ;;  %v4543_v39 = vld [vmem:[#allocation5 + $0x10c] ss:$16 sps:$4 sm:$0xff]  }
  0x72   :  { %374 = vmatmul.mubr.bf16.gmra.mxu0 %v5111_v42  ;;  %447 = vmatmul.mubr.bf16.gmra.mxu1 %v5111_v42 }
  0x73   :  { %383 = vmatprep.mubr.bf16.mxu0 %v5043_v0  ;;  %820 = vmatpush1.bf16.msra.mxu0 %v4436_v44  ;;  %v4555_v44 = vld [vmem:[#allocation7 + $0x164] ss:$8 sps:$4 sm:$0xff]  }
  0x74   :  { %821 = vmatprep.subr.bf16.mxu0 %v4444_v45  ;;  %456 = vmatprep.mubr.bf16.mxu1 %v5043_v0  ;;  %v4553_v45 = vld [vmem:[#allocation7 + $0x160] ss:$8 sps:$4 sm:$0xff]  }
  0x75   :  { %1180 = vmatpush1.bf16.msra.mxu1 %v4505_v13 }
  0x76   :  { %1181 = vmatprep.subr.bf16.mxu1 %v4510_v15 }
  0x77   :  { %822 = vmatpush1.bf16.msra.mxu0 %v4442_v47  ;;  %v4559_v47 = vld [vmem:[#allocation7 + $0x150] ss:$8 sps:$4 sm:$0xff]  }
  0x78   :  { %823 = vmatprep.subr.bf16.mxu0 %v4450_v48  ;;  %v4567_v48 = vld [vmem:[#allocation7 + $0x144] ss:$8 sps:$4 sm:$0xff]  }
  0x79   :  { %1182 = vmatpush1.bf16.msra.mxu1 %v4508_v16 }
  0x7a   :  { %384 = vmatmul.mubr.bf16.gmra.mxu0 %v5115_v49  ;;  %457 = vmatmul.mubr.bf16.gmra.mxu1 %v5115_v49 }
  0x7b   :  { %824 = vmatpush1.bf16.msra.mxu0 %v4448_v50  ;;  %1205 = vmatprep.mubr.bf16.mxu1 %v5043_v0  ;;  %v4565_v50 = vld [vmem:[#allocation7 + $0x140] ss:$8 sps:$4 sm:$0xff]  }
  0x7c   :  { %825 = vmatprep.subr.bf16.mxu0 %v4456_v51  ;;  %1183 = vmatprep.subr.bf16.mxu1 %v4513_v17  ;;  %v4573_v51 = vld [vmem:[#allocation7 + $0x134] ss:$8 sps:$4 sm:$0xff]   ;;  %v4601_v17 = vld [vmem:[#allocation7 + $0x1e0] ss:$8 sps:$4 sm:$0xff]  }
  0x7d   :  { %1184 = vmatpush1.bf16.msra.mxu1 %v4511_v18 }
  0x7e   :  { %1185 = vmatprep.subr.bf16.mxu1 %v4516_v19 }
  0x7f   :  { %826 = vmatpush1.bf16.msra.mxu0 %v4454_v52  ;;  %v467_v52 = vlaneseq }
  0x80   :  { %827 = vmatprep.subr.bf16.mxu0 %v4462_v53  ;;  %v4579_v53 = vld [vmem:[#allocation7 + $0x124] ss:$8 sps:$4 sm:$0xff]  }
  0x81   :  { %1186 = vmatpush1.bf16.msra.mxu1 %v4514_v20 }
  0x82   :  { %1187 = vmatprep.subr.bf16.mxu1 %v4519_v21  ;;  %v4609_v21 = vld [vmem:[#allocation7 + $0x1d4] ss:$8 sps:$4 sm:$0xff]  }
  0x83   :  { %828 = vmatpush2.bf16.msra.mxu0 %v4460_v54  ;;  %v5138_v54 = vshrl.u32 %v467_v52, 7 }
  0x84   :  { %829 = vmatprep.subr.bf16.mxu0 %v4468_v55  ;;  %v4577_v55 = vld [vmem:[#allocation7 + $0x120] ss:$8 sps:$4 sm:$0xff]  }
  0x85   :  { %1188 = vmatpush1.bf16.msra.mxu1 %v4517_v22 }
  0x86   :  { %1246 = vmatprep.subr.bf16.mxu1 %v4522_v23 }
  0x87   :  { %830 = vmatpush2.bf16.msra.mxu0 %v4466_v56  ;;  %v541_v56 = vsub.s32 0, %v5138_v54 }
  0x88   :  { %831 = vmatprep.subr.bf16.mxu0 %v4474_v57  ;;  %1206 = vmatmul.mubr.bf16.vlgmr.msra.gmra.mxu1 %v5103_v24  ;;  %v5143_v57 = vld [vmem:[#allocation8 + $0x8] sm:$0xff] }
  0x89   :  { %1247 = vmatpush1.bf16.msra.mxu1 %v4520_v25  ;;  %1215 = vmatprep.mubr.bf16.mxu1 %v5043_v0 }
  0x8a   :  { %1248 = vmatprep.subr.bf16.mxu1 %v4525_v26 }
  0x8b   :  { %832 = vmatpush2.bf16.msra.mxu0 %v4472_v58  ;;  %v5145_v58 = vld [vmem:[#allocation8] sm:$0xff] }
  0x8c   :  { %833 = vmatprep.subr.bf16.mxu0 %v4480_v59  ;;  %v4583_v59 = vld [vmem:[#allocation7 + $0x110] ss:$8 sps:$4 sm:$0xff]  }
  0x8d   :  { %1249 = vmatpush1.bf16.msra.mxu1 %v4523_v27  ;;  %v4544_v27 = vld [vmem:[#allocation7 + $0x370] ss:$8 sps:$4 sm:$0xff]  }
  0x8e   :  { %1250 = vmatprep.subr.bf16.mxu1 %v4528_v28 }
  0x8f   :  { %834 = vmatpush2.bf16.msra.mxu0 %v4478_v60  ;;  %v5148_v60 = vrot.slane %v5143_v57, %v541_v56 }
  0x90   :  { %835 = vmatprep.subr.bf16.mxu0 %v4486_v61  ;;  %1216 = vmatmul.mubr.bf16.gmra.mxu1 %v5107_v33  ;;  %v4591_v61 = vld [vmem:[#allocation7 + $0x104] ss:$8 sps:$4 sm:$0xff]  }
  0x91   :  { %1251 = vmatpush1.bf16.msra.mxu1 %v4526_v29  ;;  %1225 = vmatprep.mubr.bf16.mxu1 %v5043_v0 }
  0x92   :  { %1252 = vmatprep.subr.bf16.mxu1 %v4531_v30  ;;  %v4552_v30 = vld [vmem:[#allocation7 + $0x364] ss:$8 sps:$4 sm:$0xff]  }
  0x93   :  { %836 = vmatpush2.bf16.msra.mxu0 %v4484_v62  ;;  %v5151_v62 = vrot.slane %v5145_v58, %v541_v56 }
  0x94   :  { %837 = vmatprep.subr.bf16.mxu0 %v4489_v63 }
  0x95   :  { %1253 = vmatpush1.bf16.msra.mxu1 %v4529_v31 }
  0x96   :  { %1254 = vmatprep.subr.bf16.mxu1 %v4534_v32  ;;  %v4607_v32 = vld [vmem:[#allocation7 + $0x1d0] ss:$8 sps:$4 sm:$0xff]  }
  0x97   :  { %838 = vmatpush2.bf16.msra.mxu0 %v4487_v1  ;;  %v4589_v1 = vld [vmem:[#allocation7 + $0x100] ss:$8 sps:$4 sm:$0xff]  }
  0x98   :  { %839 = vmatprep.subr.bf16.mxu0 %v4492_v2  ;;  %1226 = vmatmul.mubr.bf16.gmra.mxu1 %v5111_v42 }
  0x99   :  { %1255 = vmatpush1.bf16.msra.mxu1 %v4532_v34  ;;  %1235 = vmatprep.mubr.bf16.mxu1 %v5043_v0  ;;  %v4615_v34 = vld [vmem:[#allocation7 + $0x1c4] ss:$8 sps:$4 sm:$0xff]  }
  0x9a   :  { %1256 = vmatprep.subr.bf16.mxu1 %v4537_v35 }
  0x9b   :  { %840 = vmatpush2.bf16.msra.mxu0 %v4490_v3  ;;  %v4597_v3 = vld [vmem:[#allocation7 + $0x1f4] ss:$8 sps:$4 sm:$0xff]  }
  0x9c   :  { %841 = vmatprep.subr.bf16.mxu0 %v4495_v4 }
  0x9d   :  { %1257 = vmatpush1.bf16.msra.mxu1 %v4535_v36 }
  0x9e   :  { %1258 = vmatprep.subr.bf16.mxu1 %v4540_v37 }
  0x9f   :  { %842 = vmatpush2.bf16.msra.mxu0 %v4493_v5 }
  0xa0   :  { %1512 = vmatprep.subr.bf16.mxu0 %v4546_v14  ;;  %1236 = vmatmul.mubr.bf16.gmra.mxu1 %v5115_v49 }
  0xa1   :  { %1259 = vmatpush1.bf16.msra.mxu1 %v4538_v38  ;;  %1278 = vmatprep.mubr.bf16.mxu1 %v5043_v0 }
  0xa2   :  { %1260 = vmatprep.subr.bf16.mxu1 %v4543_v39 }
  0xa5   :  { %1261 = vmatpush1.bf16.msra.mxu1 %v4541_v40  ;;  %v4550_v40 = vld [vmem:[#allocation7 + $0x360] ss:$8 sps:$4 sm:$0xff]  }
  0xa6   :  { %1850 = vmatprep.subr.bf16.mxu1 %v4549_v41 }
  0xa8   :  { %1279 = vmatmul.mubr.bf16.vlgmr.msra.gmra.mxu1 %v5103_v24  ;;  %v4571_v24 = vld [vmem:[#allocation7 + $0x130] ss:$8 sps:$4 sm:$0xff]  }
  0xa9   :  { %1851 = vmatpush1.bf16.msra.mxu1 %v4547_v43  ;;  %1288 = vmatprep.mubr.bf16.mxu1 %v5043_v0  ;;  %v4558_v43 = vld [vmem:[#allocation7 + $0x354] ss:$8 sps:$4 sm:$0xff]  }
  0xaa   :  { %1852 = vmatprep.subr.bf16.mxu1 %v4555_v44 }
  0xad   :  { %1853 = vmatpush1.bf16.msra.mxu1 %v4553_v45 }
  0xae   :  { %1854 = vmatprep.subr.bf16.mxu1 %v4561_v46  ;;  %v4613_v46 = vld [vmem:[#allocation7 + $0x1c0] ss:$8 sps:$4 sm:$0xff]  }
  0xb0   :  { %1289 = vmatmul.mubr.bf16.gmra.mxu1 %v5107_v33  ;;  %v4585_v33 = vld [vmem:[#allocation7 + $0x114] ss:$8 sps:$4 sm:$0xff]  }
  0xb1   :  { %1855 = vmatpush1.bf16.msra.mxu1 %v4559_v47  ;;  %1298 = vmatprep.mubr.bf16.mxu1 %v5043_v0 }
  0xb2   :  { %1856 = vmatprep.subr.bf16.mxu1 %v4567_v48 }
  0xb5   :  { %1857 = vmatpush1.bf16.msra.mxu1 %v4565_v50 }
  0xb6   :  { %1858 = vmatprep.subr.bf16.mxu1 %v4573_v51 }
  0xb8   :  { %1299 = vmatmul.mubr.bf16.gmra.mxu1 %v5111_v42 }
  0xb9   :  { %1859 = vmatpush1.bf16.msra.mxu1 %v4571_v24  ;;  %1308 = vmatprep.mubr.bf16.mxu1 %v5043_v0 }
  0xba   :  { %1860 = vmatprep.subr.bf16.mxu1 %v4579_v53 }
  0xbd   :  { %1861 = vmatpush1.bf16.msra.mxu1 %v4577_v55  ;;  %v4556_v55 = vld [vmem:[#allocation7 + $0x350] ss:$8 sps:$4 sm:$0xff]  }
  0xbe   :  { %1862 = vmatprep.subr.bf16.mxu1 %v4585_v33 }
  0xc0   :  { %1309 = vmatmul.mubr.bf16.gmra.mxu1 %v5115_v49 }
  0xc1   :  { %1863 = vmatpush1.bf16.msra.mxu1 %v4583_v59  ;;  %v4564_v59 = vld [vmem:[#allocation7 + $0x344] ss:$8 sps:$4 sm:$0xff]  }
  0xc2   :  { %1864 = vmatprep.subr.bf16.mxu1 %v4591_v61 }
  0xc5   :  { %1865 = vmatpush1.bf16.msra.mxu1 %v4589_v1 }
  0xc6   :  { %1866 = vmatprep.subr.bf16.mxu1 %v4597_v3 }
  0xc9   :  { %1867 = vmatpush2.bf16.msra.mxu1 %v4595_v8 }
  0xca   :  { %1868 = vmatprep.subr.bf16.mxu1 %v4603_v9 }
  0xcd   :  { %1869 = vmatpush2.bf16.msra.mxu1 %v4601_v17 }
  0xce   :  { %1870 = vmatprep.subr.bf16.mxu1 %v4609_v21 }
  0xd1   :  { %1871 = vmatpush2.bf16.msra.mxu1 %v4607_v32  ;;  %v4580_v32 = vld [vmem:[#allocation7 + $0x310] ss:$8 sps:$4 sm:$0xff]  }
  0xd2   :  { %1872 = vmatprep.subr.bf16.mxu1 %v4615_v34 }
  0xd5   :  { %1873 = vmatpush2.bf16.msra.mxu1 %v4613_v46  ;;  %v4621_v46 = vld [vmem:[#allocation7 + $0x1b4] ss:$8 sps:$4 sm:$0xff]  }
  0xd6   :  { %1874 = vmatprep.subr.bf16.mxu1 %v4621_v46 }
 0x122   :  { %v355_v42 = vpop.f32.mrf.mxu0 }
 0x123   :  { %v547_v4 = vadd.f32 %v5151_v62, %v355_v42 }
 0x124   :  { %v357_v63 = vpop.f32.mrf.mxu0 }
 0x125   :  { %v548_v2 = vadd.f32 %v5148_v60, %v357_v63  ;;  %v579_v12 = vmul.f32 0.2, %v547_v4  ;;  %vm563_vm2 = vcmp.ge.f32.partialorder %v547_v4, 0.0 }
 0x126   :  { %v359_v5 = vpop.f32.mrf.mxu0 }
 0x127   :  { %v549_v6 = vadd.f32 %v5151_v62, %v359_v5  ;;  %v580_v10 = vmul.f32 0.2, %v548_v2  ;;  %vm564_vm1 = vcmp.ge.f32.partialorder %v548_v2, 0.0  ;;  %v595_v22 = vsel %vm563_vm2, %v547_v4, %v579_v12  ;;  %v4562_v4 = vld [vmem:[#allocation7 + $0x340] ss:$8 sps:$4 sm:$0xff]  }
 0x128   :  { %v361_v7 = vpop.f32.mrf.mxu0 }
 0x129   :  { %vm565_vm0 = vcmp.ge.f32.partialorder %v549_v6, 0.0  ;;  %v581_v11 = vmul.f32 0.2, %v549_v6  ;;  %v550_v49 = vadd.f32 %v5148_v60, %v361_v7  ;;  %v596_v19 = vsel %vm564_vm1, %v548_v2, %v580_v10 }
 0x12a   :  { %v365_v13 = vpop.f32.mrf.mxu0 }
 0x12b   :  { %vm566_vm3 = vcmp.ge.f32.partialorder %v550_v49, 0.0  ;;  %v582_v14 = vmul.f32 0.2, %v550_v49  ;;  %v597_v15 = vsel %vm565_vm0, %v549_v6, %v581_v11  ;;  %v551_v23 = vadd.f32 %v5151_v62, %v365_v13  ;;  %v4570_v6 = vld [vmem:[#allocation7 + $0x334] ss:$8 sps:$4 sm:$0xff]  }
 0x12c   :  { %v367_v16 = vpop.f32.mrf.mxu0  ;;  %v611_v28 = vpack.c.bf16 %v597_v15, %v595_v22  ;;  %v4568_v15 = vld [vmem:[#allocation7 + $0x330] ss:$8 sps:$4 sm:$0xff]  }
 0x12d   :  { %v552_v18 = vadd.f32 %v5148_v60, %v367_v16  ;;  %v598_v20 = vsel %vm566_vm3, %v550_v49, %v582_v14  ;;  %v583_v38 = vmul.f32 0.2, %v551_v23  ;;  %vm567_vm6 = vcmp.ge.f32.partialorder %v551_v23, 0.0 }
 0x12e   :  { %v369_v25 = vpop.f32.mrf.mxu0  ;;  %v612_v26 = vpack.c.bf16 %v598_v20, %v596_v19 }
 0x12f   :  { %v553_v29 = vadd.f32 %v5151_v62, %v369_v25  ;;  %v584_v35 = vmul.f32 0.2, %v552_v18  ;;  %vm568_vm5 = vcmp.ge.f32.partialorder %v552_v18, 0.0  ;;  %v599_v53 = vsel %vm567_vm6, %v551_v23, %v583_v38  ;;  %v4574_v25 = vld [vmem:[#allocation7 + $0x320] ss:$8 sps:$4 sm:$0xff]  }
 0x130   :  { %v371_v31 = vpop.f32.mrf.mxu0  ;;  %843 = vmatprep.mubr.bf16.mxu0 %v612_v26  ;;  %v4600_v38 = vld [vmem:[#allocation7 + $0x3e4] ss:$8 sps:$4 sm:$0xff]  }
 0x131   :  { %vm569_vm4 = vcmp.ge.f32.partialorder %v553_v29, 0.0  ;;  %v585_v36 = vmul.f32 0.2, %v553_v29  ;;  %v554_v37 = vadd.f32 %v5148_v60, %v371_v31  ;;  %844 = vmatmul.mubr.bf16.vlgmr.msra.gmra.mxu0 %v611_v28  ;;  %v600_v48 = vsel %vm568_vm5, %v552_v18, %v584_v35  ;;  %v4576_v18 = vld [vmem:[#allocation7 + $0x324] ss:$8 sps:$4 sm:$0xff]  }
 0x132   :  { %v375_v39 = vpop.f32.mrf.mxu0  ;;  %1513 = vmatpush1.bf16.msra.mxu0 %v4544_v27  ;;  %v4586_v35 = vld [vmem:[#allocation7 + $0x300] ss:$8 sps:$4 sm:$0xff]  }
 0x133   :  { %vm570_vm7 = vcmp.ge.f32.partialorder %v554_v37, 0.0  ;;  %v586_v41 = vmul.f32 0.2, %v554_v37  ;;  %1514 = vmatprep.subr.bf16.mxu0 %v4552_v30  ;;  %v601_v45 = vsel %vm569_vm4, %v553_v29, %v585_v36  ;;  %v555_v51 = vadd.f32 %v5151_v62, %v375_v39  ;;  %v4594_v36 = vld [vmem:[#allocation7 + $0x3f4] ss:$8 sps:$4 sm:$0xff]  }
 0x134   :  { %v377_v44 = vpop.f32.mrf.mxu0  ;;  %v613_v56 = vpack.c.bf16 %v601_v45, %v599_v53  ;;  %v4598_v39 = vld [vmem:[#allocation7 + $0x3e0] ss:$8 sps:$4 sm:$0xff]   ;;  %v4618_v45 = vld [vmem:[#allocation7 + $0x3b4] ss:$8 sps:$4 sm:$0xff]  }
 0x135   :  { %v556_v47 = vadd.f32 %v5148_v60, %v377_v44  ;;  %v602_v50 = vsel %vm570_vm7, %v554_v37, %v586_v41  ;;  %v587_v2 = vmul.f32 0.2, %v555_v51  ;;  %vm571_vm10 = vcmp.ge.f32.partialorder %v555_v51, 0.0  ;;  %v4592_v37 = vld [vmem:[#allocation7 + $0x3f0] ss:$8 sps:$4 sm:$0xff]  }
 0x136   :  { %v379_v52 = vpop.f32.mrf.mxu0  ;;  %v614_v24 = vpack.c.bf16 %v602_v50, %v600_v48  ;;  %1515 = vmatpush1.bf16.msra.mxu0 %v4550_v40  ;;  %v4606_v40 = vld [vmem:[#allocation7 + $0x3d4] ss:$8 sps:$4 sm:$0xff]   ;;  %v4604_v41 = vld [vmem:[#allocation7 + $0x3d0] ss:$8 sps:$4 sm:$0xff]   ;;  %v4610_v44 = vld [vmem:[#allocation7 + $0x3c0] ss:$8 sps:$4 sm:$0xff]  }
 0x137   :  { %v557_v33 = vadd.f32 %v5151_v62, %v379_v52  ;;  %1516 = vmatprep.subr.bf16.mxu0 %v4558_v43  ;;  %v588_v42 = vmul.f32 0.2, %v556_v47  ;;  %vm572_vm9 = vcmp.ge.f32.partialorder %v556_v47, 0.0  ;;  %v603_v14 = vsel %vm571_vm10, %v555_v51, %v587_v2  ;;  %v4612_v43 = vld [vmem:[#allocation7 + $0x3c4] ss:$8 sps:$4 sm:$0xff]   ;;  %v428_v2 = vpop.f32.mrf.mxu1 }
 0x138   :  { %v381_v61 = vpop.f32.mrf.mxu0  ;;  %853 = vmatprep.mubr.bf16.mxu0 %v614_v24  ;;  %v4619_v48 = vld [vmem:[#allocation7 + $0x1b0] ss:$8 sps:$4 sm:$0xff]   ;;  %v4624_v50 = vld [vmem:[#allocation7 + $0x3a4] ss:$8 sps:$4 sm:$0xff]   ;;  %v4622_v52 = vld [vmem:[#allocation7 + $0x3a0] ss:$8 sps:$4 sm:$0xff]  }
 0x139   :  { %vm573_vm8 = vcmp.ge.f32.partialorder %v557_v33, 0.0  ;;  %v589_v63 = vmul.f32 0.2, %v557_v33  ;;  %v558_v1 = vadd.f32 %v5148_v60, %v381_v61  ;;  %854 = vmatmul.mubr.bf16.gmra.mxu0 %v613_v56  ;;  %v604_v10 = vsel %vm572_vm9, %v556_v47, %v588_v42  ;;  %v4616_v47 = vld [vmem:[#allocation7 + $0x3b0] ss:$8 sps:$4 sm:$0xff]   ;;  %1875 = vmatpush2.bf16.msra.mxu1 %v4619_v48 }
 0x13a   :  { %v385_v3 = vpop.f32.mrf.mxu0  ;;  %1517 = vmatpush1.bf16.msra.mxu0 %v4556_v55  ;;  %v4627_v51 = vld [vmem:[#allocation7 + $0x1a4] ss:$8 sps:$4 sm:$0xff]   ;;  %v4625_v24 = vld [vmem:[#allocation7 + $0x1a0] ss:$8 sps:$4 sm:$0xff]   ;;  %v4630_v53 = vld [vmem:[#allocation7 + $0x394] ss:$8 sps:$4 sm:$0xff]  }
 0x13b   :  { %vm574_vm11 = vcmp.ge.f32.partialorder %v558_v1, 0.0  ;;  %v590_v5 = vmul.f32 0.2, %v558_v1  ;;  %1518 = vmatprep.subr.bf16.mxu0 %v4564_v59  ;;  %v605_v8 = vsel %vm573_vm8, %v557_v33, %v589_v63  ;;  %v559_v49 = vadd.f32 %v5151_v62, %v385_v3  ;;  %1876 = vmatprep.subr.bf16.mxu1 %v4627_v51  ;;  %v4633_v55 = vld [vmem:[#allocation7 + $0x194] ss:$8 sps:$4 sm:$0xff]   ;;  %v430_v3 = vpop.f32.mrf.mxu1 }
 0x13c   :  { %v387_v7 = vpop.f32.mrf.mxu0  ;;  %v615_v17 = vpack.c.bf16 %v605_v8, %v603_v14  ;;  %v4628_v33 = vld [vmem:[#allocation7 + $0x390] ss:$8 sps:$4 sm:$0xff]   ;;  %v4636_v59 = vld [vmem:[#allocation7 + $0x384] ss:$8 sps:$4 sm:$0xff]   ;;  %v4634_v42 = vld [vmem:[#allocation7 + $0x380] ss:$8 sps:$4 sm:$0xff]  }
 0x13d   :  { %v560_v9 = vadd.f32 %v5148_v60, %v387_v7  ;;  %v606_v11 = vsel %vm574_vm11, %v558_v1, %v590_v5  ;;  %v591_v23 = vmul.f32 0.2, %v559_v49  ;;  %vm575_vm14 = vcmp.ge.f32.partialorder %v559_v49, 0.0  ;;  %1877 = vmatpush2.bf16.msra.mxu1 %v4625_v24  ;;  %v4631_v56 = vld [vmem:[#allocation7 + $0x190] ss:$8 sps:$4 sm:$0xff]  }
 0x13e   :  { %v389_v12 = vpop.f32.mrf.mxu0  ;;  %v616_v13 = vpack.c.bf16 %v606_v11, %v604_v10  ;;  %1519 = vmatpush1.bf16.msra.mxu0 %v4562_v4  ;;  %1878 = vmatprep.subr.bf16.mxu1 %v4633_v55  ;;  %v4639_v61 = vld [vmem:[#allocation7 + $0x184] ss:$8 sps:$4 sm:$0xff]   ;;  %v4637_v63 = vld [vmem:[#allocation7 + $0x180] ss:$8 sps:$4 sm:$0xff]   ;;  %v4642_v1 = vld [vmem:[#allocation7 + $0x274] ss:$8 sps:$4 sm:$0xff]   ;;  %v432_v4 = vpop.f32.mrf.mxu1 }
 0x13f   :  { %v561_v16 = vadd.f32 %v5151_v62, %v389_v12  ;;  %1520 = vmatprep.subr.bf16.mxu0 %v4570_v6  ;;  %v592_v20 = vmul.f32 0.2, %v560_v9  ;;  %vm576_vm13 = vcmp.ge.f32.partialorder %v560_v9, 0.0  ;;  %v4582_v62 = vld [vmem:[#allocation7 + $0x314] ss:$8 sps:$4 sm:$0xff]   ;;  %v607_v31 = vsel %vm575_vm14, %v559_v49, %v591_v23 }
 0x140   :  { %v391_v19 = vpop.f32.mrf.mxu0  ;;  %863 = vmatprep.mubr.bf16.mxu0 %v616_v13  ;;  %v434_v5 = vpop.f32.mrf.mxu1 }
 0x141   :  { %vm577_vm12 = vcmp.ge.f32.partialorder %v561_v16, 0.0  ;;  %v593_v21 = vmul.f32 0.2, %v561_v16  ;;  %v562_v22 = vadd.f32 %v5148_v60, %v391_v19  ;;  %864 = vmatmul.mubr.bf16.gmra.mxu0 %v615_v17  ;;  %v608_v28 = vsel %vm576_vm13, %v560_v9, %v592_v20  ;;  %v4588_v60 = vld [vmem:[#allocation7 + $0x304] ss:$8 sps:$4 sm:$0xff]   ;;  %1879 = vmatpush2.bf16.msra.mxu1 %v4631_v56 }
 0x142   :  { %1521 = vmatpush1.bf16.msra.mxu0 %v4568_v15  ;;  %1880 = vmatprep.subr.bf16.mxu1 %v4639_v61  ;;  %v438_v6 = vpop.f32.mrf.mxu1  ;;  %v469_v9 = vsub.s32 2, %v5138_v54 }
 0x143   :  { %vm578_vm15 = vcmp.ge.f32.partialorder %v562_v22, 0.0  ;;  %v594_v26 = vmul.f32 0.2, %v562_v22  ;;  %1522 = vmatprep.subr.bf16.mxu0 %v4576_v18  ;;  %v609_v27 = vsel %vm577_vm12, %v561_v16, %v593_v21 }
 0x144   :  { %v617_v34 = vpack.c.bf16 %v609_v27, %v607_v31  ;;  %v440_v7 = vpop.f32.mrf.mxu1  ;;  %v5174_v11 = vrot.slane %v5145_v58, %v469_v9  ;;  %v5177_v12 = vrot.slane %v5143_v57, %v469_v9 }
 0x145   :  { %v610_v29 = vsel %vm578_vm15, %v562_v22, %v594_v26  ;;  %1881 = vmatpush2.bf16.msra.mxu1 %v4637_v63  ;;  %v902_v26 = vsub.s32 1, %v5138_v54 }
 0x146   :  { %v618_v30 = vpack.c.bf16 %v610_v29, %v608_v28  ;;  %1523 = vmatpush1.bf16.msra.mxu0 %v4574_v25  ;;  %v442_v8 = vpop.f32.mrf.mxu1  ;;  %v475_v13 = vadd.f32 %v5174_v11, %v428_v2  ;;  %v476_v15 = vadd.f32 %v5177_v12, %v430_v3  ;;  %v477_v16 = vadd.f32 %v5174_v11, %v432_v4 }
 0x147   :  { %1524 = vmatprep.subr.bf16.mxu0 %v4582_v62  ;;  %v479_v17 = vadd.f32 %v5174_v11, %v438_v6  ;;  %v478_v19 = vadd.f32 %v5177_v12, %v434_v5  ;;  %v480_v20 = vadd.f32 %v5177_v12, %v440_v7  ;;  %v481_v21 = vadd.f32 %v5174_v11, %v442_v8 }
 0x148   :  { %873 = vmatprep.mubr.bf16.mxu0 %v618_v30  ;;  %v444_v10 = vpop.f32.mrf.mxu1  ;;  %v507_v18 = vmul.f32 0.2, %v475_v13  ;;  %v508_v23 = vmul.f32 0.2, %v476_v15  ;;  %v509_v25 = vmul.f32 0.2, %v477_v16 }
 0x149   :  { %874 = vmatmul.mubr.bf16.gmra.mxu0 %v617_v34  ;;  %vm491_vm0 = vcmp.ge.f32.partialorder %v475_v13, 0.0  ;;  %vm492_vm1 = vcmp.ge.f32.partialorder %v476_v15, 0.0  ;;  %vm493_vm2 = vcmp.ge.f32.partialorder %v477_v16, 0.0  ;;  %v511_v62 = vmul.f32 0.2, %v479_v17 }
 0x14a   :  { %1525 = vmatpush1.bf16.msra.mxu0 %v4580_v32  ;;  %v448_v49 = vpop.f32.mrf.mxu1  ;;  %v482_v28 = vadd.f32 %v5177_v12, %v444_v10  ;;  %v512_v29 = vmul.f32 0.2, %v480_v20  ;;  %v513_v30 = vmul.f32 0.2, %v481_v21  ;;  %v523_v31 = vsel %vm491_vm0, %v475_v13, %v507_v18 }
 0x14b   :  { %1526 = vmatprep.subr.bf16.mxu0 %v4588_v60  ;;  %v510_v32 = vmul.f32 0.2, %v478_v19  ;;  %v5189_v60 = vrot.slane %v5145_v58, %v902_v26  ;;  %vm494_vm3 = vcmp.ge.f32.partialorder %v478_v19, 0.0  ;;  %vm495_vm4 = vcmp.ge.f32.partialorder %v479_v17, 0.0 }
 0x14c   :  { %v450_v14 = vpop.f32.mrf.mxu1  ;;  %vm496_vm5 = vcmp.ge.f32.partialorder %v480_v20, 0.0  ;;  %vm497_vm6 = vcmp.ge.f32.partialorder %v481_v21, 0.0  ;;  %v527_v51 = vsel %vm495_vm4, %v479_v17, %v511_v62  ;;  %vm498_vm7 = vcmp.ge.f32.partialorder %v482_v28, 0.0 }
 0x14d   :  { %v528_v55 = vsel %vm496_vm5, %v480_v20, %v512_v29 }
 0x14e   :  { %1527 = vmatpush1.bf16.msra.mxu0 %v4586_v35  ;;  %v452_v22 = vpop.f32.mrf.mxu1  ;;  %v524_v35 = vsel %vm492_vm1, %v476_v15, %v508_v23 }
 0x14f   :  { %1528 = vmatprep.subr.bf16.mxu0 %v4594_v36  ;;  %v5197_v58 = vadd.f32 %v5174_v11, %v452_v22 }
 0x150   :  { %v454_v34 = vpop.f32.mrf.mxu1 }
 0x151   :  { %v517_v63 = vmul.f32 0.2, %v5197_v58  ;;  %vm501_vm14 = vcmp.ge.f32.partialorder %v5197_v58, 0.0 }
 0x152   :  { %1529 = vmatpush2.bf16.msra.mxu0 %v4592_v37  ;;  %v525_v37 = vsel %vm493_vm2, %v477_v16, %v509_v25  ;;  %v458_v48 = vpop.f32.mrf.mxu1 }
 0x153   :  { %1530 = vmatprep.subr.bf16.mxu0 %v4600_v38  ;;  %v5211_v7 = vadd.f32 %v5174_v11, %v458_v48 }
 0x155   :  { %vm503_vm4 = vcmp.ge.f32.partialorder %v5211_v7, 0.0 }
 0x156   :  { %1531 = vmatpush2.bf16.msra.mxu0 %v4598_v39 }
 0x157   :  { %1532 = vmatprep.subr.bf16.mxu0 %v4606_v40  ;;  %v5192_v40 = vrot.slane %v5143_v57, %v902_v26 }
 0x15a   :  { %1533 = vmatpush2.bf16.msra.mxu0 %v4604_v41  ;;  %v483_v41 = vadd.f32 %v5174_v11, %v448_v49 }
 0x15b   :  { %1534 = vmatprep.subr.bf16.mxu0 %v4612_v43 }
 0x15c   :  { %vm499_vm8 = vcmp.ge.f32.partialorder %v483_v41, 0.0 }
 0x15e   :  { %1535 = vmatpush2.bf16.msra.mxu0 %v4610_v44  ;;  %v484_v44 = vadd.f32 %v5177_v12, %v450_v14 }
 0x15f   :  { %1536 = vmatprep.subr.bf16.mxu0 %v4618_v45  ;;  %v514_v45 = vmul.f32 0.2, %v482_v28 }
 0x160   :  { %v516_v56 = vmul.f32 0.2, %v484_v44  ;;  %vm500_vm9 = vcmp.ge.f32.partialorder %v484_v44, 0.0 }
 0x161   :  { %v530_v2 = vsel %vm498_vm7, %v482_v28, %v514_v45  ;;  %v533_v45 = vsel %vm501_vm14, %v5197_v58, %v517_v63 }
 0x162   :  { %1537 = vmatpush2.bf16.msra.mxu0 %v4616_v47  ;;  %v5200_v47 = vadd.f32 %v5177_v12, %v454_v34  ;;  %v532_v62 = vsel %vm500_vm9, %v484_v44, %v516_v56  ;;  %v519_v34 = vmul.f32 0.2, %v5211_v7 }
 0x163   :  { %1538 = vmatprep.subr.bf16.mxu0 %v4624_v50  ;;  %v526_v50 = vsel %vm494_vm3, %v478_v19, %v510_v32 }
 0x164   :  { %v5207_v3 = vmul.f32 0.2, %v5200_v47  ;;  %vm502_vm15 = vcmp.ge.f32.partialorder %v5200_v47, 0.0 }
 0x166   :  { %1539 = vmatpush2.bf16.msra.mxu0 %v4622_v52  ;;  %v534_v58 = vsel %vm502_vm15, %v5200_v47, %v5207_v3 }
 0x167   :  { %1540 = vmatprep.subr.bf16.mxu0 %v4630_v53 }
 0x16a   :  { %1541 = vmatpush2.bf16.msra.mxu0 %v4628_v33  ;;  %v515_v33 = vmul.f32 0.2, %v483_v41 }
 0x16b   :  { %1542 = vmatprep.subr.bf16.mxu0 %v4636_v59 }
 0x16c   :  { %v531_v17 = vsel %vm499_vm8, %v483_v41, %v515_v33 }
 0x16e   :  { %1543 = vmatpush2.bf16.msra.mxu0 %v4634_v42  ;;  %v529_v42 = vsel %vm497_vm6, %v481_v21, %v513_v30 }
 0x16f   :  { %2196 = vmatprep.subr.bf16.mxu0 %v4642_v1  ;;  %v460_v1 = vpop.f32.mrf.mxu1 }
 0x170   :  { %v5217_v20 = vadd.f32 %v5177_v12, %v460_v1 }
 0x171   :  { %v462_v16 = vpop.f32.mrf.mxu1 }
 0x172   :  { %vm504_vm5 = vcmp.ge.f32.partialorder %v5217_v20, 0.0 }
 0x1f1   :  { %v845_v27 = vpop.f32.mrf.mxu0 }
 0x1f2   :  { %v884_v38 = vadd.f32 %v845_v27, %v523_v31  ;;  %v4640_v31 = vld [vmem:[#allocation7 + $0x270] ss:$8 sps:$4 sm:$0xff]  }
 0x1f3   :  { %v847_v36 = vpop.f32.mrf.mxu0 }
 0x1f4   :  { %v885_v39 = vadd.f32 %v847_v36, %v524_v35  ;;  %v908_v52 = vadd.f32 %v5189_v60, %v884_v38  ;;  %v5227_v36 = vadd.f32 %v5174_v11, %v462_v16  ;;  %v4645_v38 = vld [vmem:[#allocation7 + $0x264] ss:$8 sps:$4 sm:$0xff]  }
 0x1f5   :  { %v849_v43 = vpop.f32.mrf.mxu0 }
 0x1f6   :  { %v886_v46 = vadd.f32 %v849_v43, %v525_v37  ;;  %v909_v24 = vadd.f32 %v5192_v40, %v885_v39  ;;  %v940_v8 = vmul.f32 0.2, %v908_v52  ;;  %vm924_vm13 = vcmp.ge.f32.partialorder %v908_v52, 0.0  ;;  %v464_v37 = vpop.f32.mrf.mxu1 }
 0x1f7   :  { %v851_v57 = vpop.f32.mrf.mxu0  ;;  %v520_v43 = vmul.f32 0.2, %v5217_v20  ;;  %vm505_vm6 = vcmp.ge.f32.partialorder %v5227_v36, 0.0 }
 0x1f8   :  { %v910_v53 = vadd.f32 %v5189_v60, %v886_v46  ;;  %v887_v59 = vadd.f32 %v851_v57, %v526_v50  ;;  %v941_v9 = vmul.f32 0.2, %v909_v24  ;;  %vm925_vm11 = vcmp.ge.f32.partialorder %v909_v24, 0.0 }
 0x1f9   :  { %v855_v61 = vpop.f32.mrf.mxu0  ;;  %v956_v27 = vsel %vm924_vm13, %v908_v52, %v940_v8  ;;  %v490_v57 = vadd.f32 %v5177_v12, %v464_v37  ;;  %v4643_v52 = vld [vmem:[#allocation7 + $0x260] ss:$8 sps:$4 sm:$0xff]  }
 0x1fa   :  { %v942_v4 = vmul.f32 0.2, %v910_v53  ;;  %v911_v5 = vadd.f32 %v5192_v40, %v887_v59  ;;  %vm926_vm10 = vcmp.ge.f32.partialorder %v910_v53, 0.0  ;;  %v888_v13 = vadd.f32 %v855_v61, %v527_v51 }
 0x1fb   :  { %v857_v6 = vpop.f32.mrf.mxu0  ;;  %v957_v26 = vsel %vm925_vm11, %v909_v24, %v941_v9  ;;  %v521_v24 = vmul.f32 0.2, %v5227_v36  ;;  %vm506_vm7 = vcmp.ge.f32.partialorder %v490_v57, 0.0  ;;  %v4651_v9 = vld [vmem:[#allocation7 + $0x244] ss:$8 sps:$4 sm:$0xff]  }
 0x1fc   :  { %v889_v10 = vadd.f32 %v857_v6, %v528_v55  ;;  %vm927_vm12 = vcmp.ge.f32.partialorder %v911_v5, 0.0  ;;  %v943_v49 = vmul.f32 0.2, %v911_v5  ;;  %v958_v18 = vsel %vm926_vm10, %v910_v53, %v942_v4  ;;  %v4648_v55 = vld [vmem:[#allocation7 + $0x254] ss:$8 sps:$4 sm:$0xff]  }
 0x1fd   :  { %v859_v14 = vpop.f32.mrf.mxu0  ;;  %v912_v28 = vadd.f32 %v5189_v60, %v888_v13  ;;  %v972_v32 = vpack.c.bf16 %v958_v18, %v956_v27  ;;  %v522_v4 = vmul.f32 0.2, %v490_v57  ;;  %v535_v13 = vsel %vm503_vm4, %v5211_v7, %v519_v34 }
 0x1fe   :  { %v890_v15 = vadd.f32 %v859_v14, %v529_v42  ;;  %v913_v19 = vadd.f32 %v5192_v40, %v889_v10  ;;  %v959_v22 = vsel %vm927_vm12, %v911_v5, %v943_v49  ;;  %v4646_v5 = vld [vmem:[#allocation7 + $0x250] ss:$8 sps:$4 sm:$0xff]   ;;  %v536_v14 = vsel %vm504_vm5, %v5217_v20, %v520_v43 }
 0x1ff   :  { %v861_v21 = vpop.f32.mrf.mxu0  ;;  %v973_v30 = vpack.c.bf16 %v959_v22, %v957_v26  ;;  %v944_v48 = vmul.f32 0.2, %v912_v28  ;;  %vm928_vm3 = vcmp.ge.f32.partialorder %v912_v28, 0.0  ;;  %v537_v7 = vsel %vm505_vm6, %v5227_v36, %v521_v24  ;;  %v4649_v22 = vld [vmem:[#allocation7 + $0x240] ss:$8 sps:$4 sm:$0xff]  }
 0x200   :  { %v914_v23 = vadd.f32 %v5189_v60, %v890_v15  ;;  %v891_v25 = vadd.f32 %v861_v21, %v530_v2  ;;  %v945_v39 = vmul.f32 0.2, %v913_v19  ;;  %vm929_vm2 = vcmp.ge.f32.partialorder %v913_v19, 0.0  ;;  %v4652_v36 = vld [vmem:[#allocation7 + $0x230] ss:$8 sps:$4 sm:$0xff]  }
 0x201   :  { %v865_v29 = vpop.f32.mrf.mxu0  ;;  %1544 = vmatprep.mubr.bf16.mxu0 %v973_v30  ;;  %1882 = vmatprep.mubr.bf16.mxu1 %v973_v30  ;;  %v960_v3 = vsel %vm928_vm3, %v912_v28, %v944_v48  ;;  %v538_v26 = vsel %vm506_vm7, %v490_v57, %v522_v4  ;;  %v4663_v24 = vld [vmem:[#allocation7 + $0x204] ss:$8 sps:$4 sm:$0xff]  }
 0x202   :  { %v915_v35 = vadd.f32 %v5192_v40, %v891_v25  ;;  %v946_v41 = vmul.f32 0.2, %v914_v23  ;;  %vm930_vm0 = vcmp.ge.f32.partialorder %v914_v23, 0.0  ;;  %1545 = vmatmul.mubr.bf16.vlgmr.msra.gmra.mxu0 %v972_v32  ;;  %1883 = vmatmul.mubr.bf16.vlgmr.msra.gmra.mxu1 %v972_v32  ;;  %v892_v50 = vadd.f32 %v865_v29, %v531_v17  ;;  %v4654_v25 = vld [vmem:[#allocation7 + $0x234] ss:$8 sps:$4 sm:$0xff]  }
 0x203   :  { %v867_v44 = vpop.f32.mrf.mxu0  ;;  %2197 = vmatpush1.bf16.msra.mxu0 %v4640_v31  ;;  %v961_v63 = vsel %vm929_vm2, %v913_v19, %v945_v39 }
 0x204   :  { %vm931_vm1 = vcmp.ge.f32.partialorder %v915_v35, 0.0  ;;  %v947_v46 = vmul.f32 0.2, %v915_v35  ;;  %v893_v11 = vadd.f32 %v867_v44, %v532_v62  ;;  %2198 = vmatprep.subr.bf16.mxu0 %v4645_v38  ;;  %v962_v59 = vsel %vm930_vm0, %v914_v23, %v946_v41  ;;  %v4657_v41 = vld [vmem:[#allocation7 + $0x224] ss:$8 sps:$4 sm:$0xff]  }
 0x205   :  { %v869_v51 = vpop.f32.mrf.mxu0  ;;  %v916_v47 = vadd.f32 %v5189_v60, %v892_v50  ;;  %v974_v8 = vpack.c.bf16 %v962_v59, %v960_v3  ;;  %v4660_v50 = vld [vmem:[#allocation7 + $0x214] ss:$8 sps:$4 sm:$0xff]   ;;  %v4670_v59 = vld [vmem:[#allocation7 + $0x2d0] ss:$8 sps:$4 sm:$0xff]   ;;  %v4679_v3 = vld [vmem:[#allocation7 + $0x2a0] ss:$8 sps:$4 sm:$0xff]  }
 0x206   :  { %v894_v53 = vadd.f32 %v869_v51, %v533_v45  ;;  %v917_v33 = vadd.f32 %v5192_v40, %v893_v11  ;;  %v963_v12 = vsel %vm931_vm1, %v915_v35, %v947_v46  ;;  %v4655_v11 = vld [vmem:[#allocation7 + $0x220] ss:$8 sps:$4 sm:$0xff]  }
 0x207   :  { %v871_v56 = vpop.f32.mrf.mxu0  ;;  %v975_v2 = vpack.c.bf16 %v963_v12, %v961_v63  ;;  %2199 = vmatpush1.bf16.msra.mxu0 %v4643_v52  ;;  %v948_v18 = vmul.f32 0.2, %v916_v47  ;;  %vm932_vm11 = vcmp.ge.f32.partialorder %v916_v47, 0.0  ;;  %v4658_v52 = vld [vmem:[#allocation7 + $0x210] ss:$8 sps:$4 sm:$0xff]  }
 0x208   :  { %v918_v61 = vadd.f32 %v5189_v60, %v894_v53  ;;  %v895_v42 = vadd.f32 %v871_v56, %v534_v58  ;;  %2200 = vmatprep.subr.bf16.mxu0 %v4648_v55  ;;  %v949_v10 = vmul.f32 0.2, %v917_v33  ;;  %vm933_vm10 = vcmp.ge.f32.partialorder %v917_v33, 0.0  ;;  %v4661_v53 = vld [vmem:[#allocation7 + $0x200] ss:$8 sps:$4 sm:$0xff]  }
 0x209   :  { %v875_v1 = vpop.f32.mrf.mxu0  ;;  %1554 = vmatprep.mubr.bf16.mxu0 %v975_v2  ;;  %1892 = vmatprep.mubr.bf16.mxu1 %v975_v2  ;;  %v964_v35 = vsel %vm932_vm11, %v916_v47, %v948_v18  ;;  %v4666_v58 = vld [vmem:[#allocation7 + $0x2f4] ss:$8 sps:$4 sm:$0xff]   ;;  %v4664_v55 = vld [vmem:[#allocation7 + $0x2f0] ss:$8 sps:$4 sm:$0xff]   ;;  %v4667_v56 = vld [vmem:[#allocation7 + $0x2e0] ss:$8 sps:$4 sm:$0xff]  }
 0x20a   :  { %v919_v6 = vadd.f32 %v5192_v40, %v895_v42  ;;  %v950_v49 = vmul.f32 0.2, %v918_v61  ;;  %vm934_vm8 = vcmp.ge.f32.partialorder %v918_v61, 0.0  ;;  %1555 = vmatmul.mubr.bf16.gmra.mxu0 %v974_v8  ;;  %1893 = vmatmul.mubr.bf16.gmra.mxu1 %v974_v8  ;;  %v896_v19 = vadd.f32 %v875_v1, %v535_v13  ;;  %v4672_v12 = vld [vmem:[#allocation7 + $0x2d4] ss:$8 sps:$4 sm:$0xff]   ;;  %v5268_v1 = vpop.f32.mrf.mxu1 }
 0x20b   :  { %v877_v15 = vpop.f32.mrf.mxu0  ;;  %2201 = vmatpush1.bf16.msra.mxu0 %v4646_v5  ;;  %v965_v31 = vsel %vm933_vm10, %v917_v33, %v949_v10  ;;  %v4669_v33 = vld [vmem:[#allocation7 + $0x2e4] ss:$8 sps:$4 sm:$0xff]   ;;  %v4673_v42 = vld [vmem:[#allocation7 + $0x2c0] ss:$8 sps:$4 sm:$0xff]   ;;  %v4678_v63 = vld [vmem:[#allocation7 + $0x2b4] ss:$8 sps:$4 sm:$0xff]  }
 0x20c   :  { %vm935_vm9 = vcmp.ge.f32.partialorder %v919_v6, 0.0  ;;  %v951_v16 = vmul.f32 0.2, %v919_v6  ;;  %v897_v17 = vadd.f32 %v877_v15, %v536_v14  ;;  %2202 = vmatprep.subr.bf16.mxu0 %v4651_v9  ;;  %v966_v28 = vsel %vm934_vm8, %v918_v61, %v950_v49  ;;  %v4675_v61 = vld [vmem:[#allocation7 + $0x2c4] ss:$8 sps:$4 sm:$0xff]   ;;  %v5270_v4 = vpop.f32.mrf.mxu1 }
 0x20d   :  { %v879_v21 = vpop.f32.mrf.mxu0  ;;  %v920_v32 = vadd.f32 %v5189_v60, %v896_v19  ;;  %v976_v39 = vpack.c.bf16 %v966_v28, %v964_v35  ;;  %v4676_v47 = vld [vmem:[#allocation7 + $0x2b0] ss:$8 sps:$4 sm:$0xff]   ;;  %v4681_v2 = vld [vmem:[#allocation7 + $0x2a4] ss:$8 sps:$4 sm:$0xff]   ;;  %v4684_v5 = vld [vmem:[#allocation7 + $0x294] ss:$8 sps:$4 sm:$0xff]  }
 0x20e   :  { %v921_v20 = vadd.f32 %v5192_v40, %v897_v17  ;;  %v898_v23 = vadd.f32 %v879_v21, %v537_v7  ;;  %v967_v27 = vsel %vm935_vm9, %v919_v6, %v951_v16  ;;  %v4682_v6 = vld [vmem:[#allocation7 + $0x290] ss:$8 sps:$4 sm:$0xff]   ;;  %v5272_v8 = vpop.f32.mrf.mxu1  ;;  %v4687_v9 = vld [vmem:[#allocation7 + $0x284] ss:$8 sps:$4 sm:$0xff]   ;;  %v4685_v10 = vld [vmem:[#allocation7 + $0x280] ss:$8 sps:$4 sm:$0xff]  }
 0x20f   :  { %v881_v62 = vpop.f32.mrf.mxu0  ;;  %v977_v34 = vpack.c.bf16 %v967_v27, %v965_v31  ;;  %2203 = vmatpush1.bf16.msra.mxu0 %v4649_v22  ;;  %vm936_vm15 = vcmp.ge.f32.partialorder %v920_v32, 0.0  ;;  %v4688_v19 = vld [vmem:[#allocation5 + $0x2e0] ss:$16 sps:$4 sm:$0xff]   ;;  %v4690_v7 = vld [vmem:[#allocation5 + $0x2e4] ss:$16 sps:$4 sm:$0xff]  }
 0x210   :  { %v922_v29 = vadd.f32 %v5189_v60, %v898_v23  ;;  %v899_v30 = vadd.f32 %v881_v62, %v538_v26  ;;  %v953_v37 = vmul.f32 0.2, %v921_v20  ;;  %2204 = vmatprep.subr.bf16.mxu0 %v4654_v25  ;;  %vm937_vm12 = vcmp.ge.f32.partialorder %v921_v20, 0.0  ;;  %v5274_v49 = vpop.f32.mrf.mxu1  ;;  %v4693_v22 = vld [vmem:[#allocation5 + $0x2c4] ss:$16 sps:$4 sm:$0xff]   ;;  %2558 = vmatprep.subr.bf16.mxu1 %v4690_v7 }
 0x211   :  { %1564 = vmatprep.mubr.bf16.mxu0 %v977_v34  ;;  %1902 = vmatprep.mubr.bf16.mxu1 %v977_v34  ;;  %v952_v60 = vmul.f32 0.2, %v920_v32  ;;  %v4696_v23 = vld [vmem:[#allocation5 + $0x2a4] ss:$16 sps:$4 sm:$0xff]   ;;  %v4694_v26 = vld [vmem:[#allocation5 + $0x2a0] ss:$16 sps:$4 sm:$0xff]  }
 0x212   :  { %v923_v38 = vadd.f32 %v5192_v40, %v899_v30  ;;  %v954_v43 = vmul.f32 0.2, %v922_v29  ;;  %vm938_vm13 = vcmp.ge.f32.partialorder %v922_v29, 0.0  ;;  %1565 = vmatmul.mubr.bf16.gmra.mxu0 %v976_v39  ;;  %1903 = vmatmul.mubr.bf16.gmra.mxu1 %v976_v39  ;;  %v969_v45 = vsel %vm937_vm12, %v921_v20, %v953_v37  ;;  %v5276_v13 = vpop.f32.mrf.mxu1  ;;  %v4691_v20 = vld [vmem:[#allocation5 + $0x2c0] ss:$16 sps:$4 sm:$0xff]  }
 0x213   :  { %2205 = vmatpush1.bf16.msra.mxu0 %v4652_v36  ;;  %v968_v57 = vsel %vm936_vm15, %v920_v32, %v952_v60  ;;  %2559 = vmatpush1.bf16.msra.mxu1 %v4688_v19  ;;  %v4699_v62 = vld [vmem:[#allocation5 + $0x284] ss:$16 sps:$4 sm:$0xff]   ;;  %v4697_v28 = vld [vmem:[#allocation5 + $0x280] ss:$16 sps:$4 sm:$0xff]   ;;  %v4714_v60 = vld [vmem:[#allocation5 + $0x2ec] ss:$16 sps:$4 sm:$0xff]  }
 0x214   :  { %vm939_vm14 = vcmp.ge.f32.partialorder %v923_v38, 0.0  ;;  %v955_v44 = vmul.f32 0.2, %v923_v38  ;;  %2206 = vmatprep.subr.bf16.mxu0 %v4657_v41  ;;  %v970_v48 = vsel %vm938_vm13, %v922_v29, %v954_v43  ;;  %v5278_v14 = vpop.f32.mrf.mxu1  ;;  %2560 = vmatprep.subr.bf16.mxu1 %v4693_v22  ;;  %v4738_v29 = vld [vmem:[#allocation7 + $0x674] ss:$8 sps:$4 sm:$0xff]  }
 0x215   :  { %v978_v51 = vpack.c.bf16 %v970_v48, %v968_v57  ;;  %v4702_v30 = vld [vmem:[#allocation5 + $0x264] ss:$16 sps:$4 sm:$0xff]   ;;  %v4700_v32 = vld [vmem:[#allocation5 + $0x260] ss:$16 sps:$4 sm:$0xff]   ;;  %v4720_v57 = vld [vmem:[#allocation5 + $0x2ac] ss:$16 sps:$4 sm:$0xff]  }
 0x216   :  { %v971_v46 = vsel %vm939_vm14, %v923_v38, %v955_v44  ;;  %v5280_v15 = vpop.f32.mrf.mxu1  ;;  %v4705_v34 = vld [vmem:[#allocation5 + $0x244] ss:$16 sps:$4 sm:$0xff]   ;;  %v4703_v36 = vld [vmem:[#allocation5 + $0x240] ss:$16 sps:$4 sm:$0xff]   ;;  %v4733_v19 = vld [vmem:[#allocation5 + $0x208] ss:$16 sps:$4 sm:$0xff]  }
 0x217   :  { %v979_v40 = vpack.c.bf16 %v971_v46, %v969_v45  ;;  %2207 = vmatpush1.bf16.msra.mxu0 %v4655_v11  ;;  %2561 = vmatpush1.bf16.msra.mxu1 %v4691_v20  ;;  %v4708_v37 = vld [vmem:[#allocation5 + $0x224] ss:$16 sps:$4 sm:$0xff]   ;;  %v4706_v39 = vld [vmem:[#allocation5 + $0x220] ss:$16 sps:$4 sm:$0xff]   ;;  %v4712_v46 = vld [vmem:[#allocation5 + $0x2e8] ss:$16 sps:$4 sm:$0xff]  }
 0x218   :  { %2208 = vmatprep.subr.bf16.mxu0 %v4660_v50  ;;  %v5282_v16 = vpop.f32.mrf.mxu1  ;;  %2562 = vmatprep.subr.bf16.mxu1 %v4696_v23  ;;  %v4711_v41 = vld [vmem:[#allocation5 + $0x204] ss:$16 sps:$4 sm:$0xff]   ;;  %v4709_v44 = vld [vmem:[#allocation5 + $0x200] ss:$16 sps:$4 sm:$0xff]   ;;  %v4717_v11 = vld [vmem:[#allocation5 + $0x2cc] ss:$16 sps:$4 sm:$0xff]  }
 0x219   :  { %1574 = vmatprep.mubr.bf16.mxu0 %v979_v40  ;;  %1912 = vmatprep.mubr.bf16.mxu1 %v979_v40  ;;  %v4896_v48 = vld [vmem:[#allocation2] sm:$0xff]   ;;  %v4715_v50 = vld [vmem:[#allocation5 + $0x2c8] ss:$16 sps:$4 sm:$0xff]   ;;  %v4741_v7 = vld [vmem:[#allocation7 + $0x474] ss:$8 sps:$4 sm:$0xff]  }
 0x21a   :  { %1575 = vmatmul.mubr.bf16.gmra.mxu0 %v978_v51  ;;  %1913 = vmatmul.mubr.bf16.gmra.mxu1 %v978_v51  ;;  %v5284_v17 = vpop.f32.mrf.mxu1  ;;  %v4739_v20 = vld [vmem:[#allocation7 + $0x470] ss:$8 sps:$4 sm:$0xff]   ;;  %v4747_v23 = vld [vmem:[#allocation7 + $0x464] ss:$8 sps:$4 sm:$0xff]  }
 0x21b   :  { %2590 = vmatprep.mubr.bf16.mxu1 %v5043_v0  ;;  %2209 = vmatpush1.bf16.msra.mxu0 %v4658_v52 }
 0x21c   :  { %2210 = vmatprep.subr.bf16.mxu0 %v4663_v24  ;;  %v5286_v18 = vpop.f32.mrf.mxu1  ;;  %2563 = vmatpush1.bf16.msra.mxu1 %v4694_v26  ;;  %v4718_v24 = vld [vmem:[#allocation5 + $0x2a8] ss:$16 sps:$4 sm:$0xff]  }
 0x21d   :  { %2564 = vmatprep.subr.bf16.mxu1 %v4699_v62  ;;  %v4745_v62 = vld [vmem:[#allocation7 + $0x460] ss:$8 sps:$4 sm:$0xff]  }
 0x21e   :  { %v5288_v21 = vpop.f32.mrf.mxu1 }
 0x21f   :  { %2211 = vmatpush1.bf16.msra.mxu0 %v4661_v53  ;;  %v4723_v53 = vld [vmem:[#allocation5 + $0x28c] ss:$16 sps:$4 sm:$0xff]  }
 0x220   :  { %2212 = vmatprep.subr.bf16.mxu0 %v4666_v58  ;;  %v5290_v25 = vpop.f32.mrf.mxu1  ;;  %2565 = vmatpush1.bf16.msra.mxu1 %v4697_v28  ;;  %v4897_v58 = vld [vmem:[#allocation2 + $0x8] sm:$0xff]   ;;  %v4753_v28 = vld [vmem:[#allocation7 + $0x454] ss:$8 sps:$4 sm:$0xff]  }
 0x221   :  { %2566 = vmatprep.subr.bf16.mxu1 %v4702_v30  ;;  %v4751_v30 = vld [vmem:[#allocation7 + $0x450] ss:$8 sps:$4 sm:$0xff]  }
 0x222   :  { %v5292_v27 = vpop.f32.mrf.mxu1 }
 0x223   :  { %2213 = vmatpush2.bf16.msra.mxu0 %v4664_v55 }
 0x224   :  { %2214 = vmatprep.subr.bf16.mxu0 %v4669_v33  ;;  %v5294_v31 = vpop.f32.mrf.mxu1  ;;  %2567 = vmatpush1.bf16.msra.mxu1 %v4700_v32  ;;  %v4721_v33 = vld [vmem:[#allocation5 + $0x288] ss:$16 sps:$4 sm:$0xff]   ;;  %v4759_v32 = vld [vmem:[#allocation7 + $0x444] ss:$8 sps:$4 sm:$0xff]  }
 0x225   :  { %2568 = vmatprep.subr.bf16.mxu1 %v4705_v34 }
 0x226   :  { %v5296_v35 = vpop.f32.mrf.mxu1 }
 0x227   :  { %2215 = vmatpush2.bf16.msra.mxu0 %v4667_v56  ;;  %v4726_v56 = vld [vmem:[#allocation5 + $0x26c] ss:$16 sps:$4 sm:$0xff]  }
 0x228   :  { %2216 = vmatprep.subr.bf16.mxu0 %v4672_v12  ;;  %v5298_v38 = vpop.f32.mrf.mxu1  ;;  %2569 = vmatpush1.bf16.msra.mxu1 %v4703_v36  ;;  %v4757_v36 = vld [vmem:[#allocation7 + $0x440] ss:$8 sps:$4 sm:$0xff]  }
 0x229   :  { %2570 = vmatprep.subr.bf16.mxu1 %v4708_v37  ;;  %v4765_v37 = vld [vmem:[#allocation7 + $0x434] ss:$8 sps:$4 sm:$0xff]  }
 0x22a   :  { %v5300_v43 = vpop.f32.mrf.mxu1 }
 0x22b   :  { %2217 = vmatpush2.bf16.msra.mxu0 %v4670_v59  ;;  %v4724_v59 = vld [vmem:[#allocation5 + $0x268] ss:$16 sps:$4 sm:$0xff]  }
 0x22c   :  { %2218 = vmatprep.subr.bf16.mxu0 %v4675_v61  ;;  %2571 = vmatpush1.bf16.msra.mxu1 %v4706_v39  ;;  %v5302_v45 = vpop.f32.mrf.mxu1  ;;  %v4729_v61 = vld [vmem:[#allocation5 + $0x24c] ss:$16 sps:$4 sm:$0xff]  }
 0x22d   :  { %2572 = vmatprep.subr.bf16.mxu1 %v4711_v41  ;;  %v4763_v41 = vld [vmem:[#allocation7 + $0x430] ss:$8 sps:$4 sm:$0xff]  }
 0x22e   :  { %v5304_v40 = vpop.f32.mrf.mxu1 }
 0x22f   :  { %2219 = vmatpush2.bf16.msra.mxu0 %v4673_v42  ;;  %v4898_v42 = vld [vmem:[#allocation2 + $0x10] sm:$0xff]  }
 0x230   :  { %2220 = vmatprep.subr.bf16.mxu0 %v4678_v63  ;;  %2573 = vmatpush1.bf16.msra.mxu1 %v4709_v44  ;;  %v5307_v51 = vpop.f32.mrf.mxu1  ;;  %v4771_v44 = vld [vmem:[#allocation7 + $0x424] ss:$8 sps:$4 sm:$0xff]  }
 0x231   :  { %2631 = vmatprep.subr.bf16.mxu1 %v4714_v60 }
 0x232   :  { %v5309_v52 = vpop.f32.mrf.mxu1 }
 0x233   :  { %2221 = vmatpush2.bf16.msra.mxu0 %v4676_v47  ;;  %2591 = vmatmul.mubr.bf16.vlgmr.msra.gmra.mxu1 %v4896_v48  ;;  %v4727_v47 = vld [vmem:[#allocation5 + $0x248] ss:$16 sps:$4 sm:$0xff]  }
 0x234   :  { %2222 = vmatprep.subr.bf16.mxu0 %v4681_v2  ;;  %2632 = vmatpush1.bf16.msra.mxu1 %v4712_v46  ;;  %v5311_v55 = vpop.f32.mrf.mxu1  ;;  %v4732_v2 = vld [vmem:[#allocation5 + $0x22c] ss:$16 sps:$4 sm:$0xff]   ;;  %v4769_v46 = vld [vmem:[#allocation7 + $0x420] ss:$8 sps:$4 sm:$0xff]  }
 0x235   :  { %2600 = vmatprep.mubr.bf16.mxu1 %v5043_v0  ;;  %2633 = vmatprep.subr.bf16.mxu1 %v4717_v11  ;;  %v1925_v11 = vsub.s32 3, %v5138_v54 }
 0x236   :  { %v5314_v12 = vpop.f32.mrf.mxu1 }
 0x237   :  { %2223 = vmatpush2.bf16.msra.mxu0 %v4679_v3 }
 0x238   :  { %2224 = vmatprep.subr.bf16.mxu0 %v4684_v5  ;;  %2634 = vmatpush1.bf16.msra.mxu1 %v4715_v50  ;;  %v5316_v63 = vpop.f32.mrf.mxu1  ;;  %v4730_v5 = vld [vmem:[#allocation5 + $0x228] ss:$16 sps:$4 sm:$0xff]  }
 0x239   :  { %2635 = vmatprep.subr.bf16.mxu1 %v4720_v57 }
 0x23a   :  { %v5319_v3 = vpop.f32.mrf.mxu1 }
 0x23b   :  { %2225 = vmatpush2.bf16.msra.mxu0 %v4682_v6  ;;  %2601 = vmatmul.mubr.bf16.gmra.mxu1 %v4897_v58  ;;  %v4735_v6 = vld [vmem:[#allocation5 + $0x20c] ss:$16 sps:$4 sm:$0xff]  }
 0x23c   :  { %2226 = vmatprep.subr.bf16.mxu0 %v4687_v9  ;;  %2636 = vmatpush1.bf16.msra.mxu1 %v4718_v24  ;;  %v4899_v9 = vld [vmem:[#allocation2 + $0x18] sm:$0xff]   ;;  %v5340_v24 = vld [vmem:[#allocation8 + $0x8] sm:$0xff] }
 0x23d   :  { %2610 = vmatprep.mubr.bf16.mxu1 %v5043_v0  ;;  %2637 = vmatprep.subr.bf16.mxu1 %v4723_v53  ;;  %v5343_v53 = vrot.slane %v5340_v24, %v1925_v11 }
 0x23f   :  { %2227 = vmatpush2.bf16.msra.mxu0 %v4685_v10  ;;  %v5321_v10 = vpop.f32.mrf.mxu1 }
 0x240   :  { %2897 = vmatprep.subr.bf16.mxu0 %v4738_v29  ;;  %2638 = vmatpush1.bf16.msra.mxu1 %v4721_v33 }
 0x241   :  { %2639 = vmatprep.subr.bf16.mxu1 %v4726_v56  ;;  %v5324_v22 = vpop.f32.mrf.mxu1  ;;  %v5346_v56 = vld [vmem:[#allocation8] sm:$0xff] }
 0x243   :  { %2611 = vmatmul.mubr.bf16.gmra.mxu1 %v4898_v42  ;;  %v5326_v26 = vpop.f32.mrf.mxu1 }
 0x244   :  { %2640 = vmatpush1.bf16.msra.mxu1 %v4724_v59  ;;  %2620 = vmatprep.mubr.bf16.mxu1 %v5043_v0  ;;  %v5349_v59 = vrot.slane %v5346_v56, %v1925_v11 }
 0x245   :  { %2641 = vmatprep.subr.bf16.mxu1 %v4729_v61  ;;  %v5329_v29 = vpop.f32.mrf.mxu1  ;;  %v4783_v61 = vld [vmem:[#allocation7 + $0x404] ss:$8 sps:$4 sm:$0xff]  }
 0x247   :  { %v5331_v34 = vpop.f32.mrf.mxu1 }
 0x248   :  { %2642 = vmatpush1.bf16.msra.mxu1 %v4727_v47 }
 0x249   :  { %2643 = vmatprep.subr.bf16.mxu1 %v4732_v2  ;;  %v5334_v39 = vpop.f32.mrf.mxu1 }
 0x24b   :  { %2621 = vmatmul.mubr.bf16.gmra.mxu1 %v4899_v9  ;;  %v5336_v60 = vpop.f32.mrf.mxu1 }
 0x24c   :  { %2644 = vmatpush1.bf16.msra.mxu1 %v4730_v5  ;;  %2663 = vmatprep.mubr.bf16.mxu1 %v5043_v0 }
 0x24d   :  { %2645 = vmatprep.subr.bf16.mxu1 %v4735_v6  ;;  %v4781_v6 = vld [vmem:[#allocation7 + $0x400] ss:$8 sps:$4 sm:$0xff]  }
 0x250   :  { %2646 = vmatpush1.bf16.msra.mxu1 %v4733_v19  ;;  %v4789_v19 = vld [vmem:[#allocation7 + $0x4f4] ss:$8 sps:$4 sm:$0xff]  }
 0x251   :  { %3235 = vmatprep.subr.bf16.mxu1 %v4741_v7 }
 0x253   :  { %2664 = vmatmul.mubr.bf16.vlgmr.msra.gmra.mxu1 %v4896_v48  ;;  %v4777_v48 = vld [vmem:[#allocation7 + $0x414] ss:$8 sps:$4 sm:$0xff]  }
 0x254   :  { %3236 = vmatpush1.bf16.msra.mxu1 %v4739_v20  ;;  %2673 = vmatprep.mubr.bf16.mxu1 %v5043_v0 }
 0x255   :  { %3237 = vmatprep.subr.bf16.mxu1 %v4747_v23  ;;  %v4787_v23 = vld [vmem:[#allocation7 + $0x4f0] ss:$8 sps:$4 sm:$0xff]  }
 0x258   :  { %3238 = vmatpush1.bf16.msra.mxu1 %v4745_v62 }
 0x259   :  { %3239 = vmatprep.subr.bf16.mxu1 %v4753_v28 }
 0x25b   :  { %2674 = vmatmul.mubr.bf16.gmra.mxu1 %v4897_v58  ;;  %v4775_v58 = vld [vmem:[#allocation7 + $0x410] ss:$8 sps:$4 sm:$0xff]  }
 0x25c   :  { %3240 = vmatpush1.bf16.msra.mxu1 %v4751_v30  ;;  %2683 = vmatprep.mubr.bf16.mxu1 %v5043_v0 }
 0x25d   :  { %3241 = vmatprep.subr.bf16.mxu1 %v4759_v32 }
 0x260   :  { %3242 = vmatpush1.bf16.msra.mxu1 %v4757_v36  ;;  %v4795_v36 = vld [vmem:[#allocation7 + $0x4e4] ss:$8 sps:$4 sm:$0xff]  }
 0x261   :  { %3243 = vmatprep.subr.bf16.mxu1 %v4765_v37 }
 0x263   :  { %2684 = vmatmul.mubr.bf16.gmra.mxu1 %v4898_v42 }
 0x264   :  { %3244 = vmatpush1.bf16.msra.mxu1 %v4763_v41  ;;  %2693 = vmatprep.mubr.bf16.mxu1 %v5043_v0 }
 0x265   :  { %3245 = vmatprep.subr.bf16.mxu1 %v4771_v44 }
 0x268   :  { %3246 = vmatpush1.bf16.msra.mxu1 %v4769_v46 }
 0x269   :  { %3247 = vmatprep.subr.bf16.mxu1 %v4777_v48 }
 0x26b   :  { %2694 = vmatmul.mubr.bf16.gmra.mxu1 %v4899_v9 }
 0x26c   :  { %3248 = vmatpush1.bf16.msra.mxu1 %v4775_v58 }
 0x26d   :  { %3249 = vmatprep.subr.bf16.mxu1 %v4783_v61  ;;  %v4736_v61 = vld [vmem:[#allocation7 + $0x670] ss:$8 sps:$4 sm:$0xff]  }
 0x270   :  { %3250 = vmatpush1.bf16.msra.mxu1 %v4781_v6  ;;  %v4744_v6 = vld [vmem:[#allocation7 + $0x664] ss:$8 sps:$4 sm:$0xff]  }
 0x271   :  { %3251 = vmatprep.subr.bf16.mxu1 %v4789_v19  ;;  %v4742_v19 = vld [vmem:[#allocation7 + $0x660] ss:$8 sps:$4 sm:$0xff]  }
 0x274   :  { %3252 = vmatpush2.bf16.msra.mxu1 %v4787_v23 }
 0x275   :  { %3253 = vmatprep.subr.bf16.mxu1 %v4795_v36 }
 0x2c2   :  { %v1884_v50 = vpop.f32.mrf.mxu1 }
 0x2c3   :  { %v1885_v33 = vadd.f32 %v1884_v50, %v5268_v1 }
 0x2c4   :  { %v1886_v57 = vpop.f32.mrf.mxu1 }
 0x2c5   :  { %v1887_v0 = vadd.f32 %v1886_v57, %v5270_v4  ;;  %v1931_v1 = vadd.f32 %v5349_v59, %v1885_v33  ;;  %v4793_v57 = vld [vmem:[#allocation7 + $0x4e0] ss:$8 sps:$4 sm:$0xff]  }
 0x2c6   :  { %v1888_v42 = vpop.f32.mrf.mxu1  ;;  %3254 = vmatpush2.bf16.msra.mxu1 %v4793_v57  ;;  %v4748_v57 = vld [vmem:[#allocation7 + $0x650] ss:$8 sps:$4 sm:$0xff]  }
 0x2c7   :  { %v1932_v47 = vadd.f32 %v5343_v53, %v1887_v0  ;;  %v1889_v2 = vadd.f32 %v1888_v42, %v5272_v8  ;;  %v1963_v8 = vmul.f32 0.2, %v1931_v1  ;;  %vm1947_vm2 = vcmp.ge.f32.partialorder %v1931_v1, 0.0  ;;  %v4801_v42 = vld [vmem:[#allocation7 + $0x4d4] ss:$8 sps:$4 sm:$0xff]  }
 0x2c8   :  { %v1890_v5 = vpop.f32.mrf.mxu1  ;;  %3255 = vmatprep.subr.bf16.mxu1 %v4801_v42 }
 0x2c9   :  { %v1933_v7 = vadd.f32 %v5349_v59, %v1889_v2  ;;  %v1891_v20 = vadd.f32 %v1890_v5, %v5274_v49  ;;  %v1964_v62 = vmul.f32 0.2, %v1932_v47  ;;  %vm1948_vm1 = vcmp.ge.f32.partialorder %v1932_v47, 0.0 }
 0x2ca   :  { %v1894_v4 = vpop.f32.mrf.mxu1  ;;  %v1979_v58 = vsel %vm1947_vm2, %v1931_v1, %v1963_v8  ;;  %v4807_v8 = vld [vmem:[#allocation7 + $0x4c4] ss:$8 sps:$4 sm:$0xff]  }
 0x2cb   :  { %vm1949_vm0 = vcmp.ge.f32.partialorder %v1933_v7, 0.0  ;;  %v1965_v9 = vmul.f32 0.2, %v1933_v7  ;;  %v1934_v28 = vadd.f32 %v5343_v53, %v1891_v20  ;;  %v1895_v49 = vadd.f32 %v1894_v4, %v5276_v13  ;;  %v4750_v20 = vld [vmem:[#allocation7 + $0x654] ss:$8 sps:$4 sm:$0xff]  }
 0x2cc   :  { %v1896_v30 = vpop.f32.mrf.mxu1  ;;  %v1980_v48 = vsel %vm1948_vm1, %v1932_v47, %v1964_v62 }
 0x2cd   :  { %v1897_v32 = vadd.f32 %v1896_v30, %v5278_v14  ;;  %vm1950_vm3 = vcmp.ge.f32.partialorder %v1934_v28, 0.0  ;;  %v1966_v37 = vmul.f32 0.2, %v1934_v28  ;;  %v1981_v44 = vsel %vm1949_vm0, %v1933_v7, %v1965_v9 }
 0x2ce   :  { %v1898_v41 = vpop.f32.mrf.mxu1  ;;  %v1995_v2 = vpack.c.bf16 %v1981_v44, %v1979_v58  ;;  %v1935_v13 = vadd.f32 %v5349_v59, %v1895_v49  ;;  %v4805_v44 = vld [vmem:[#allocation7 + $0x4c0] ss:$8 sps:$4 sm:$0xff]  }
 0x2cf   :  { %v1899_v46 = vadd.f32 %v1898_v41, %v5280_v15  ;;  %v1982_v50 = vsel %vm1950_vm3, %v1934_v28, %v1966_v37  ;;  %v1936_v33 = vadd.f32 %v5343_v53, %v1897_v32 }
 0x2d0   :  { %v1900_v11 = vpop.f32.mrf.mxu1  ;;  %v1996_v0 = vpack.c.bf16 %v1982_v50, %v1980_v48  ;;  %v1967_v62 = vmul.f32 0.2, %v1935_v13  ;;  %vm1951_vm7 = vcmp.ge.f32.partialorder %v1935_v13, 0.0 }
 0x2d1   :  { %v1901_v14 = vadd.f32 %v1900_v11, %v5282_v16  ;;  %v1937_v5 = vadd.f32 %v5349_v59, %v1899_v46  ;;  %v4799_v16 = vld [vmem:[#allocation7 + $0x4d0] ss:$8 sps:$4 sm:$0xff]   ;;  %v1968_v4 = vmul.f32 0.2, %v1936_v33  ;;  %vm1952_vm6 = vcmp.ge.f32.partialorder %v1936_v33, 0.0 }
 0x2d2   :  { %v1904_v15 = vpop.f32.mrf.mxu1  ;;  %2228 = vmatprep.mubr.bf16.mxu0 %v1996_v0  ;;  %3256 = vmatpush2.bf16.msra.mxu1 %v4799_v16  ;;  %v4756_v0 = vld [vmem:[#allocation7 + $0x644] ss:$8 sps:$4 sm:$0xff]  }
 0x2d3   :  { %v1938_v47 = vadd.f32 %v5343_v53, %v1901_v14  ;;  %v1969_v1 = vmul.f32 0.2, %v1937_v5  ;;  %2229 = vmatmul.mubr.bf16.vlgmr.msra.gmra.mxu0 %v1995_v2  ;;  %vm1953_vm4 = vcmp.ge.f32.partialorder %v1937_v5, 0.0  ;;  %v1905_v9 = vadd.f32 %v1904_v15, %v5284_v17  ;;  %3257 = vmatprep.subr.bf16.mxu1 %v4807_v8 }
 0x2d4   :  { %v1906_v7 = vpop.f32.mrf.mxu1  ;;  %2898 = vmatpush1.bf16.msra.mxu0 %v4736_v61 }
 0x2d5   :  { %vm1954_vm5 = vcmp.ge.f32.partialorder %v1938_v47, 0.0  ;;  %v1970_v23 = vmul.f32 0.2, %v1938_v47  ;;  %v1907_v28 = vadd.f32 %v1906_v7, %v5286_v18  ;;  %2899 = vmatprep.subr.bf16.mxu0 %v4744_v6  ;;  %v1985_v41 = vsel %vm1953_vm4, %v1937_v5, %v1969_v1  ;;  %v4754_v6 = vld [vmem:[#allocation7 + $0x640] ss:$8 sps:$4 sm:$0xff]  }
 0x2d6   :  { %v1908_v30 = vpop.f32.mrf.mxu1  ;;  %v1984_v18 = vsel %vm1952_vm6, %v1936_v33, %v1968_v4  ;;  %v1939_v11 = vadd.f32 %v5349_v59, %v1905_v9  ;;  %3258 = vmatpush2.bf16.msra.mxu1 %v4805_v44 }
 0x2d7   :  { %v1909_v32 = vadd.f32 %v1908_v30, %v5288_v21  ;;  %v1940_v36 = vadd.f32 %v5343_v53, %v1907_v28  ;;  %v1986_v49 = vsel %vm1954_vm5, %v1938_v47, %v1970_v23  ;;  %v1983_v21 = vsel %vm1951_vm7, %v1935_v13, %v1967_v62  ;;  %v4768_v30 = vld [vmem:[#allocation7 + $0x624] ss:$8 sps:$4 sm:$0xff]  }
 0x2d8   :  { %v1910_v37 = vpop.f32.mrf.mxu1  ;;  %2900 = vmatpush1.bf16.msra.mxu0 %v4742_v19  ;;  %v1998_v50 = vpack.c.bf16 %v1986_v49, %v1984_v18  ;;  %v1997_v14 = vpack.c.bf16 %v1985_v41, %v1983_v21  ;;  %v1971_v5 = vmul.f32 0.2, %v1939_v11  ;;  %vm1955_vm11 = vcmp.ge.f32.partialorder %v1939_v11, 0.0  ;;  %v4762_v19 = vld [vmem:[#allocation7 + $0x634] ss:$8 sps:$4 sm:$0xff]  }
 0x2d9   :  { %v1941_v46 = vadd.f32 %v5349_v59, %v1909_v32  ;;  %v1911_v17 = vadd.f32 %v1910_v37, %v5290_v25  ;;  %2901 = vmatprep.subr.bf16.mxu0 %v4750_v20  ;;  %v1972_v61 = vmul.f32 0.2, %v1940_v36  ;;  %vm1956_vm10 = vcmp.ge.f32.partialorder %v1940_v36, 0.0  ;;  %v4786_v21 = vld [vmem:[#allocation7 + $0x6f4] ss:$8 sps:$4 sm:$0xff]  }
 0x2da   :  { %v1914_v48 = vpop.f32.mrf.mxu1  ;;  %2238 = vmatprep.mubr.bf16.mxu0 %v1998_v50  ;;  %v1987_v9 = vsel %vm1955_vm11, %v1939_v11, %v1971_v5  ;;  %v4772_v11 = vld [vmem:[#allocation7 + $0x610] ss:$8 sps:$4 sm:$0xff]   ;;  %v4778_v50 = vld [vmem:[#allocation7 + $0x600] ss:$8 sps:$4 sm:$0xff]  }
 0x2db   :  { %v1942_v58 = vadd.f32 %v5343_v53, %v1911_v17  ;;  %v1973_v42 = vmul.f32 0.2, %v1941_v46  ;;  %vm1957_vm8 = vcmp.ge.f32.partialorder %v1941_v46, 0.0  ;;  %2239 = vmatmul.mubr.bf16.gmra.mxu0 %v1997_v14  ;;  %v1915_v13 = vadd.f32 %v1914_v48, %v5292_v27  ;;  %v4780_v48 = vld [vmem:[#allocation7 + $0x604] ss:$8 sps:$4 sm:$0xff]  }
 0x2dc   :  { %v1916_v2 = vpop.f32.mrf.mxu1  ;;  %2902 = vmatpush1.bf16.msra.mxu0 %v4748_v57  ;;  %v1988_v4 = vsel %vm1956_vm10, %v1940_v36, %v1972_v61  ;;  %v4766_v36 = vld [vmem:[#allocation7 + $0x620] ss:$8 sps:$4 sm:$0xff]   ;;  %v4784_v57 = vld [vmem:[#allocation7 + $0x6f0] ss:$8 sps:$4 sm:$0xff]  }
 0x2dd   :  { %vm1958_vm9 = vcmp.ge.f32.partialorder %v1942_v58, 0.0  ;;  %v1974_v25 = vmul.f32 0.2, %v1942_v58  ;;  %v1917_v33 = vadd.f32 %v1916_v2, %v5294_v31  ;;  %2903 = vmatprep.subr.bf16.mxu0 %v4756_v0  ;;  %v1989_v16 = vsel %vm1957_vm8, %v1941_v46, %v1973_v42  ;;  %v4790_v14 = vld [vmem:[#allocation7 + $0x6e0] ss:$8 sps:$4 sm:$0xff]  }
 0x2de   :  { %v1918_v15 = vpop.f32.mrf.mxu1  ;;  %v1943_v27 = vadd.f32 %v5349_v59, %v1915_v13  ;;  %v1999_v28 = vpack.c.bf16 %v1989_v16, %v1987_v9  ;;  %v4798_v0 = vld [vmem:[#allocation7 + $0x6d4] ss:$8 sps:$4 sm:$0xff]   ;;  %v4796_v61 = vld [vmem:[#allocation7 + $0x6d0] ss:$8 sps:$4 sm:$0xff]   ;;  %v4804_v42 = vld [vmem:[#allocation7 + $0x6c4] ss:$8 sps:$4 sm:$0xff]   ;;  %v1546_v9 = vpop.f32.mrf.mxu0 }
 0x2df   :  { %v1919_v47 = vadd.f32 %v1918_v15, %v5296_v35  ;;  %v1944_v1 = vadd.f32 %v5343_v53, %v1917_v33  ;;  %v1990_v20 = vsel %vm1958_vm9, %v1942_v58, %v1974_v25  ;;  %v4760_v35 = vld [vmem:[#allocation7 + $0x630] ss:$8 sps:$4 sm:$0xff]   ;;  %v4792_v58 = vld [vmem:[#allocation7 + $0x6e4] ss:$8 sps:$4 sm:$0xff]   ;;  %v4802_v2 = vld [vmem:[#allocation7 + $0x6c0] ss:$8 sps:$4 sm:$0xff]  }
 0x2e0   :  { %v1920_v7 = vpop.f32.mrf.mxu1  ;;  %v2000_v62 = vpack.c.bf16 %v1990_v20, %v1988_v4  ;;  %2904 = vmatpush1.bf16.msra.mxu0 %v4754_v6  ;;  %v1975_v49 = vmul.f32 0.2, %v1943_v27  ;;  %vm1959_vm15 = vcmp.ge.f32.partialorder %v1943_v27, 0.0  ;;  %v4810_v25 = vld [vmem:[#allocation7 + $0x6b4] ss:$8 sps:$4 sm:$0xff]  }
 0x2e1   :  { %v1945_v31 = vadd.f32 %v5349_v59, %v1919_v47  ;;  %v1921_v23 = vadd.f32 %v1920_v7, %v5298_v38  ;;  %2905 = vmatprep.subr.bf16.mxu0 %v4762_v19  ;;  %v1976_v8 = vmul.f32 0.2, %v1944_v1  ;;  %vm1960_vm12 = vcmp.ge.f32.partialorder %v1944_v1, 0.0  ;;  %v4774_v38 = vld [vmem:[#allocation7 + $0x614] ss:$8 sps:$4 sm:$0xff]  }
 0x2e2   :  { %2248 = vmatprep.mubr.bf16.mxu0 %v2000_v62  ;;  %v1991_v18 = vsel %vm1959_vm15, %v1943_v27, %v1975_v49  ;;  %v4813_v33 = vld [vmem:[#allocation7 + $0x4b4] ss:$8 sps:$4 sm:$0xff]   ;;  %v4808_v5 = vld [vmem:[#allocation7 + $0x6b0] ss:$8 sps:$4 sm:$0xff]   ;;  %v4814_v15 = vld [vmem:[#allocation7 + $0x6a0] ss:$8 sps:$4 sm:$0xff]  }
 0x2e3   :  { %v1977_v32 = vmul.f32 0.2, %v1945_v31  ;;  %v1946_v37 = vadd.f32 %v5343_v53, %v1921_v23  ;;  %vm1961_vm13 = vcmp.ge.f32.partialorder %v1945_v31, 0.0  ;;  %2249 = vmatmul.mubr.bf16.gmra.mxu0 %v1999_v28  ;;  %v1992_v41 = vsel %vm1960_vm12, %v1944_v1, %v1976_v8  ;;  %v4811_v13 = vld [vmem:[#allocation7 + $0x4b0] ss:$8 sps:$4 sm:$0xff]   ;;  %3259 = vmatprep.subr.bf16.mxu1 %v4813_v33 }
 0x2e4   :  { %2906 = vmatpush1.bf16.msra.mxu0 %v4760_v35  ;;  %3260 = vmatpush2.bf16.msra.mxu1 %v4811_v13  ;;  %v4816_v6 = vld [vmem:[#allocation7 + $0x6a4] ss:$8 sps:$4 sm:$0xff]   ;;  %v4817_v47 = vld [vmem:[#allocation7 + $0x4a0] ss:$8 sps:$4 sm:$0xff]   ;;  %v4822_v1 = vld [vmem:[#allocation7 + $0x694] ss:$8 sps:$4 sm:$0xff]   ;;  %v1548_v35 = vpop.f32.mrf.mxu0 }
 0x2e5   :  { %vm1962_vm14 = vcmp.ge.f32.partialorder %v1946_v37, 0.0  ;;  %v1978_v59 = vmul.f32 0.2, %v1946_v37  ;;  %2907 = vmatprep.subr.bf16.mxu0 %v4768_v30  ;;  %v1993_v46 = vsel %vm1961_vm13, %v1945_v31, %v1977_v32  ;;  %v4819_v19 = vld [vmem:[#allocation7 + $0x4a4] ss:$8 sps:$4 sm:$0xff]  }
 0x2e6   :  { %v2001_v53 = vpack.c.bf16 %v1993_v46, %v1991_v18  ;;  %3261 = vmatprep.subr.bf16.mxu1 %v4819_v19  ;;  %v4820_v7 = vld [vmem:[#allocation7 + $0x690] ss:$8 sps:$4 sm:$0xff]   ;;  %v4825_v20 = vld [vmem:[#allocation7 + $0x494] ss:$8 sps:$4 sm:$0xff]   ;;  %v4828_v31 = vld [vmem:[#allocation7 + $0x684] ss:$8 sps:$4 sm:$0xff]   ;;  %v1550_v28 = vpop.f32.mrf.mxu0  ;;  %v1547_v46 = vadd.f32 %v1546_v9, %v5300_v43 }
 0x2e7   :  { %v1994_v44 = vsel %vm1962_vm14, %v1946_v37, %v1978_v59  ;;  %v4823_v16 = vld [vmem:[#allocation7 + $0x490] ss:$8 sps:$4 sm:$0xff]   ;;  %v4826_v4 = vld [vmem:[#allocation7 + $0x680] ss:$8 sps:$4 sm:$0xff]   ;;  %v4831_v27 = vld [vmem:[#allocation7 + $0x484] ss:$8 sps:$4 sm:$0xff]  }
 0x2e8   :  { %v2002_v17 = vpack.c.bf16 %v1994_v44, %v1992_v41  ;;  %2908 = vmatpush1.bf16.msra.mxu0 %v4766_v36  ;;  %3262 = vmatpush2.bf16.msra.mxu1 %v4817_v47  ;;  %v4829_v23 = vld [vmem:[#allocation7 + $0x480] ss:$8 sps:$4 sm:$0xff]   ;;  %v4834_v62 = vld [vmem:[#allocation7 + $0x574] ss:$8 sps:$4 sm:$0xff]   ;;  %v1552_v30 = vpop.f32.mrf.mxu0  ;;  %v1587_v41 = vsub.s32 5, %v5138_v54 }
 0x2e9   :  { %2909 = vmatprep.subr.bf16.mxu0 %v4774_v38  ;;  %3263 = vmatprep.subr.bf16.mxu1 %v4825_v20 }
 0x2ea   :  { %2258 = vmatprep.mubr.bf16.mxu0 %v2002_v17  ;;  %v1556_v8 = vpop.f32.mrf.mxu0  ;;  %v1588_v17 = vrot.slane %v5346_v56, %v1587_v41 }
 0x2eb   :  { %2259 = vmatmul.mubr.bf16.gmra.mxu0 %v2001_v53  ;;  %v5391_v53 = vrot.slane %v5340_v24, %v1587_v41  ;;  %v1557_v43 = vadd.f32 %v1556_v8, %v5309_v52 }
 0x2ec   :  { %2910 = vmatpush1.bf16.msra.mxu0 %v4772_v11  ;;  %3264 = vmatpush2.bf16.msra.mxu1 %v4823_v16  ;;  %v1558_v32 = vpop.f32.mrf.mxu0  ;;  %v1549_v11 = vadd.f32 %v1548_v35, %v5302_v45 }
 0x2ed   :  { %2911 = vmatprep.subr.bf16.mxu0 %v4780_v48  ;;  %3265 = vmatprep.subr.bf16.mxu1 %v4831_v27  ;;  %v1593_v48 = vadd.f32 %v1588_v17, %v1547_v46 }
 0x2ee   :  { %v1560_v37 = vpop.f32.mrf.mxu0 }
 0x2ef   :  { %vm1609_vm0 = vcmp.ge.f32.partialorder %v1593_v48, 0.0 }
 0x2f0   :  { %2912 = vmatpush1.bf16.msra.mxu0 %v4778_v50  ;;  %3266 = vmatpush2.bf16.msra.mxu1 %v4829_v23  ;;  %v1562_v36 = vpop.f32.mrf.mxu0 }
 0x2f1   :  { %2913 = vmatprep.subr.bf16.mxu0 %v4786_v21  ;;  %v1594_v21 = vadd.f32 %v5391_v53, %v1549_v11 }
 0x2f2   :  { %v1566_v49 = vpop.f32.mrf.mxu0 }
 0x2f3   :  { %v1567_v33 = vadd.f32 %v1566_v49, %v5319_v3  ;;  %vm1610_vm1 = vcmp.ge.f32.partialorder %v1594_v21, 0.0 }
 0x2f4   :  { %2914 = vmatpush2.bf16.msra.mxu0 %v4784_v57  ;;  %v1568_v59 = vpop.f32.mrf.mxu0  ;;  %v1551_v57 = vadd.f32 %v1550_v28, %v5304_v40 }
 0x2f5   :  { %2915 = vmatprep.subr.bf16.mxu0 %v4792_v58  ;;  %v1553_v58 = vadd.f32 %v1552_v30, %v5307_v51 }
 0x2f6   :  { %v1570_v38 = vpop.f32.mrf.mxu0  ;;  %v1595_v45 = vadd.f32 %v1588_v17, %v1551_v57 }
 0x2f7   :  { %v1596_v40 = vadd.f32 %v5391_v53, %v1553_v58  ;;  %v1571_v51 = vadd.f32 %v1570_v38, %v5324_v22 }
 0x2f8   :  { %2916 = vmatpush2.bf16.msra.mxu0 %v4790_v14  ;;  %v1572_v44 = vpop.f32.mrf.mxu0  ;;  %v1627_v19 = vmul.f32 0.2, %v1595_v45  ;;  %vm1611_vm2 = vcmp.ge.f32.partialorder %v1595_v45, 0.0 }
 0x2f9   :  { %2917 = vmatprep.subr.bf16.mxu0 %v4798_v0  ;;  %v1625_v0 = vmul.f32 0.2, %v1593_v48  ;;  %v1573_v3 = vadd.f32 %v1572_v44, %v5326_v26  ;;  %v5416_v20 = vadd.f32 %v1588_v17, %v1571_v51  ;;  %v1628_v9 = vmul.f32 0.2, %v1596_v40 }
 0x2fa   :  { %v1576_v18 = vpop.f32.mrf.mxu0  ;;  %vm1612_vm3 = vcmp.ge.f32.partialorder %v1596_v40, 0.0 }
 0x2fb   :  { %v1641_v52 = vsel %vm1609_vm0, %v1593_v48, %v1625_v0  ;;  %v5427_v35 = vadd.f32 %v5391_v53, %v1573_v3  ;;  %vm1619_vm14 = vcmp.ge.f32.partialorder %v5416_v20, 0.0 }
 0x2fc   :  { %2918 = vmatpush2.bf16.msra.mxu0 %v4796_v61  ;;  %v1578_v50 = vpop.f32.mrf.mxu0  ;;  %v1559_v61 = vadd.f32 %v1558_v32, %v5311_v55 }
 0x2fd   :  { %2919 = vmatprep.subr.bf16.mxu0 %v4804_v42  ;;  %v1561_v42 = vadd.f32 %v1560_v37, %v5314_v12  ;;  %v1579_v16 = vadd.f32 %v1578_v50, %v5331_v34  ;;  %vm1620_vm15 = vcmp.ge.f32.partialorder %v5427_v35, 0.0 }
 0x2fe   :  { %v1580_v14 = vpop.f32.mrf.mxu0  ;;  %v1598_v55 = vadd.f32 %v5391_v53, %v1559_v61 }
 0x2ff   :  { %v1599_v12 = vadd.f32 %v1588_v17, %v1561_v42 }
 0x300   :  { %2920 = vmatpush2.bf16.msra.mxu0 %v4802_v2  ;;  %v1563_v2 = vadd.f32 %v1562_v36, %v5316_v63  ;;  %v1582_v13 = vpop.f32.mrf.mxu0  ;;  %v1630_v8 = vmul.f32 0.2, %v1598_v55  ;;  %vm1614_vm5 = vcmp.ge.f32.partialorder %v1598_v55, 0.0 }
 0x301   :  { %2921 = vmatprep.subr.bf16.mxu0 %v4810_v25  ;;  %v1626_v25 = vmul.f32 0.2, %v1594_v21  ;;  %v1631_v38 = vmul.f32 0.2, %v1599_v12  ;;  %v1583_v41 = vadd.f32 %v1582_v13, %v5336_v60  ;;  %vm1615_vm6 = vcmp.ge.f32.partialorder %v1599_v12, 0.0 }
 0x302   :  { %v5407_v63 = vadd.f32 %v5391_v53, %v1563_v2  ;;  %v1646_v48 = vsel %vm1614_vm5, %v1598_v55, %v1630_v8  ;;  %v1635_v55 = vmul.f32 0.2, %v5416_v20 }
 0x303   :  { %v1647_v60 = vsel %vm1615_vm6, %v1599_v12, %v1631_v38  ;;  %v4832_v12 = vld [vmem:[#allocation7 + $0x570] ss:$8 sps:$4 sm:$0xff]  }
 0x304   :  { %2922 = vmatpush2.bf16.msra.mxu0 %v4808_v5  ;;  %v1569_v5 = vadd.f32 %v1568_v59, %v5321_v10  ;;  %v1642_v10 = vsel %vm1610_vm1, %v1594_v21, %v1626_v25  ;;  %v1644_v59 = vsel %vm1612_vm3, %v1596_v40, %v1628_v9  ;;  %vm1616_vm7 = vcmp.ge.f32.partialorder %v5407_v63, 0.0 }
 0x305   :  { %2923 = vmatprep.subr.bf16.mxu0 %v4816_v6  ;;  %v2287_v6 = vsub.s32 4, %v5138_v54  ;;  %v1651_v9 = vsel %vm1619_vm14, %v5416_v20, %v1635_v55 }
 0x306   :  { %v5413_v22 = vadd.f32 %v5391_v53, %v1569_v5 }
 0x307   :  { %v5421_v26 = vrot.slane %v5340_v24, %v2287_v6  ;;  %v5424_v23 = vrot.slane %v5346_v56, %v2287_v6  ;;  %v5432_v24 = vadd.f32 %v5391_v53, %v1579_v16 }
 0x308   :  { %2924 = vmatpush2.bf16.msra.mxu0 %v4814_v15  ;;  %v1597_v15 = vadd.f32 %v1588_v17, %v1557_v43  ;;  %vm1618_vm13 = vcmp.ge.f32.partialorder %v5413_v22, 0.0  ;;  %v1634_v40 = vmul.f32 0.2, %v5413_v22 }
 0x309   :  { %2925 = vmatprep.subr.bf16.mxu0 %v4822_v1  ;;  %v5410_v1 = vadd.f32 %v1588_v17, %v1567_v33  ;;  %vm1622_vm5 = vcmp.ge.f32.partialorder %v5432_v24, 0.0 }
 0x30a   :  { %v1629_v30 = vmul.f32 0.2, %v1597_v15  ;;  %vm1613_vm4 = vcmp.ge.f32.partialorder %v1597_v15, 0.0 }
 0x30b   :  { %vm1617_vm9 = vcmp.ge.f32.partialorder %v5410_v1, 0.0 }
 0x30c   :  { %2926 = vmatpush2.bf16.msra.mxu0 %v4820_v7  ;;  %v1577_v7 = vadd.f32 %v1576_v18, %v5329_v29  ;;  %v1643_v29 = vsel %vm1611_vm2, %v1595_v45, %v1627_v19  ;;  %v1645_v46 = vsel %vm1613_vm4, %v1597_v15, %v1629_v30 }
 0x30d   :  { %2927 = vmatprep.subr.bf16.mxu0 %v4828_v31  ;;  %v1581_v31 = vadd.f32 %v1580_v14, %v5334_v39  ;;  %v1633_v14 = vmul.f32 0.2, %v5410_v1 }
 0x30e   :  { %v5429_v34 = vadd.f32 %v1588_v17, %v1577_v7 }
 0x30f   :  { %v5434_v32 = vadd.f32 %v1588_v17, %v1581_v31  ;;  %v1632_v17 = vmul.f32 0.2, %v5407_v63  ;;  %v1649_v7 = vsel %vm1617_vm9, %v5410_v1, %v1633_v14 }
 0x310   :  { %2928 = vmatpush2.bf16.msra.mxu0 %v4826_v4  ;;  %vm1621_vm0 = vcmp.ge.f32.partialorder %v5429_v34, 0.0 }
 0x311   :  { %3581 = vmatprep.subr.bf16.mxu0 %v4834_v62  ;;  %v1648_v2 = vsel %vm1616_vm7, %v5407_v63, %v1632_v17  ;;  %v4837_v63 = vld [vmem:[#allocation7 + $0x564] ss:$8 sps:$4 sm:$0xff]   ;;  %vm1623_vm6 = vcmp.ge.f32.partialorder %v5434_v32, 0.0 }
 0x393   :  { %v2230_v47 = vpop.f32.mrf.mxu0 }
 0x394   :  { %v2269_v27 = vadd.f32 %v2230_v47, %v1641_v52 }
 0x395   :  { %v2232_v4 = vpop.f32.mrf.mxu0 }
 0x396   :  { %v2270_v62 = vadd.f32 %v2232_v4, %v1642_v10  ;;  %v2293_v36 = vadd.f32 %v5424_v23, %v2269_v27  ;;  %v5455_v10 = vadd.f32 %v5391_v53, %v1583_v41  ;;  %v1636_v4 = vmul.f32 0.2, %v5427_v35 }
 0x397   :  { %v2234_v28 = vpop.f32.mrf.mxu0 }
 0x398   :  { %v2271_v39 = vadd.f32 %v2234_v28, %v1643_v29  ;;  %v2294_v56 = vadd.f32 %v5421_v26, %v2270_v62  ;;  %v2325_v57 = vmul.f32 0.2, %v2293_v36  ;;  %vm2309_vm11 = vcmp.ge.f32.partialorder %v2293_v36, 0.0  ;;  %v4835_v29 = vld [vmem:[#allocation7 + $0x560] ss:$8 sps:$4 sm:$0xff]  }
 0x399   :  { %v2236_v37 = vpop.f32.mrf.mxu0  ;;  %v1650_v62 = vsel %vm1618_vm13, %v5413_v22, %v1634_v40  ;;  %v1652_v20 = vsel %vm1620_vm15, %v5427_v35, %v1636_v4  ;;  %vm1624_vm7 = vcmp.ge.f32.partialorder %v5455_v10, 0.0 }
 0x39a   :  { %v2295_v49 = vadd.f32 %v5424_v23, %v2271_v39  ;;  %v2272_v44 = vadd.f32 %v2236_v37, %v1644_v59  ;;  %v2326_v50 = vmul.f32 0.2, %v2294_v56  ;;  %vm2310_vm10 = vcmp.ge.f32.partialorder %v2294_v56, 0.0  ;;  %v4840_v39 = vld [vmem:[#allocation7 + $0x554] ss:$8 sps:$4 sm:$0xff]  }
 0x39b   :  { %v2240_v11 = vpop.f32.mrf.mxu0  ;;  %v2341_v51 = vsel %vm2309_vm11, %v2293_v36, %v2325_v57  ;;  %v1637_v36 = vmul.f32 0.2, %v5429_v34  ;;  %v4838_v57 = vld [vmem:[#allocation7 + $0x550] ss:$8 sps:$4 sm:$0xff]  }
 0x39c   :  { %v2327_v18 = vmul.f32 0.2, %v2295_v49  ;;  %vm2311_vm8 = vcmp.ge.f32.partialorder %v2295_v49, 0.0  ;;  %v2296_v21 = vadd.f32 %v5421_v26, %v2272_v44  ;;  %v2273_v61 = vadd.f32 %v2240_v11, %v1645_v46 }
 0x39d   :  { %v2242_v58 = vpop.f32.mrf.mxu0  ;;  %v2342_v33 = vsel %vm2310_vm10, %v2294_v56, %v2326_v50  ;;  %v1638_v44 = vmul.f32 0.2, %v5432_v24 }
 0x39e   :  { %vm2312_vm12 = vcmp.ge.f32.partialorder %v2296_v21, 0.0  ;;  %v2328_v0 = vmul.f32 0.2, %v2296_v21  ;;  %v2343_v43 = vsel %vm2311_vm8, %v2295_v49, %v2327_v18  ;;  %v2274_v42 = vadd.f32 %v2242_v58, %v1646_v48 }
 0x39f   :  { %v2244_v45 = vpop.f32.mrf.mxu0  ;;  %v2357_v6 = vpack.c.bf16 %v2343_v43, %v2341_v51  ;;  %v2297_v19 = vadd.f32 %v5424_v23, %v2273_v61 }
 0x3a0   :  { %v2275_v25 = vadd.f32 %v2244_v45, %v1647_v60  ;;  %v2344_v5 = vsel %vm2312_vm12, %v2296_v21, %v2328_v0  ;;  %v2298_v13 = vadd.f32 %v5421_v26, %v2274_v42  ;;  %v1639_v21 = vmul.f32 0.2, %v5434_v32  ;;  %v4843_v0 = vld [vmem:[#allocation7 + $0x544] ss:$8 sps:$4 sm:$0xff]  }
 0x3a1   :  { %v2246_v52 = vpop.f32.mrf.mxu0  ;;  %v2358_v15 = vpack.c.bf16 %v2344_v5, %v2342_v33  ;;  %v2329_v8 = vmul.f32 0.2, %v2297_v19  ;;  %vm2313_vm4 = vcmp.ge.f32.partialorder %v2297_v19, 0.0  ;;  %v1653_v60 = vsel %vm1621_vm0, %v5429_v34, %v1637_v36  ;;  %v4855_v36 = vld [vmem:[#allocation7 + $0x504] ss:$8 sps:$4 sm:$0xff]  }
 0x3a2   :  { %v2299_v3 = vadd.f32 %v5424_v23, %v2275_v25  ;;  %v2276_v47 = vadd.f32 %v2246_v52, %v1648_v2  ;;  %v2330_v53 = vmul.f32 0.2, %v2298_v13  ;;  %vm2314_vm3 = vcmp.ge.f32.partialorder %v2298_v13, 0.0 }
 0x3a3   :  { %v2250_v16 = vpop.f32.mrf.mxu0  ;;  %2929 = vmatprep.mubr.bf16.mxu0 %v2358_v15  ;;  %3267 = vmatprep.mubr.bf16.mxu1 %v2358_v15  ;;  %v2345_v50 = vsel %vm2313_vm4, %v2297_v19, %v2329_v8  ;;  %v1654_v42 = vsel %vm1622_vm5, %v5432_v24, %v1638_v44  ;;  %v1640_v2 = vmul.f32 0.2, %v5455_v10  ;;  %v1655_v40 = vsel %vm1623_vm6, %v5434_v32, %v1639_v21  ;;  %v4846_v15 = vld [vmem:[#allocation7 + $0x534] ss:$8 sps:$4 sm:$0xff]   ;;  %v4862_v44 = vld [vmem:[#allocation7 + $0x5d0] ss:$8 sps:$4 sm:$0xff]  }
 0x3a4   :  { %v2300_v31 = vadd.f32 %v5421_v26, %v2276_v47  ;;  %2930 = vmatmul.mubr.bf16.vlgmr.msra.gmra.mxu0 %v2357_v6  ;;  %3268 = vmatmul.mubr.bf16.vlgmr.msra.gmra.mxu1 %v2357_v6  ;;  %v2331_v27 = vmul.f32 0.2, %v2299_v3  ;;  %vm2315_vm1 = vcmp.ge.f32.partialorder %v2299_v3, 0.0  ;;  %v2277_v56 = vadd.f32 %v2250_v16, %v1649_v7  ;;  %v4871_v21 = vld [vmem:[#allocation7 + $0x5a0] ss:$8 sps:$4 sm:$0xff]  }
 0x3a5   :  { %v2252_v1 = vpop.f32.mrf.mxu0  ;;  %3582 = vmatpush1.bf16.msra.mxu0 %v4832_v12  ;;  %v2346_v11 = vsel %vm2314_vm3, %v2298_v13, %v2330_v53  ;;  %v4841_v13 = vld [vmem:[#allocation7 + $0x540] ss:$8 sps:$4 sm:$0xff]   ;;  %v1656_v55 = vsel %vm1624_vm7, %v5455_v10, %v1640_v2 }
 0x3a6   :  { %vm2316_vm2 = vcmp.ge.f32.partialorder %v2300_v31, 0.0  ;;  %v2332_v28 = vmul.f32 0.2, %v2300_v31  ;;  %v2278_v30 = vadd.f32 %v2252_v1, %v1650_v62  ;;  %3583 = vmatprep.subr.bf16.mxu0 %v4837_v63  ;;  %v2347_v41 = vsel %vm2315_vm1, %v2299_v3, %v2331_v27  ;;  %v4849_v27 = vld [vmem:[#allocation7 + $0x524] ss:$8 sps:$4 sm:$0xff]  }
 0x3a7   :  { %v2254_v37 = vpop.f32.mrf.mxu0  ;;  %v2301_v35 = vadd.f32 %v5424_v23, %v2277_v56  ;;  %v2359_v14 = vpack.c.bf16 %v2347_v41, %v2345_v50  ;;  %v4864_v41 = vld [vmem:[#allocation7 + $0x5d4] ss:$8 sps:$4 sm:$0xff]  }
 0x3a8   :  { %v2279_v22 = vadd.f32 %v2254_v37, %v1651_v9  ;;  %v2302_v49 = vadd.f32 %v5421_v26, %v2278_v30  ;;  %v2348_v38 = vsel %vm2316_vm2, %v2300_v31, %v2332_v28  ;;  %v4844_v31 = vld [vmem:[#allocation7 + $0x530] ss:$8 sps:$4 sm:$0xff]   ;;  %v4847_v28 = vld [vmem:[#allocation7 + $0x520] ss:$8 sps:$4 sm:$0xff]  }
 0x3a9   :  { %v2256_v59 = vpop.f32.mrf.mxu0  ;;  %3584 = vmatpush1.bf16.msra.mxu0 %v4835_v29  ;;  %v2360_v17 = vpack.c.bf16 %v2348_v38, %v2346_v11  ;;  %v2333_v33 = vmul.f32 0.2, %v2301_v35  ;;  %vm2317_vm11 = vcmp.ge.f32.partialorder %v2301_v35, 0.0  ;;  %v4850_v37 = vld [vmem:[#allocation7 + $0x510] ss:$8 sps:$4 sm:$0xff]   ;;  %v5508_v11 = vpop.f32.mrf.mxu1 }
 0x3aa   :  { %v2303_v46 = vadd.f32 %v5424_v23, %v2279_v22  ;;  %v2280_v18 = vadd.f32 %v2256_v59, %v1652_v20  ;;  %3585 = vmatprep.subr.bf16.mxu0 %v4840_v39  ;;  %v2334_v43 = vmul.f32 0.2, %v2302_v49  ;;  %vm2318_vm10 = vcmp.ge.f32.partialorder %v2302_v49, 0.0  ;;  %v4852_v39 = vld [vmem:[#allocation7 + $0x514] ss:$8 sps:$4 sm:$0xff]  }
 0x3ab   :  { %v2260_v48 = vpop.f32.mrf.mxu0  ;;  %2939 = vmatprep.mubr.bf16.mxu0 %v2360_v17  ;;  %3277 = vmatprep.mubr.bf16.mxu1 %v2360_v17  ;;  %v2349_v16 = vsel %vm2317_vm11, %v2301_v35, %v2333_v33  ;;  %v4853_v22 = vld [vmem:[#allocation7 + $0x500] ss:$8 sps:$4 sm:$0xff]   ;;  %v4858_v20 = vld [vmem:[#allocation7 + $0x5f4] ss:$8 sps:$4 sm:$0xff]   ;;  %v4861_v59 = vld [vmem:[#allocation7 + $0x5e4] ss:$8 sps:$4 sm:$0xff]   ;;  %v5510_v17 = vpop.f32.mrf.mxu1 }
 0x3ac   :  { %v2304_v58 = vadd.f32 %v5421_v26, %v2280_v18  ;;  %v2335_v61 = vmul.f32 0.2, %v2303_v46  ;;  %vm2319_vm8 = vcmp.ge.f32.partialorder %v2303_v46, 0.0  ;;  %2940 = vmatmul.mubr.bf16.gmra.mxu0 %v2359_v14  ;;  %3278 = vmatmul.mubr.bf16.gmra.mxu1 %v2359_v14  ;;  %v2281_v5 = vadd.f32 %v2260_v48, %v1653_v60  ;;  %v4859_v38 = vld [vmem:[#allocation7 + $0x5e0] ss:$8 sps:$4 sm:$0xff]  }
 0x3ad   :  { %v2262_v45 = vpop.f32.mrf.mxu0  ;;  %3586 = vmatpush1.bf16.msra.mxu0 %v4838_v57  ;;  %v2350_v63 = vsel %vm2318_vm10, %v2302_v49, %v2334_v43  ;;  %v4856_v49 = vld [vmem:[#allocation7 + $0x5f0] ss:$8 sps:$4 sm:$0xff]   ;;  %v4865_v18 = vld [vmem:[#allocation7 + $0x5c0] ss:$8 sps:$4 sm:$0xff]   ;;  %v4870_v48 = vld [vmem:[#allocation7 + $0x5b4] ss:$8 sps:$4 sm:$0xff]   ;;  %v5512_v50 = vpop.f32.mrf.mxu1 }
 0x3ae   :  { %vm2320_vm9 = vcmp.ge.f32.partialorder %v2304_v58, 0.0  ;;  %v2336_v25 = vmul.f32 0.2, %v2304_v58  ;;  %v2282_v34 = vadd.f32 %v2262_v45, %v1654_v42  ;;  %3587 = vmatprep.subr.bf16.mxu0 %v4843_v0  ;;  %v2351_v3 = vsel %vm2319_vm8, %v2303_v46, %v2335_v61  ;;  %v4867_v46 = vld [vmem:[#allocation7 + $0x5c4] ss:$8 sps:$4 sm:$0xff]  }
 0x3af   :  { %v2264_v51 = vpop.f32.mrf.mxu0  ;;  %v2305_v19 = vadd.f32 %v5424_v23, %v2281_v5  ;;  %v2361_v10 = vpack.c.bf16 %v2351_v3, %v2349_v16  ;;  %v4868_v35 = vld [vmem:[#allocation7 + $0x5b0] ss:$8 sps:$4 sm:$0xff]   ;;  %v4873_v57 = vld [vmem:[#allocation7 + $0x5a4] ss:$8 sps:$4 sm:$0xff]   ;;  %v5514_v60 = vpop.f32.mrf.mxu1  ;;  %v4877_v43 = vld [vmem:[#allocation7 + $0x580] ss:$8 sps:$4 sm:$0xff]  }
 0x3b0   :  { %v2306_v24 = vadd.f32 %v5421_v26, %v2282_v34  ;;  %v2283_v52 = vadd.f32 %v2264_v51, %v1655_v40  ;;  %v2352_v6 = vsel %vm2320_vm9, %v2304_v58, %v2336_v25  ;;  %v4876_v58 = vld [vmem:[#allocation7 + $0x594] ss:$8 sps:$4 sm:$0xff]   ;;  %v4874_v14 = vld [vmem:[#allocation7 + $0x590] ss:$8 sps:$4 sm:$0xff]   ;;  %v4879_v61 = vld [vmem:[#allocation7 + $0x584] ss:$8 sps:$4 sm:$0xff]  }
 0x3b1   :  { %v2266_v12 = vpop.f32.mrf.mxu0  ;;  %v2362_v7 = vpack.c.bf16 %v2352_v6, %v2350_v63  ;;  %3588 = vmatpush1.bf16.msra.mxu0 %v4841_v13  ;;  %vm2321_vm15 = vcmp.ge.f32.partialorder %v2305_v19, 0.0  ;;  %v5516_v0 = vpop.f32.mrf.mxu1  ;;  %v4880_v5 = vld [vmem:[#allocation10 + $0x78] sm:$0xff]   ;;  %v4882_v51 = vld [vmem:[#allocation10 + $0x70] sm:$0xff]   ;;  %v4887_v3 = vld [vmem:[#allocation10 + $0x20] sm:$0xff]  }
 0x3b2   :  { %v2307_v32 = vadd.f32 %v5424_v23, %v2283_v52  ;;  %v2284_v47 = vadd.f32 %v2266_v12, %v1656_v55  ;;  %v2338_v4 = vmul.f32 0.2, %v2306_v24  ;;  %3589 = vmatprep.subr.bf16.mxu0 %v4846_v15  ;;  %vm2322_vm12 = vcmp.ge.f32.partialorder %v2306_v24, 0.0  ;;  %v4881_v40 = vld [vmem:[#allocation10 + $0x38] sm:$0xff]   ;;  %4343 = vmatprep.subr.bf16.mxu1 %v4880_v5  ;;  %v4884_v52 = vld [vmem:[#allocation10 + $0x68] sm:$0xff]   ;;  %v4886_v12 = vld [vmem:[#allocation10 + $0x60] sm:$0xff]  }
 0x3b3   :  { %2949 = vmatprep.mubr.bf16.mxu0 %v2362_v7  ;;  %3287 = vmatprep.mubr.bf16.mxu1 %v2362_v7  ;;  %v2337_v23 = vmul.f32 0.2, %v2305_v19  ;;  %v5518_v42 = vpop.f32.mrf.mxu1  ;;  %v4885_v55 = vld [vmem:[#allocation10 + $0x28] sm:$0xff]   ;;  %v4889_v63 = vld [vmem:[#allocation10 + $0x18] sm:$0xff]  }
 0x3b4   :  { %v2308_v53 = vadd.f32 %v5421_v26, %v2284_v47  ;;  %v2339_v62 = vmul.f32 0.2, %v2307_v32  ;;  %vm2323_vm13 = vcmp.ge.f32.partialorder %v2307_v32, 0.0  ;;  %2950 = vmatmul.mubr.bf16.gmra.mxu0 %v2361_v10  ;;  %3288 = vmatmul.mubr.bf16.gmra.mxu1 %v2361_v10  ;;  %v2354_v9 = vsel %vm2322_vm12, %v2306_v24, %v2338_v4  ;;  %v4883_v24 = vld [vmem:[#allocation10 + $0x30] sm:$0xff]  }
 0x3b5   :  { %3590 = vmatpush1.bf16.msra.mxu0 %v4844_v31  ;;  %v2353_v8 = vsel %vm2321_vm15, %v2305_v19, %v2337_v23  ;;  %v5520_v45 = vpop.f32.mrf.mxu1  ;;  %4344 = vmatpush3.bf16.msra.mxu1 %v4881_v40 }
 0x3b6   :  { %vm2324_vm14 = vcmp.ge.f32.partialorder %v2308_v53, 0.0  ;;  %v2340_v1 = vmul.f32 0.2, %v2308_v53  ;;  %3591 = vmatprep.subr.bf16.mxu0 %v4849_v27  ;;  %v2355_v30 = vsel %vm2323_vm13, %v2307_v32, %v2339_v62  ;;  %4345 = vmatprep.subr.bf16.mxu1 %v4882_v51  ;;  %v4888_v32 = vld [vmem:[#allocation10 + $0x58] sm:$0xff]  }
 0x3b7   :  { %v2363_v56 = vpack.c.bf16 %v2355_v30, %v2353_v8  ;;  %v5522_v2 = vpop.f32.mrf.mxu1 }
 0x3b8   :  { %v2356_v29 = vsel %vm2324_vm14, %v2308_v53, %v2340_v1 }
 0x3b9   :  { %v2364_v26 = vpack.c.bf16 %v2356_v29, %v2354_v9  ;;  %3592 = vmatpush1.bf16.msra.mxu0 %v4847_v28  ;;  %v5524_v25 = vpop.f32.mrf.mxu1  ;;  %4346 = vmatpush3.bf16.msra.mxu1 %v4883_v24 }
 0x3ba   :  { %3593 = vmatprep.subr.bf16.mxu0 %v4852_v39  ;;  %4347 = vmatprep.subr.bf16.mxu1 %v4884_v52 }
 0x3bb   :  { %2959 = vmatprep.mubr.bf16.mxu0 %v2364_v26  ;;  %3297 = vmatprep.mubr.bf16.mxu1 %v2364_v26  ;;  %v5526_v34 = vpop.f32.mrf.mxu1 }
 0x3bc   :  { %2960 = vmatmul.mubr.bf16.gmra.mxu0 %v2363_v56  ;;  %3298 = vmatmul.mubr.bf16.gmra.mxu1 %v2363_v56  ;;  %v3310_v56 = vsub.s32 6, %v5138_v54 }
 0x3bd   :  { %3594 = vmatpush1.bf16.msra.mxu0 %v4850_v37  ;;  %v5528_v33 = vpop.f32.mrf.mxu1  ;;  %4348 = vmatpush3.bf16.msra.mxu1 %v4885_v55 }
 0x3be   :  { %3595 = vmatprep.subr.bf16.mxu0 %v4855_v36  ;;  %4349 = vmatprep.subr.bf16.mxu1 %v4886_v12 }
 0x3bf   :  { %v5530_v13 = vpop.f32.mrf.mxu1 }
 0x3c1   :  { %3596 = vmatpush1.bf16.msra.mxu0 %v4853_v22  ;;  %v5532_v15 = vpop.f32.mrf.mxu1  ;;  %4350 = vmatpush3.bf16.msra.mxu1 %v4887_v3  ;;  %v5574_v22 = vld [vmem:[#allocation8 + $0x8] sm:$0xff] }
 0x3c2   :  { %3597 = vmatprep.subr.bf16.mxu0 %v4858_v20  ;;  %4351 = vmatprep.subr.bf16.mxu1 %v4888_v32  ;;  %v5577_v20 = vrot.slane %v5574_v22, %v3310_v56 }
 0x3c3   :  { %v5534_v6 = vpop.f32.mrf.mxu1 }
 0x3c5   :  { %3598 = vmatpush2.bf16.msra.mxu0 %v4856_v49  ;;  %v5536_v47 = vpop.f32.mrf.mxu1  ;;  %4352 = vmatpush3.bf16.msra.mxu1 %v4889_v63 }
 0x3c6   :  { %3599 = vmatprep.subr.bf16.mxu0 %v4861_v59  ;;  %v5580_v59 = vld [vmem:[#allocation8] sm:$0xff] }
 0x3c7   :  { %v5538_v19 = vpop.f32.mrf.mxu1 }
 0x3c9   :  { %3600 = vmatpush2.bf16.msra.mxu0 %v4859_v38  ;;  %v5540_v7 = vpop.f32.mrf.mxu1  ;;  %v5583_v38 = vrot.slane %v5580_v59, %v3310_v56 }
 0x3ca   :  { %3601 = vmatprep.subr.bf16.mxu0 %v4864_v41 }
 0x3cb   :  { %v5542_v16 = vpop.f32.mrf.mxu1 }
 0x3cd   :  { %3602 = vmatpush2.bf16.msra.mxu0 %v4862_v44  ;;  %v5544_v31 = vpop.f32.mrf.mxu1 }
 0x3ce   :  { %3603 = vmatprep.subr.bf16.mxu0 %v4867_v46 }
 0x3cf   :  { %v5546_v4 = vpop.f32.mrf.mxu1 }
 0x3d1   :  { %3604 = vmatpush2.bf16.msra.mxu0 %v4865_v18  ;;  %v5548_v53 = vpop.f32.mrf.mxu1 }
 0x3d2   :  { %3605 = vmatprep.subr.bf16.mxu0 %v4870_v48 }
 0x3d3   :  { %v5550_v10 = vpop.f32.mrf.mxu1 }
 0x3d5   :  { %3606 = vmatpush2.bf16.msra.mxu0 %v4868_v35  ;;  %v5552_v27 = vpop.f32.mrf.mxu1 }
 0x3d6   :  { %3607 = vmatprep.subr.bf16.mxu0 %v4873_v57 }
 0x3d7   :  { %v5554_v62 = vpop.f32.mrf.mxu1 }
 0x3d9   :  { %3608 = vmatpush2.bf16.msra.mxu0 %v4871_v21  ;;  %v5556_v1 = vpop.f32.mrf.mxu1 }
 0x3da   :  { %3609 = vmatprep.subr.bf16.mxu0 %v4876_v58 }
 0x3db   :  { %v5558_v23 = vpop.f32.mrf.mxu1 }
 0x3dd   :  { %3610 = vmatpush2.bf16.msra.mxu0 %v4874_v14  ;;  %v5560_v9 = vpop.f32.mrf.mxu1 }
 0x3de   :  { %3611 = vmatprep.subr.bf16.mxu0 %v4879_v61 }
 0x3df   :  { %v5562_v29 = vpop.f32.mrf.mxu1 }
 0x3e1   :  { %3612 = vmatpush2.bf16.msra.mxu0 %v4877_v43  ;;  %v5564_v28 = vpop.f32.mrf.mxu1 }
 0x3e3   :  { %v5566_v26 = vpop.f32.mrf.mxu1 }
 0x3e5   :  { %v5568_v30 = vpop.f32.mrf.mxu1 }
 0x3e7   :  { %v5570_v39 = vpop.f32.mrf.mxu1 }
 0x464   :  { %v3269_v8 = vpop.f32.mrf.mxu1 }
 0x465   :  { %v3270_v49 = vadd.f32 %v3269_v8, %v5508_v11 }
 0x466   :  { %v3271_v37 = vpop.f32.mrf.mxu1 }
 0x467   :  { %v3272_v36 = vadd.f32 %v3271_v37, %v5510_v17  ;;  %v3316_v35 = vadd.f32 %v5583_v38, %v3270_v49 }
 0x468   :  { %v3273_v41 = vpop.f32.mrf.mxu1 }
 0x469   :  { %v3274_v44 = vadd.f32 %v3273_v41, %v5512_v50  ;;  %v3317_v18 = vadd.f32 %v5577_v20, %v3272_v36  ;;  %v3348_v14 = vmul.f32 0.2, %v3316_v35  ;;  %vm3332_vm3 = vcmp.ge.f32.partialorder %v3316_v35, 0.0 }
 0x46a   :  { %v3275_v46 = vpop.f32.mrf.mxu1 }
 0x46b   :  { %v3318_v48 = vadd.f32 %v5583_v38, %v3274_v44  ;;  %v3276_v17 = vadd.f32 %v3275_v46, %v5514_v60  ;;  %v3349_v58 = vmul.f32 0.2, %v3317_v18  ;;  %vm3333_vm1 = vcmp.ge.f32.partialorder %v3317_v18, 0.0 }
 0x46c   :  { %v3279_v57 = vpop.f32.mrf.mxu1  ;;  %v3364_v52 = vsel %vm3332_vm3, %v3316_v35, %v3348_v14 }
 0x46d   :  { %v3350_v21 = vmul.f32 0.2, %v3318_v48  ;;  %v3319_v11 = vadd.f32 %v5577_v20, %v3276_v17  ;;  %vm3334_vm0 = vcmp.ge.f32.partialorder %v3318_v48, 0.0  ;;  %v3280_v5 = vadd.f32 %v3279_v57, %v5516_v0 }
 0x46e   :  { %v3281_v50 = vpop.f32.mrf.mxu1  ;;  %v3365_v60 = vsel %vm3333_vm1, %v3317_v18, %v3349_v58 }
 0x46f   :  { %vm3335_vm2 = vcmp.ge.f32.partialorder %v3319_v11, 0.0  ;;  %v3351_v43 = vmul.f32 0.2, %v3319_v11  ;;  %v3366_v61 = vsel %vm3334_vm0, %v3318_v48, %v3350_v21  ;;  %v3282_v40 = vadd.f32 %v3281_v50, %v5518_v42 }
 0x470   :  { %v3283_v51 = vpop.f32.mrf.mxu1  ;;  %v3380_v32 = vpack.c.bf16 %v3366_v61, %v3364_v52  ;;  %v3320_v56 = vadd.f32 %v5583_v38, %v3280_v5 }
 0x471   :  { %v3367_v24 = vsel %vm3335_vm2, %v3319_v11, %v3351_v43  ;;  %v3284_v55 = vadd.f32 %v3283_v51, %v5520_v45  ;;  %v3321_v63 = vadd.f32 %v5577_v20, %v3282_v40 }
 0x472   :  { %v3285_v12 = vpop.f32.mrf.mxu1  ;;  %v3381_v3 = vpack.c.bf16 %v3367_v24, %v3365_v60  ;;  %v3352_v44 = vmul.f32 0.2, %v3320_v56  ;;  %vm3336_vm7 = vcmp.ge.f32.partialorder %v3320_v56, 0.0 }
 0x473   :  { %v3286_v8 = vadd.f32 %v3285_v12, %v5522_v2  ;;  %v3322_v37 = vadd.f32 %v5583_v38, %v3284_v55  ;;  %v3353_v41 = vmul.f32 0.2, %v3321_v63  ;;  %vm3337_vm6 = vcmp.ge.f32.partialorder %v3321_v63, 0.0 }
 0x474   :  { %v3289_v0 = vpop.f32.mrf.mxu1  ;;  %3613 = vmatprep.mubr.bf16.mxu0 %v3381_v3  ;;  %v3368_v61 = vsel %vm3336_vm7, %v3320_v56, %v3352_v44 }
 0x475   :  { %v3323_v42 = vadd.f32 %v5577_v20, %v3286_v8  ;;  %3614 = vmatmul.mubr.bf16.vlgmr.msra.gmra.mxu0 %v3380_v32  ;;  %v3354_v36 = vmul.f32 0.2, %v3322_v37  ;;  %vm3338_vm4 = vcmp.ge.f32.partialorder %v3322_v37, 0.0  ;;  %v3290_v46 = vadd.f32 %v3289_v0, %v5524_v25 }
 0x476   :  { %v3291_v49 = vpop.f32.mrf.mxu1  ;;  %v3369_v14 = vsel %vm3337_vm6, %v3321_v63, %v3353_v41 }
 0x477   :  { %vm3339_vm5 = vcmp.ge.f32.partialorder %v3323_v42, 0.0  ;;  %v3355_v45 = vmul.f32 0.2, %v3323_v42  ;;  %v3292_v2 = vadd.f32 %v3291_v49, %v5526_v34  ;;  %v3370_v11 = vsel %vm3338_vm4, %v3322_v37, %v3354_v36 }
 0x478   :  { %v3293_v18 = vpop.f32.mrf.mxu1  ;;  %v3324_v43 = vadd.f32 %v5583_v38, %v3290_v46  ;;  %v3382_v5 = vpack.c.bf16 %v3370_v11, %v3368_v61  ;;  %v4894_v11 = vld [vmem:[#allocation10 + $0x40] sm:$0xff]  }
 0x479   :  { %v3294_v35 = vadd.f32 %v3293_v18, %v5528_v33  ;;  %v3325_v48 = vadd.f32 %v5577_v20, %v3292_v2  ;;  %v3371_v21 = vsel %vm3339_vm5, %v3323_v42, %v3355_v45 }
 0x47a   :  { %v3295_v17 = vpop.f32.mrf.mxu1  ;;  %v3383_v25 = vpack.c.bf16 %v3371_v21, %v3369_v14  ;;  %vm3340_vm11 = vcmp.ge.f32.partialorder %v3324_v43, 0.0  ;;  %v4893_v21 = vld [vmem:[#allocation10 + $0x8] sm:$0xff]  }
 0x47b   :  { %v3326_v57 = vadd.f32 %v5583_v38, %v3294_v35  ;;  %v3296_v58 = vadd.f32 %v3295_v17, %v5530_v13  ;;  %v3357_v40 = vmul.f32 0.2, %v3325_v48  ;;  %v3356_v13 = vmul.f32 0.2, %v3324_v43  ;;  %v4891_v17 = vld [vmem:[#allocation10 + $0x10] sm:$0xff]  }
 0x47c   :  { %v3299_v50 = vpop.f32.mrf.mxu1  ;;  %3623 = vmatprep.mubr.bf16.mxu0 %v3383_v25  ;;  %vm3341_vm10 = vcmp.ge.f32.partialorder %v3325_v48, 0.0 }
 0x47d   :  { %v3327_v34 = vadd.f32 %v5577_v20, %v3296_v58  ;;  %v3358_v33 = vmul.f32 0.2, %v3326_v57  ;;  %vm3342_vm8 = vcmp.ge.f32.partialorder %v3326_v57, 0.0  ;;  %3624 = vmatmul.mubr.bf16.gmra.mxu0 %v3382_v5  ;;  %v3300_v52 = vadd.f32 %v3299_v50, %v5532_v15  ;;  %v2931_v58 = vpop.f32.mrf.mxu0 }
 0x47e   :  { %v3301_v51 = vpop.f32.mrf.mxu1  ;;  %v3373_v37 = vsel %vm3341_vm10, %v3325_v48, %v3357_v40  ;;  %v3372_v36 = vsel %vm3340_vm11, %v3324_v43, %v3356_v13  ;;  %v4890_v48 = vld [vmem:[#allocation10 + $0x50] sm:$0xff]  }
 0x47f   :  { %vm3343_vm9 = vcmp.ge.f32.partialorder %v3327_v34, 0.0  ;;  %v3359_v24 = vmul.f32 0.2, %v3327_v34  ;;  %v3302_v60 = vadd.f32 %v3301_v51, %v5534_v6  ;;  %v3374_v8 = vsel %vm3342_vm8, %v3326_v57, %v3358_v33  ;;  %4353 = vmatprep.subr.bf16.mxu1 %v4890_v48  ;;  %v4895_v57 = vld [vmem:[#allocation10] sm:$0xff]   ;;  %v2933_v14 = vpop.f32.mrf.mxu0 }
 0x480   :  { %v3303_v55 = vpop.f32.mrf.mxu1  ;;  %v3328_v0 = vadd.f32 %v5583_v38, %v3300_v52  ;;  %v3384_v49 = vpack.c.bf16 %v3374_v8, %v3372_v36  ;;  %4354 = vmatpush3.bf16.msra.mxu1 %v4891_v17  ;;  %v2932_v52 = vadd.f32 %v2931_v58, %v5540_v7 }
 0x481   :  { %v3304_v12 = vadd.f32 %v3303_v55, %v5536_v47  ;;  %v3329_v3 = vadd.f32 %v5577_v20, %v3302_v60  ;;  %v3375_v63 = vsel %vm3343_vm9, %v3327_v34, %v3359_v24  ;;  %v2935_v43 = vpop.f32.mrf.mxu0  ;;  %v2934_v55 = vadd.f32 %v2933_v14, %v5542_v16 }
 0x482   :  { %v3305_v32 = vpop.f32.mrf.mxu1  ;;  %v3385_v42 = vpack.c.bf16 %v3375_v63, %v3373_v37  ;;  %v3360_v47 = vmul.f32 0.2, %v3328_v0  ;;  %vm3344_vm15 = vcmp.ge.f32.partialorder %v3328_v0, 0.0 }
 0x483   :  { %v3330_v56 = vadd.f32 %v5583_v38, %v3304_v12  ;;  %v3306_v6 = vadd.f32 %v3305_v32, %v5538_v19  ;;  %v3361_v15 = vmul.f32 0.2, %v3329_v3  ;;  %vm3345_vm12 = vcmp.ge.f32.partialorder %v3329_v3, 0.0  ;;  %v2937_v50 = vpop.f32.mrf.mxu0  ;;  %v5624_v32 = vld [vmem:[#allocation8 + $0x18] ss:$0 sm:$0xff] }
 0x484   :  { %3633 = vmatprep.mubr.bf16.mxu0 %v3385_v42  ;;  %v3376_v19 = vsel %vm3344_vm15, %v3328_v0, %v3360_v47  ;;  %v2936_v12 = vadd.f32 %v2935_v43, %v5544_v31  ;;  %v2938_v63 = vadd.f32 %v2937_v50, %v5546_v4  ;;  %v2979_v37 = vadd.f32 %v5624_v32, %v2934_v55 }
 0x485   :  { %v3362_v41 = vmul.f32 0.2, %v3330_v56  ;;  %v3331_v45 = vadd.f32 %v5577_v20, %v3306_v6  ;;  %vm3346_vm13 = vcmp.ge.f32.partialorder %v3330_v56, 0.0  ;;  %3634 = vmatmul.mubr.bf16.gmra.mxu0 %v3384_v49  ;;  %v3377_v46 = vsel %vm3345_vm12, %v3329_v3, %v3361_v15  ;;  %v4892_v20 = vld [vmem:[#allocation10 + $0x48] sm:$0xff]   ;;  %v2941_v25 = vpop.f32.mrf.mxu0  ;;  %v5622_v3 = vld [vmem:[#allocation8 + $0x10] ss:$0 sm:$0xff] }
 0x486   :  { %4355 = vmatprep.subr.bf16.mxu1 %v4892_v20  ;;  %v2980_v0 = vadd.f32 %v5622_v3, %v2936_v12  ;;  %v2981_v7 = vadd.f32 %v5624_v32, %v2938_v63  ;;  %v3011_v42 = vmul.f32 0.2, %v2979_v37  ;;  %vm2995_vm1 = vcmp.ge.f32.partialorder %v2979_v37, 0.0 }
 0x487   :  { %vm3347_vm14 = vcmp.ge.f32.partialorder %v3331_v45, 0.0  ;;  %v3363_v44 = vmul.f32 0.2, %v3331_v45  ;;  %v3378_v38 = vsel %vm3346_vm13, %v3330_v56, %v3362_v41  ;;  %4356 = vmatpush3.bf16.msra.mxu1 %v4893_v21  ;;  %v2943_v61 = vpop.f32.mrf.mxu0  ;;  %v2978_v56 = vadd.f32 %v5622_v3, %v2932_v52 }
 0x488   :  { %v3386_v35 = vpack.c.bf16 %v3378_v38, %v3376_v19  ;;  %4357 = vmatprep.subr.bf16.mxu1 %v4894_v11  ;;  %v3012_v36 = vmul.f32 0.2, %v2980_v0  ;;  %v2944_v49 = vadd.f32 %v2943_v61, %v5550_v10  ;;  %vm2996_vm2 = vcmp.ge.f32.partialorder %v2980_v0, 0.0 }
 0x489   :  { %v3379_v2 = vsel %vm3347_vm14, %v3331_v45, %v3363_v44  ;;  %v2945_v34 = vpop.f32.mrf.mxu0  ;;  %v3010_v16 = vmul.f32 0.2, %v2978_v56  ;;  %vm2994_vm0 = vcmp.ge.f32.partialorder %v2978_v56, 0.0  ;;  %v3672_v15 = vsub.s32 7, %v5138_v54 }
 0x48a   :  { %v3387_v18 = vpack.c.bf16 %v3379_v2, %v3377_v46  ;;  %v2946_v4 = vadd.f32 %v2945_v34, %v5552_v27  ;;  %v3013_v45 = vmul.f32 0.2, %v2981_v7  ;;  %v2942_v47 = vadd.f32 %v2941_v25, %v5548_v53 }
 0x48b   :  { %4358 = vmatpush3.bf16.msra.mxu1 %v4895_v57  ;;  %v2947_v5 = vpop.f32.mrf.mxu0  ;;  %vm2997_vm3 = vcmp.ge.f32.partialorder %v2981_v7, 0.0  ;;  %v3026_v46 = vsel %vm2994_vm0, %v2978_v56, %v3010_v16  ;;  %v3027_v2 = vsel %vm2995_vm1, %v2979_v37, %v3011_v42  ;;  %v3028_v38 = vsel %vm2996_vm2, %v2980_v0, %v3012_v36 }
 0x48c   :  { %3643 = vmatprep.mubr.bf16.mxu0 %v3387_v18  ;;  %v2948_v44 = vadd.f32 %v2947_v5, %v5554_v62  ;;  %v2983_v10 = vadd.f32 %v5624_v32, %v2944_v49  ;;  %v2984_v54 = vadd.f32 %v5622_v3, %v2946_v4  ;;  %v5646_v17 = vrot.slane %v5580_v59, %v3672_v15 }
 0x48d   :  { %3644 = vmatmul.mubr.bf16.gmra.mxu0 %v3386_v35  ;;  %v2951_v40 = vpop.f32.mrf.mxu0  ;;  %v5642_v35 = vrot.slane %v5574_v22, %v3672_v15  ;;  %v3029_v53 = vsel %vm2997_vm3, %v2981_v7, %v3013_v45  ;;  %v2982_v62 = vadd.f32 %v5622_v3, %v2942_v47 }
 0x48e   :  { %v2985_v11 = vadd.f32 %v5624_v32, %v2948_v44  ;;  %v2952_v58 = vadd.f32 %v2951_v40, %v5556_v1  ;;  %v3015_v61 = vmul.f32 0.2, %v2983_v10  ;;  %v3016_v34 = vmul.f32 0.2, %v2984_v54 }
 0x48f   :  { %v2953_v33 = vpop.f32.mrf.mxu0  ;;  %v3014_v5 = vmul.f32 0.2, %v2982_v62  ;;  %vm2999_vm4 = vcmp.ge.f32.partialorder %v2983_v10, 0.0  ;;  %vm3000_vm5 = vcmp.ge.f32.partialorder %v2984_v54, 0.0  ;;  %vm2998_vm6 = vcmp.ge.f32.partialorder %v2982_v62, 0.0 }
 0x490   :  { %v2954_v22 = vadd.f32 %v2953_v33, %v5558_v23  ;;  %v3017_v40 = vmul.f32 0.2, %v2985_v11  ;;  %v2986_v33 = vadd.f32 %v5622_v3, %v2952_v58  ;;  %vm3001_vm7 = vcmp.ge.f32.partialorder %v2985_v11, 0.0 }
 0x491   :  { %v2955_v51 = vpop.f32.mrf.mxu0  ;;  %v3031_v12 = vsel %vm2999_vm4, %v2983_v10, %v3015_v61  ;;  %v3032_v63 = vsel %vm3000_vm5, %v2984_v54, %v3016_v34  ;;  %v3030_v37 = vsel %vm2998_vm6, %v2982_v62, %v3014_v5 }
 0x492   :  { %v2956_v59 = vadd.f32 %v2955_v51, %v5560_v9  ;;  %v2987_v9 = vadd.f32 %v5624_v32, %v2954_v22  ;;  %v3033_v16 = vsel %vm3001_vm7, %v2985_v11, %v3017_v40  ;;  %vm3002_vm10 = vcmp.ge.f32.partialorder %v2986_v33, 0.0 }
 0x493   :  { %v2957_v24 = vpop.f32.mrf.mxu0 }
 0x494   :  { %v2958_v55 = vadd.f32 %v2957_v24, %v5562_v29  ;;  %v2988_v51 = vadd.f32 %v5622_v3, %v2956_v59  ;;  %v3019_v47 = vmul.f32 0.2, %v2987_v9  ;;  %vm3003_vm8 = vcmp.ge.f32.partialorder %v2987_v9, 0.0 }
 0x495   :  { %v5615_v60 = vpop.f32.mrf.mxu0 }
 0x496   :  { %v2989_v29 = vadd.f32 %v5624_v32, %v2958_v55  ;;  %v2962_v42 = vadd.f32 %v5615_v60, %v5564_v28  ;;  %v3020_v44 = vmul.f32 0.2, %v2988_v51  ;;  %vm3004_vm9 = vcmp.ge.f32.partialorder %v2988_v51, 0.0 }
 0x497   :  { %v5617_v13 = vpop.f32.mrf.mxu0 }
 0x498   :  { %v2964_v36 = vadd.f32 %v5617_v13, %v5566_v26  ;;  %v3021_v60 = vmul.f32 0.2, %v2989_v29  ;;  %v2990_v13 = vadd.f32 %v5622_v3, %v2962_v42  ;;  %vm3005_vm11 = vcmp.ge.f32.partialorder %v2989_v29, 0.0 }
 0x499   :  { %v5627_v8 = vpop.f32.mrf.mxu0 }
 0x49a   :  { %v2966_v49 = vadd.f32 %v5627_v8, %v5568_v30  ;;  %v2991_v8 = vadd.f32 %v5624_v32, %v2964_v36  ;;  %v3037_v62 = vsel %vm3005_vm11, %v2989_v29, %v3021_v60  ;;  %v3022_v58 = vmul.f32 0.2, %v2990_v13  ;;  %v4287_v36 = vld [vmem:[%s5700_s5] ss:$0 sm:$0xff]  ;;  %s5044_s5 = smov [#allocation11]  }
 0x49b   :  { %v5633_v6 = vpop.f32.mrf.mxu0  ;;  %vm3006_vm14 = vcmp.ge.f32.partialorder %v2990_v13, 0.0  ;;  %s3947_s25 = sshll.u32 %s5044_s5, 4  ;;  %s3948_s25 = int_to_ptr.vmem [resolvable:$true] %s3947_s25 }
 0x49c   :  { %v2968_v28 = vadd.f32 %v5633_v6, %v5570_v39  ;;  %vm3007_vm12 = vcmp.ge.f32.partialorder %v2991_v8, 0.0  ;;  %s5004_s26 = scalar_lea.vmem %s3948_s25, 512  ;;  %p5009_p12 = scmp.lt.s32.totalorder %s3948_s25, %s3948_s25 }
 0x49d   :  { %p5005_p11 = scmp.ne.s32.totalorder %s3948_s25, %s5004_s26  ;;  %p5010_p13 = scmp.lt.s32.totalorder %s5004_s26, %s5004_s26 }
 0x49e   :  { %v2993_v6 = vadd.f32 %v5624_v32, %v2968_v28 }
 0x49f   :  { %p5011_p0 = por %p5010_p13, %p5009_p12 }
 0x4a0   :  { %vm3009_vm15 = vcmp.ge.f32.partialorder %v2993_v6, 0.0 }
 0x4a1   :  { %p5012_p1 = pnand %p5011_p0, %p5005_p11 }
 0x535   :  { %v3615_v31 = vpop.f32.mrf.mxu0 }
 0x536   :  { %v3654_v48 = vadd.f32 %v3615_v31, %v3026_v46 }
 0x537   :  { %v3617_v41 = vpop.f32.mrf.mxu0 }
 0x538   :  { %v3655_v19 = vadd.f32 %v3617_v41, %v3027_v2  ;;  %v3678_v50 = vadd.f32 %v5646_v17, %v3654_v48  ;;  %v3018_v41 = vmul.f32 0.2, %v2986_v33 }
 0x539   :  { %v3619_v18 = vpop.f32.mrf.mxu0 }
 0x53a   :  { %v3656_v27 = vadd.f32 %v3619_v18, %v3028_v38  ;;  %v3679_v14 = vadd.f32 %v5642_v35, %v3655_v19  ;;  %v2992_v18 = vadd.f32 %v5622_v3, %v2966_v49  ;;  %v3035_v19 = vsel %vm3003_vm8, %v2987_v9, %v3019_v47 }
 0x53b   :  { %v3621_v20 = vpop.f32.mrf.mxu0  ;;  %v3034_v48 = vsel %vm3002_vm10, %v2986_v33, %v3018_v41  ;;  %v3023_v3 = vmul.f32 0.2, %v2991_v8 }
 0x53c   :  { %v3657_v21 = vadd.f32 %v3621_v20, %v3029_v53  ;;  %v3680_v57 = vadd.f32 %v5646_v17, %v3656_v27  ;;  %v3036_v27 = vsel %vm3004_vm9, %v2988_v51, %v3020_v44  ;;  %vm3008_vm13 = vcmp.ge.f32.partialorder %v2992_v18, 0.0 }
 0x53d   :  { %v3625_v25 = vpop.f32.mrf.mxu0  ;;  %v3039_v5 = vsel %vm3007_vm12, %v2991_v8, %v3023_v3 }
 0x53e   :  { %v3681_v43 = vadd.f32 %v5642_v35, %v3657_v21  ;;  %v3694_v1 = vpack.c.bf16 %v3680_v57, %v3678_v50  ;;  %v3658_v24 = vadd.f32 %v3625_v25, %v3030_v37  ;;  %v3025_v25 = vmul.f32 0.2, %v2993_v6 }
 0x53f   :  { %v3627_v23 = vpop.f32.mrf.mxu0 }
 0x540   :  { %v3695_v52 = vpack.c.bf16 %v3681_v43, %v3679_v14  ;;  %v3659_v0 = vadd.f32 %v3627_v23, %v3031_v12  ;;  %v3682_v26 = vadd.f32 %v5646_v17, %v3658_v24  ;;  %v3024_v14 = vmul.f32 0.2, %v2992_v18 }
 0x541   :  { %v3629_v56 = vpop.f32.mrf.mxu0  ;;  %v3041_v9 = vsel %vm3009_vm15, %v2993_v6, %v3025_v25 }
 0x542   :  { %3869 = vmatprep.mubr.bf16.mxu1 %v3695_v52  ;;  %v3660_v7 = vadd.f32 %v3629_v56, %v3032_v63  ;;  %v3683_v46 = vadd.f32 %v5642_v35, %v3659_v0  ;;  %v3040_v52 = vsel %vm3008_vm13, %v2992_v18, %v3024_v14 }
 0x543   :  { %3870 = vmatmul.mubr.bf16.vlgmr.msra.gmra.mxu1 %v3694_v1  ;;  %v3631_v31 = vpop.f32.mrf.mxu0  ;;  %v3038_v1 = vsel %vm3006_vm14, %v2990_v13, %v3022_v58 }
 0x544   :  { %v3661_v4 = vadd.f32 %v3631_v31, %v3033_v16  ;;  %v3684_v15 = vadd.f32 %v5646_v17, %v3660_v7 }
 0x545   :  { %v3635_v45 = vpop.f32.mrf.mxu0 }
 0x546   :  { %v3685_v2 = vadd.f32 %v5642_v35, %v3661_v4  ;;  %v3696_v10 = vpack.c.bf16 %v3684_v15, %v3682_v26  ;;  %v3662_v20 = vadd.f32 %v3635_v45, %v3034_v48 }
 0x547   :  { %v3637_v30 = vpop.f32.mrf.mxu0 }
 0x548   :  { %v3697_v38 = vpack.c.bf16 %v3685_v2, %v3683_v46  ;;  %v3663_v53 = vadd.f32 %v3637_v30, %v3035_v19  ;;  %v3686_v50 = vadd.f32 %v5646_v17, %v3662_v20 }
 0x549   :  { %v3639_v54 = vpop.f32.mrf.mxu0 }
 0x54a   :  { %v3664_v39 = vadd.f32 %v3639_v54, %v3036_v27  ;;  %3877 = vmatprep.mubr.bf16.mxu1 %v3697_v38  ;;  %v3687_v43 = vadd.f32 %v5642_v35, %v3663_v53 }
 0x54b   :  { %v3641_v21 = vpop.f32.mrf.mxu0  ;;  %3878 = vmatmul.mubr.bf16.gmra.mxu1 %v3696_v10 }
 0x54c   :  { %v3665_v11 = vadd.f32 %v3641_v21, %v3037_v62  ;;  %v3688_v57 = vadd.f32 %v5646_v17, %v3664_v39 }
 0x54d   :  { %v3645_v22 = vpop.f32.mrf.mxu0 }
 0x54e   :  { %v3689_v59 = vadd.f32 %v5642_v35, %v3665_v11  ;;  %v3698_v34 = vpack.c.bf16 %v3688_v57, %v3686_v50  ;;  %v3666_v33 = vadd.f32 %v3645_v22, %v3038_v1 }
 0x54f   :  { %v3647_v32 = vpop.f32.mrf.mxu0 }
 0x550   :  { %v3699_v61 = vpack.c.bf16 %v3689_v59, %v3687_v43  ;;  %v3667_v23 = vadd.f32 %v3647_v32, %v3039_v5  ;;  %v3690_v0 = vadd.f32 %v5646_v17, %v3666_v33 }
 0x551   :  { %v3649_v55 = vpop.f32.mrf.mxu0 }
 0x552   :  { %v3668_v40 = vadd.f32 %v3649_v55, %v3040_v52  ;;  %3885 = vmatprep.mubr.bf16.mxu1 %v3699_v61  ;;  %v3691_v56 = vadd.f32 %v5642_v35, %v3667_v23 }
 0x553   :  { %v3651_v51 = vpop.f32.mrf.mxu0  ;;  %3886 = vmatmul.mubr.bf16.gmra.mxu1 %v3698_v34 }
 0x554   :  { %v3669_v12 = vadd.f32 %v3651_v51, %v3041_v9  ;;  %v3692_v63 = vadd.f32 %v5646_v17, %v3668_v40 }
 0x556   :  { %v3693_v37 = vadd.f32 %v5642_v35, %v3669_v12  ;;  %v3700_v29 = vpack.c.bf16 %v3692_v63, %v3690_v0 }
 0x558   :  { %v3701_v7 = vpack.c.bf16 %v3693_v37, %v3691_v56 }
 0x55a   :  { %3893 = vmatprep.mubr.bf16.mxu1 %v3701_v7 }
 0x55b   :  { %3894 = vmatmul.mubr.bf16.gmra.mxu1 %v3700_v29 }
 0x603   :  { %v4359_v24 = vpop.f32.mrf.mxu1 }
 0x605   :  { %v4360_v16 = vpop.f32.mrf.mxu1 }
 0x606   :  { %v4361_v42 = vadd.f32 %v4360_v16, %v4359_v24 }
 0x607   :  { %v4362_v31 = vpop.f32.mrf.mxu1 }
 0x608   :  { %v3872_v15 = vadd.f32 %v4361_v42, %v4287_v36 }
 0x609   :  { %v4363_v49 = vpop.f32.mrf.mxu1 }
 0x60a   :  { %v4364_v4 = vadd.f32 %v4363_v49, %v4362_v31 }
 0x60b   :  { %v4365_v45 = vpop.f32.mrf.mxu1 }
 0x60c   :  { %v3875_v41 = vadd.f32 %v4364_v4, %v4287_v36 }
 0x60d   :  { %v4366_v47 = vpop.f32.mrf.mxu1 }
 0x60e   :  { %v4323_v35 = vpack.c.bf16 %v3875_v41, %v3872_v15  ;;  %v4367_v44 = vadd.f32 %v4366_v47, %v4365_v45 }
 0x60f   :  { %v4368_v17 = vpop.f32.mrf.mxu1 }
 0x610   :  { %4324 = vst [vmem:[#allocation11] sm:$0xff] %v4323_v35   ;;  %v3880_v26 = vadd.f32 %v4367_v44, %v4287_v36 }
 0x611   :  { %v4369_v46 = vpop.f32.mrf.mxu1 }
 0x612   :  { %v4370_v2 = vadd.f32 %v4369_v46, %v4368_v17 }
 0x613   :  { %v4371_v28 = vpop.f32.mrf.mxu1 }
 0x614   :  { %v3883_v30 = vadd.f32 %v4370_v2, %v4287_v36 }
 0x615   :  { %v4372_v60 = vpop.f32.mrf.mxu1 }
 0x616   :  { %v4328_v13 = vpack.c.bf16 %v3883_v30, %v3880_v26  ;;  %v4373_v38 = vadd.f32 %v4372_v60, %v4371_v28 }
 0x617   :  { %v4374_v8 = vpop.f32.mrf.mxu1 }
 0x618   :  { %4340 = vst [vmem:[#allocation11 + $0x8] sm:$0xff] %v4328_v13   ;;  %v3888_v27 = vadd.f32 %v4373_v38, %v4287_v36 }
 0x619   :  { %v4375_v18 = vpop.f32.mrf.mxu1 }
 0x61a   :  { %v4376_v10 = vadd.f32 %v4375_v18, %v4374_v8 }
 0x61b   :  { %v4377_v19 = vpop.f32.mrf.mxu1 }
 0x61c   :  { %v3891_v54 = vadd.f32 %v4376_v10, %v4287_v36 }
 0x61d   :  { %v4378_v48 = vpop.f32.mrf.mxu1 }
 0x61e   :  { %v4333_v53 = vpack.c.bf16 %v3891_v54, %v3888_v27  ;;  %v4379_v6 = vadd.f32 %v4378_v48, %v4377_v19 }
 0x61f   :  { %v4380_v39 = vpop.f32.mrf.mxu1 }
 0x620   :  { %4341 = vst [vmem:[#allocation11 + $0x10] sm:$0xff] %v4333_v53   ;;  %v3896_v21 = vadd.f32 %v4379_v6, %v4287_v36 }
 0x621   :  { %v4381_v20 = vpop.f32.mrf.mxu1 }
 0x622   :  { %v4382_v62 = vadd.f32 %v4381_v20, %v4380_v39 }
 0x624   :  { %v3899_v11 = vadd.f32 %v4382_v62, %v4287_v36 }
 0x626   :  { %v4338_v57 = vpack.c.bf16 %v3899_v11, %v3896_v21 }
 0x628   :  { %4342 = vst [vmem:[#allocation11 + $0x18] sm:$0xff] %v4338_v57  }
 0x629   :  { %5015 = shalt.err (!%p5012_p1)
}
 0x62a   :  { %3953 = dma.vmem_to_hbm [thread:$0]  %s3948_s25, 512, %s5701_s6, [#allocation4], %s5037_s1, %s5037_s1, %s5038_s12  }
 0x62b   :  { %5030 = dma.done.wait [#allocation4], 512  }
 0x62c   :  { %5031 = vsyncadd [#allocation4], 4294966784 }
 0x62d   :  { %3957 = vsyncpa [#allocation3], 1 }
 0x62e   :  { %3958 = vsyncpa [#allocation6], 1 }
 0x62f   :  { %3959 = vsyncpa [#allocation9], 1 }
 0x630   :  { %3960 = vsyncpa [#allocation4], 1 }

// kernel: tpu_custom_call.1
= control target key start
LH: loop header
LB: loop body
LE: loop exit
PB: predicated region body
PF: predicated region fallthrough
CT: control target
= control target key end

     0   :  { %11 = vsyncpa [#allocation3], 0  ;;  %s5695_s0 = inlined_call_operand.hbm [shape: bf16[64,128], index: 0, kind: input, shape index: {}]   ;;  %s5696_s1 = inlined_call_operand.hbm [shape: bf16[3,128,512], index: 1, kind: input, shape index: {}]   ;;  %s5697_s2 = inlined_call_operand.hbm [shape: bf16[7,256,256], index: 2, kind: input, shape index: {}]   ;;  %s5698_s3 = inlined_call_operand.hbm [shape: f32[9,256], index: 3, kind: input, shape index: {}]   ;;  %s5699_s4 = inlined_call_operand.hbm [shape: bf16[256,128], index: 4, kind: input, shape index: {}]   ;;  %s5700_s5 = inlined_call_operand.vmem [shape: f32[1,128], index: 5, kind: input, shape index: {}]   ;;  %s5701_s6 = inlined_call_operand.hbm [shape: bf16[64,128], index: 6, kind: output, shape index: {}]  }
   0x1   :  { %12 = vsyncpa [#allocation6], 0 }
   0x2   :  { %13 = vsyncpa [#allocation9], 0 }
   0x3   :  { %14 = vsyncpa [#allocation4], 0  ;;  %s5032_s21 = smov [#allocation5]  }
   0x4   :  { %s32_s22 = sshll.u32 %s5032_s21, 4  ;;  %s33_s22 = int_to_ptr.vmem [resolvable:$true] %s32_s22 }
   0x5   :  { %s4912_s23 = scalar_lea.vmem %s33_s22, 12288  ;;  %p4917_p1 = scmp.lt.s32.totalorder %s33_s22, %s33_s22 }
   0x6   :  { %p4913_p0 = scmp.ne.s32.totalorder %s33_s22, %s4912_s23  ;;  %p4918_p2 = scmp.lt.s32.totalorder %s4912_s23, %s4912_s23 }
   0x8   :  { %p4919_p3 = por %p4918_p2, %p4917_p1 }
   0xa   :  { %p4920_p4 = pnand %p4919_p3, %p4913_p0 }
   0xc   :  { %4923 = shalt.err (!%p4920_p4)
}
   0xd   :  { %s5033_s24 = smov 256   ;;  %s5034_s25 = smov 16  }
   0xe   :  { %38 = dma.hbm_to_vmem [thread:$0]  %s5696_s1, 12288, %s33_s22, [#allocation6], %s5033_s24, %s5033_s24, %s5034_s25  }
   0xf   :  { %s5035_s28 = smov [#allocation8]   ;;  %s5036_s30 = smov [#allocation2]  }
  0x10   :  { %s56_s29 = sshll.u32 %s5035_s28, 4  ;;  %s20_s7 = sshll.u32 %s5036_s30, 4  ;;  %s57_s29 = int_to_ptr.vmem [resolvable:$true] %s56_s29  ;;  %s21_s7 = int_to_ptr.vmem [resolvable:$true] %s20_s7 }
  0x11   :  { %s4932_s8 = scalar_lea.vmem %s57_s29, 512  ;;  %p4937_p6 = scmp.lt.s32.totalorder %s57_s29, %s57_s29 }
  0x12   :  { %p4933_p5 = scmp.ne.s32.totalorder %s57_s29, %s4932_s8  ;;  %p4938_p7 = scmp.lt.s32.totalorder %s4932_s8, %s4932_s8 }
  0x14   :  { %p4939_p8 = por %p4938_p7, %p4937_p6 }
  0x16   :  { %p4940_p9 = pnand %p4939_p8, %p4933_p5 }
  0x18   :  { %4943 = shalt.err (!%p4940_p9)
}
  0x19   :  { %62 = dma.hbm_to_vmem [thread:$0]  %s5698_s3, 512, %s57_s29, [#allocation9], %s5033_s24, %s5033_s24, %s5034_s25  }
  0x1a   :  { %s4952_s11 = scalar_lea.vmem %s21_s7, 512  ;;  %p4957_p11 = scmp.lt.s32.totalorder %s21_s7, %s21_s7 }
  0x1b   :  { %p4953_p10 = scmp.ne.s32.totalorder %s21_s7, %s4952_s11  ;;  %p4958_p12 = scmp.lt.s32.totalorder %s4952_s11, %s4952_s11 }
  0x1d   :  { %p4959_p13 = por %p4958_p12, %p4957_p11 }
  0x1f   :  { %p4960_p0 = pnand %p4959_p13, %p4953_p10 }
  0x21   :  { %4963 = shalt.err (!%p4960_p0)
}
  0x22   :  { %s5037_s1 = smov 64   ;;  %s5038_s12 = smov 4  }
  0x23   :  { %26 = dma.hbm_to_vmem [thread:$0]  %s5695_s0, 512, %s21_s7, [#allocation3], %s5037_s1, %s5037_s1, %s5038_s12  }
  0x24   :  { %s5039_s15 = smov [#allocation7]  }
  0x25   :  { %s44_s16 = sshll.u32 %s5039_s15, 4  ;;  %s45_s16 = int_to_ptr.vmem [resolvable:$true] %s44_s16 }
  0x26   :  { %s4972_s3 = scalar_lea.vmem %s45_s16, 28672  ;;  %p4977_p2 = scmp.lt.s32.totalorder %s45_s16, %s45_s16 }
  0x27   :  { %p4973_p1 = scmp.ne.s32.totalorder %s45_s16, %s4972_s3  ;;  %p4978_p3 = scmp.lt.s32.totalorder %s4972_s3, %s4972_s3 }
  0x29   :  { %p4979_p4 = por %p4978_p3, %p4977_p2 }
  0x2b   :  { %p4980_p5 = pnand %p4979_p4, %p4973_p1 }
  0x2d   :  { %4983 = shalt.err (!%p4980_p5)
}
  0x2e   :  { %s5040_s17 = smov 128   ;;  %s5041_s18 = smov 8  }
  0x2f   :  { %50 = dma.hbm_to_vmem [thread:$0]  %s5697_s2, 28672, %s45_s16, [#allocation6], %s5040_s17, %s5040_s17, %s5041_s18  }
  0x30   :  { %s5042_s21 = smov [#allocation10]  }
  0x31   :  { %s68_s22 = sshll.u32 %s5042_s21, 4  ;;  %s69_s22 = int_to_ptr.vmem [resolvable:$true] %s68_s22 }
  0x32   :  { %s4992_s0 = scalar_lea.vmem %s69_s22, 2048  ;;  %p4997_p7 = scmp.lt.s32.totalorder %s69_s22, %s69_s22 }
  0x33   :  { %p4993_p6 = scmp.ne.s32.totalorder %s69_s22, %s4992_s0  ;;  %p4998_p8 = scmp.lt.s32.totalorder %s4992_s0, %s4992_s0 }
  0x35   :  { %p4999_p9 = por %p4998_p8, %p4997_p7 }
  0x37   :  { %p5000_p10 = pnand %p4999_p9, %p4993_p6 }
  0x39   :  { %5003 = shalt.err (!%p5000_p10)
}
  0x3a   :  { %74 = dma.hbm_to_vmem [thread:$0]  %s5699_s4, 2048, %s69_s22, [#allocation9], %s5037_s1, %s5037_s1, %s5038_s12  }
  0x3b   :  { %5024 = dma.done.wait [#allocation3], 512  }
  0x3c   :  { %5025 = vsyncadd [#allocation3], 4294966784 }
  0x3d   :  { %5026 = dma.done.wait [#allocation6], 40960  }
  0x3e   :  { %5027 = vsyncadd [#allocation6], 4294926336 }
  0x3f   :  { %5028 = dma.done.wait [#allocation9], 2560  }
  0x40   :  { %5029 = vsyncadd [#allocation9], 4294964736  ;;  %v5043_v0 = vmov 0   ;;  %v4396_v1 = vld [vmem:[#allocation5 + $0xe4] ss:$16 sps:$4 sm:$0xff]   ;;  %v5107_v33 = vld [vmem:[#allocation2 + $0x8] sm:$0xff]  }
  0x41   :  { %353 = vmatprep.mubr.bf16.mxu0 %v5043_v0  ;;  %426 = vmatprep.mubr.bf16.mxu1 %v5043_v0  ;;  %v4398_v2 = vld [vmem:[#allocation5 + $0xe0] ss:$16 sps:$4 sm:$0xff]   ;;  %v4399_v3 = vld [vmem:[#allocation5 + $0xc4] ss:$16 sps:$4 sm:$0xff]   ;;  %v4439_v14 = vld [vmem:[#allocation5 + $0xec] ss:$16 sps:$4 sm:$0xff]  }
  0x42   :  { %321 = vmatprep.subr.bf16.mxu0 %v4396_v1  ;;  %v4401_v4 = vld [vmem:[#allocation5 + $0xc0] ss:$16 sps:$4 sm:$0xff]   ;;  %v4402_v5 = vld [vmem:[#allocation5 + $0xa4] ss:$16 sps:$4 sm:$0xff]   ;;  %v4441_v15 = vld [vmem:[#allocation5 + $0xe8] ss:$16 sps:$4 sm:$0xff]   ;;  %394 = vmatprep.subr.bf16.mxu1 %v4439_v14 }
  0x43   :  { %322 = vmatpush1.bf16.msra.mxu0 %v4398_v2  ;;  %v4404_v6 = vld [vmem:[#allocation5 + $0xa0] ss:$16 sps:$4 sm:$0xff]   ;;  %v4405_v7 = vld [vmem:[#allocation5 + $0x84] ss:$16 sps:$4 sm:$0xff]   ;;  %v4445_v18 = vld [vmem:[#allocation5 + $0xcc] ss:$16 sps:$4 sm:$0xff]   ;;  %395 = vmatpush1.bf16.msra.mxu1 %v4441_v15 }
  0x44   :  { %323 = vmatprep.subr.bf16.mxu0 %v4399_v3  ;;  %v4407_v8 = vld [vmem:[#allocation5 + $0x80] ss:$16 sps:$4 sm:$0xff]   ;;  %v4408_v9 = vld [vmem:[#allocation5 + $0x64] ss:$16 sps:$4 sm:$0xff]   ;;  %v4447_v19 = vld [vmem:[#allocation5 + $0xc8] ss:$16 sps:$4 sm:$0xff]   ;;  %396 = vmatprep.subr.bf16.mxu1 %v4445_v18 }
  0x45   :  { %v4410_v10 = vld [vmem:[#allocation5 + $0x60] ss:$16 sps:$4 sm:$0xff]   ;;  %v4411_v11 = vld [vmem:[#allocation5 + $0x44] ss:$16 sps:$4 sm:$0xff]   ;;  %v4451_v21 = vld [vmem:[#allocation5 + $0xac] ss:$16 sps:$4 sm:$0xff]  }
  0x46   :  { %v4413_v12 = vld [vmem:[#allocation5 + $0x40] ss:$16 sps:$4 sm:$0xff]   ;;  %v4414_v13 = vld [vmem:[#allocation5 + $0x24] ss:$16 sps:$4 sm:$0xff]   ;;  %v4453_v23 = vld [vmem:[#allocation5 + $0xa8] ss:$16 sps:$4 sm:$0xff]  }
  0x47   :  { %324 = vmatpush1.bf16.msra.mxu0 %v4401_v4  ;;  %v4416_v16 = vld [vmem:[#allocation5 + $0x20] ss:$16 sps:$4 sm:$0xff]   ;;  %v4417_v17 = vld [vmem:[#allocation5 + $0x4] ss:$16 sps:$4 sm:$0xff]   ;;  %397 = vmatpush1.bf16.msra.mxu1 %v4447_v19  ;;  %v4457_v25 = vld [vmem:[#allocation5 + $0x8c] ss:$16 sps:$4 sm:$0xff]  }
  0x48   :  { %325 = vmatprep.subr.bf16.mxu0 %v4402_v5  ;;  %v4419_v20 = vld [vmem:[#allocation5] ss:$16 sps:$4 sm:$0xff]   ;;  %v4426_v22 = vld [vmem:[#allocation7 + $0x74] ss:$8 sps:$4 sm:$0xff]   ;;  %398 = vmatprep.subr.bf16.mxu1 %v4451_v21  ;;  %v4429_v27 = vld [vmem:[#allocation7 + $0x64] ss:$8 sps:$4 sm:$0xff]  }
  0x49   :  { %v5103_v24 = vld [vmem:[#allocation2] sm:$0xff]   ;;  %v4424_v26 = vld [vmem:[#allocation7 + $0x70] ss:$8 sps:$4 sm:$0xff]   ;;  %v4463_v29 = vld [vmem:[#allocation5 + $0x6c] ss:$16 sps:$4 sm:$0xff]  }
  0x4a   :  { %v4459_v28 = vld [vmem:[#allocation5 + $0x88] ss:$16 sps:$4 sm:$0xff]   ;;  %v4432_v31 = vld [vmem:[#allocation7 + $0x54] ss:$8 sps:$4 sm:$0xff]   ;;  %v4435_v36 = vld [vmem:[#allocation7 + $0x44] ss:$8 sps:$4 sm:$0xff]  }
  0x4b   :  { %326 = vmatpush1.bf16.msra.mxu0 %v4404_v6  ;;  %399 = vmatpush1.bf16.msra.mxu1 %v4453_v23  ;;  %v4427_v30 = vld [vmem:[#allocation7 + $0x60] ss:$8 sps:$4 sm:$0xff]   ;;  %v4469_v34 = vld [vmem:[#allocation5 + $0x4c] ss:$16 sps:$4 sm:$0xff]   ;;  %v4430_v35 = vld [vmem:[#allocation7 + $0x50] ss:$8 sps:$4 sm:$0xff]  }
  0x4c   :  { %327 = vmatprep.subr.bf16.mxu0 %v4405_v7  ;;  %400 = vmatprep.subr.bf16.mxu1 %v4457_v25  ;;  %v4465_v32 = vld [vmem:[#allocation5 + $0x68] ss:$16 sps:$4 sm:$0xff]   ;;  %v4438_v39 = vld [vmem:[#allocation7 + $0x34] ss:$8 sps:$4 sm:$0xff]   ;;  %v4444_v45 = vld [vmem:[#allocation7 + $0x24] ss:$8 sps:$4 sm:$0xff]  }
  0x4d   :  { %v4471_v37 = vld [vmem:[#allocation5 + $0x48] ss:$16 sps:$4 sm:$0xff]   ;;  %v4475_v40 = vld [vmem:[#allocation5 + $0x2c] ss:$16 sps:$4 sm:$0xff]   ;;  %v5111_v42 = vld [vmem:[#allocation2 + $0x10] sm:$0xff]  }
  0x4e   :  { %v4433_v38 = vld [vmem:[#allocation7 + $0x40] ss:$8 sps:$4 sm:$0xff]   ;;  %v4481_v43 = vld [vmem:[#allocation5 + $0xc] ss:$16 sps:$4 sm:$0xff]   ;;  %v4436_v44 = vld [vmem:[#allocation7 + $0x30] ss:$8 sps:$4 sm:$0xff]  }
  0x4f   :  { %328 = vmatpush1.bf16.msra.mxu0 %v4407_v8  ;;  %401 = vmatpush1.bf16.msra.mxu1 %v4459_v28  ;;  %v4477_v41 = vld [vmem:[#allocation5 + $0x28] ss:$16 sps:$4 sm:$0xff]   ;;  %v4450_v48 = vld [vmem:[#allocation7 + $0x14] ss:$8 sps:$4 sm:$0xff]   ;;  %v4456_v51 = vld [vmem:[#allocation7 + $0x4] ss:$8 sps:$4 sm:$0xff]  }
  0x50   :  { %329 = vmatprep.subr.bf16.mxu0 %v4408_v9  ;;  %402 = vmatprep.subr.bf16.mxu1 %v4463_v29  ;;  %v4483_v46 = vld [vmem:[#allocation5 + $0x8] ss:$16 sps:$4 sm:$0xff]   ;;  %v4462_v53 = vld [vmem:[#allocation7 + $0xf4] ss:$8 sps:$4 sm:$0xff]   ;;  %v4468_v55 = vld [vmem:[#allocation7 + $0xe4] ss:$8 sps:$4 sm:$0xff]  }
  0x51   :  { %v4442_v47 = vld [vmem:[#allocation7 + $0x20] ss:$8 sps:$4 sm:$0xff]   ;;  %v5115_v49 = vld [vmem:[#allocation2 + $0x18] sm:$0xff]   ;;  %v4480_v59 = vld [vmem:[#allocation7 + $0xc4] ss:$8 sps:$4 sm:$0xff]  }
  0x52   :  { %v4448_v50 = vld [vmem:[#allocation7 + $0x10] ss:$8 sps:$4 sm:$0xff]   ;;  %v4454_v52 = vld [vmem:[#allocation7] ss:$8 sps:$4 sm:$0xff]   ;;  %v4474_v57 = vld [vmem:[#allocation7 + $0xd4] ss:$8 sps:$4 sm:$0xff]  }
  0x53   :  { %330 = vmatpush1.bf16.msra.mxu0 %v4410_v10  ;;  %403 = vmatpush1.bf16.msra.mxu1 %v4465_v32  ;;  %v4460_v54 = vld [vmem:[#allocation7 + $0xf0] ss:$8 sps:$4 sm:$0xff]   ;;  %v4466_v56 = vld [vmem:[#allocation7 + $0xe0] ss:$8 sps:$4 sm:$0xff]   ;;  %v4486_v61 = vld [vmem:[#allocation7 + $0xb4] ss:$8 sps:$4 sm:$0xff]  }
  0x54   :  { %331 = vmatprep.subr.bf16.mxu0 %v4411_v11  ;;  %404 = vmatprep.subr.bf16.mxu1 %v4469_v34  ;;  %v4472_v58 = vld [vmem:[#allocation7 + $0xd0] ss:$8 sps:$4 sm:$0xff]   ;;  %v4478_v60 = vld [vmem:[#allocation7 + $0xc0] ss:$8 sps:$4 sm:$0xff]   ;;  %v4489_v63 = vld [vmem:[#allocation7 + $0xa4] ss:$8 sps:$4 sm:$0xff]  }
  0x55   :  { %v4484_v62 = vld [vmem:[#allocation7 + $0xb0] ss:$8 sps:$4 sm:$0xff]   ;;  %v4487_v1 = vld [vmem:[#allocation7 + $0xa0] ss:$8 sps:$4 sm:$0xff]   ;;  %v4492_v2 = vld [vmem:[#allocation7 + $0x94] ss:$8 sps:$4 sm:$0xff]  }
  0x56   :  { %v4490_v3 = vld [vmem:[#allocation7 + $0x90] ss:$8 sps:$4 sm:$0xff]   ;;  %v4495_v4 = vld [vmem:[#allocation7 + $0x84] ss:$8 sps:$4 sm:$0xff]   ;;  %v4493_v5 = vld [vmem:[#allocation7 + $0x80] ss:$8 sps:$4 sm:$0xff]  }
  0x57   :  { %332 = vmatpush1.bf16.msra.mxu0 %v4413_v12  ;;  %405 = vmatpush1.bf16.msra.mxu1 %v4471_v37  ;;  %v4496_v6 = vld [vmem:[#allocation5 + $0x1e0] ss:$16 sps:$4 sm:$0xff]   ;;  %v4498_v7 = vld [vmem:[#allocation5 + $0x1e4] ss:$16 sps:$4 sm:$0xff]   ;;  %v4522_v23 = vld [vmem:[#allocation5 + $0x1ec] ss:$16 sps:$4 sm:$0xff]  }
  0x58   :  { %333 = vmatprep.subr.bf16.mxu0 %v4414_v13  ;;  %406 = vmatprep.subr.bf16.mxu1 %v4475_v40  ;;  %v4501_v8 = vld [vmem:[#allocation5 + $0x1c4] ss:$16 sps:$4 sm:$0xff]   ;;  %v4499_v9 = vld [vmem:[#allocation5 + $0x1c0] ss:$16 sps:$4 sm:$0xff]   ;;  %v4520_v25 = vld [vmem:[#allocation5 + $0x1e8] ss:$16 sps:$4 sm:$0xff]  }
  0x59   :  { %v4504_v10 = vld [vmem:[#allocation5 + $0x1a4] ss:$16 sps:$4 sm:$0xff]   ;;  %v4502_v11 = vld [vmem:[#allocation5 + $0x1a0] ss:$16 sps:$4 sm:$0xff]   ;;  %v4528_v28 = vld [vmem:[#allocation5 + $0x1ac] ss:$16 sps:$4 sm:$0xff]  }
  0x5a   :  { %v4507_v12 = vld [vmem:[#allocation5 + $0x184] ss:$16 sps:$4 sm:$0xff]   ;;  %v4505_v13 = vld [vmem:[#allocation5 + $0x180] ss:$16 sps:$4 sm:$0xff]   ;;  %v4526_v29 = vld [vmem:[#allocation5 + $0x1a8] ss:$16 sps:$4 sm:$0xff]  }
  0x5b   :  { %334 = vmatpush1.bf16.msra.mxu0 %v4416_v16  ;;  %407 = vmatpush1.bf16.msra.mxu1 %v4477_v41  ;;  %v4546_v14 = vld [vmem:[#allocation7 + $0x374] ss:$8 sps:$4 sm:$0xff]   ;;  %v4508_v16 = vld [vmem:[#allocation5 + $0x160] ss:$16 sps:$4 sm:$0xff]   ;;  %v4532_v34 = vld [vmem:[#allocation5 + $0x168] ss:$16 sps:$4 sm:$0xff]  }
  0x5c   :  { %335 = vmatprep.subr.bf16.mxu0 %v4417_v17  ;;  %408 = vmatprep.subr.bf16.mxu1 %v4481_v43  ;;  %v4510_v15 = vld [vmem:[#allocation5 + $0x164] ss:$16 sps:$4 sm:$0xff]   ;;  %v4511_v18 = vld [vmem:[#allocation5 + $0x140] ss:$16 sps:$4 sm:$0xff]   ;;  %v4534_v32 = vld [vmem:[#allocation5 + $0x16c] ss:$16 sps:$4 sm:$0xff]  }
  0x5d   :  { %v4513_v17 = vld [vmem:[#allocation5 + $0x144] ss:$16 sps:$4 sm:$0xff]   ;;  %v4540_v37 = vld [vmem:[#allocation5 + $0x12c] ss:$16 sps:$4 sm:$0xff]   ;;  %v4541_v40 = vld [vmem:[#allocation5 + $0x108] ss:$16 sps:$4 sm:$0xff]  }
  0x5e   :  { %v4516_v19 = vld [vmem:[#allocation5 + $0x124] ss:$16 sps:$4 sm:$0xff]   ;;  %v4547_v43 = vld [vmem:[#allocation7 + $0x170] ss:$8 sps:$4 sm:$0xff]  }
  0x5f   :  { %336 = vmatpush1.bf16.msra.mxu0 %v4419_v20  ;;  %409 = vmatpush1.bf16.msra.mxu1 %v4483_v46  ;;  %v4514_v20 = vld [vmem:[#allocation5 + $0x120] ss:$16 sps:$4 sm:$0xff]   ;;  %v4519_v21 = vld [vmem:[#allocation5 + $0x104] ss:$16 sps:$4 sm:$0xff]  }
  0x60   :  { %811 = vmatprep.subr.bf16.mxu0 %v4426_v22  ;;  %1173 = vmatprep.subr.bf16.mxu1 %v4498_v7  ;;  %v4517_v22 = vld [vmem:[#allocation5 + $0x100] ss:$16 sps:$4 sm:$0xff]   ;;  %v4549_v41 = vld [vmem:[#allocation7 + $0x174] ss:$8 sps:$4 sm:$0xff]  }
  0x61   :  { %v4561_v46 = vld [vmem:[#allocation7 + $0x154] ss:$8 sps:$4 sm:$0xff]  }
  0x62   :  { %354 = vmatmul.mubr.bf16.vlgmr.msra.gmra.mxu0 %v5103_v24  ;;  %427 = vmatmul.mubr.bf16.vlgmr.msra.gmra.mxu1 %v5103_v24 }
  0x63   :  { %363 = vmatprep.mubr.bf16.mxu0 %v5043_v0  ;;  %812 = vmatpush1.bf16.msra.mxu0 %v4424_v26  ;;  %v4525_v26 = vld [vmem:[#allocation5 + $0x1cc] ss:$16 sps:$4 sm:$0xff]  }
  0x64   :  { %813 = vmatprep.subr.bf16.mxu0 %v4429_v27  ;;  %436 = vmatprep.mubr.bf16.mxu1 %v5043_v0  ;;  %v4523_v27 = vld [vmem:[#allocation5 + $0x1c8] ss:$16 sps:$4 sm:$0xff]  }
  0x65   :  { %1174 = vmatpush1.bf16.msra.mxu1 %v4496_v6 }
  0x66   :  { %1175 = vmatprep.subr.bf16.mxu1 %v4501_v8  ;;  %v4595_v8 = vld [vmem:[#allocation7 + $0x1f0] ss:$8 sps:$4 sm:$0xff]  }
  0x67   :  { %814 = vmatpush1.bf16.msra.mxu0 %v4427_v30  ;;  %v4531_v30 = vld [vmem:[#allocation5 + $0x18c] ss:$16 sps:$4 sm:$0xff]  }
  0x68   :  { %815 = vmatprep.subr.bf16.mxu0 %v4432_v31  ;;  %v4529_v31 = vld [vmem:[#allocation5 + $0x188] ss:$16 sps:$4 sm:$0xff]  }
  0x69   :  { %1176 = vmatpush1.bf16.msra.mxu1 %v4499_v9  ;;  %v4603_v9 = vld [vmem:[#allocation7 + $0x1e4] ss:$8 sps:$4 sm:$0xff]  }
  0x6a   :  { %364 = vmatmul.mubr.bf16.gmra.mxu0 %v5107_v33  ;;  %437 = vmatmul.mubr.bf16.gmra.mxu1 %v5107_v33 }
  0x6b   :  { %373 = vmatprep.mubr.bf16.mxu0 %v5043_v0  ;;  %816 = vmatpush1.bf16.msra.mxu0 %v4430_v35  ;;  %v4537_v35 = vld [vmem:[#allocation5 + $0x14c] ss:$16 sps:$4 sm:$0xff]  }
  0x6c   :  { %817 = vmatprep.subr.bf16.mxu0 %v4435_v36  ;;  %446 = vmatprep.mubr.bf16.mxu1 %v5043_v0  ;;  %v4535_v36 = vld [vmem:[#allocation5 + $0x148] ss:$16 sps:$4 sm:$0xff]  }
  0x6d   :  { %1177 = vmatprep.subr.bf16.mxu1 %v4504_v10 }
  0x6e   :  { %1178 = vmatpush1.bf16.msra.mxu1 %v4502_v11 }
  0x6f   :  { %818 = vmatpush1.bf16.msra.mxu0 %v4433_v38  ;;  %1179 = vmatprep.subr.bf16.mxu1 %v4507_v12  ;;  %v4538_v38 = vld [vmem:[#allocation5 + $0x128] ss:$16 sps:$4 sm:$0xff]  }
  0x70   :  { %819 = vmatprep.subr.bf16.mxu0 %v4438_v39  ;;  %v4543_v39 = vld [vmem:[#allocation5 + $0x10c] ss:$16 sps:$4 sm:$0xff]  }
  0x72   :  { %374 = vmatmul.mubr.bf16.gmra.mxu0 %v5111_v42  ;;  %447 = vmatmul.mubr.bf16.gmra.mxu1 %v5111_v42 }
  0x73   :  { %383 = vmatprep.mubr.bf16.mxu0 %v5043_v0  ;;  %820 = vmatpush1.bf16.msra.mxu0 %v4436_v44  ;;  %v4555_v44 = vld [vmem:[#allocation7 + $0x164] ss:$8 sps:$4 sm:$0xff]  }
  0x74   :  { %821 = vmatprep.subr.bf16.mxu0 %v4444_v45  ;;  %456 = vmatprep.mubr.bf16.mxu1 %v5043_v0  ;;  %v4553_v45 = vld [vmem:[#allocation7 + $0x160] ss:$8 sps:$4 sm:$0xff]  }
  0x75   :  { %1180 = vmatpush1.bf16.msra.mxu1 %v4505_v13 }
  0x76   :  { %1181 = vmatprep.subr.bf16.mxu1 %v4510_v15 }
  0x77   :  { %822 = vmatpush1.bf16.msra.mxu0 %v4442_v47  ;;  %v4559_v47 = vld [vmem:[#allocation7 + $0x150] ss:$8 sps:$4 sm:$0xff]  }
  0x78   :  { %823 = vmatprep.subr.bf16.mxu0 %v4450_v48  ;;  %v4567_v48 = vld [vmem:[#allocation7 + $0x144] ss:$8 sps:$4 sm:$0xff]  }
  0x79   :  { %1182 = vmatpush1.bf16.msra.mxu1 %v4508_v16 }
  0x7a   :  { %384 = vmatmul.mubr.bf16.gmra.mxu0 %v5115_v49  ;;  %457 = vmatmul.mubr.bf16.gmra.mxu1 %v5115_v49 }
  0x7b   :  { %824 = vmatpush1.bf16.msra.mxu0 %v4448_v50  ;;  %1205 = vmatprep.mubr.bf16.mxu1 %v5043_v0  ;;  %v4565_v50 = vld [vmem:[#allocation7 + $0x140] ss:$8 sps:$4 sm:$0xff]  }
  0x7c   :  { %825 = vmatprep.subr.bf16.mxu0 %v4456_v51  ;;  %1183 = vmatprep.subr.bf16.mxu1 %v4513_v17  ;;  %v4573_v51 = vld [vmem:[#allocation7 + $0x134] ss:$8 sps:$4 sm:$0xff]   ;;  %v4601_v17 = vld [vmem:[#allocation7 + $0x1e0] ss:$8 sps:$4 sm:$0xff]  }
  0x7d   :  { %1184 = vmatpush1.bf16.msra.mxu1 %v4511_v18 }
  0x7e   :  { %1185 = vmatprep.subr.bf16.mxu1 %v4516_v19 }
  0x7f   :  { %826 = vmatpush1.bf16.msra.mxu0 %v4454_v52  ;;  %v467_v52 = vlaneseq }
  0x80   :  { %827 = vmatprep.subr.bf16.mxu0 %v4462_v53  ;;  %v4579_v53 = vld [vmem:[#allocation7 + $0x124] ss:$8 sps:$4 sm:$0xff]  }
  0x81   :  { %1186 = vmatpush1.bf16.msra.mxu1 %v4514_v20 }
  0x82   :  { %1187 = vmatprep.subr.bf16.mxu1 %v4519_v21  ;;  %v4609_v21 = vld [vmem:[#allocation7 + $0x1d4] ss:$8 sps:$4 sm:$0xff]  }
  0x83   :  { %828 = vmatpush2.bf16.msra.mxu0 %v4460_v54  ;;  %v5138_v54 = vshrl.u32 %v467_v52, 7 }
  0x84   :  { %829 = vmatprep.subr.bf16.mxu0 %v4468_v55  ;;  %v4577_v55 = vld [vmem:[#allocation7 + $0x120] ss:$8 sps:$4 sm:$0xff]  }
  0x85   :  { %1188 = vmatpush1.bf16.msra.mxu1 %v4517_v22 }
  0x86   :  { %1246 = vmatprep.subr.bf16.mxu1 %v4522_v23 }
  0x87   :  { %830 = vmatpush2.bf16.msra.mxu0 %v4466_v56  ;;  %v541_v56 = vsub.s32 0, %v5138_v54 }
  0x88   :  { %831 = vmatprep.subr.bf16.mxu0 %v4474_v57  ;;  %1206 = vmatmul.mubr.bf16.vlgmr.msra.gmra.mxu1 %v5103_v24  ;;  %v5143_v57 = vld [vmem:[#allocation8 + $0x8] sm:$0xff] }
  0x89   :  { %1247 = vmatpush1.bf16.msra.mxu1 %v4520_v25  ;;  %1215 = vmatprep.mubr.bf16.mxu1 %v5043_v0 }
  0x8a   :  { %1248 = vmatprep.subr.bf16.mxu1 %v4525_v26 }
  0x8b   :  { %832 = vmatpush2.bf16.msra.mxu0 %v4472_v58  ;;  %v5145_v58 = vld [vmem:[#allocation8] sm:$0xff] }
  0x8c   :  { %833 = vmatprep.subr.bf16.mxu0 %v4480_v59  ;;  %v4583_v59 = vld [vmem:[#allocation7 + $0x110] ss:$8 sps:$4 sm:$0xff]  }
  0x8d   :  { %1249 = vmatpush1.bf16.msra.mxu1 %v4523_v27  ;;  %v4544_v27 = vld [vmem:[#allocation7 + $0x370] ss:$8 sps:$4 sm:$0xff]  }
  0x8e   :  { %1250 = vmatprep.subr.bf16.mxu1 %v4528_v28 }
  0x8f   :  { %834 = vmatpush2.bf16.msra.mxu0 %v4478_v60  ;;  %v5148_v60 = vrot.slane %v5143_v57, %v541_v56 }
  0x90   :  { %835 = vmatprep.subr.bf16.mxu0 %v4486_v61  ;;  %1216 = vmatmul.mubr.bf16.gmra.mxu1 %v5107_v33  ;;  %v4591_v61 = vld [vmem:[#allocation7 + $0x104] ss:$8 sps:$4 sm:$0xff]  }
  0x91   :  { %1251 = vmatpush1.bf16.msra.mxu1 %v4526_v29  ;;  %1225 = vmatprep.mubr.bf16.mxu1 %v5043_v0 }
  0x92   :  { %1252 = vmatprep.subr.bf16.mxu1 %v4531_v30  ;;  %v4552_v30 = vld [vmem:[#allocation7 + $0x364] ss:$8 sps:$4 sm:$0xff]  }
  0x93   :  { %836 = vmatpush2.bf16.msra.mxu0 %v4484_v62  ;;  %v5151_v62 = vrot.slane %v5145_v58, %v541_v56 }
  0x94   :  { %837 = vmatprep.subr.bf16.mxu0 %v4489_v63 }
  0x95   :  { %1253 = vmatpush1.bf16.msra.mxu1 %v4529_v31 }
  0x96   :  { %1254 = vmatprep.subr.bf16.mxu1 %v4534_v32  ;;  %v4607_v32 = vld [vmem:[#allocation7 + $0x1d0] ss:$8 sps:$4 sm:$0xff]  }
  0x97   :  { %838 = vmatpush2.bf16.msra.mxu0 %v4487_v1  ;;  %v4589_v1 = vld [vmem:[#allocation7 + $0x100] ss:$8 sps:$4 sm:$0xff]  }
  0x98   :  { %839 = vmatprep.subr.bf16.mxu0 %v4492_v2  ;;  %1226 = vmatmul.mubr.bf16.gmra.mxu1 %v5111_v42 }
  0x99   :  { %1255 = vmatpush1.bf16.msra.mxu1 %v4532_v34  ;;  %1235 = vmatprep.mubr.bf16.mxu1 %v5043_v0  ;;  %v4615_v34 = vld [vmem:[#allocation7 + $0x1c4] ss:$8 sps:$4 sm:$0xff]  }
  0x9a   :  { %1256 = vmatprep.subr.bf16.mxu1 %v4537_v35 }
  0x9b   :  { %840 = vmatpush2.bf16.msra.mxu0 %v4490_v3  ;;  %v4597_v3 = vld [vmem:[#allocation7 + $0x1f4] ss:$8 sps:$4 sm:$0xff]  }
  0x9c   :  { %841 = vmatprep.subr.bf16.mxu0 %v4495_v4 }
  0x9d   :  { %1257 = vmatpush1.bf16.msra.mxu1 %v4535_v36 }
  0x9e   :  { %1258 = vmatprep.subr.bf16.mxu1 %v4540_v37 }
  0x9f   :  { %842 = vmatpush2.bf16.msra.mxu0 %v4493_v5 }
  0xa0   :  { %1512 = vmatprep.subr.bf16.mxu0 %v4546_v14  ;;  %1236 = vmatmul.mubr.bf16.gmra.mxu1 %v5115_v49 }
  0xa1   :  { %1259 = vmatpush1.bf16.msra.mxu1 %v4538_v38  ;;  %1278 = vmatprep.mubr.bf16.mxu1 %v5043_v0 }
  0xa2   :  { %1260 = vmatprep.subr.bf16.mxu1 %v4543_v39 }
  0xa5   :  { %1261 = vmatpush1.bf16.msra.mxu1 %v4541_v40  ;;  %v4550_v40 = vld [vmem:[#allocation7 + $0x360] ss:$8 sps:$4 sm:$0xff]  }
  0xa6   :  { %1850 = vmatprep.subr.bf16.mxu1 %v4549_v41 }
  0xa8   :  { %1279 = vmatmul.mubr.bf16.vlgmr.msra.gmra.mxu1 %v5103_v24  ;;  %v4571_v24 = vld [vmem:[#allocation7 + $0x130] ss:$8 sps:$4 sm:$0xff]  }
  0xa9   :  { %1851 = vmatpush1.bf16.msra.mxu1 %v4547_v43  ;;  %1288 = vmatprep.mubr.bf16.mxu1 %v5043_v0  ;;  %v4558_v43 = vld [vmem:[#allocation7 + $0x354] ss:$8 sps:$4 sm:$0xff]  }
  0xaa   :  { %1852 = vmatprep.subr.bf16.mxu1 %v4555_v44 }
  0xad   :  { %1853 = vmatpush1.bf16.msra.mxu1 %v4553_v45 }
  0xae   :  { %1854 = vmatprep.subr.bf16.mxu1 %v4561_v46  ;;  %v4613_v46 = vld [vmem:[#allocation7 + $0x1c0] ss:$8 sps:$4 sm:$0xff]  }
  0xb0   :  { %1289 = vmatmul.mubr.bf16.gmra.mxu1 %v5107_v33  ;;  %v4585_v33 = vld [vmem:[#allocation7 + $0x114] ss:$8 sps:$4 sm:$0xff]  }
  0xb1   :  { %1855 = vmatpush1.bf16.msra.mxu1 %v4559_v47  ;;  %1298 = vmatprep.mubr.bf16.mxu1 %v5043_v0 }
  0xb2   :  { %1856 = vmatprep.subr.bf16.mxu1 %v4567_v48 }
  0xb5   :  { %1857 = vmatpush1.bf16.msra.mxu1 %v4565_v50 }
  0xb6   :  { %1858 = vmatprep.subr.bf16.mxu1 %v4573_v51 }
  0xb8   :  { %1299 = vmatmul.mubr.bf16.gmra.mxu1 %v5111_v42 }
  0xb9   :  { %1859 = vmatpush1.bf16.msra.mxu1 %v4571_v24  ;;  %1308 = vmatprep.mubr.bf16.mxu1 %v5043_v0 }
  0xba   :  { %1860 = vmatprep.subr.bf16.mxu1 %v4579_v53 }
  0xbd   :  { %1861 = vmatpush1.bf16.msra.mxu1 %v4577_v55  ;;  %v4556_v55 = vld [vmem:[#allocation7 + $0x350] ss:$8 sps:$4 sm:$0xff]  }
  0xbe   :  { %1862 = vmatprep.subr.bf16.mxu1 %v4585_v33 }
  0xc0   :  { %1309 = vmatmul.mubr.bf16.gmra.mxu1 %v5115_v49 }
  0xc1   :  { %1863 = vmatpush1.bf16.msra.mxu1 %v4583_v59  ;;  %v4564_v59 = vld [vmem:[#allocation7 + $0x344] ss:$8 sps:$4 sm:$0xff]  }
  0xc2   :  { %1864 = vmatprep.subr.bf16.mxu1 %v4591_v61 }
  0xc5   :  { %1865 = vmatpush1.bf16.msra.mxu1 %v4589_v1 }
  0xc6   :  { %1866 = vmatprep.subr.bf16.mxu1 %v4597_v3 }
  0xc9   :  { %1867 = vmatpush2.bf16.msra.mxu1 %v4595_v8 }
  0xca   :  { %1868 = vmatprep.subr.bf16.mxu1 %v4603_v9 }
  0xcd   :  { %1869 = vmatpush2.bf16.msra.mxu1 %v4601_v17 }
  0xce   :  { %1870 = vmatprep.subr.bf16.mxu1 %v4609_v21 }
  0xd1   :  { %1871 = vmatpush2.bf16.msra.mxu1 %v4607_v32  ;;  %v4580_v32 = vld [vmem:[#allocation7 + $0x310] ss:$8 sps:$4 sm:$0xff]  }
  0xd2   :  { %1872 = vmatprep.subr.bf16.mxu1 %v4615_v34 }
  0xd5   :  { %1873 = vmatpush2.bf16.msra.mxu1 %v4613_v46  ;;  %v4621_v46 = vld [vmem:[#allocation7 + $0x1b4] ss:$8 sps:$4 sm:$0xff]  }
  0xd6   :  { %1874 = vmatprep.subr.bf16.mxu1 %v4621_v46 }
 0x122   :  { %v355_v42 = vpop.f32.mrf.mxu0 }
 0x123   :  { %v547_v4 = vadd.f32 %v5151_v62, %v355_v42 }
 0x124   :  { %v357_v63 = vpop.f32.mrf.mxu0 }
 0x125   :  { %v548_v2 = vadd.f32 %v5148_v60, %v357_v63  ;;  %v579_v12 = vmul.f32 0.2, %v547_v4  ;;  %vm563_vm2 = vcmp.ge.f32.partialorder %v547_v4, 0.0 }
 0x126   :  { %v359_v5 = vpop.f32.mrf.mxu0 }
 0x127   :  { %v549_v6 = vadd.f32 %v5151_v62, %v359_v5  ;;  %v580_v10 = vmul.f32 0.2, %v548_v2  ;;  %vm564_vm1 = vcmp.ge.f32.partialorder %v548_v2, 0.0  ;;  %v595_v22 = vsel %vm563_vm2, %v547_v4, %v579_v12  ;;  %v4562_v4 = vld [vmem:[#allocation7 + $0x340] ss:$8 sps:$4 sm:$0xff]  }
 0x128   :  { %v361_v7 = vpop.f32.mrf.mxu0 }
 0x129   :  { %vm565_vm0 = vcmp.ge.f32.partialorder %v549_v6, 0.0  ;;  %v581_v11 = vmul.f32 0.2, %v549_v6  ;;  %v550_v49 = vadd.f32 %v5148_v60, %v361_v7  ;;  %v596_v19 = vsel %vm564_vm1, %v548_v2, %v580_v10 }
 0x12a   :  { %v365_v13 = vpop.f32.mrf.mxu0 }
 0x12b   :  { %vm566_vm3 = vcmp.ge.f32.partialorder %v550_v49, 0.0  ;;  %v582_v14 = vmul.f32 0.2, %v550_v49  ;;  %v597_v15 = vsel %vm565_vm0, %v549_v6, %v581_v11  ;;  %v551_v23 = vadd.f32 %v5151_v62, %v365_v13  ;;  %v4570_v6 = vld [vmem:[#allocation7 + $0x334] ss:$8 sps:$4 sm:$0xff]  }
 0x12c   :  { %v367_v16 = vpop.f32.mrf.mxu0  ;;  %v611_v28 = vpack.c.bf16 %v597_v15, %v595_v22  ;;  %v4568_v15 = vld [vmem:[#allocation7 + $0x330] ss:$8 sps:$4 sm:$0xff]  }
 0x12d   :  { %v552_v18 = vadd.f32 %v5148_v60, %v367_v16  ;;  %v598_v20 = vsel %vm566_vm3, %v550_v49, %v582_v14  ;;  %v583_v38 = vmul.f32 0.2, %v551_v23  ;;  %vm567_vm6 = vcmp.ge.f32.partialorder %v551_v23, 0.0 }
 0x12e   :  { %v369_v25 = vpop.f32.mrf.mxu0  ;;  %v612_v26 = vpack.c.bf16 %v598_v20, %v596_v19 }
 0x12f   :  { %v553_v29 = vadd.f32 %v5151_v62, %v369_v25  ;;  %v584_v35 = vmul.f32 0.2, %v552_v18  ;;  %vm568_vm5 = vcmp.ge.f32.partialorder %v552_v18, 0.0  ;;  %v599_v53 = vsel %vm567_vm6, %v551_v23, %v583_v38  ;;  %v4574_v25 = vld [vmem:[#allocation7 + $0x320] ss:$8 sps:$4 sm:$0xff]  }
 0x130   :  { %v371_v31 = vpop.f32.mrf.mxu0  ;;  %843 = vmatprep.mubr.bf16.mxu0 %v612_v26  ;;  %v4600_v38 = vld [vmem:[#allocation7 + $0x3e4] ss:$8 sps:$4 sm:$0xff]  }
 0x131   :  { %vm569_vm4 = vcmp.ge.f32.partialorder %v553_v29, 0.0  ;;  %v585_v36 = vmul.f32 0.2, %v553_v29  ;;  %v554_v37 = vadd.f32 %v5148_v60, %v371_v31  ;;  %844 = vmatmul.mubr.bf16.vlgmr.msra.gmra.mxu0 %v611_v28  ;;  %v600_v48 = vsel %vm568_vm5, %v552_v18, %v584_v35  ;;  %v4576_v18 = vld [vmem:[#allocation7 + $0x324] ss:$8 sps:$4 sm:$0xff]  }
 0x132   :  { %v375_v39 = vpop.f32.mrf.mxu0  ;;  %1513 = vmatpush1.bf16.msra.mxu0 %v4544_v27  ;;  %v4586_v35 = vld [vmem:[#allocation7 + $0x300] ss:$8 sps:$4 sm:$0xff]  }
 0x133   :  { %vm570_vm7 = vcmp.ge.f32.partialorder %v554_v37, 0.0  ;;  %v586_v41 = vmul.f32 0.2, %v554_v37  ;;  %1514 = vmatprep.subr.bf16.mxu0 %v4552_v30  ;;  %v601_v45 = vsel %vm569_vm4, %v553_v29, %v585_v36  ;;  %v555_v51 = vadd.f32 %v5151_v62, %v375_v39  ;;  %v4594_v36 = vld [vmem:[#allocation7 + $0x3f4] ss:$8 sps:$4 sm:$0xff]  }
 0x134   :  { %v377_v44 = vpop.f32.mrf.mxu0  ;;  %v613_v56 = vpack.c.bf16 %v601_v45, %v599_v53  ;;  %v4598_v39 = vld [vmem:[#allocation7 + $0x3e0] ss:$8 sps:$4 sm:$0xff]   ;;  %v4618_v45 = vld [vmem:[#allocation7 + $0x3b4] ss:$8 sps:$4 sm:$0xff]  }
 0x135   :  { %v556_v47 = vadd.f32 %v5148_v60, %v377_v44  ;;  %v602_v50 = vsel %vm570_vm7, %v554_v37, %v586_v41  ;;  %v587_v2 = vmul.f32 0.2, %v555_v51  ;;  %vm571_vm10 = vcmp.ge.f32.partialorder %v555_v51, 0.0  ;;  %v4592_v37 = vld [vmem:[#allocation7 + $0x3f0] ss:$8 sps:$4 sm:$0xff]  }
 0x136   :  { %v379_v52 = vpop.f32.mrf.mxu0  ;;  %v614_v24 = vpack.c.bf16 %v602_v50, %v600_v48  ;;  %1515 = vmatpush1.bf16.msra.mxu0 %v4550_v40  ;;  %v4606_v40 = vld [vmem:[#allocation7 + $0x3d4] ss:$8 sps:$4 sm:$0xff]   ;;  %v4604_v41 = vld [vmem:[#allocation7 + $0x3d0] ss:$8 sps:$4 sm:$0xff]   ;;  %v4610_v44 = vld [vmem:[#allocation7 + $0x3c0] ss:$8 sps:$4 sm:$0xff]  }
 0x137   :  { %v557_v33 = vadd.f32 %v5151_v62, %v379_v52  ;;  %1516 = vmatprep.subr.bf16.mxu0 %v4558_v43  ;;  %v588_v42 = vmul.f32 0.2, %v556_v47  ;;  %vm572_vm9 = vcmp.ge.f32.partialorder %v556_v47, 0.0  ;;  %v603_v14 = vsel %vm571_vm10, %v555_v51, %v587_v2  ;;  %v4612_v43 = vld [vmem:[#allocation7 + $0x3c4] ss:$8 sps:$4 sm:$0xff]   ;;  %v428_v2 = vpop.f32.mrf.mxu1 }
 0x138   :  { %v381_v61 = vpop.f32.mrf.mxu0  ;;  %853 = vmatprep.mubr.bf16.mxu0 %v614_v24  ;;  %v4619_v48 = vld [vmem:[#allocation7 + $0x1b0] ss:$8 sps:$4 sm:$0xff]   ;;  %v4624_v50 = vld [vmem:[#allocation7 + $0x3a4] ss:$8 sps:$4 sm:$0xff]   ;;  %v4622_v52 = vld [vmem:[#allocation7 + $0x3a0] ss:$8 sps:$4 sm:$0xff]  }
 0x139   :  { %vm573_vm8 = vcmp.ge.f32.partialorder %v557_v33, 0.0  ;;  %v589_v63 = vmul.f32 0.2, %v557_v33  ;;  %v558_v1 = vadd.f32 %v5148_v60, %v381_v61  ;;  %854 = vmatmul.mubr.bf16.gmra.mxu0 %v613_v56  ;;  %v604_v10 = vsel %vm572_vm9, %v556_v47, %v588_v42  ;;  %v4616_v47 = vld [vmem:[#allocation7 + $0x3b0] ss:$8 sps:$4 sm:$0xff]   ;;  %1875 = vmatpush2.bf16.msra.mxu1 %v4619_v48 }
 0x13a   :  { %v385_v3 = vpop.f32.mrf.mxu0  ;;  %1517 = vmatpush1.bf16.msra.mxu0 %v4556_v55  ;;  %v4627_v51 = vld [vmem:[#allocation7 + $0x1a4] ss:$8 sps:$4 sm:$0xff]   ;;  %v4625_v24 = vld [vmem:[#allocation7 + $0x1a0] ss:$8 sps:$4 sm:$0xff]   ;;  %v4630_v53 = vld [vmem:[#allocation7 + $0x394] ss:$8 sps:$4 sm:$0xff]  }
 0x13b   :  { %vm574_vm11 = vcmp.ge.f32.partialorder %v558_v1, 0.0  ;;  %v590_v5 = vmul.f32 0.2, %v558_v1  ;;  %1518 = vmatprep.subr.bf16.mxu0 %v4564_v59  ;;  %v605_v8 = vsel %vm573_vm8, %v557_v33, %v589_v63  ;;  %v559_v49 = vadd.f32 %v5151_v62, %v385_v3  ;;  %1876 = vmatprep.subr.bf16.mxu1 %v4627_v51  ;;  %v4633_v55 = vld [vmem:[#allocation7 + $0x194] ss:$8 sps:$4 sm:$0xff]   ;;  %v430_v3 = vpop.f32.mrf.mxu1 }
 0x13c   :  { %v387_v7 = vpop.f32.mrf.mxu0  ;;  %v615_v17 = vpack.c.bf16 %v605_v8, %v603_v14  ;;  %v4628_v33 = vld [vmem:[#allocation7 + $0x390] ss:$8 sps:$4 sm:$0xff]   ;;  %v4636_v59 = vld [vmem:[#allocation7 + $0x384] ss:$8 sps:$4 sm:$0xff]   ;;  %v4634_v42 = vld [vmem:[#allocation7 + $0x380] ss:$8 sps:$4 sm:$0xff]  }
 0x13d   :  { %v560_v9 = vadd.f32 %v5148_v60, %v387_v7  ;;  %v606_v11 = vsel %vm574_vm11, %v558_v1, %v590_v5  ;;  %v591_v23 = vmul.f32 0.2, %v559_v49  ;;  %vm575_vm14 = vcmp.ge.f32.partialorder %v559_v49, 0.0  ;;  %1877 = vmatpush2.bf16.msra.mxu1 %v4625_v24  ;;  %v4631_v56 = vld [vmem:[#allocation7 + $0x190] ss:$8 sps:$4 sm:$0xff]  }
 0x13e   :  { %v389_v12 = vpop.f32.mrf.mxu0  ;;  %v616_v13 = vpack.c.bf16 %v606_v11, %v604_v10  ;;  %1519 = vmatpush1.bf16.msra.mxu0 %v4562_v4  ;;  %1878 = vmatprep.subr.bf16.mxu1 %v4633_v55  ;;  %v4639_v61 = vld [vmem:[#allocation7 + $0x184] ss:$8 sps:$4 sm:$0xff]   ;;  %v4637_v63 = vld [vmem:[#allocation7 + $0x180] ss:$8 sps:$4 sm:$0xff]   ;;  %v4642_v1 = vld [vmem:[#allocation7 + $0x274] ss:$8 sps:$4 sm:$0xff]   ;;  %v432_v4 = vpop.f32.mrf.mxu1 }
 0x13f   :  { %v561_v16 = vadd.f32 %v5151_v62, %v389_v12  ;;  %1520 = vmatprep.subr.bf16.mxu0 %v4570_v6  ;;  %v592_v20 = vmul.f32 0.2, %v560_v9  ;;  %vm576_vm13 = vcmp.ge.f32.partialorder %v560_v9, 0.0  ;;  %v4582_v62 = vld [vmem:[#allocation7 + $0x314] ss:$8 sps:$4 sm:$0xff]   ;;  %v607_v31 = vsel %vm575_vm14, %v559_v49, %v591_v23 }
 0x140   :  { %v391_v19 = vpop.f32.mrf.mxu0  ;;  %863 = vmatprep.mubr.bf16.mxu0 %v616_v13  ;;  %v434_v5 = vpop.f32.mrf.mxu1 }
 0x141   :  { %vm577_vm12 = vcmp.ge.f32.partialorder %v561_v16, 0.0  ;;  %v593_v21 = vmul.f32 0.2, %v561_v16  ;;  %v562_v22 = vadd.f32 %v5148_v60, %v391_v19  ;;  %864 = vmatmul.mubr.bf16.gmra.mxu0 %v615_v17  ;;  %v608_v28 = vsel %vm576_vm13, %v560_v9, %v592_v20  ;;  %v4588_v60 = vld [vmem:[#allocation7 + $0x304] ss:$8 sps:$4 sm:$0xff]   ;;  %1879 = vmatpush2.bf16.msra.mxu1 %v4631_v56 }
 0x142   :  { %1521 = vmatpush1.bf16.msra.mxu0 %v4568_v15  ;;  %1880 = vmatprep.subr.bf16.mxu1 %v4639_v61  ;;  %v438_v6 = vpop.f32.mrf.mxu1  ;;  %v469_v9 = vsub.s32 2, %v5138_v54 }
 0x143   :  { %vm578_vm15 = vcmp.ge.f32.partialorder %v562_v22, 0.0  ;;  %v594_v26 = vmul.f32 0.2, %v562_v22  ;;  %1522 = vmatprep.subr.bf16.mxu0 %v4576_v18  ;;  %v609_v27 = vsel %vm577_vm12, %v561_v16, %v593_v21 }
 0x144   :  { %v617_v34 = vpack.c.bf16 %v609_v27, %v607_v31  ;;  %v440_v7 = vpop.f32.mrf.mxu1  ;;  %v5174_v11 = vrot.slane %v5145_v58, %v469_v9  ;;  %v5177_v12 = vrot.slane %v5143_v57, %v469_v9 }
 0x145   :  { %v610_v29 = vsel %vm578_vm15, %v562_v22, %v594_v26  ;;  %1881 = vmatpush2.bf16.msra.mxu1 %v4637_v63  ;;  %v902_v26 = vsub.s32 1, %v5138_v54 }
 0x146   :  { %v618_v30 = vpack.c.bf16 %v610_v29, %v608_v28  ;;  %1523 = vmatpush1.bf16.msra.mxu0 %v4574_v25  ;;  %v442_v8 = vpop.f32.mrf.mxu1  ;;  %v475_v13 = vadd.f32 %v5174_v11, %v428_v2  ;;  %v476_v15 = vadd.f32 %v5177_v12, %v430_v3  ;;  %v477_v16 = vadd.f32 %v5174_v11, %v432_v4 }
 0x147   :  { %1524 = vmatprep.subr.bf16.mxu0 %v4582_v62  ;;  %v479_v17 = vadd.f32 %v5174_v11, %v438_v6  ;;  %v478_v19 = vadd.f32 %v5177_v12, %v434_v5  ;;  %v480_v20 = vadd.f32 %v5177_v12, %v440_v7  ;;  %v481_v21 = vadd.f32 %v5174_v11, %v442_v8 }
 0x148   :  { %873 = vmatprep.mubr.bf16.mxu0 %v618_v30  ;;  %v444_v10 = vpop.f32.mrf.mxu1  ;;  %v507_v18 = vmul.f32 0.2, %v475_v13  ;;  %v508_v23 = vmul.f32 0.2, %v476_v15  ;;  %v509_v25 = vmul.f32 0.2, %v477_v16 }
 0x149   :  { %874 = vmatmul.mubr.bf16.gmra.mxu0 %v617_v34  ;;  %vm491_vm0 = vcmp.ge.f32.partialorder %v475_v13, 0.0  ;;  %vm492_vm1 = vcmp.ge.f32.partialorder %v476_v15, 0.0  ;;  %vm493_vm2 = vcmp.ge.f32.partialorder %v477_v16, 0.0  ;;  %v511_v62 = vmul.f32 0.2, %v479_v17 }
 0x14a   :  { %1525 = vmatpush1.bf16.msra.mxu0 %v4580_v32  ;;  %v448_v49 = vpop.f32.mrf.mxu1  ;;  %v482_v28 = vadd.f32 %v5177_v12, %v444_v10  ;;  %v512_v29 = vmul.f32 0.2, %v480_v20  ;;  %v513_v30 = vmul.f32 0.2, %v481_v21  ;;  %v523_v31 = vsel %vm491_vm0, %v475_v13, %v507_v18 }
 0x14b   :  { %1526 = vmatprep.subr.bf16.mxu0 %v4588_v60  ;;  %v510_v32 = vmul.f32 0.2, %v478_v19  ;;  %v5189_v60 = vrot.slane %v5145_v58, %v902_v26  ;;  %vm494_vm3 = vcmp.ge.f32.partialorder %v478_v19, 0.0  ;;  %vm495_vm4 = vcmp.ge.f32.partialorder %v479_v17, 0.0 }
 0x14c   :  { %v450_v14 = vpop.f32.mrf.mxu1  ;;  %vm496_vm5 = vcmp.ge.f32.partialorder %v480_v20, 0.0  ;;  %vm497_vm6 = vcmp.ge.f32.partialorder %v481_v21, 0.0  ;;  %v527_v51 = vsel %vm495_vm4, %v479_v17, %v511_v62  ;;  %vm498_vm7 = vcmp.ge.f32.partialorder %v482_v28, 0.0 }
 0x14d   :  { %v528_v55 = vsel %vm496_vm5, %v480_v20, %v512_v29 }
 0x14e   :  { %1527 = vmatpush1.bf16.msra.mxu0 %v4586_v35  ;;  %v452_v22 = vpop.f32.mrf.mxu1  ;;  %v524_v35 = vsel %vm492_vm1, %v476_v15, %v508_v23 }
 0x14f   :  { %1528 = vmatprep.subr.bf16.mxu0 %v4594_v36  ;;  %v5197_v58 = vadd.f32 %v5174_v11, %v452_v22 }
 0x150   :  { %v454_v34 = vpop.f32.mrf.mxu1 }
 0x151   :  { %v517_v63 = vmul.f32 0.2, %v5197_v58  ;;  %vm501_vm14 = vcmp.ge.f32.partialorder %v5197_v58, 0.0 }
 0x152   :  { %1529 = vmatpush2.bf16.msra.mxu0 %v4592_v37  ;;  %v525_v37 = vsel %vm493_vm2, %v477_v16, %v509_v25  ;;  %v458_v48 = vpop.f32.mrf.mxu1 }
 0x153   :  { %1530 = vmatprep.subr.bf16.mxu0 %v4600_v38  ;;  %v5211_v7 = vadd.f32 %v5174_v11, %v458_v48 }
 0x155   :  { %vm503_vm4 = vcmp.ge.f32.partialorder %v5211_v7, 0.0 }
 0x156   :  { %1531 = vmatpush2.bf16.msra.mxu0 %v4598_v39 }
 0x157   :  { %1532 = vmatprep.subr.bf16.mxu0 %v4606_v40  ;;  %v5192_v40 = vrot.slane %v5143_v57, %v902_v26 }
 0x15a   :  { %1533 = vmatpush2.bf16.msra.mxu0 %v4604_v41  ;;  %v483_v41 = vadd.f32 %v5174_v11, %v448_v49 }
 0x15b   :  { %1534 = vmatprep.subr.bf16.mxu0 %v4612_v43 }
 0x15c   :  { %vm499_vm8 = vcmp.ge.f32.partialorder %v483_v41, 0.0 }
 0x15e   :  { %1535 = vmatpush2.bf16.msra.mxu0 %v4610_v44  ;;  %v484_v44 = vadd.f32 %v5177_v12, %v450_v14 }
 0x15f   :  { %1536 = vmatprep.subr.bf16.mxu0 %v4618_v45  ;;  %v514_v45 = vmul.f32 0.2, %v482_v28 }
 0x160   :  { %v516_v56 = vmul.f32 0.2, %v484_v44  ;;  %vm500_vm9 = vcmp.ge.f32.partialorder %v484_v44, 0.0 }
 0x161   :  { %v530_v2 = vsel %vm498_vm7, %v482_v28, %v514_v45  ;;  %v533_v45 = vsel %vm501_vm14, %v5197_v58, %v517_v63 }
 0x162   :  { %1537 = vmatpush2.bf16.msra.mxu0 %v4616_v47  ;;  %v5200_v47 = vadd.f32 %v5177_v12, %v454_v34  ;;  %v532_v62 = vsel %vm500_vm9, %v484_v44, %v516_v56  ;;  %v519_v34 = vmul.f32 0.2, %v5211_v7 }
 0x163   :  { %1538 = vmatprep.subr.bf16.mxu0 %v4624_v50  ;;  %v526_v50 = vsel %vm494_vm3, %v478_v19, %v510_v32 }
 0x164   :  { %v5207_v3 = vmul.f32 0.2, %v5200_v47  ;;  %vm502_vm15 = vcmp.ge.f32.partialorder %v5200_v47, 0.0 }
 0x166   :  { %1539 = vmatpush2.bf16.msra.mxu0 %v4622_v52  ;;  %v534_v58 = vsel %vm502_vm15, %v5200_v47, %v5207_v3 }
 0x167   :  { %1540 = vmatprep.subr.bf16.mxu0 %v4630_v53 }
 0x16a   :  { %1541 = vmatpush2.bf16.msra.mxu0 %v4628_v33  ;;  %v515_v33 = vmul.f32 0.2, %v483_v41 }
 0x16b   :  { %1542 = vmatprep.subr.bf16.mxu0 %v4636_v59 }
 0x16c   :  { %v531_v17 = vsel %vm499_vm8, %v483_v41, %v515_v33 }
 0x16e   :  { %1543 = vmatpush2.bf16.msra.mxu0 %v4634_v42  ;;  %v529_v42 = vsel %vm497_vm6, %v481_v21, %v513_v30 }
 0x16f   :  { %2196 = vmatprep.subr.bf16.mxu0 %v4642_v1  ;;  %v460_v1 = vpop.f32.mrf.mxu1 }
 0x170   :  { %v5217_v20 = vadd.f32 %v5177_v12, %v460_v1 }
 0x171   :  { %v462_v16 = vpop.f32.mrf.mxu1 }
 0x172   :  { %vm504_vm5 = vcmp.ge.f32.partialorder %v5217_v20, 0.0 }
 0x1f1   :  { %v845_v27 = vpop.f32.mrf.mxu0 }
 0x1f2   :  { %v884_v38 = vadd.f32 %v845_v27, %v523_v31  ;;  %v4640_v31 = vld [vmem:[#allocation7 + $0x270] ss:$8 sps:$4 sm:$0xff]  }
 0x1f3   :  { %v847_v36 = vpop.f32.mrf.mxu0 }
 0x1f4   :  { %v885_v39 = vadd.f32 %v847_v36, %v524_v35  ;;  %v908_v52 = vadd.f32 %v5189_v60, %v884_v38  ;;  %v5227_v36 = vadd.f32 %v5174_v11, %v462_v16  ;;  %v4645_v38 = vld [vmem:[#allocation7 + $0x264] ss:$8 sps:$4 sm:$0xff]  }
 0x1f5   :  { %v849_v43 = vpop.f32.mrf.mxu0 }
 0x1f6   :  { %v886_v46 = vadd.f32 %v849_v43, %v525_v37  ;;  %v909_v24 = vadd.f32 %v5192_v40, %v885_v39  ;;  %v940_v8 = vmul.f32 0.2, %v908_v52  ;;  %vm924_vm13 = vcmp.ge.f32.partialorder %v908_v52, 0.0  ;;  %v464_v37 = vpop.f32.mrf.mxu1 }
 0x1f7   :  { %v851_v57 = vpop.f32.mrf.mxu0  ;;  %v520_v43 = vmul.f32 0.2, %v5217_v20  ;;  %vm505_vm6 = vcmp.ge.f32.partialorder %v5227_v36, 0.0 }
 0x1f8   :  { %v910_v53 = vadd.f32 %v5189_v60, %v886_v46  ;;  %v887_v59 = vadd.f32 %v851_v57, %v526_v50  ;;  %v941_v9 = vmul.f32 0.2, %v909_v24  ;;  %vm925_vm11 = vcmp.ge.f32.partialorder %v909_v24, 0.0 }
 0x1f9   :  { %v855_v61 = vpop.f32.mrf.mxu0  ;;  %v956_v27 = vsel %vm924_vm13, %v908_v52, %v940_v8  ;;  %v490_v57 = vadd.f32 %v5177_v12, %v464_v37  ;;  %v4643_v52 = vld [vmem:[#allocation7 + $0x260] ss:$8 sps:$4 sm:$0xff]  }
 0x1fa   :  { %v942_v4 = vmul.f32 0.2, %v910_v53  ;;  %v911_v5 = vadd.f32 %v5192_v40, %v887_v59  ;;  %vm926_vm10 = vcmp.ge.f32.partialorder %v910_v53, 0.0  ;;  %v888_v13 = vadd.f32 %v855_v61, %v527_v51 }
 0x1fb   :  { %v857_v6 = vpop.f32.mrf.mxu0  ;;  %v957_v26 = vsel %vm925_vm11, %v909_v24, %v941_v9  ;;  %v521_v24 = vmul.f32 0.2, %v5227_v36  ;;  %vm506_vm7 = vcmp.ge.f32.partialorder %v490_v57, 0.0  ;;  %v4651_v9 = vld [vmem:[#allocation7 + $0x244] ss:$8 sps:$4 sm:$0xff]  }
 0x1fc   :  { %v889_v10 = vadd.f32 %v857_v6, %v528_v55  ;;  %vm927_vm12 = vcmp.ge.f32.partialorder %v911_v5, 0.0  ;;  %v943_v49 = vmul.f32 0.2, %v911_v5  ;;  %v958_v18 = vsel %vm926_vm10, %v910_v53, %v942_v4  ;;  %v4648_v55 = vld [vmem:[#allocation7 + $0x254] ss:$8 sps:$4 sm:$0xff]  }
 0x1fd   :  { %v859_v14 = vpop.f32.mrf.mxu0  ;;  %v912_v28 = vadd.f32 %v5189_v60, %v888_v13  ;;  %v972_v32 = vpack.c.bf16 %v958_v18, %v956_v27  ;;  %v522_v4 = vmul.f32 0.2, %v490_v57  ;;  %v535_v13 = vsel %vm503_vm4, %v5211_v7, %v519_v34 }
 0x1fe   :  { %v890_v15 = vadd.f32 %v859_v14, %v529_v42  ;;  %v913_v19 = vadd.f32 %v5192_v40, %v889_v10  ;;  %v959_v22 = vsel %vm927_vm12, %v911_v5, %v943_v49  ;;  %v4646_v5 = vld [vmem:[#allocation7 + $0x250] ss:$8 sps:$4 sm:$0xff]   ;;  %v536_v14 = vsel %vm504_vm5, %v5217_v20, %v520_v43 }
 0x1ff   :  { %v861_v21 = vpop.f32.mrf.mxu0  ;;  %v973_v30 = vpack.c.bf16 %v959_v22, %v957_v26  ;;  %v944_v48 = vmul.f32 0.2, %v912_v28  ;;  %vm928_vm3 = vcmp.ge.f32.partialorder %v912_v28, 0.0  ;;  %v537_v7 = vsel %vm505_vm6, %v5227_v36, %v521_v24  ;;  %v4649_v22 = vld [vmem:[#allocation7 + $0x240] ss:$8 sps:$4 sm:$0xff]  }
 0x200   :  { %v914_v23 = vadd.f32 %v5189_v60, %v890_v15  ;;  %v891_v25 = vadd.f32 %v861_v21, %v530_v2  ;;  %v945_v39 = vmul.f32 0.2, %v913_v19  ;;  %vm929_vm2 = vcmp.ge.f32.partialorder %v913_v19, 0.0  ;;  %v4652_v36 = vld [vmem:[#allocation7 + $0x230] ss:$8 sps:$4 sm:$0xff]  }
 0x201   :  { %v865_v29 = vpop.f32.mrf.mxu0  ;;  %1544 = vmatprep.mubr.bf16.mxu0 %v973_v30  ;;  %1882 = vmatprep.mubr.bf16.mxu1 %v973_v30  ;;  %v960_v3 = vsel %vm928_vm3, %v912_v28, %v944_v48  ;;  %v538_v26 = vsel %vm506_vm7, %v490_v57, %v522_v4  ;;  %v4663_v24 = vld [vmem:[#allocation7 + $0x204] ss:$8 sps:$4 sm:$0xff]  }
 0x202   :  { %v915_v35 = vadd.f32 %v5192_v40, %v891_v25  ;;  %v946_v41 = vmul.f32 0.2, %v914_v23  ;;  %vm930_vm0 = vcmp.ge.f32.partialorder %v914_v23, 0.0  ;;  %1545 = vmatmul.mubr.bf16.vlgmr.msra.gmra.mxu0 %v972_v32  ;;  %1883 = vmatmul.mubr.bf16.vlgmr.msra.gmra.mxu1 %v972_v32  ;;  %v892_v50 = vadd.f32 %v865_v29, %v531_v17  ;;  %v4654_v25 = vld [vmem:[#allocation7 + $0x234] ss:$8 sps:$4 sm:$0xff]  }
 0x203   :  { %v867_v44 = vpop.f32.mrf.mxu0  ;;  %2197 = vmatpush1.bf16.msra.mxu0 %v4640_v31  ;;  %v961_v63 = vsel %vm929_vm2, %v913_v19, %v945_v39 }
 0x204   :  { %vm931_vm1 = vcmp.ge.f32.partialorder %v915_v35, 0.0  ;;  %v947_v46 = vmul.f32 0.2, %v915_v35  ;;  %v893_v11 = vadd.f32 %v867_v44, %v532_v62  ;;  %2198 = vmatprep.subr.bf16.mxu0 %v4645_v38  ;;  %v962_v59 = vsel %vm930_vm0, %v914_v23, %v946_v41  ;;  %v4657_v41 = vld [vmem:[#allocation7 + $0x224] ss:$8 sps:$4 sm:$0xff]  }
 0x205   :  { %v869_v51 = vpop.f32.mrf.mxu0  ;;  %v916_v47 = vadd.f32 %v5189_v60, %v892_v50  ;;  %v974_v8 = vpack.c.bf16 %v962_v59, %v960_v3  ;;  %v4660_v50 = vld [vmem:[#allocation7 + $0x214] ss:$8 sps:$4 sm:$0xff]   ;;  %v4670_v59 = vld [vmem:[#allocation7 + $0x2d0] ss:$8 sps:$4 sm:$0xff]   ;;  %v4679_v3 = vld [vmem:[#allocation7 + $0x2a0] ss:$8 sps:$4 sm:$0xff]  }
 0x206   :  { %v894_v53 = vadd.f32 %v869_v51, %v533_v45  ;;  %v917_v33 = vadd.f32 %v5192_v40, %v893_v11  ;;  %v963_v12 = vsel %vm931_vm1, %v915_v35, %v947_v46  ;;  %v4655_v11 = vld [vmem:[#allocation7 + $0x220] ss:$8 sps:$4 sm:$0xff]  }
 0x207   :  { %v871_v56 = vpop.f32.mrf.mxu0  ;;  %v975_v2 = vpack.c.bf16 %v963_v12, %v961_v63  ;;  %2199 = vmatpush1.bf16.msra.mxu0 %v4643_v52  ;;  %v948_v18 = vmul.f32 0.2, %v916_v47  ;;  %vm932_vm11 = vcmp.ge.f32.partialorder %v916_v47, 0.0  ;;  %v4658_v52 = vld [vmem:[#allocation7 + $0x210] ss:$8 sps:$4 sm:$0xff]  }
 0x208   :  { %v918_v61 = vadd.f32 %v5189_v60, %v894_v53  ;;  %v895_v42 = vadd.f32 %v871_v56, %v534_v58  ;;  %2200 = vmatprep.subr.bf16.mxu0 %v4648_v55  ;;  %v949_v10 = vmul.f32 0.2, %v917_v33  ;;  %vm933_vm10 = vcmp.ge.f32.partialorder %v917_v33, 0.0  ;;  %v4661_v53 = vld [vmem:[#allocation7 + $0x200] ss:$8 sps:$4 sm:$0xff]  }
 0x209   :  { %v875_v1 = vpop.f32.mrf.mxu0  ;;  %1554 = vmatprep.mubr.bf16.mxu0 %v975_v2  ;;  %1892 = vmatprep.mubr.bf16.mxu1 %v975_v2  ;;  %v964_v35 = vsel %vm932_vm11, %v916_v47, %v948_v18  ;;  %v4666_v58 = vld [vmem:[#allocation7 + $0x2f4] ss:$8 sps:$4 sm:$0xff]   ;;  %v4664_v55 = vld [vmem:[#allocation7 + $0x2f0] ss:$8 sps:$4 sm:$0xff]   ;;  %v4667_v56 = vld [vmem:[#allocation7 + $0x2e0] ss:$8 sps:$4 sm:$0xff]  }
 0x20a   :  { %v919_v6 = vadd.f32 %v5192_v40, %v895_v42  ;;  %v950_v49 = vmul.f32 0.2, %v918_v61  ;;  %vm934_vm8 = vcmp.ge.f32.partialorder %v918_v61, 0.0  ;;  %1555 = vmatmul.mubr.bf16.gmra.mxu0 %v974_v8  ;;  %1893 = vmatmul.mubr.bf16.gmra.mxu1 %v974_v8  ;;  %v896_v19 = vadd.f32 %v875_v1, %v535_v13  ;;  %v4672_v12 = vld [vmem:[#allocation7 + $0x2d4] ss:$8 sps:$4 sm:$0xff]   ;;  %v5268_v1 = vpop.f32.mrf.mxu1 }
 0x20b   :  { %v877_v15 = vpop.f32.mrf.mxu0  ;;  %2201 = vmatpush1.bf16.msra.mxu0 %v4646_v5  ;;  %v965_v31 = vsel %vm933_vm10, %v917_v33, %v949_v10  ;;  %v4669_v33 = vld [vmem:[#allocation7 + $0x2e4] ss:$8 sps:$4 sm:$0xff]   ;;  %v4673_v42 = vld [vmem:[#allocation7 + $0x2c0] ss:$8 sps:$4 sm:$0xff]   ;;  %v4678_v63 = vld [vmem:[#allocation7 + $0x2b4] ss:$8 sps:$4 sm:$0xff]  }
 0x20c   :  { %vm935_vm9 = vcmp.ge.f32.partialorder %v919_v6, 0.0  ;;  %v951_v16 = vmul.f32 0.2, %v919_v6  ;;  %v897_v17 = vadd.f32 %v877_v15, %v536_v14  ;;  %2202 = vmatprep.subr.bf16.mxu0 %v4651_v9  ;;  %v966_v28 = vsel %vm934_vm8, %v918_v61, %v950_v49  ;;  %v4675_v61 = vld [vmem:[#allocation7 + $0x2c4] ss:$8 sps:$4 sm:$0xff]   ;;  %v5270_v4 = vpop.f32.mrf.mxu1 }
 0x20d   :  { %v879_v21 = vpop.f32.mrf.mxu0  ;;  %v920_v32 = vadd.f32 %v5189_v60, %v896_v19  ;;  %v976_v39 = vpack.c.bf16 %v966_v28, %v964_v35  ;;  %v4676_v47 = vld [vmem:[#allocation7 + $0x2b0] ss:$8 sps:$4 sm:$0xff]   ;;  %v4681_v2 = vld [vmem:[#allocation7 + $0x2a4] ss:$8 sps:$4 sm:$0xff]   ;;  %v4684_v5 = vld [vmem:[#allocation7 + $0x294] ss:$8 sps:$4 sm:$0xff]  }
 0x20e   :  { %v921_v20 = vadd.f32 %v5192_v40, %v897_v17  ;;  %v898_v23 = vadd.f32 %v879_v21, %v537_v7  ;;  %v967_v27 = vsel %vm935_vm9, %v919_v6, %v951_v16  ;;  %v4682_v6 = vld [vmem:[#allocation7 + $0x290] ss:$8 sps:$4 sm:$0xff]   ;;  %v5272_v8 = vpop.f32.mrf.mxu1  ;;  %v4687_v9 = vld [vmem:[#allocation7 + $0x284] ss:$8 sps:$4 sm:$0xff]   ;;  %v4685_v10 = vld [vmem:[#allocation7 + $0x280] ss:$8 sps:$4 sm:$0xff]  }
 0x20f   :  { %v881_v62 = vpop.f32.mrf.mxu0  ;;  %v977_v34 = vpack.c.bf16 %v967_v27, %v965_v31  ;;  %2203 = vmatpush1.bf16.msra.mxu0 %v4649_v22  ;;  %vm936_vm15 = vcmp.ge.f32.partialorder %v920_v32, 0.0  ;;  %v4688_v19 = vld [vmem:[#allocation5 + $0x2e0] ss:$16 sps:$4 sm:$0xff]   ;;  %v4690_v7 = vld [vmem:[#allocation5 + $0x2e4] ss:$16 sps:$4 sm:$0xff]  }
 0x210   :  { %v922_v29 = vadd.f32 %v5189_v60, %v898_v23  ;;  %v899_v30 = vadd.f32 %v881_v62, %v538_v26  ;;  %v953_v37 = vmul.f32 0.2, %v921_v20  ;;  %2204 = vmatprep.subr.bf16.mxu0 %v4654_v25  ;;  %vm937_vm12 = vcmp.ge.f32.partialorder %v921_v20, 0.0  ;;  %v5274_v49 = vpop.f32.mrf.mxu1  ;;  %v4693_v22 = vld [vmem:[#allocation5 + $0x2c4] ss:$16 sps:$4 sm:$0xff]   ;;  %2558 = vmatprep.subr.bf16.mxu1 %v4690_v7 }
 0x211   :  { %1564 = vmatprep.mubr.bf16.mxu0 %v977_v34  ;;  %1902 = vmatprep.mubr.bf16.mxu1 %v977_v34  ;;  %v952_v60 = vmul.f32 0.2, %v920_v32  ;;  %v4696_v23 = vld [vmem:[#allocation5 + $0x2a4] ss:$16 sps:$4 sm:$0xff]   ;;  %v4694_v26 = vld [vmem:[#allocation5 + $0x2a0] ss:$16 sps:$4 sm:$0xff]  }
 0x212   :  { %v923_v38 = vadd.f32 %v5192_v40, %v899_v30  ;;  %v954_v43 = vmul.f32 0.2, %v922_v29  ;;  %vm938_vm13 = vcmp.ge.f32.partialorder %v922_v29, 0.0  ;;  %1565 = vmatmul.mubr.bf16.gmra.mxu0 %v976_v39  ;;  %1903 = vmatmul.mubr.bf16.gmra.mxu1 %v976_v39  ;;  %v969_v45 = vsel %vm937_vm12, %v921_v20, %v953_v37  ;;  %v5276_v13 = vpop.f32.mrf.mxu1  ;;  %v4691_v20 = vld [vmem:[#allocation5 + $0x2c0] ss:$16 sps:$4 sm:$0xff]  }
 0x213   :  { %2205 = vmatpush1.bf16.msra.mxu0 %v4652_v36  ;;  %v968_v57 = vsel %vm936_vm15, %v920_v32, %v952_v60  ;;  %2559 = vmatpush1.bf16.msra.mxu1 %v4688_v19  ;;  %v4699_v62 = vld [vmem:[#allocation5 + $0x284] ss:$16 sps:$4 sm:$0xff]   ;;  %v4697_v28 = vld [vmem:[#allocation5 + $0x280] ss:$16 sps:$4 sm:$0xff]   ;;  %v4714_v60 = vld [vmem:[#allocation5 + $0x2ec] ss:$16 sps:$4 sm:$0xff]  }
 0x214   :  { %vm939_vm14 = vcmp.ge.f32.partialorder %v923_v38, 0.0  ;;  %v955_v44 = vmul.f32 0.2, %v923_v38  ;;  %2206 = vmatprep.subr.bf16.mxu0 %v4657_v41  ;;  %v970_v48 = vsel %vm938_vm13, %v922_v29, %v954_v43  ;;  %v5278_v14 = vpop.f32.mrf.mxu1  ;;  %2560 = vmatprep.subr.bf16.mxu1 %v4693_v22  ;;  %v4738_v29 = vld [vmem:[#allocation7 + $0x674] ss:$8 sps:$4 sm:$0xff]  }
 0x215   :  { %v978_v51 = vpack.c.bf16 %v970_v48, %v968_v57  ;;  %v4702_v30 = vld [vmem:[#allocation5 + $0x264] ss:$16 sps:$4 sm:$0xff]   ;;  %v4700_v32 = vld [vmem:[#allocation5 + $0x260] ss:$16 sps:$4 sm:$0xff]   ;;  %v4720_v57 = vld [vmem:[#allocation5 + $0x2ac] ss:$16 sps:$4 sm:$0xff]  }
 0x216   :  { %v971_v46 = vsel %vm939_vm14, %v923_v38, %v955_v44  ;;  %v5280_v15 = vpop.f32.mrf.mxu1  ;;  %v4705_v34 = vld [vmem:[#allocation5 + $0x244] ss:$16 sps:$4 sm:$0xff]   ;;  %v4703_v36 = vld [vmem:[#allocation5 + $0x240] ss:$16 sps:$4 sm:$0xff]   ;;  %v4733_v19 = vld [vmem:[#allocation5 + $0x208] ss:$16 sps:$4 sm:$0xff]  }
 0x217   :  { %v979_v40 = vpack.c.bf16 %v971_v46, %v969_v45  ;;  %2207 = vmatpush1.bf16.msra.mxu0 %v4655_v11  ;;  %2561 = vmatpush1.bf16.msra.mxu1 %v4691_v20  ;;  %v4708_v37 = vld [vmem:[#allocation5 + $0x224] ss:$16 sps:$4 sm:$0xff]   ;;  %v4706_v39 = vld [vmem:[#allocation5 + $0x220] ss:$16 sps:$4 sm:$0xff]   ;;  %v4712_v46 = vld [vmem:[#allocation5 + $0x2e8] ss:$16 sps:$4 sm:$0xff]  }
 0x218   :  { %2208 = vmatprep.subr.bf16.mxu0 %v4660_v50  ;;  %v5282_v16 = vpop.f32.mrf.mxu1  ;;  %2562 = vmatprep.subr.bf16.mxu1 %v4696_v23  ;;  %v4711_v41 = vld [vmem:[#allocation5 + $0x204] ss:$16 sps:$4 sm:$0xff]   ;;  %v4709_v44 = vld [vmem:[#allocation5 + $0x200] ss:$16 sps:$4 sm:$0xff]   ;;  %v4717_v11 = vld [vmem:[#allocation5 + $0x2cc] ss:$16 sps:$4 sm:$0xff]  }
 0x219   :  { %1574 = vmatprep.mubr.bf16.mxu0 %v979_v40  ;;  %1912 = vmatprep.mubr.bf16.mxu1 %v979_v40  ;;  %v4896_v48 = vld [vmem:[#allocation2] sm:$0xff]   ;;  %v4715_v50 = vld [vmem:[#allocation5 + $0x2c8] ss:$16 sps:$4 sm:$0xff]   ;;  %v4741_v7 = vld [vmem:[#allocation7 + $0x474] ss:$8 sps:$4 sm:$0xff]  }
 0x21a   :  { %1575 = vmatmul.mubr.bf16.gmra.mxu0 %v978_v51  ;;  %1913 = vmatmul.mubr.bf16.gmra.mxu1 %v978_v51  ;;  %v5284_v17 = vpop.f32.mrf.mxu1  ;;  %v4739_v20 = vld [vmem:[#allocation7 + $0x470] ss:$8 sps:$4 sm:$0xff]   ;;  %v4747_v23 = vld [vmem:[#allocation7 + $0x464] ss:$8 sps:$4 sm:$0xff]  }
 0x21b   :  { %2590 = vmatprep.mubr.bf16.mxu1 %v5043_v0  ;;  %2209 = vmatpush1.bf16.msra.mxu0 %v4658_v52 }
 0x21c   :  { %2210 = vmatprep.subr.bf16.mxu0 %v4663_v24  ;;  %v5286_v18 = vpop.f32.mrf.mxu1  ;;  %2563 = vmatpush1.bf16.msra.mxu1 %v4694_v26  ;;  %v4718_v24 = vld [vmem:[#allocation5 + $0x2a8] ss:$16 sps:$4 sm:$0xff]  }
 0x21d   :  { %2564 = vmatprep.subr.bf16.mxu1 %v4699_v62  ;;  %v4745_v62 = vld [vmem:[#allocation7 + $0x460] ss:$8 sps:$4 sm:$0xff]  }
 0x21e   :  { %v5288_v21 = vpop.f32.mrf.mxu1 }
 0x21f   :  { %2211 = vmatpush1.bf16.msra.mxu0 %v4661_v53  ;;  %v4723_v53 = vld [vmem:[#allocation5 + $0x28c] ss:$16 sps:$4 sm:$0xff]  }
 0x220   :  { %2212 = vmatprep.subr.bf16.mxu0 %v4666_v58  ;;  %v5290_v25 = vpop.f32.mrf.mxu1  ;;  %2565 = vmatpush1.bf16.msra.mxu1 %v4697_v28  ;;  %v4897_v58 = vld [vmem:[#allocation2 + $0x8] sm:$0xff]   ;;  %v4753_v28 = vld [vmem:[#allocation7 + $0x454] ss:$8 sps:$4 sm:$0xff]  }
 0x221   :  { %2566 = vmatprep.subr.bf16.mxu1 %v4702_v30  ;;  %v4751_v30 = vld [vmem:[#allocation7 + $0x450] ss:$8 sps:$4 sm:$0xff]  }
 0x222   :  { %v5292_v27 = vpop.f32.mrf.mxu1 }
 0x223   :  { %2213 = vmatpush2.bf16.msra.mxu0 %v4664_v55 }
 0x224   :  { %2214 = vmatprep.subr.bf16.mxu0 %v4669_v33  ;;  %v5294_v31 = vpop.f32.mrf.mxu1  ;;  %2567 = vmatpush1.bf16.msra.mxu1 %v4700_v32  ;;  %v4721_v33 = vld [vmem:[#allocation5 + $0x288] ss:$16 sps:$4 sm:$0xff]   ;;  %v4759_v32 = vld [vmem:[#allocation7 + $0x444] ss:$8 sps:$4 sm:$0xff]  }
 0x225   :  { %2568 = vmatprep.subr.bf16.mxu1 %v4705_v34 }
 0x226   :  { %v5296_v35 = vpop.f32.mrf.mxu1 }
 0x227   :  { %2215 = vmatpush2.bf16.msra.mxu0 %v4667_v56  ;;  %v4726_v56 = vld [vmem:[#allocation5 + $0x26c] ss:$16 sps:$4 sm:$0xff]  }
 0x228   :  { %2216 = vmatprep.subr.bf16.mxu0 %v4672_v12  ;;  %v5298_v38 = vpop.f32.mrf.mxu1  ;;  %2569 = vmatpush1.bf16.msra.mxu1 %v4703_v36  ;;  %v4757_v36 = vld [vmem:[#allocation7 + $0x440] ss:$8 sps:$4 sm:$0xff]  }
 0x229   :  { %2570 = vmatprep.subr.bf16.mxu1 %v4708_v37  ;;  %v4765_v37 = vld [vmem:[#allocation7 + $0x434] ss:$8 sps:$4 sm:$0xff]  }
 0x22a   :  { %v5300_v43 = vpop.f32.mrf.mxu1 }
 0x22b   :  { %2217 = vmatpush2.bf16.msra.mxu0 %v4670_v59  ;;  %v4724_v59 = vld [vmem:[#allocation5 + $0x268] ss:$16 sps:$4 sm:$0xff]  }
 0x22c   :  { %2218 = vmatprep.subr.bf16.mxu0 %v4675_v61  ;;  %2571 = vmatpush1.bf16.msra.mxu1 %v4706_v39  ;;  %v5302_v45 = vpop.f32.mrf.mxu1  ;;  %v4729_v61 = vld [vmem:[#allocation5 + $0x24c] ss:$16 sps:$4 sm:$0xff]  }
 0x22d   :  { %2572 = vmatprep.subr.bf16.mxu1 %v4711_v41  ;;  %v4763_v41 = vld [vmem:[#allocation7 + $0x430] ss:$8 sps:$4 sm:$0xff]  }
 0x22e   :  { %v5304_v40 = vpop.f32.mrf.mxu1 }
 0x22f   :  { %2219 = vmatpush2.bf16.msra.mxu0 %v4673_v42  ;;  %v4898_v42 = vld [vmem:[#allocation2 + $0x10] sm:$0xff]  }
 0x230   :  { %2220 = vmatprep.subr.bf16.mxu0 %v4678_v63  ;;  %2573 = vmatpush1.bf16.msra.mxu1 %v4709_v44  ;;  %v5307_v51 = vpop.f32.mrf.mxu1  ;;  %v4771_v44 = vld [vmem:[#allocation7 + $0x424] ss:$8 sps:$4 sm:$0xff]  }
 0x231   :  { %2631 = vmatprep.subr.bf16.mxu1 %v4714_v60 }
 0x232   :  { %v5309_v52 = vpop.f32.mrf.mxu1 }
 0x233   :  { %2221 = vmatpush2.bf16.msra.mxu0 %v4676_v47  ;;  %2591 = vmatmul.mubr.bf16.vlgmr.msra.gmra.mxu1 %v4896_v48  ;;  %v4727_v47 = vld [vmem:[#allocation5 + $0x248] ss:$16 sps:$4 sm:$0xff]  }
 0x234   :  { %2222 = vmatprep.subr.bf16.mxu0 %v4681_v2  ;;  %2632 = vmatpush1.bf16.msra.mxu1 %v4712_v46  ;;  %v5311_v55 = vpop.f32.mrf.mxu1  ;;  %v4732_v2 = vld [vmem:[#allocation5 + $0x22c] ss:$16 sps:$4 sm:$0xff]   ;;  %v4769_v46 = vld [vmem:[#allocation7 + $0x420] ss:$8 sps:$4 sm:$0xff]  }
 0x235   :  { %2600 = vmatprep.mubr.bf16.mxu1 %v5043_v0  ;;  %2633 = vmatprep.subr.bf16.mxu1 %v4717_v11  ;;  %v1925_v11 = vsub.s32 3, %v5138_v54 }
 0x236   :  { %v5314_v12 = vpop.f32.mrf.mxu1 }
 0x237   :  { %2223 = vmatpush2.bf16.msra.mxu0 %v4679_v3 }
 0x238   :  { %2224 = vmatprep.subr.bf16.mxu0 %v4684_v5  ;;  %2634 = vmatpush1.bf16.msra.mxu1 %v4715_v50  ;;  %v5316_v63 = vpop.f32.mrf.mxu1  ;;  %v4730_v5 = vld [vmem:[#allocation5 + $0x228] ss:$16 sps:$4 sm:$0xff]  }
 0x239   :  { %2635 = vmatprep.subr.bf16.mxu1 %v4720_v57 }
 0x23a   :  { %v5319_v3 = vpop.f32.mrf.mxu1 }
 0x23b   :  { %2225 = vmatpush2.bf16.msra.mxu0 %v4682_v6  ;;  %2601 = vmatmul.mubr.bf16.gmra.mxu1 %v4897_v58  ;;  %v4735_v6 = vld [vmem:[#allocation5 + $0x20c] ss:$16 sps:$4 sm:$0xff]  }
 0x23c   :  { %2226 = vmatprep.subr.bf16.mxu0 %v4687_v9  ;;  %2636 = vmatpush1.bf16.msra.mxu1 %v4718_v24  ;;  %v4899_v9 = vld [vmem:[#allocation2 + $0x18] sm:$0xff]   ;;  %v5340_v24 = vld [vmem:[#allocation8 + $0x8] sm:$0xff] }
 0x23d   :  { %2610 = vmatprep.mubr.bf16.mxu1 %v5043_v0  ;;  %2637 = vmatprep.subr.bf16.mxu1 %v4723_v53  ;;  %v5343_v53 = vrot.slane %v5340_v24, %v1925_v11 }
 0x23f   :  { %2227 = vmatpush2.bf16.msra.mxu0 %v4685_v10  ;;  %v5321_v10 = vpop.f32.mrf.mxu1 }
 0x240   :  { %2897 = vmatprep.subr.bf16.mxu0 %v4738_v29  ;;  %2638 = vmatpush1.bf16.msra.mxu1 %v4721_v33 }
 0x241   :  { %2639 = vmatprep.subr.bf16.mxu1 %v4726_v56  ;;  %v5324_v22 = vpop.f32.mrf.mxu1  ;;  %v5346_v56 = vld [vmem:[#allocation8] sm:$0xff] }
 0x243   :  { %2611 = vmatmul.mubr.bf16.gmra.mxu1 %v4898_v42  ;;  %v5326_v26 = vpop.f32.mrf.mxu1 }
 0x244   :  { %2640 = vmatpush1.bf16.msra.mxu1 %v4724_v59  ;;  %2620 = vmatprep.mubr.bf16.mxu1 %v5043_v0  ;;  %v5349_v59 = vrot.slane %v5346_v56, %v1925_v11 }
 0x245   :  { %2641 = vmatprep.subr.bf16.mxu1 %v4729_v61  ;;  %v5329_v29 = vpop.f32.mrf.mxu1  ;;  %v4783_v61 = vld [vmem:[#allocation7 + $0x404] ss:$8 sps:$4 sm:$0xff]  }
 0x247   :  { %v5331_v34 = vpop.f32.mrf.mxu1 }
 0x248   :  { %2642 = vmatpush1.bf16.msra.mxu1 %v4727_v47 }
 0x249   :  { %2643 = vmatprep.subr.bf16.mxu1 %v4732_v2  ;;  %v5334_v39 = vpop.f32.mrf.mxu1 }
 0x24b   :  { %2621 = vmatmul.mubr.bf16.gmra.mxu1 %v4899_v9  ;;  %v5336_v60 = vpop.f32.mrf.mxu1 }
 0x24c   :  { %2644 = vmatpush1.bf16.msra.mxu1 %v4730_v5  ;;  %2663 = vmatprep.mubr.bf16.mxu1 %v5043_v0 }
 0x24d   :  { %2645 = vmatprep.subr.bf16.mxu1 %v4735_v6  ;;  %v4781_v6 = vld [vmem:[#allocation7 + $0x400] ss:$8 sps:$4 sm:$0xff]  }
 0x250   :  { %2646 = vmatpush1.bf16.msra.mxu1 %v4733_v19  ;;  %v4789_v19 = vld [vmem:[#allocation7 + $0x4f4] ss:$8 sps:$4 sm:$0xff]  }
 0x251   :  { %3235 = vmatprep.subr.bf16.mxu1 %v4741_v7 }
 0x253   :  { %2664 = vmatmul.mubr.bf16.vlgmr.msra.gmra.mxu1 %v4896_v48  ;;  %v4777_v48 = vld [vmem:[#allocation7 + $0x414] ss:$8 sps:$4 sm:$0xff]  }
 0x254   :  { %3236 = vmatpush1.bf16.msra.mxu1 %v4739_v20  ;;  %2673 = vmatprep.mubr.bf16.mxu1 %v5043_v0 }
 0x255   :  { %3237 = vmatprep.subr.bf16.mxu1 %v4747_v23  ;;  %v4787_v23 = vld [vmem:[#allocation7 + $0x4f0] ss:$8 sps:$4 sm:$0xff]  }
 0x258   :  { %3238 = vmatpush1.bf16.msra.mxu1 %v4745_v62 }
 0x259   :  { %3239 = vmatprep.subr.bf16.mxu1 %v4753_v28 }
 0x25b   :  { %2674 = vmatmul.mubr.bf16.gmra.mxu1 %v4897_v58  ;;  %v4775_v58 = vld [vmem:[#allocation7 + $0x410] ss:$8 sps:$4 sm:$0xff]  }
 0x25c   :  { %3240 = vmatpush1.bf16.msra.mxu1 %v4751_v30  ;;  %2683 = vmatprep.mubr.bf16.mxu1 %v5043_v0 }
 0x25d   :  { %3241 = vmatprep.subr.bf16.mxu1 %v4759_v32 }
 0x260   :  { %3242 = vmatpush1.bf16.msra.mxu1 %v4757_v36  ;;  %v4795_v36 = vld [vmem:[#allocation7 + $0x4e4] ss:$8 sps:$4 sm:$0xff]  }
 0x261   :  { %3243 = vmatprep.subr.bf16.mxu1 %v4765_v37 }
 0x263   :  { %2684 = vmatmul.mubr.bf16.gmra.mxu1 %v4898_v42 }
 0x264   :  { %3244 = vmatpush1.bf16.msra.mxu1 %v4763_v41  ;;  %2693 = vmatprep.mubr.bf16.mxu1 %v5043_v0 }
 0x265   :  { %3245 = vmatprep.subr.bf16.mxu1 %v4771_v44 }
 0x268   :  { %3246 = vmatpush1.bf16.msra.mxu1 %v4769_v46 }
 0x269   :  { %3247 = vmatprep.subr.bf16.mxu1 %v4777_v48 }
 0x26b   :  { %2694 = vmatmul.mubr.bf16.gmra.mxu1 %v4899_v9 }
 0x26c   :  { %3248 = vmatpush1.bf16.msra.mxu1 %v4775_v58 }
 0x26d   :  { %3249 = vmatprep.subr.bf16.mxu1 %v4783_v61  ;;  %v4736_v61 = vld [vmem:[#allocation7 + $0x670] ss:$8 sps:$4 sm:$0xff]  }
 0x270   :  { %3250 = vmatpush1.bf16.msra.mxu1 %v4781_v6  ;;  %v4744_v6 = vld [vmem:[#allocation7 + $0x664] ss:$8 sps:$4 sm:$0xff]  }
 0x271   :  { %3251 = vmatprep.subr.bf16.mxu1 %v4789_v19  ;;  %v4742_v19 = vld [vmem:[#allocation7 + $0x660] ss:$8 sps:$4 sm:$0xff]  }
 0x274   :  { %3252 = vmatpush2.bf16.msra.mxu1 %v4787_v23 }
 0x275   :  { %3253 = vmatprep.subr.bf16.mxu1 %v4795_v36 }
 0x2c2   :  { %v1884_v50 = vpop.f32.mrf.mxu1 }
 0x2c3   :  { %v1885_v33 = vadd.f32 %v1884_v50, %v5268_v1 }
 0x2c4   :  { %v1886_v57 = vpop.f32.mrf.mxu1 }
 0x2c5   :  { %v1887_v0 = vadd.f32 %v1886_v57, %v5270_v4  ;;  %v1931_v1 = vadd.f32 %v5349_v59, %v1885_v33  ;;  %v4793_v57 = vld [vmem:[#allocation7 + $0x4e0] ss:$8 sps:$4 sm:$0xff]  }
 0x2c6   :  { %v1888_v42 = vpop.f32.mrf.mxu1  ;;  %3254 = vmatpush2.bf16.msra.mxu1 %v4793_v57  ;;  %v4748_v57 = vld [vmem:[#allocation7 + $0x650] ss:$8 sps:$4 sm:$0xff]  }
 0x2c7   :  { %v1932_v47 = vadd.f32 %v5343_v53, %v1887_v0  ;;  %v1889_v2 = vadd.f32 %v1888_v42, %v5272_v8  ;;  %v1963_v8 = vmul.f32 0.2, %v1931_v1  ;;  %vm1947_vm2 = vcmp.ge.f32.partialorder %v1931_v1, 0.0  ;;  %v4801_v42 = vld [vmem:[#allocation7 + $0x4d4] ss:$8 sps:$4 sm:$0xff]  }
 0x2c8   :  { %v1890_v5 = vpop.f32.mrf.mxu1  ;;  %3255 = vmatprep.subr.bf16.mxu1 %v4801_v42 }
 0x2c9   :  { %v1933_v7 = vadd.f32 %v5349_v59, %v1889_v2  ;;  %v1891_v20 = vadd.f32 %v1890_v5, %v5274_v49  ;;  %v1964_v62 = vmul.f32 0.2, %v1932_v47  ;;  %vm1948_vm1 = vcmp.ge.f32.partialorder %v1932_v47, 0.0 }
 0x2ca   :  { %v1894_v4 = vpop.f32.mrf.mxu1  ;;  %v1979_v58 = vsel %vm1947_vm2, %v1931_v1, %v1963_v8  ;;  %v4807_v8 = vld [vmem:[#allocation7 + $0x4c4] ss:$8 sps:$4 sm:$0xff]  }
 0x2cb   :  { %vm1949_vm0 = vcmp.ge.f32.partialorder %v1933_v7, 0.0  ;;  %v1965_v9 = vmul.f32 0.2, %v1933_v7  ;;  %v1934_v28 = vadd.f32 %v5343_v53, %v1891_v20  ;;  %v1895_v49 = vadd.f32 %v1894_v4, %v5276_v13  ;;  %v4750_v20 = vld [vmem:[#allocation7 + $0x654] ss:$8 sps:$4 sm:$0xff]  }
 0x2cc   :  { %v1896_v30 = vpop.f32.mrf.mxu1  ;;  %v1980_v48 = vsel %vm1948_vm1, %v1932_v47, %v1964_v62 }
 0x2cd   :  { %v1897_v32 = vadd.f32 %v1896_v30, %v5278_v14  ;;  %vm1950_vm3 = vcmp.ge.f32.partialorder %v1934_v28, 0.0  ;;  %v1966_v37 = vmul.f32 0.2, %v1934_v28  ;;  %v1981_v44 = vsel %vm1949_vm0, %v1933_v7, %v1965_v9 }
 0x2ce   :  { %v1898_v41 = vpop.f32.mrf.mxu1  ;;  %v1995_v2 = vpack.c.bf16 %v1981_v44, %v1979_v58  ;;  %v1935_v13 = vadd.f32 %v5349_v59, %v1895_v49  ;;  %v4805_v44 = vld [vmem:[#allocation7 + $0x4c0] ss:$8 sps:$4 sm:$0xff]  }
 0x2cf   :  { %v1899_v46 = vadd.f32 %v1898_v41, %v5280_v15  ;;  %v1982_v50 = vsel %vm1950_vm3, %v1934_v28, %v1966_v37  ;;  %v1936_v33 = vadd.f32 %v5343_v53, %v1897_v32 }
 0x2d0   :  { %v1900_v11 = vpop.f32.mrf.mxu1  ;;  %v1996_v0 = vpack.c.bf16 %v1982_v50, %v1980_v48  ;;  %v1967_v62 = vmul.f32 0.2, %v1935_v13  ;;  %vm1951_vm7 = vcmp.ge.f32.partialorder %v1935_v13, 0.0 }
 0x2d1   :  { %v1901_v14 = vadd.f32 %v1900_v11, %v5282_v16  ;;  %v1937_v5 = vadd.f32 %v5349_v59, %v1899_v46  ;;  %v4799_v16 = vld [vmem:[#allocation7 + $0x4d0] ss:$8 sps:$4 sm:$0xff]   ;;  %v1968_v4 = vmul.f32 0.2, %v1936_v33  ;;  %vm1952_vm6 = vcmp.ge.f32.partialorder %v1936_v33, 0.0 }
 0x2d2   :  { %v1904_v15 = vpop.f32.mrf.mxu1  ;;  %2228 = vmatprep.mubr.bf16.mxu0 %v1996_v0  ;;  %3256 = vmatpush2.bf16.msra.mxu1 %v4799_v16  ;;  %v4756_v0 = vld [vmem:[#allocation7 + $0x644] ss:$8 sps:$4 sm:$0xff]  }
 0x2d3   :  { %v1938_v47 = vadd.f32 %v5343_v53, %v1901_v14  ;;  %v1969_v1 = vmul.f32 0.2, %v1937_v5  ;;  %2229 = vmatmul.mubr.bf16.vlgmr.msra.gmra.mxu0 %v1995_v2  ;;  %vm1953_vm4 = vcmp.ge.f32.partialorder %v1937_v5, 0.0  ;;  %v1905_v9 = vadd.f32 %v1904_v15, %v5284_v17  ;;  %3257 = vmatprep.subr.bf16.mxu1 %v4807_v8 }
 0x2d4   :  { %v1906_v7 = vpop.f32.mrf.mxu1  ;;  %2898 = vmatpush1.bf16.msra.mxu0 %v4736_v61 }
 0x2d5   :  { %vm1954_vm5 = vcmp.ge.f32.partialorder %v1938_v47, 0.0  ;;  %v1970_v23 = vmul.f32 0.2, %v1938_v47  ;;  %v1907_v28 = vadd.f32 %v1906_v7, %v5286_v18  ;;  %2899 = vmatprep.subr.bf16.mxu0 %v4744_v6  ;;  %v1985_v41 = vsel %vm1953_vm4, %v1937_v5, %v1969_v1  ;;  %v4754_v6 = vld [vmem:[#allocation7 + $0x640] ss:$8 sps:$4 sm:$0xff]  }
 0x2d6   :  { %v1908_v30 = vpop.f32.mrf.mxu1  ;;  %v1984_v18 = vsel %vm1952_vm6, %v1936_v33, %v1968_v4  ;;  %v1939_v11 = vadd.f32 %v5349_v59, %v1905_v9  ;;  %3258 = vmatpush2.bf16.msra.mxu1 %v4805_v44 }
 0x2d7   :  { %v1909_v32 = vadd.f32 %v1908_v30, %v5288_v21  ;;  %v1940_v36 = vadd.f32 %v5343_v53, %v1907_v28  ;;  %v1986_v49 = vsel %vm1954_vm5, %v1938_v47, %v1970_v23  ;;  %v1983_v21 = vsel %vm1951_vm7, %v1935_v13, %v1967_v62  ;;  %v4768_v30 = vld [vmem:[#allocation7 + $0x624] ss:$8 sps:$4 sm:$0xff]  }
 0x2d8   :  { %v1910_v37 = vpop.f32.mrf.mxu1  ;;  %2900 = vmatpush1.bf16.msra.mxu0 %v4742_v19  ;;  %v1998_v50 = vpack.c.bf16 %v1986_v49, %v1984_v18  ;;  %v1997_v14 = vpack.c.bf16 %v1985_v41, %v1983_v21  ;;  %v1971_v5 = vmul.f32 0.2, %v1939_v11  ;;  %vm1955_vm11 = vcmp.ge.f32.partialorder %v1939_v11, 0.0  ;;  %v4762_v19 = vld [vmem:[#allocation7 + $0x634] ss:$8 sps:$4 sm:$0xff]  }
 0x2d9   :  { %v1941_v46 = vadd.f32 %v5349_v59, %v1909_v32  ;;  %v1911_v17 = vadd.f32 %v1910_v37, %v5290_v25  ;;  %2901 = vmatprep.subr.bf16.mxu0 %v4750_v20  ;;  %v1972_v61 = vmul.f32 0.2, %v1940_v36  ;;  %vm1956_vm10 = vcmp.ge.f32.partialorder %v1940_v36, 0.0  ;;  %v4786_v21 = vld [vmem:[#allocation7 + $0x6f4] ss:$8 sps:$4 sm:$0xff]  }
 0x2da   :  { %v1914_v48 = vpop.f32.mrf.mxu1  ;;  %2238 = vmatprep.mubr.bf16.mxu0 %v1998_v50  ;;  %v1987_v9 = vsel %vm1955_vm11, %v1939_v11, %v1971_v5  ;;  %v4772_v11 = vld [vmem:[#allocation7 + $0x610] ss:$8 sps:$4 sm:$0xff]   ;;  %v4778_v50 = vld [vmem:[#allocation7 + $0x600] ss:$8 sps:$4 sm:$0xff]  }
 0x2db   :  { %v1942_v58 = vadd.f32 %v5343_v53, %v1911_v17  ;;  %v1973_v42 = vmul.f32 0.2, %v1941_v46  ;;  %vm1957_vm8 = vcmp.ge.f32.partialorder %v1941_v46, 0.0  ;;  %2239 = vmatmul.mubr.bf16.gmra.mxu0 %v1997_v14  ;;  %v1915_v13 = vadd.f32 %v1914_v48, %v5292_v27  ;;  %v4780_v48 = vld [vmem:[#allocation7 + $0x604] ss:$8 sps:$4 sm:$0xff]  }
 0x2dc   :  { %v1916_v2 = vpop.f32.mrf.mxu1  ;;  %2902 = vmatpush1.bf16.msra.mxu0 %v4748_v57  ;;  %v1988_v4 = vsel %vm1956_vm10, %v1940_v36, %v1972_v61  ;;  %v4766_v36 = vld [vmem:[#allocation7 + $0x620] ss:$8 sps:$4 sm:$0xff]   ;;  %v4784_v57 = vld [vmem:[#allocation7 + $0x6f0] ss:$8 sps:$4 sm:$0xff]  }
 0x2dd   :  { %vm1958_vm9 = vcmp.ge.f32.partialorder %v1942_v58, 0.0  ;;  %v1974_v25 = vmul.f32 0.2, %v1942_v58  ;;  %v1917_v33 = vadd.f32 %v1916_v2, %v5294_v31  ;;  %2903 = vmatprep.subr.bf16.mxu0 %v4756_v0  ;;  %v1989_v16 = vsel %vm1957_vm8, %v1941_v46, %v1973_v42  ;;  %v4790_v14 = vld [vmem:[#allocation7 + $0x6e0] ss:$8 sps:$4 sm:$0xff]  }
 0x2de   :  { %v1918_v15 = vpop.f32.mrf.mxu1  ;;  %v1943_v27 = vadd.f32 %v5349_v59, %v1915_v13  ;;  %v1999_v28 = vpack.c.bf16 %v1989_v16, %v1987_v9  ;;  %v4798_v0 = vld [vmem:[#allocation7 + $0x6d4] ss:$8 sps:$4 sm:$0xff]   ;;  %v4796_v61 = vld [vmem:[#allocation7 + $0x6d0] ss:$8 sps:$4 sm:$0xff]   ;;  %v4804_v42 = vld [vmem:[#allocation7 + $0x6c4] ss:$8 sps:$4 sm:$0xff]   ;;  %v1546_v9 = vpop.f32.mrf.mxu0 }
 0x2df   :  { %v1919_v47 = vadd.f32 %v1918_v15, %v5296_v35  ;;  %v1944_v1 = vadd.f32 %v5343_v53, %v1917_v33  ;;  %v1990_v20 = vsel %vm1958_vm9, %v1942_v58, %v1974_v25  ;;  %v4760_v35 = vld [vmem:[#allocation7 + $0x630] ss:$8 sps:$4 sm:$0xff]   ;;  %v4792_v58 = vld [vmem:[#allocation7 + $0x6e4] ss:$8 sps:$4 sm:$0xff]   ;;  %v4802_v2 = vld [vmem:[#allocation7 + $0x6c0] ss:$8 sps:$4 sm:$0xff]  }
 0x2e0   :  { %v1920_v7 = vpop.f32.mrf.mxu1  ;;  %v2000_v62 = vpack.c.bf16 %v1990_v20, %v1988_v4  ;;  %2904 = vmatpush1.bf16.msra.mxu0 %v4754_v6  ;;  %v1975_v49 = vmul.f32 0.2, %v1943_v27  ;;  %vm1959_vm15 = vcmp.ge.f32.partialorder %v1943_v27, 0.0  ;;  %v4810_v25 = vld [vmem:[#allocation7 + $0x6b4] ss:$8 sps:$4 sm:$0xff]  }
 0x2e1   :  { %v1945_v31 = vadd.f32 %v5349_v59, %v1919_v47  ;;  %v1921_v23 = vadd.f32 %v1920_v7, %v5298_v38  ;;  %2905 = vmatprep.subr.bf16.mxu0 %v4762_v19  ;;  %v1976_v8 = vmul.f32 0.2, %v1944_v1  ;;  %vm1960_vm12 = vcmp.ge.f32.partialorder %v1944_v1, 0.0  ;;  %v4774_v38 = vld [vmem:[#allocation7 + $0x614] ss:$8 sps:$4 sm:$0xff]  }
 0x2e2   :  { %2248 = vmatprep.mubr.bf16.mxu0 %v2000_v62  ;;  %v1991_v18 = vsel %vm1959_vm15, %v1943_v27, %v1975_v49  ;;  %v4813_v33 = vld [vmem:[#allocation7 + $0x4b4] ss:$8 sps:$4 sm:$0xff]   ;;  %v4808_v5 = vld [vmem:[#allocation7 + $0x6b0] ss:$8 sps:$4 sm:$0xff]   ;;  %v4814_v15 = vld [vmem:[#allocation7 + $0x6a0] ss:$8 sps:$4 sm:$0xff]  }
 0x2e3   :  { %v1977_v32 = vmul.f32 0.2, %v1945_v31  ;;  %v1946_v37 = vadd.f32 %v5343_v53, %v1921_v23  ;;  %vm1961_vm13 = vcmp.ge.f32.partialorder %v1945_v31, 0.0  ;;  %2249 = vmatmul.mubr.bf16.gmra.mxu0 %v1999_v28  ;;  %v1992_v41 = vsel %vm1960_vm12, %v1944_v1, %v1976_v8  ;;  %v4811_v13 = vld [vmem:[#allocation7 + $0x4b0] ss:$8 sps:$4 sm:$0xff]   ;;  %3259 = vmatprep.subr.bf16.mxu1 %v4813_v33 }
 0x2e4   :  { %2906 = vmatpush1.bf16.msra.mxu0 %v4760_v35  ;;  %3260 = vmatpush2.bf16.msra.mxu1 %v4811_v13  ;;  %v4816_v6 = vld [vmem:[#allocation7 + $0x6a4] ss:$8 sps:$4 sm:$0xff]   ;;  %v4817_v47 = vld [vmem:[#allocation7 + $0x4a0] ss:$8 sps:$4 sm:$0xff]   ;;  %v4822_v1 = vld [vmem:[#allocation7 + $0x694] ss:$8 sps:$4 sm:$0xff]   ;;  %v1548_v35 = vpop.f32.mrf.mxu0 }
 0x2e5   :  { %vm1962_vm14 = vcmp.ge.f32.partialorder %v1946_v37, 0.0  ;;  %v1978_v59 = vmul.f32 0.2, %v1946_v37  ;;  %2907 = vmatprep.subr.bf16.mxu0 %v4768_v30  ;;  %v1993_v46 = vsel %vm1961_vm13, %v1945_v31, %v1977_v32  ;;  %v4819_v19 = vld [vmem:[#allocation7 + $0x4a4] ss:$8 sps:$4 sm:$0xff]  }
 0x2e6   :  { %v2001_v53 = vpack.c.bf16 %v1993_v46, %v1991_v18  ;;  %3261 = vmatprep.subr.bf16.mxu1 %v4819_v19  ;;  %v4820_v7 = vld [vmem:[#allocation7 + $0x690] ss:$8 sps:$4 sm:$0xff]   ;;  %v4825_v20 = vld [vmem:[#allocation7 + $0x494] ss:$8 sps:$4 sm:$0xff]   ;;  %v4828_v31 = vld [vmem:[#allocation7 + $0x684] ss:$8 sps:$4 sm:$0xff]   ;;  %v1550_v28 = vpop.f32.mrf.mxu0  ;;  %v1547_v46 = vadd.f32 %v1546_v9, %v5300_v43 }
 0x2e7   :  { %v1994_v44 = vsel %vm1962_vm14, %v1946_v37, %v1978_v59  ;;  %v4823_v16 = vld [vmem:[#allocation7 + $0x490] ss:$8 sps:$4 sm:$0xff]   ;;  %v4826_v4 = vld [vmem:[#allocation7 + $0x680] ss:$8 sps:$4 sm:$0xff]   ;;  %v4831_v27 = vld [vmem:[#allocation7 + $0x484] ss:$8 sps:$4 sm:$0xff]  }
 0x2e8   :  { %v2002_v17 = vpack.c.bf16 %v1994_v44, %v1992_v41  ;;  %2908 = vmatpush1.bf16.msra.mxu0 %v4766_v36  ;;  %3262 = vmatpush2.bf16.msra.mxu1 %v4817_v47  ;;  %v4829_v23 = vld [vmem:[#allocation7 + $0x480] ss:$8 sps:$4 sm:$0xff]   ;;  %v4834_v62 = vld [vmem:[#allocation7 + $0x574] ss:$8 sps:$4 sm:$0xff]   ;;  %v1552_v30 = vpop.f32.mrf.mxu0  ;;  %v1587_v41 = vsub.s32 5, %v5138_v54 }
 0x2e9   :  { %2909 = vmatprep.subr.bf16.mxu0 %v4774_v38  ;;  %3263 = vmatprep.subr.bf16.mxu1 %v4825_v20 }
 0x2ea   :  { %2258 = vmatprep.mubr.bf16.mxu0 %v2002_v17  ;;  %v1556_v8 = vpop.f32.mrf.mxu0  ;;  %v1588_v17 = vrot.slane %v5346_v56, %v1587_v41 }
 0x2eb   :  { %2259 = vmatmul.mubr.bf16.gmra.mxu0 %v2001_v53  ;;  %v5391_v53 = vrot.slane %v5340_v24, %v1587_v41  ;;  %v1557_v43 = vadd.f32 %v1556_v8, %v5309_v52 }
 0x2ec   :  { %2910 = vmatpush1.bf16.msra.mxu0 %v4772_v11  ;;  %3264 = vmatpush2.bf16.msra.mxu1 %v4823_v16  ;;  %v1558_v32 = vpop.f32.mrf.mxu0  ;;  %v1549_v11 = vadd.f32 %v1548_v35, %v5302_v45 }
 0x2ed   :  { %2911 = vmatprep.subr.bf16.mxu0 %v4780_v48  ;;  %3265 = vmatprep.subr.bf16.mxu1 %v4831_v27  ;;  %v1593_v48 = vadd.f32 %v1588_v17, %v1547_v46 }
 0x2ee   :  { %v1560_v37 = vpop.f32.mrf.mxu0 }
 0x2ef   :  { %vm1609_vm0 = vcmp.ge.f32.partialorder %v1593_v48, 0.0 }
 0x2f0   :  { %2912 = vmatpush1.bf16.msra.mxu0 %v4778_v50  ;;  %3266 = vmatpush2.bf16.msra.mxu1 %v4829_v23  ;;  %v1562_v36 = vpop.f32.mrf.mxu0 }
 0x2f1   :  { %2913 = vmatprep.subr.bf16.mxu0 %v4786_v21  ;;  %v1594_v21 = vadd.f32 %v5391_v53, %v1549_v11 }
 0x2f2   :  { %v1566_v49 = vpop.f32.mrf.mxu0 }
 0x2f3   :  { %v1567_v33 = vadd.f32 %v1566_v49, %v5319_v3  ;;  %vm1610_vm1 = vcmp.ge.f32.partialorder %v1594_v21, 0.0 }
 0x2f4   :  { %2914 = vmatpush2.bf16.msra.mxu0 %v4784_v57  ;;  %v1568_v59 = vpop.f32.mrf.mxu0  ;;  %v1551_v57 = vadd.f32 %v1550_v28, %v5304_v40 }
 0x2f5   :  { %2915 = vmatprep.subr.bf16.mxu0 %v4792_v58  ;;  %v1553_v58 = vadd.f32 %v1552_v30, %v5307_v51 }
 0x2f6   :  { %v1570_v38 = vpop.f32.mrf.mxu0  ;;  %v1595_v45 = vadd.f32 %v1588_v17, %v1551_v57 }
 0x2f7   :  { %v1596_v40 = vadd.f32 %v5391_v53, %v1553_v58  ;;  %v1571_v51 = vadd.f32 %v1570_v38, %v5324_v22 }
 0x2f8   :  { %2916 = vmatpush2.bf16.msra.mxu0 %v4790_v14  ;;  %v1572_v44 = vpop.f32.mrf.mxu0  ;;  %v1627_v19 = vmul.f32 0.2, %v1595_v45  ;;  %vm1611_vm2 = vcmp.ge.f32.partialorder %v1595_v45, 0.0 }
 0x2f9   :  { %2917 = vmatprep.subr.bf16.mxu0 %v4798_v0  ;;  %v1625_v0 = vmul.f32 0.2, %v1593_v48  ;;  %v1573_v3 = vadd.f32 %v1572_v44, %v5326_v26  ;;  %v5416_v20 = vadd.f32 %v1588_v17, %v1571_v51  ;;  %v1628_v9 = vmul.f32 0.2, %v1596_v40 }
 0x2fa   :  { %v1576_v18 = vpop.f32.mrf.mxu0  ;;  %vm1612_vm3 = vcmp.ge.f32.partialorder %v1596_v40, 0.0 }
 0x2fb   :  { %v1641_v52 = vsel %vm1609_vm0, %v1593_v48, %v1625_v0  ;;  %v5427_v35 = vadd.f32 %v5391_v53, %v1573_v3  ;;  %vm1619_vm14 = vcmp.ge.f32.partialorder %v5416_v20, 0.0 }
 0x2fc   :  { %2918 = vmatpush2.bf16.msra.mxu0 %v4796_v61  ;;  %v1578_v50 = vpop.f32.mrf.mxu0  ;;  %v1559_v61 = vadd.f32 %v1558_v32, %v5311_v55 }
 0x2fd   :  { %2919 = vmatprep.subr.bf16.mxu0 %v4804_v42  ;;  %v1561_v42 = vadd.f32 %v1560_v37, %v5314_v12  ;;  %v1579_v16 = vadd.f32 %v1578_v50, %v5331_v34  ;;  %vm1620_vm15 = vcmp.ge.f32.partialorder %v5427_v35, 0.0 }
 0x2fe   :  { %v1580_v14 = vpop.f32.mrf.mxu0  ;;  %v1598_v55 = vadd.f32 %v5391_v53, %v1559_v61 }
 0x2ff   :  { %v1599_v12 = vadd.f32 %v1588_v17, %v1561_v42 }
 0x300   :  { %2920 = vmatpush2.bf16.msra.mxu0 %v4802_v2  ;;  %v1563_v2 = vadd.f32 %v1562_v36, %v5316_v63  ;;  %v1582_v13 = vpop.f32.mrf.mxu0  ;;  %v1630_v8 = vmul.f32 0.2, %v1598_v55  ;;  %vm1614_vm5 = vcmp.ge.f32.partialorder %v1598_v55, 0.0 }
 0x301   :  { %2921 = vmatprep.subr.bf16.mxu0 %v4810_v25  ;;  %v1626_v25 = vmul.f32 0.2, %v1594_v21  ;;  %v1631_v38 = vmul.f32 0.2, %v1599_v12  ;;  %v1583_v41 = vadd.f32 %v1582_v13, %v5336_v60  ;;  %vm1615_vm6 = vcmp.ge.f32.partialorder %v1599_v12, 0.0 }
 0x302   :  { %v5407_v63 = vadd.f32 %v5391_v53, %v1563_v2  ;;  %v1646_v48 = vsel %vm1614_vm5, %v1598_v55, %v1630_v8  ;;  %v1635_v55 = vmul.f32 0.2, %v5416_v20 }
 0x303   :  { %v1647_v60 = vsel %vm1615_vm6, %v1599_v12, %v1631_v38  ;;  %v4832_v12 = vld [vmem:[#allocation7 + $0x570] ss:$8 sps:$4 sm:$0xff]  }
 0x304   :  { %2922 = vmatpush2.bf16.msra.mxu0 %v4808_v5  ;;  %v1569_v5 = vadd.f32 %v1568_v59, %v5321_v10  ;;  %v1642_v10 = vsel %vm1610_vm1, %v1594_v21, %v1626_v25  ;;  %v1644_v59 = vsel %vm1612_vm3, %v1596_v40, %v1628_v9  ;;  %vm1616_vm7 = vcmp.ge.f32.partialorder %v5407_v63, 0.0 }
 0x305   :  { %2923 = vmatprep.subr.bf16.mxu0 %v4816_v6  ;;  %v2287_v6 = vsub.s32 4, %v5138_v54  ;;  %v1651_v9 = vsel %vm1619_vm14, %v5416_v20, %v1635_v55 }
 0x306   :  { %v5413_v22 = vadd.f32 %v5391_v53, %v1569_v5 }
 0x307   :  { %v5421_v26 = vrot.slane %v5340_v24, %v2287_v6  ;;  %v5424_v23 = vrot.slane %v5346_v56, %v2287_v6  ;;  %v5432_v24 = vadd.f32 %v5391_v53, %v1579_v16 }
 0x308   :  { %2924 = vmatpush2.bf16.msra.mxu0 %v4814_v15  ;;  %v1597_v15 = vadd.f32 %v1588_v17, %v1557_v43  ;;  %vm1618_vm13 = vcmp.ge.f32.partialorder %v5413_v22, 0.0  ;;  %v1634_v40 = vmul.f32 0.2, %v5413_v22 }
 0x309   :  { %2925 = vmatprep.subr.bf16.mxu0 %v4822_v1  ;;  %v5410_v1 = vadd.f32 %v1588_v17, %v1567_v33  ;;  %vm1622_vm5 = vcmp.ge.f32.partialorder %v5432_v24, 0.0 }
 0x30a   :  { %v1629_v30 = vmul.f32 0.2, %v1597_v15  ;;  %vm1613_vm4 = vcmp.ge.f32.partialorder %v1597_v15, 0.0 }
 0x30b   :  { %vm1617_vm9 = vcmp.ge.f32.partialorder %v5410_v1, 0.0 }
 0x30c   :  { %2926 = vmatpush2.bf16.msra.mxu0 %v4820_v7  ;;  %v1577_v7 = vadd.f32 %v1576_v18, %v5329_v29  ;;  %v1643_v29 = vsel %vm1611_vm2, %v1595_v45, %v1627_v19  ;;  %v1645_v46 = vsel %vm1613_vm4, %v1597_v15, %v1629_v30 }
 0x30d   :  { %2927 = vmatprep.subr.bf16.mxu0 %v4828_v31  ;;  %v1581_v31 = vadd.f32 %v1580_v14, %v5334_v39  ;;  %v1633_v14 = vmul.f32 0.2, %v5410_v1 }
 0x30e   :  { %v5429_v34 = vadd.f32 %v1588_v17, %v1577_v7 }
 0x30f   :  { %v5434_v32 = vadd.f32 %v1588_v17, %v1581_v31  ;;  %v1632_v17 = vmul.f32 0.2, %v5407_v63  ;;  %v1649_v7 = vsel %vm1617_vm9, %v5410_v1, %v1633_v14 }
 0x310   :  { %2928 = vmatpush2.bf16.msra.mxu0 %v4826_v4  ;;  %vm1621_vm0 = vcmp.ge.f32.partialorder %v5429_v34, 0.0 }
 0x311   :  { %3581 = vmatprep.subr.bf16.mxu0 %v4834_v62  ;;  %v1648_v2 = vsel %vm1616_vm7, %v5407_v63, %v1632_v17  ;;  %v4837_v63 = vld [vmem:[#allocation7 + $0x564] ss:$8 sps:$4 sm:$0xff]   ;;  %vm1623_vm6 = vcmp.ge.f32.partialorder %v5434_v32, 0.0 }
 0x393   :  { %v2230_v47 = vpop.f32.mrf.mxu0 }
 0x394   :  { %v2269_v27 = vadd.f32 %v2230_v47, %v1641_v52 }
 0x395   :  { %v2232_v4 = vpop.f32.mrf.mxu0 }
 0x396   :  { %v2270_v62 = vadd.f32 %v2232_v4, %v1642_v10  ;;  %v2293_v36 = vadd.f32 %v5424_v23, %v2269_v27  ;;  %v5455_v10 = vadd.f32 %v5391_v53, %v1583_v41  ;;  %v1636_v4 = vmul.f32 0.2, %v5427_v35 }
 0x397   :  { %v2234_v28 = vpop.f32.mrf.mxu0 }
 0x398   :  { %v2271_v39 = vadd.f32 %v2234_v28, %v1643_v29  ;;  %v2294_v56 = vadd.f32 %v5421_v26, %v2270_v62  ;;  %v2325_v57 = vmul.f32 0.2, %v2293_v36  ;;  %vm2309_vm11 = vcmp.ge.f32.partialorder %v2293_v36, 0.0  ;;  %v4835_v29 = vld [vmem:[#allocation7 + $0x560] ss:$8 sps:$4 sm:$0xff]  }
 0x399   :  { %v2236_v37 = vpop.f32.mrf.mxu0  ;;  %v1650_v62 = vsel %vm1618_vm13, %v5413_v22, %v1634_v40  ;;  %v1652_v20 = vsel %vm1620_vm15, %v5427_v35, %v1636_v4  ;;  %vm1624_vm7 = vcmp.ge.f32.partialorder %v5455_v10, 0.0 }
 0x39a   :  { %v2295_v49 = vadd.f32 %v5424_v23, %v2271_v39  ;;  %v2272_v44 = vadd.f32 %v2236_v37, %v1644_v59  ;;  %v2326_v50 = vmul.f32 0.2, %v2294_v56  ;;  %vm2310_vm10 = vcmp.ge.f32.partialorder %v2294_v56, 0.0  ;;  %v4840_v39 = vld [vmem:[#allocation7 + $0x554] ss:$8 sps:$4 sm:$0xff]  }
 0x39b   :  { %v2240_v11 = vpop.f32.mrf.mxu0  ;;  %v2341_v51 = vsel %vm2309_vm11, %v2293_v36, %v2325_v57  ;;  %v1637_v36 = vmul.f32 0.2, %v5429_v34  ;;  %v4838_v57 = vld [vmem:[#allocation7 + $0x550] ss:$8 sps:$4 sm:$0xff]  }
 0x39c   :  { %v2327_v18 = vmul.f32 0.2, %v2295_v49  ;;  %vm2311_vm8 = vcmp.ge.f32.partialorder %v2295_v49, 0.0  ;;  %v2296_v21 = vadd.f32 %v5421_v26, %v2272_v44  ;;  %v2273_v61 = vadd.f32 %v2240_v11, %v1645_v46 }
 0x39d   :  { %v2242_v58 = vpop.f32.mrf.mxu0  ;;  %v2342_v33 = vsel %vm2310_vm10, %v2294_v56, %v2326_v50  ;;  %v1638_v44 = vmul.f32 0.2, %v5432_v24 }
 0x39e   :  { %vm2312_vm12 = vcmp.ge.f32.partialorder %v2296_v21, 0.0  ;;  %v2328_v0 = vmul.f32 0.2, %v2296_v21  ;;  %v2343_v43 = vsel %vm2311_vm8, %v2295_v49, %v2327_v18  ;;  %v2274_v42 = vadd.f32 %v2242_v58, %v1646_v48 }
 0x39f   :  { %v2244_v45 = vpop.f32.mrf.mxu0  ;;  %v2357_v6 = vpack.c.bf16 %v2343_v43, %v2341_v51  ;;  %v2297_v19 = vadd.f32 %v5424_v23, %v2273_v61 }
 0x3a0   :  { %v2275_v25 = vadd.f32 %v2244_v45, %v1647_v60  ;;  %v2344_v5 = vsel %vm2312_vm12, %v2296_v21, %v2328_v0  ;;  %v2298_v13 = vadd.f32 %v5421_v26, %v2274_v42  ;;  %v1639_v21 = vmul.f32 0.2, %v5434_v32  ;;  %v4843_v0 = vld [vmem:[#allocation7 + $0x544] ss:$8 sps:$4 sm:$0xff]  }
 0x3a1   :  { %v2246_v52 = vpop.f32.mrf.mxu0  ;;  %v2358_v15 = vpack.c.bf16 %v2344_v5, %v2342_v33  ;;  %v2329_v8 = vmul.f32 0.2, %v2297_v19  ;;  %vm2313_vm4 = vcmp.ge.f32.partialorder %v2297_v19, 0.0  ;;  %v1653_v60 = vsel %vm1621_vm0, %v5429_v34, %v1637_v36  ;;  %v4855_v36 = vld [vmem:[#allocation7 + $0x504] ss:$8 sps:$4 sm:$0xff]  }
 0x3a2   :  { %v2299_v3 = vadd.f32 %v5424_v23, %v2275_v25  ;;  %v2276_v47 = vadd.f32 %v2246_v52, %v1648_v2  ;;  %v2330_v53 = vmul.f32 0.2, %v2298_v13  ;;  %vm2314_vm3 = vcmp.ge.f32.partialorder %v2298_v13, 0.0 }
 0x3a3   :  { %v2250_v16 = vpop.f32.mrf.mxu0  ;;  %2929 = vmatprep.mubr.bf16.mxu0 %v2358_v15  ;;  %3267 = vmatprep.mubr.bf16.mxu1 %v2358_v15  ;;  %v2345_v50 = vsel %vm2313_vm4, %v2297_v19, %v2329_v8  ;;  %v1654_v42 = vsel %vm1622_vm5, %v5432_v24, %v1638_v44  ;;  %v1640_v2 = vmul.f32 0.2, %v5455_v10  ;;  %v1655_v40 = vsel %vm1623_vm6, %v5434_v32, %v1639_v21  ;;  %v4846_v15 = vld [vmem:[#allocation7 + $0x534] ss:$8 sps:$4 sm:$0xff]   ;;  %v4862_v44 = vld [vmem:[#allocation7 + $0x5d0] ss:$8 sps:$4 sm:$0xff]  }
 0x3a4   :  { %v2300_v31 = vadd.f32 %v5421_v26, %v2276_v47  ;;  %2930 = vmatmul.mubr.bf16.vlgmr.msra.gmra.mxu0 %v2357_v6  ;;  %3268 = vmatmul.mubr.bf16.vlgmr.msra.gmra.mxu1 %v2357_v6  ;;  %v2331_v27 = vmul.f32 0.2, %v2299_v3  ;;  %vm2315_vm1 = vcmp.ge.f32.partialorder %v2299_v3, 0.0  ;;  %v2277_v56 = vadd.f32 %v2250_v16, %v1649_v7  ;;  %v4871_v21 = vld [vmem:[#allocation7 + $0x5a0] ss:$8 sps:$4 sm:$0xff]  }
 0x3a5   :  { %v2252_v1 = vpop.f32.mrf.mxu0  ;;  %3582 = vmatpush1.bf16.msra.mxu0 %v4832_v12  ;;  %v2346_v11 = vsel %vm2314_vm3, %v2298_v13, %v2330_v53  ;;  %v4841_v13 = vld [vmem:[#allocation7 + $0x540] ss:$8 sps:$4 sm:$0xff]   ;;  %v1656_v55 = vsel %vm1624_vm7, %v5455_v10, %v1640_v2 }
 0x3a6   :  { %vm2316_vm2 = vcmp.ge.f32.partialorder %v2300_v31, 0.0  ;;  %v2332_v28 = vmul.f32 0.2, %v2300_v31  ;;  %v2278_v30 = vadd.f32 %v2252_v1, %v1650_v62  ;;  %3583 = vmatprep.subr.bf16.mxu0 %v4837_v63  ;;  %v2347_v41 = vsel %vm2315_vm1, %v2299_v3, %v2331_v27  ;;  %v4849_v27 = vld [vmem:[#allocation7 + $0x524] ss:$8 sps:$4 sm:$0xff]  }
 0x3a7   :  { %v2254_v37 = vpop.f32.mrf.mxu0  ;;  %v2301_v35 = vadd.f32 %v5424_v23, %v2277_v56  ;;  %v2359_v14 = vpack.c.bf16 %v2347_v41, %v2345_v50  ;;  %v4864_v41 = vld [vmem:[#allocation7 + $0x5d4] ss:$8 sps:$4 sm:$0xff]  }
 0x3a8   :  { %v2279_v22 = vadd.f32 %v2254_v37, %v1651_v9  ;;  %v2302_v49 = vadd.f32 %v5421_v26, %v2278_v30  ;;  %v2348_v38 = vsel %vm2316_vm2, %v2300_v31, %v2332_v28  ;;  %v4844_v31 = vld [vmem:[#allocation7 + $0x530] ss:$8 sps:$4 sm:$0xff]   ;;  %v4847_v28 = vld [vmem:[#allocation7 + $0x520] ss:$8 sps:$4 sm:$0xff]  }
 0x3a9   :  { %v2256_v59 = vpop.f32.mrf.mxu0  ;;  %3584 = vmatpush1.bf16.msra.mxu0 %v4835_v29  ;;  %v2360_v17 = vpack.c.bf16 %v2348_v38, %v2346_v11  ;;  %v2333_v33 = vmul.f32 0.2, %v2301_v35  ;;  %vm2317_vm11 = vcmp.ge.f32.partialorder %v2301_v35, 0.0  ;;  %v4850_v37 = vld [vmem:[#allocation7 + $0x510] ss:$8 sps:$4 sm:$0xff]   ;;  %v5508_v11 = vpop.f32.mrf.mxu1 }
 0x3aa   :  { %v2303_v46 = vadd.f32 %v5424_v23, %v2279_v22  ;;  %v2280_v18 = vadd.f32 %v2256_v59, %v1652_v20  ;;  %3585 = vmatprep.subr.bf16.mxu0 %v4840_v39  ;;  %v2334_v43 = vmul.f32 0.2, %v2302_v49  ;;  %vm2318_vm10 = vcmp.ge.f32.partialorder %v2302_v49, 0.0  ;;  %v4852_v39 = vld [vmem:[#allocation7 + $0x514] ss:$8 sps:$4 sm:$0xff]  }
 0x3ab   :  { %v2260_v48 = vpop.f32.mrf.mxu0  ;;  %2939 = vmatprep.mubr.bf16.mxu0 %v2360_v17  ;;  %3277 = vmatprep.mubr.bf16.mxu1 %v2360_v17  ;;  %v2349_v16 = vsel %vm2317_vm11, %v2301_v35, %v2333_v33  ;;  %v4853_v22 = vld [vmem:[#allocation7 + $0x500] ss:$8 sps:$4 sm:$0xff]   ;;  %v4858_v20 = vld [vmem:[#allocation7 + $0x5f4] ss:$8 sps:$4 sm:$0xff]   ;;  %v4861_v59 = vld [vmem:[#allocation7 + $0x5e4] ss:$8 sps:$4 sm:$0xff]   ;;  %v5510_v17 = vpop.f32.mrf.mxu1 }
 0x3ac   :  { %v2304_v58 = vadd.f32 %v5421_v26, %v2280_v18  ;;  %v2335_v61 = vmul.f32 0.2, %v2303_v46  ;;  %vm2319_vm8 = vcmp.ge.f32.partialorder %v2303_v46, 0.0  ;;  %2940 = vmatmul.mubr.bf16.gmra.mxu0 %v2359_v14  ;;  %3278 = vmatmul.mubr.bf16.gmra.mxu1 %v2359_v14  ;;  %v2281_v5 = vadd.f32 %v2260_v48, %v1653_v60  ;;  %v4859_v38 = vld [vmem:[#allocation7 + $0x5e0] ss:$8 sps:$4 sm:$0xff]  }
 0x3ad   :  { %v2262_v45 = vpop.f32.mrf.mxu0  ;;  %3586 = vmatpush1.bf16.msra.mxu0 %v4838_v57  ;;  %v2350_v63 = vsel %vm2318_vm10, %v2302_v49, %v2334_v43  ;;  %v4856_v49 = vld [vmem:[#allocation7 + $0x5f0] ss:$8 sps:$4 sm:$0xff]   ;;  %v4865_v18 = vld [vmem:[#allocation7 + $0x5c0] ss:$8 sps:$4 sm:$0xff]   ;;  %v4870_v48 = vld [vmem:[#allocation7 + $0x5b4] ss:$8 sps:$4 sm:$0xff]   ;;  %v5512_v50 = vpop.f32.mrf.mxu1 }
 0x3ae   :  { %vm2320_vm9 = vcmp.ge.f32.partialorder %v2304_v58, 0.0  ;;  %v2336_v25 = vmul.f32 0.2, %v2304_v58  ;;  %v2282_v34 = vadd.f32 %v2262_v45, %v1654_v42  ;;  %3587 = vmatprep.subr.bf16.mxu0 %v4843_v0  ;;  %v2351_v3 = vsel %vm2319_vm8, %v2303_v46, %v2335_v61  ;;  %v4867_v46 = vld [vmem:[#allocation7 + $0x5c4] ss:$8 sps:$4 sm:$0xff]  }
 0x3af   :  { %v2264_v51 = vpop.f32.mrf.mxu0  ;;  %v2305_v19 = vadd.f32 %v5424_v23, %v2281_v5  ;;  %v2361_v10 = vpack.c.bf16 %v2351_v3, %v2349_v16  ;;  %v4868_v35 = vld [vmem:[#allocation7 + $0x5b0] ss:$8 sps:$4 sm:$0xff]   ;;  %v4873_v57 = vld [vmem:[#allocation7 + $0x5a4] ss:$8 sps:$4 sm:$0xff]   ;;  %v5514_v60 = vpop.f32.mrf.mxu1  ;;  %v4877_v43 = vld [vmem:[#allocation7 + $0x580] ss:$8 sps:$4 sm:$0xff]  }
 0x3b0   :  { %v2306_v24 = vadd.f32 %v5421_v26, %v2282_v34  ;;  %v2283_v52 = vadd.f32 %v2264_v51, %v1655_v40  ;;  %v2352_v6 = vsel %vm2320_vm9, %v2304_v58, %v2336_v25  ;;  %v4876_v58 = vld [vmem:[#allocation7 + $0x594] ss:$8 sps:$4 sm:$0xff]   ;;  %v4874_v14 = vld [vmem:[#allocation7 + $0x590] ss:$8 sps:$4 sm:$0xff]   ;;  %v4879_v61 = vld [vmem:[#allocation7 + $0x584] ss:$8 sps:$4 sm:$0xff]  }
 0x3b1   :  { %v2266_v12 = vpop.f32.mrf.mxu0  ;;  %v2362_v7 = vpack.c.bf16 %v2352_v6, %v2350_v63  ;;  %3588 = vmatpush1.bf16.msra.mxu0 %v4841_v13  ;;  %vm2321_vm15 = vcmp.ge.f32.partialorder %v2305_v19, 0.0  ;;  %v5516_v0 = vpop.f32.mrf.mxu1  ;;  %v4880_v5 = vld [vmem:[#allocation10 + $0x78] sm:$0xff]   ;;  %v4882_v51 = vld [vmem:[#allocation10 + $0x70] sm:$0xff]   ;;  %v4887_v3 = vld [vmem:[#allocation10 + $0x20] sm:$0xff]  }
 0x3b2   :  { %v2307_v32 = vadd.f32 %v5424_v23, %v2283_v52  ;;  %v2284_v47 = vadd.f32 %v2266_v12, %v1656_v55  ;;  %v2338_v4 = vmul.f32 0.2, %v2306_v24  ;;  %3589 = vmatprep.subr.bf16.mxu0 %v4846_v15  ;;  %vm2322_vm12 = vcmp.ge.f32.partialorder %v2306_v24, 0.0  ;;  %v4881_v40 = vld [vmem:[#allocation10 + $0x38] sm:$0xff]   ;;  %4343 = vmatprep.subr.bf16.mxu1 %v4880_v5  ;;  %v4884_v52 = vld [vmem:[#allocation10 + $0x68] sm:$0xff]   ;;  %v4886_v12 = vld [vmem:[#allocation10 + $0x60] sm:$0xff]  }
 0x3b3   :  { %2949 = vmatprep.mubr.bf16.mxu0 %v2362_v7  ;;  %3287 = vmatprep.mubr.bf16.mxu1 %v2362_v7  ;;  %v2337_v23 = vmul.f32 0.2, %v2305_v19  ;;  %v5518_v42 = vpop.f32.mrf.mxu1  ;;  %v4885_v55 = vld [vmem:[#allocation10 + $0x28] sm:$0xff]   ;;  %v4889_v63 = vld [vmem:[#allocation10 + $0x18] sm:$0xff]  }
 0x3b4   :  { %v2308_v53 = vadd.f32 %v5421_v26, %v2284_v47  ;;  %v2339_v62 = vmul.f32 0.2, %v2307_v32  ;;  %vm2323_vm13 = vcmp.ge.f32.partialorder %v2307_v32, 0.0  ;;  %2950 = vmatmul.mubr.bf16.gmra.mxu0 %v2361_v10  ;;  %3288 = vmatmul.mubr.bf16.gmra.mxu1 %v2361_v10  ;;  %v2354_v9 = vsel %vm2322_vm12, %v2306_v24, %v2338_v4  ;;  %v4883_v24 = vld [vmem:[#allocation10 + $0x30] sm:$0xff]  }
 0x3b5   :  { %3590 = vmatpush1.bf16.msra.mxu0 %v4844_v31  ;;  %v2353_v8 = vsel %vm2321_vm15, %v2305_v19, %v2337_v23  ;;  %v5520_v45 = vpop.f32.mrf.mxu1  ;;  %4344 = vmatpush3.bf16.msra.mxu1 %v4881_v40 }
 0x3b6   :  { %vm2324_vm14 = vcmp.ge.f32.partialorder %v2308_v53, 0.0  ;;  %v2340_v1 = vmul.f32 0.2, %v2308_v53  ;;  %3591 = vmatprep.subr.bf16.mxu0 %v4849_v27  ;;  %v2355_v30 = vsel %vm2323_vm13, %v2307_v32, %v2339_v62  ;;  %4345 = vmatprep.subr.bf16.mxu1 %v4882_v51  ;;  %v4888_v32 = vld [vmem:[#allocation10 + $0x58] sm:$0xff]  }
 0x3b7   :  { %v2363_v56 = vpack.c.bf16 %v2355_v30, %v2353_v8  ;;  %v5522_v2 = vpop.f32.mrf.mxu1 }
 0x3b8   :  { %v2356_v29 = vsel %vm2324_vm14, %v2308_v53, %v2340_v1 }
 0x3b9   :  { %v2364_v26 = vpack.c.bf16 %v2356_v29, %v2354_v9  ;;  %3592 = vmatpush1.bf16.msra.mxu0 %v4847_v28  ;;  %v5524_v25 = vpop.f32.mrf.mxu1  ;;  %4346 = vmatpush3.bf16.msra.mxu1 %v4883_v24 }
 0x3ba   :  { %3593 = vmatprep.subr.bf16.mxu0 %v4852_v39  ;;  %4347 = vmatprep.subr.bf16.mxu1 %v4884_v52 }
 0x3bb   :  { %2959 = vmatprep.mubr.bf16.mxu0 %v2364_v26  ;;  %3297 = vmatprep.mubr.bf16.mxu1 %v2364_v26  ;;  %v5526_v34 = vpop.f32.mrf.mxu1 }
 0x3bc   :  { %2960 = vmatmul.mubr.bf16.gmra.mxu0 %v2363_v56  ;;  %3298 = vmatmul.mubr.bf16.gmra.mxu1 %v2363_v56  ;;  %v3310_v56 = vsub.s32 6, %v5138_v54 }
 0x3bd   :  { %3594 = vmatpush1.bf16.msra.mxu0 %v4850_v37  ;;  %v5528_v33 = vpop.f32.mrf.mxu1  ;;  %4348 = vmatpush3.bf16.msra.mxu1 %v4885_v55 }
 0x3be   :  { %3595 = vmatprep.subr.bf16.mxu0 %v4855_v36  ;;  %4349 = vmatprep.subr.bf16.mxu1 %v4886_v12 }
 0x3bf   :  { %v5530_v13 = vpop.f32.mrf.mxu1 }
 0x3c1   :  { %3596 = vmatpush1.bf16.msra.mxu0 %v4853_v22  ;;  %v5532_v15 = vpop.f32.mrf.mxu1  ;;  %4350 = vmatpush3.bf16.msra.mxu1 %v4887_v3  ;;  %v5574_v22 = vld [vmem:[#allocation8 + $0x8] sm:$0xff] }
 0x3c2   :  { %3597 = vmatprep.subr.bf16.mxu0 %v4858_v20  ;;  %4351 = vmatprep.subr.bf16.mxu1 %v4888_v32  ;;  %v5577_v20 = vrot.slane %v5574_v22, %v3310_v56 }
 0x3c3   :  { %v5534_v6 = vpop.f32.mrf.mxu1 }
 0x3c5   :  { %3598 = vmatpush2.bf16.msra.mxu0 %v4856_v49  ;;  %v5536_v47 = vpop.f32.mrf.mxu1  ;;  %4352 = vmatpush3.bf16.msra.mxu1 %v4889_v63 }
 0x3c6   :  { %3599 = vmatprep.subr.bf16.mxu0 %v4861_v59  ;;  %v5580_v59 = vld [vmem:[#allocation8] sm:$0xff] }
 0x3c7   :  { %v5538_v19 = vpop.f32.mrf.mxu1 }
 0x3c9   :  { %3600 = vmatpush2.bf16.msra.mxu0 %v4859_v38  ;;  %v5540_v7 = vpop.f32.mrf.mxu1  ;;  %v5583_v38 = vrot.slane %v5580_v59, %v3310_v56 }
 0x3ca   :  { %3601 = vmatprep.subr.bf16.mxu0 %v4864_v41 }
 0x3cb   :  { %v5542_v16 = vpop.f32.mrf.mxu1 }
 0x3cd   :  { %3602 = vmatpush2.bf16.msra.mxu0 %v4862_v44  ;;  %v5544_v31 = vpop.f32.mrf.mxu1 }
 0x3ce   :  { %3603 = vmatprep.subr.bf16.mxu0 %v4867_v46 }
 0x3cf   :  { %v5546_v4 = vpop.f32.mrf.mxu1 }
 0x3d1   :  { %3604 = vmatpush2.bf16.msra.mxu0 %v4865_v18  ;;  %v5548_v53 = vpop.f32.mrf.mxu1 }
 0x3d2   :  { %3605 = vmatprep.subr.bf16.mxu0 %v4870_v48 }
 0x3d3   :  { %v5550_v10 = vpop.f32.mrf.mxu1 }
 0x3d5   :  { %3606 = vmatpush2.bf16.msra.mxu0 %v4868_v35  ;;  %v5552_v27 = vpop.f32.mrf.mxu1 }
 0x3d6   :  { %3607 = vmatprep.subr.bf16.mxu0 %v4873_v57 }
 0x3d7   :  { %v5554_v62 = vpop.f32.mrf.mxu1 }
 0x3d9   :  { %3608 = vmatpush2.bf16.msra.mxu0 %v4871_v21  ;;  %v5556_v1 = vpop.f32.mrf.mxu1 }
 0x3da   :  { %3609 = vmatprep.subr.bf16.mxu0 %v4876_v58 }
 0x3db   :  { %v5558_v23 = vpop.f32.mrf.mxu1 }
 0x3dd   :  { %3610 = vmatpush2.bf16.msra.mxu0 %v4874_v14  ;;  %v5560_v9 = vpop.f32.mrf.mxu1 }
 0x3de   :  { %3611 = vmatprep.subr.bf16.mxu0 %v4879_v61 }
 0x3df   :  { %v5562_v29 = vpop.f32.mrf.mxu1 }
 0x3e1   :  { %3612 = vmatpush2.bf16.msra.mxu0 %v4877_v43  ;;  %v5564_v28 = vpop.f32.mrf.mxu1 }
 0x3e3   :  { %v5566_v26 = vpop.f32.mrf.mxu1 }
 0x3e5   :  { %v5568_v30 = vpop.f32.mrf.mxu1 }
 0x3e7   :  { %v5570_v39 = vpop.f32.mrf.mxu1 }
 0x464   :  { %v3269_v8 = vpop.f32.mrf.mxu1 }
 0x465   :  { %v3270_v49 = vadd.f32 %v3269_v8, %v5508_v11 }
 0x466   :  { %v3271_v37 = vpop.f32.mrf.mxu1 }
 0x467   :  { %v3272_v36 = vadd.f32 %v3271_v37, %v5510_v17  ;;  %v3316_v35 = vadd.f32 %v5583_v38, %v3270_v49 }
 0x468   :  { %v3273_v41 = vpop.f32.mrf.mxu1 }
 0x469   :  { %v3274_v44 = vadd.f32 %v3273_v41, %v5512_v50  ;;  %v3317_v18 = vadd.f32 %v5577_v20, %v3272_v36  ;;  %v3348_v14 = vmul.f32 0.2, %v3316_v35  ;;  %vm3332_vm3 = vcmp.ge.f32.partialorder %v3316_v35, 0.0 }
 0x46a   :  { %v3275_v46 = vpop.f32.mrf.mxu1 }
 0x46b   :  { %v3318_v48 = vadd.f32 %v5583_v38, %v3274_v44  ;;  %v3276_v17 = vadd.f32 %v3275_v46, %v5514_v60  ;;  %v3349_v58 = vmul.f32 0.2, %v3317_v18  ;;  %vm3333_vm1 = vcmp.ge.f32.partialorder %v3317_v18, 0.0 }
 0x46c   :  { %v3279_v57 = vpop.f32.mrf.mxu1  ;;  %v3364_v52 = vsel %vm3332_vm3, %v3316_v35, %v3348_v14 }
 0x46d   :  { %v3350_v21 = vmul.f32 0.2, %v3318_v48  ;;  %v3319_v11 = vadd.f32 %v5577_v20, %v3276_v17  ;;  %vm3334_vm0 = vcmp.ge.f32.partialorder %v3318_v48, 0.0  ;;  %v3280_v5 = vadd.f32 %v3279_v57, %v5516_v0 }
 0x46e   :  { %v3281_v50 = vpop.f32.mrf.mxu1  ;;  %v3365_v60 = vsel %vm3333_vm1, %v3317_v18, %v3349_v58 }
 0x46f   :  { %vm3335_vm2 = vcmp.ge.f32.partialorder %v3319_v11, 0.0  ;;  %v3351_v43 = vmul.f32 0.2, %v3319_v11  ;;  %v3366_v61 = vsel %vm3334_vm0, %v3318_v48, %v3350_v21  ;;  %v3282_v40 = vadd.f32 %v3281_v50, %v5518_v42 }
 0x470   :  { %v3283_v51 = vpop.f32.mrf.mxu1  ;;  %v3380_v32 = vpack.c.bf16 %v3366_v61, %v3364_v52  ;;  %v3320_v56 = vadd.f32 %v5583_v38, %v3280_v5 }
 0x471   :  { %v3367_v24 = vsel %vm3335_vm2, %v3319_v11, %v3351_v43  ;;  %v3284_v55 = vadd.f32 %v3283_v51, %v5520_v45  ;;  %v3321_v63 = vadd.f32 %v5577_v20, %v3282_v40 }
 0x472   :  { %v3285_v12 = vpop.f32.mrf.mxu1  ;;  %v3381_v3 = vpack.c.bf16 %v3367_v24, %v3365_v60  ;;  %v3352_v44 = vmul.f32 0.2, %v3320_v56  ;;  %vm3336_vm7 = vcmp.ge.f32.partialorder %v3320_v56, 0.0 }
 0x473   :  { %v3286_v8 = vadd.f32 %v3285_v12, %v5522_v2  ;;  %v3322_v37 = vadd.f32 %v5583_v38, %v3284_v55  ;;  %v3353_v41 = vmul.f32 0.2, %v3321_v63  ;;  %vm3337_vm6 = vcmp.ge.f32.partialorder %v3321_v63, 0.0 }
 0x474   :  { %v3289_v0 = vpop.f32.mrf.mxu1  ;;  %3613 = vmatprep.mubr.bf16.mxu0 %v3381_v3  ;;  %v3368_v61 = vsel %vm3336_vm7, %v3320_v56, %v3352_v44 }
 0x475   :  { %v3323_v42 = vadd.f32 %v5577_v20, %v3286_v8  ;;  %3614 = vmatmul.mubr.bf16.vlgmr.msra.gmra.mxu0 %v3380_v32  ;;  %v3354_v36 = vmul.f32 0.2, %v3322_v37  ;;  %vm3338_vm4 = vcmp.ge.f32.partialorder %v3322_v37, 0.0  ;;  %v3290_v46 = vadd.f32 %v3289_v0, %v5524_v25 }
 0x476   :  { %v3291_v49 = vpop.f32.mrf.mxu1  ;;  %v3369_v14 = vsel %vm3337_vm6, %v3321_v63, %v3353_v41 }
 0x477   :  { %vm3339_vm5 = vcmp.ge.f32.partialorder %v3323_v42, 0.0  ;;  %v3355_v45 = vmul.f32 0.2, %v3323_v42  ;;  %v3292_v2 = vadd.f32 %v3291_v49, %v5526_v34  ;;  %v3370_v11 = vsel %vm3338_vm4, %v3322_v37, %v3354_v36 }
 0x478   :  { %v3293_v18 = vpop.f32.mrf.mxu1  ;;  %v3324_v43 = vadd.f32 %v5583_v38, %v3290_v46  ;;  %v3382_v5 = vpack.c.bf16 %v3370_v11, %v3368_v61  ;;  %v4894_v11 = vld [vmem:[#allocation10 + $0x40] sm:$0xff]  }
 0x479   :  { %v3294_v35 = vadd.f32 %v3293_v18, %v5528_v33  ;;  %v3325_v48 = vadd.f32 %v5577_v20, %v3292_v2  ;;  %v3371_v21 = vsel %vm3339_vm5, %v3323_v42, %v3355_v45 }
 0x47a   :  { %v3295_v17 = vpop.f32.mrf.mxu1  ;;  %v3383_v25 = vpack.c.bf16 %v3371_v21, %v3369_v14  ;;  %vm3340_vm11 = vcmp.ge.f32.partialorder %v3324_v43, 0.0  ;;  %v4893_v21 = vld [vmem:[#allocation10 + $0x8] sm:$0xff]  }
 0x47b   :  { %v3326_v57 = vadd.f32 %v5583_v38, %v3294_v35  ;;  %v3296_v58 = vadd.f32 %v3295_v17, %v5530_v13  ;;  %v3357_v40 = vmul.f32 0.2, %v3325_v48  ;;  %v3356_v13 = vmul.f32 0.2, %v3324_v43  ;;  %v4891_v17 = vld [vmem:[#allocation10 + $0x10] sm:$0xff]  }
 0x47c   :  { %v3299_v50 = vpop.f32.mrf.mxu1  ;;  %3623 = vmatprep.mubr.bf16.mxu0 %v3383_v25  ;;  %vm3341_vm10 = vcmp.ge.f32.partialorder %v3325_v48, 0.0 }
 0x47d   :  { %v3327_v34 = vadd.f32 %v5577_v20, %v3296_v58  ;;  %v3358_v33 = vmul.f32 0.2, %v3326_v57  ;;  %vm3342_vm8 = vcmp.ge.f32.partialorder %v3326_v57, 0.0  ;;  %3624 = vmatmul.mubr.bf16.gmra.mxu0 %v3382_v5  ;;  %v3300_v52 = vadd.f32 %v3299_v50, %v5532_v15  ;;  %v2931_v58 = vpop.f32.mrf.mxu0 }
 0x47e   :  { %v3301_v51 = vpop.f32.mrf.mxu1  ;;  %v3373_v37 = vsel %vm3341_vm10, %v3325_v48, %v3357_v40  ;;  %v3372_v36 = vsel %vm3340_vm11, %v3324_v43, %v3356_v13  ;;  %v4890_v48 = vld [vmem:[#allocation10 + $0x50] sm:$0xff]  }
 0x47f   :  { %vm3343_vm9 = vcmp.ge.f32.partialorder %v3327_v34, 0.0  ;;  %v3359_v24 = vmul.f32 0.2, %v3327_v34  ;;  %v3302_v60 = vadd.f32 %v3301_v51, %v5534_v6  ;;  %v3374_v8 = vsel %vm3342_vm8, %v3326_v57, %v3358_v33  ;;  %4353 = vmatprep.subr.bf16.mxu1 %v4890_v48  ;;  %v4895_v57 = vld [vmem:[#allocation10] sm:$0xff]   ;;  %v2933_v14 = vpop.f32.mrf.mxu0 }
 0x480   :  { %v3303_v55 = vpop.f32.mrf.mxu1  ;;  %v3328_v0 = vadd.f32 %v5583_v38, %v3300_v52  ;;  %v3384_v49 = vpack.c.bf16 %v3374_v8, %v3372_v36  ;;  %4354 = vmatpush3.bf16.msra.mxu1 %v4891_v17  ;;  %v2932_v52 = vadd.f32 %v2931_v58, %v5540_v7 }
 0x481   :  { %v3304_v12 = vadd.f32 %v3303_v55, %v5536_v47  ;;  %v3329_v3 = vadd.f32 %v5577_v20, %v3302_v60  ;;  %v3375_v63 = vsel %vm3343_vm9, %v3327_v34, %v3359_v24  ;;  %v2935_v43 = vpop.f32.mrf.mxu0  ;;  %v2934_v55 = vadd.f32 %v2933_v14, %v5542_v16 }
 0x482   :  { %v3305_v32 = vpop.f32.mrf.mxu1  ;;  %v3385_v42 = vpack.c.bf16 %v3375_v63, %v3373_v37  ;;  %v3360_v47 = vmul.f32 0.2, %v3328_v0  ;;  %vm3344_vm15 = vcmp.ge.f32.partialorder %v3328_v0, 0.0 }
 0x483   :  { %v3330_v56 = vadd.f32 %v5583_v38, %v3304_v12  ;;  %v3306_v6 = vadd.f32 %v3305_v32, %v5538_v19  ;;  %v3361_v15 = vmul.f32 0.2, %v3329_v3  ;;  %vm3345_vm12 = vcmp.ge.f32.partialorder %v3329_v3, 0.0  ;;  %v2937_v50 = vpop.f32.mrf.mxu0  ;;  %v5624_v32 = vld [vmem:[#allocation8 + $0x18] ss:$0 sm:$0xff] }
 0x484   :  { %3633 = vmatprep.mubr.bf16.mxu0 %v3385_v42  ;;  %v3376_v19 = vsel %vm3344_vm15, %v3328_v0, %v3360_v47  ;;  %v2936_v12 = vadd.f32 %v2935_v43, %v5544_v31  ;;  %v2938_v63 = vadd.f32 %v2937_v50, %v5546_v4  ;;  %v2979_v37 = vadd.f32 %v5624_v32, %v2934_v55 }
 0x485   :  { %v3362_v41 = vmul.f32 0.2, %v3330_v56  ;;  %v3331_v45 = vadd.f32 %v5577_v20, %v3306_v6  ;;  %vm3346_vm13 = vcmp.ge.f32.partialorder %v3330_v56, 0.0  ;;  %3634 = vmatmul.mubr.bf16.gmra.mxu0 %v3384_v49  ;;  %v3377_v46 = vsel %vm3345_vm12, %v3329_v3, %v3361_v15  ;;  %v4892_v20 = vld [vmem:[#allocation10 + $0x48] sm:$0xff]   ;;  %v2941_v25 = vpop.f32.mrf.mxu0  ;;  %v5622_v3 = vld [vmem:[#allocation8 + $0x10] ss:$0 sm:$0xff] }
 0x486   :  { %4355 = vmatprep.subr.bf16.mxu1 %v4892_v20  ;;  %v2980_v0 = vadd.f32 %v5622_v3, %v2936_v12  ;;  %v2981_v7 = vadd.f32 %v5624_v32, %v2938_v63  ;;  %v3011_v42 = vmul.f32 0.2, %v2979_v37  ;;  %vm2995_vm1 = vcmp.ge.f32.partialorder %v2979_v37, 0.0 }
 0x487   :  { %vm3347_vm14 = vcmp.ge.f32.partialorder %v3331_v45, 0.0  ;;  %v3363_v44 = vmul.f32 0.2, %v3331_v45  ;;  %v3378_v38 = vsel %vm3346_vm13, %v3330_v56, %v3362_v41  ;;  %4356 = vmatpush3.bf16.msra.mxu1 %v4893_v21  ;;  %v2943_v61 = vpop.f32.mrf.mxu0  ;;  %v2978_v56 = vadd.f32 %v5622_v3, %v2932_v52 }
 0x488   :  { %v3386_v35 = vpack.c.bf16 %v3378_v38, %v3376_v19  ;;  %4357 = vmatprep.subr.bf16.mxu1 %v4894_v11  ;;  %v3012_v36 = vmul.f32 0.2, %v2980_v0  ;;  %v2944_v49 = vadd.f32 %v2943_v61, %v5550_v10  ;;  %vm2996_vm2 = vcmp.ge.f32.partialorder %v2980_v0, 0.0 }
 0x489   :  { %v3379_v2 = vsel %vm3347_vm14, %v3331_v45, %v3363_v44  ;;  %v2945_v34 = vpop.f32.mrf.mxu0  ;;  %v3010_v16 = vmul.f32 0.2, %v2978_v56  ;;  %vm2994_vm0 = vcmp.ge.f32.partialorder %v2978_v56, 0.0  ;;  %v3672_v15 = vsub.s32 7, %v5138_v54 }
 0x48a   :  { %v3387_v18 = vpack.c.bf16 %v3379_v2, %v3377_v46  ;;  %v2946_v4 = vadd.f32 %v2945_v34, %v5552_v27  ;;  %v3013_v45 = vmul.f32 0.2, %v2981_v7  ;;  %v2942_v47 = vadd.f32 %v2941_v25, %v5548_v53 }
 0x48b   :  { %4358 = vmatpush3.bf16.msra.mxu1 %v4895_v57  ;;  %v2947_v5 = vpop.f32.mrf.mxu0  ;;  %vm2997_vm3 = vcmp.ge.f32.partialorder %v2981_v7, 0.0  ;;  %v3026_v46 = vsel %vm2994_vm0, %v2978_v56, %v3010_v16  ;;  %v3027_v2 = vsel %vm2995_vm1, %v2979_v37, %v3011_v42  ;;  %v3028_v38 = vsel %vm2996_vm2, %v2980_v0, %v3012_v36 }
 0x48c   :  { %3643 = vmatprep.mubr.bf16.mxu0 %v3387_v18  ;;  %v2948_v44 = vadd.f32 %v2947_v5, %v5554_v62  ;;  %v2983_v10 = vadd.f32 %v5624_v32, %v2944_v49  ;;  %v2984_v54 = vadd.f32 %v5622_v3, %v2946_v4  ;;  %v5646_v17 = vrot.slane %v5580_v59, %v3672_v15 }
 0x48d   :  { %3644 = vmatmul.mubr.bf16.gmra.mxu0 %v3386_v35  ;;  %v2951_v40 = vpop.f32.mrf.mxu0  ;;  %v5642_v35 = vrot.slane %v5574_v22, %v3672_v15  ;;  %v3029_v53 = vsel %vm2997_vm3, %v2981_v7, %v3013_v45  ;;  %v2982_v62 = vadd.f32 %v5622_v3, %v2942_v47 }
 0x48e   :  { %v2985_v11 = vadd.f32 %v5624_v32, %v2948_v44  ;;  %v2952_v58 = vadd.f32 %v2951_v40, %v5556_v1  ;;  %v3015_v61 = vmul.f32 0.2, %v2983_v10  ;;  %v3016_v34 = vmul.f32 0.2, %v2984_v54 }
 0x48f   :  { %v2953_v33 = vpop.f32.mrf.mxu0  ;;  %v3014_v5 = vmul.f32 0.2, %v2982_v62  ;;  %vm2999_vm4 = vcmp.ge.f32.partialorder %v2983_v10, 0.0  ;;  %vm3000_vm5 = vcmp.ge.f32.partialorder %v2984_v54, 0.0  ;;  %vm2998_vm6 = vcmp.ge.f32.partialorder %v2982_v62, 0.0 }
 0x490   :  { %v2954_v22 = vadd.f32 %v2953_v33, %v5558_v23  ;;  %v3017_v40 = vmul.f32 0.2, %v2985_v11  ;;  %v2986_v33 = vadd.f32 %v5622_v3, %v2952_v58  ;;  %vm3001_vm7 = vcmp.ge.f32.partialorder %v2985_v11, 0.0 }
 0x491   :  { %v2955_v51 = vpop.f32.mrf.mxu0  ;;  %v3031_v12 = vsel %vm2999_vm4, %v2983_v10, %v3015_v61  ;;  %v3032_v63 = vsel %vm3000_vm5, %v2984_v54, %v3016_v34  ;;  %v3030_v37 = vsel %vm2998_vm6, %v2982_v62, %v3014_v5 }
 0x492   :  { %v2956_v59 = vadd.f32 %v2955_v51, %v5560_v9  ;;  %v2987_v9 = vadd.f32 %v5624_v32, %v2954_v22  ;;  %v3033_v16 = vsel %vm3001_vm7, %v2985_v11, %v3017_v40  ;;  %vm3002_vm10 = vcmp.ge.f32.partialorder %v2986_v33, 0.0 }
 0x493   :  { %v2957_v24 = vpop.f32.mrf.mxu0 }
 0x494   :  { %v2958_v55 = vadd.f32 %v2957_v24, %v5562_v29  ;;  %v2988_v51 = vadd.f32 %v5622_v3, %v2956_v59  ;;  %v3019_v47 = vmul.f32 0.2, %v2987_v9  ;;  %vm3003_vm8 = vcmp.ge.f32.partialorder %v2987_v9, 0.0 }
 0x495   :  { %v5615_v60 = vpop.f32.mrf.mxu0 }
 0x496   :  { %v2989_v29 = vadd.f32 %v5624_v32, %v2958_v55  ;;  %v2962_v42 = vadd.f32 %v5615_v60, %v5564_v28  ;;  %v3020_v44 = vmul.f32 0.2, %v2988_v51  ;;  %vm3004_vm9 = vcmp.ge.f32.partialorder %v2988_v51, 0.0 }
 0x497   :  { %v5617_v13 = vpop.f32.mrf.mxu0 }
 0x498   :  { %v2964_v36 = vadd.f32 %v5617_v13, %v5566_v26  ;;  %v3021_v60 = vmul.f32 0.2, %v2989_v29  ;;  %v2990_v13 = vadd.f32 %v5622_v3, %v2962_v42  ;;  %vm3005_vm11 = vcmp.ge.f32.partialorder %v2989_v29, 0.0 }
 0x499   :  { %v5627_v8 = vpop.f32.mrf.mxu0 }
 0x49a   :  { %v2966_v49 = vadd.f32 %v5627_v8, %v5568_v30  ;;  %v2991_v8 = vadd.f32 %v5624_v32, %v2964_v36  ;;  %v3037_v62 = vsel %vm3005_vm11, %v2989_v29, %v3021_v60  ;;  %v3022_v58 = vmul.f32 0.2, %v2990_v13  ;;  %v4287_v36 = vld [vmem:[%s5700_s5] ss:$0 sm:$0xff]  ;;  %s5044_s5 = smov [#allocation11]  }
 0x49b   :  { %v5633_v6 = vpop.f32.mrf.mxu0  ;;  %vm3006_vm14 = vcmp.ge.f32.partialorder %v2990_v13, 0.0  ;;  %s3947_s25 = sshll.u32 %s5044_s5, 4  ;;  %s3948_s25 = int_to_ptr.vmem [resolvable:$true] %s3947_s25 }
 0x49c   :  { %v2968_v28 = vadd.f32 %v5633_v6, %v5570_v39  ;;  %vm3007_vm12 = vcmp.ge.f32.partialorder %v2991_v8, 0.0  ;;  %s5004_s26 = scalar_lea.vmem %s3948_s25, 512  ;;  %p5009_p12 = scmp.lt.s32.totalorder %s3948_s25, %s3948_s25 }
 0x49d   :  { %p5005_p11 = scmp.ne.s32.totalorder %s3948_s25, %s5004_s26  ;;  %p5010_p13 = scmp.lt.s32.totalorder %s5004_s26, %s5004_s26 }
 0x49e   :  { %v2993_v6 = vadd.f32 %v5624_v32, %v2968_v28 }
 0x49f   :  { %p5011_p0 = por %p5010_p13, %p5009_p12 }
 0x4a0   :  { %vm3009_vm15 = vcmp.ge.f32.partialorder %v2993_v6, 0.0 }
 0x4a1   :  { %p5012_p1 = pnand %p5011_p0, %p5005_p11 }
 0x535   :  { %v3615_v31 = vpop.f32.mrf.mxu0 }
 0x536   :  { %v3654_v48 = vadd.f32 %v3615_v31, %v3026_v46 }
 0x537   :  { %v3617_v41 = vpop.f32.mrf.mxu0 }
 0x538   :  { %v3655_v19 = vadd.f32 %v3617_v41, %v3027_v2  ;;  %v3678_v50 = vadd.f32 %v5646_v17, %v3654_v48  ;;  %v3018_v41 = vmul.f32 0.2, %v2986_v33 }
 0x539   :  { %v3619_v18 = vpop.f32.mrf.mxu0 }
 0x53a   :  { %v3656_v27 = vadd.f32 %v3619_v18, %v3028_v38  ;;  %v3679_v14 = vadd.f32 %v5642_v35, %v3655_v19  ;;  %v2992_v18 = vadd.f32 %v5622_v3, %v2966_v49  ;;  %v3035_v19 = vsel %vm3003_vm8, %v2987_v9, %v3019_v47 }
 0x53b   :  { %v3621_v20 = vpop.f32.mrf.mxu0  ;;  %v3034_v48 = vsel %vm3002_vm10, %v2986_v33, %v3018_v41  ;;  %v3023_v3 = vmul.f32 0.2, %v2991_v8 }
 0x53c   :  { %v3657_v21 = vadd.f32 %v3621_v20, %v3029_v53  ;;  %v3680_v57 = vadd.f32 %v5646_v17, %v3656_v27  ;;  %v3036_v27 = vsel %vm3004_vm9, %v2988_v51, %v3020_v44  ;;  %vm3008_vm13 = vcmp.ge.f32.partialorder %v2992_v18, 0.0 }
 0x53d   :  { %v3625_v25 = vpop.f32.mrf.mxu0  ;;  %v3039_v5 = vsel %vm3007_vm12, %v2991_v8, %v3023_v3 }
 0x53e   :  { %v3681_v43 = vadd.f32 %v5642_v35, %v3657_v21  ;;  %v3694_v1 = vpack.c.bf16 %v3680_v57, %v3678_v50  ;;  %v3658_v24 = vadd.f32 %v3625_v25, %v3030_v37  ;;  %v3025_v25 = vmul.f32 0.2, %v2993_v6 }
 0x53f   :  { %v3627_v23 = vpop.f32.mrf.mxu0 }
 0x540   :  { %v3695_v52 = vpack.c.bf16 %v3681_v43, %v3679_v14  ;;  %v3659_v0 = vadd.f32 %v3627_v23, %v3031_v12  ;;  %v3682_v26 = vadd.f32 %v5646_v17, %v3658_v24  ;;  %v3024_v14 = vmul.f32 0.2, %v2992_v18 }
 0x541   :  { %v3629_v56 = vpop.f32.mrf.mxu0  ;;  %v3041_v9 = vsel %vm3009_vm15, %v2993_v6, %v3025_v25 }
 0x542   :  { %3869 = vmatprep.mubr.bf16.mxu1 %v3695_v52  ;;  %v3660_v7 = vadd.f32 %v3629_v56, %v3032_v63  ;;  %v3683_v46 = vadd.f32 %v5642_v35, %v3659_v0  ;;  %v3040_v52 = vsel %vm3008_vm13, %v2992_v18, %v3024_v14 }
 0x543   :  { %3870 = vmatmul.mubr.bf16.vlgmr.msra.gmra.mxu1 %v3694_v1  ;;  %v3631_v31 = vpop.f32.mrf.mxu0  ;;  %v3038_v1 = vsel %vm3006_vm14, %v2990_v13, %v3022_v58 }
 0x544   :  { %v3661_v4 = vadd.f32 %v3631_v31, %v3033_v16  ;;  %v3684_v15 = vadd.f32 %v5646_v17, %v3660_v7 }
 0x545   :  { %v3635_v45 = vpop.f32.mrf.mxu0 }
 0x546   :  { %v3685_v2 = vadd.f32 %v5642_v35, %v3661_v4  ;;  %v3696_v10 = vpack.c.bf16 %v3684_v15, %v3682_v26  ;;  %v3662_v20 = vadd.f32 %v3635_v45, %v3034_v48 }
 0x547   :  { %v3637_v30 = vpop.f32.mrf.mxu0 }
 0x548   :  { %v3697_v38 = vpack.c.bf16 %v3685_v2, %v3683_v46  ;;  %v3663_v53 = vadd.f32 %v3637_v30, %v3035_v19  ;;  %v3686_v50 = vadd.f32 %v5646_v17, %v3662_v20 }
 0x549   :  { %v3639_v54 = vpop.f32.mrf.mxu0 }
 0x54a   :  { %v3664_v39 = vadd.f32 %v3639_v54, %v3036_v27  ;;  %3877 = vmatprep.mubr.bf16.mxu1 %v3697_v38  ;;  %v3687_v43 = vadd.f32 %v5642_v35, %v3663_v53 }
 0x54b   :  { %v3641_v21 = vpop.f32.mrf.mxu0  ;;  %3878 = vmatmul.mubr.bf16.gmra.mxu1 %v3696_v10 }
 0x54c   :  { %v3665_v11 = vadd.f32 %v3641_v21, %v3037_v62  ;;  %v3688_v57 = vadd.f32 %v5646_v17, %v3664_v39 }
 0x54d   :  { %v3645_v22 = vpop.f32.mrf.mxu0 }
 0x54e   :  { %v3689_v59 = vadd.f32 %v5642_v35, %v3665_v11  ;;  %v3698_v34 = vpack.c.bf16 %v3688_v57, %v3686_v50  ;;  %v3666_v33 = vadd.f32 %v3645_v22, %v3038_v1 }
 0x54f   :  { %v3647_v32 = vpop.f32.mrf.mxu0 }
 0x550   :  { %v3699_v61 = vpack.c.bf16 %v3689_v59, %v3687_v43  ;;  %v3667_v23 = vadd.f32 %v3647_v32, %v3039_v5  ;;  %v3690_v0 = vadd.f32 %v5646_v17, %v3666_v33 }
 0x551   :  { %v3649_v55 = vpop.f32.mrf.mxu0 }
 0x552   :  { %v3668_v40 = vadd.f32 %v3649_v55, %v3040_v52  ;;  %3885 = vmatprep.mubr.bf16.mxu1 %v3699_v61  ;;  %v3691_v56 = vadd.f32 %v5642_v35, %v3667_v23 }
 0x553   :  { %v3651_v51 = vpop.f32.mrf.mxu0  ;;  %3886 = vmatmul.mubr.bf16.gmra.mxu1 %v3698_v34 }
 0x554   :  { %v3669_v12 = vadd.f32 %v3651_v51, %v3041_v9  ;;  %v3692_v63 = vadd.f32 %v5646_v17, %v3668_v40 }
 0x556   :  { %v3693_v37 = vadd.f32 %v5642_v35, %v3669_v12  ;;  %v3700_v29 = vpack.c.bf16 %v3692_v63, %v3690_v0 }
 0x558   :  { %v3701_v7 = vpack.c.bf16 %v3693_v37, %v3691_v56 }
 0x55a   :  { %3893 = vmatprep.mubr.bf16.mxu1 %v3701_v7 }
 0x55b   :  { %3894 = vmatmul.mubr.bf16.gmra.mxu1 %v3700_v29 }
 0x603   :  { %v4359_v24 = vpop.f32.mrf.mxu1 }
 0x605   :  { %v4360_v16 = vpop.f32.mrf.mxu1 }
 0x606   :  { %v4361_v42 = vadd.f32 %v4360_v16, %v4359_v24 }
 0x607   :  { %v4362_v31 = vpop.f32.mrf.mxu1 }
 0x608   :  { %v3872_v15 = vadd.f32 %v4361_v42, %v4287_v36 }
 0x609   :  { %v4363_v49 = vpop.f32.mrf.mxu1 }
 0x60a   :  { %v4364_v4 = vadd.f32 %v4363_v49, %v4362_v31 }
 0x60b   :  { %v4365_v45 = vpop.f32.mrf.mxu1 }
 0x60c   :  { %v3875_v41 = vadd.f32 %v4364_v4, %v4287_v36 }
 0x60d   :  { %v4366_v47 = vpop.f32.mrf.mxu1 }
 0x60e   :  { %v4323_v35 = vpack.c.bf16 %v3875_v41, %v3872_v15  ;;  %v4367_v44 = vadd.f32 %v4366_v47, %v4365_v45 }
 0x60f   :  { %v4368_v17 = vpop.f32.mrf.mxu1 }
 0x610   :  { %4324 = vst [vmem:[#allocation11] sm:$0xff] %v4323_v35   ;;  %v3880_v26 = vadd.f32 %v4367_v44, %v4287_v36 }
 0x611   :  { %v4369_v46 = vpop.f32.mrf.mxu1 }
 0x612   :  { %v4370_v2 = vadd.f32 %v4369_v46, %v4368_v17 }
 0x613   :  { %v4371_v28 = vpop.f32.mrf.mxu1 }
 0x614   :  { %v3883_v30 = vadd.f32 %v4370_v2, %v4287_v36 }
 0x615   :  { %v4372_v60 = vpop.f32.mrf.mxu1 }
 0x616   :  { %v4328_v13 = vpack.c.bf16 %v3883_v30, %v3880_v26  ;;  %v4373_v38 = vadd.f32 %v4372_v60, %v4371_v28 }
 0x617   :  { %v4374_v8 = vpop.f32.mrf.mxu1 }
 0x618   :  { %4340 = vst [vmem:[#allocation11 + $0x8] sm:$0xff] %v4328_v13   ;;  %v3888_v27 = vadd.f32 %v4373_v38, %v4287_v36 }
 0x619   :  { %v4375_v18 = vpop.f32.mrf.mxu1 }
 0x61a   :  { %v4376_v10 = vadd.f32 %v4375_v18, %v4374_v8 }
 0x61b   :  { %v4377_v19 = vpop.f32.mrf.mxu1 }
 0x61c   :  { %v3891_v54 = vadd.f32 %v4376_v10, %v4287_v36 }
 0x61d   :  { %v4378_v48 = vpop.f32.mrf.mxu1 }
 0x61e   :  { %v4333_v53 = vpack.c.bf16 %v3891_v54, %v3888_v27  ;;  %v4379_v6 = vadd.f32 %v4378_v48, %v4377_v19 }
 0x61f   :  { %v4380_v39 = vpop.f32.mrf.mxu1 }
 0x620   :  { %4341 = vst [vmem:[#allocation11 + $0x10] sm:$0xff] %v4333_v53   ;;  %v3896_v21 = vadd.f32 %v4379_v6, %v4287_v36 }
 0x621   :  { %v4381_v20 = vpop.f32.mrf.mxu1 }
 0x622   :  { %v4382_v62 = vadd.f32 %v4381_v20, %v4380_v39 }
 0x624   :  { %v3899_v11 = vadd.f32 %v4382_v62, %v4287_v36 }
 0x626   :  { %v4338_v57 = vpack.c.bf16 %v3899_v11, %v3896_v21 }
 0x628   :  { %4342 = vst [vmem:[#allocation11 + $0x18] sm:$0xff] %v4338_v57  }
 0x629   :  { %5015 = shalt.err (!%p5012_p1)
}
 0x62a   :  { %3953 = dma.vmem_to_hbm [thread:$0]  %s3948_s25, 512, %s5701_s6, [#allocation4], %s5037_s1, %s5037_s1, %s5038_s12  }
 0x62b   :  { %5030 = dma.done.wait [#allocation4], 512  }
 0x62c   :  { %5031 = vsyncadd [#allocation4], 4294966784 }
 0x62d   :  { %3957 = vsyncpa [#allocation3], 1 }
 0x62e   :  { %3958 = vsyncpa [#allocation6], 1 }
 0x62f   :  { %3959 = vsyncpa [#allocation9], 1 }
 0x630   :  { %3960 = vsyncpa [#allocation4], 1 }

</bundles_post_ra>
